<compile_context>
chip_gen: v5e
topology: v5e:2x2
jax: 0.10.0
libtpu: 0.0.40
codegen_flags: <defaults>
</compile_context>

<pallas_src>
import functools
import math

import jax
import jax.numpy as jnp
from jax.experimental import pallas as pl
from jax.experimental.pallas import tpu as pltpu


# ----------------------------------------------------------------------------
# In-kernel building blocks (operate on loaded values, fp32 math)
# ----------------------------------------------------------------------------
def _layernorm(x, g, b, eps):
    mean = jnp.mean(x, axis=-1, keepdims=True)
    c = x - mean
    var = jnp.mean(c * c, axis=-1, keepdims=True)      # biased variance (PyTorch LN)
    return c * jax.lax.rsqrt(var + eps) * g + b


def _encoder_layer(x, in_w, in_b, out_w, out_b, ln1_g, ln1_b,
                   ff1_w, ff1_b, ff2_w, ff2_b, ln2_g, ln2_b,
                   *, groups, seq, num_heads, eps):
    """One post-norm nn.TransformerEncoderLayer on a (groups*seq, D) fp32 block.

    Rows are ordered group-major: row = g*seq + q; attention mixes rows within a group.
    """
    M, D = x.shape
    H = num_heads
    hd = D // H
    scale = 1.0 / math.sqrt(hd)

    xb = x.astype(jnp.bfloat16)

    # ---- fused QKV projection (bf16 MXU inputs, fp32 accumulation) ----
    qkv = jnp.dot(xb, in_w, preferred_element_type=jnp.float32) + in_b     # (M, 3D)
    q2 = qkv[:, 0:D]
    k2 = qkv[:, D:2 * D]
    v2 = qkv[:, 2 * D:3 * D]

    # ---- multi-head attention, batched over the `groups` axis (no transposes) ----
    head_outs = []
    for h in range(H):                                        # static unroll over heads
        sl = slice(h * hd, (h + 1) * hd)
        qh = q2[:, sl].reshape(groups, seq, hd).astype(jnp.bfloat16)
        kh = k2[:, sl].reshape(groups, seq, hd).astype(jnp.bfloat16)
        vh = v2[:, sl].reshape(groups, seq, hd).astype(jnp.bfloat16)
        s = jnp.einsum("gqd,gkd->gqk", qh, kh,
                       preferred_element_type=jnp.float32) * scale
        m = jnp.max(s, axis=-1, keepdims=True)
        p = jnp.exp(s - m)
        denom = jnp.sum(p, axis=-1, keepdims=True)
        p = p * pl.reciprocal(denom, approx=True)             # EUP slot, not a VALU divide
        oh = jnp.einsum("gqk,gkd->gqd", p.astype(jnp.bfloat16), vh,
                        preferred_element_type=jnp.float32)
        head_outs.append(oh.reshape(M, hd))
    attn = jnp.concatenate(head_outs, axis=-1)                # lane-dense (M, D)

    # ---- output projection + residual + LayerNorm 1 ----
    attn = jnp.dot(attn.astype(jnp.bfloat16), out_w,
                   preferred_element_type=jnp.float32) + out_b
    x1 = _layernorm(x + attn, ln1_g, ln1_b, eps)

    # ---- feed-forward (relu) + residual + LayerNorm 2 ----
    h1 = jnp.dot(x1.astype(jnp.bfloat16), ff1_w,
                 preferred_element_type=jnp.float32) + ff1_b
    h1 = jnp.maximum(h1, 0.0)
    h2 = jnp.dot(h1.astype(jnp.bfloat16), ff2_w,
                 preferred_element_type=jnp.float32) + ff2_b
    return _layernorm(x1 + h2, ln2_g, ln2_b, eps)


# ----------------------------------------------------------------------------
# Fused forward kernel: all encoder layers + LM head in one pallas_call
# ----------------------------------------------------------------------------
def _fused_forward_kernel(x_ref, in_w_ref, in_b_ref, out_w_ref, out_b_ref,
                          ln1_g_ref, ln1_b_ref, ff1_w_ref, ff1_b_ref,
                          ff2_w_ref, ff2_b_ref, ln2_g_ref, ln2_b_ref, lm_w_ref,
                          o_ref, *, num_layers, groups, seq, num_heads, eps):
    x = x_ref[...]                                            # (rows, D) fp32
    for l in range(num_layers):                               # static unroll over layers
        x = _encoder_layer(
            x,
            in_w_ref[l], in_b_ref[l], out_w_ref[l], out_b_ref[l],
            ln1_g_ref[l], ln1_b_ref[l],
            ff1_w_ref[l], ff1_b_ref[l], ff2_w_ref[l], ff2_b_ref[l],
            ln2_g_ref[l], ln2_b_ref[l],
            groups=groups, seq=seq, num_heads=num_heads, eps=eps)
    # LM head: Linear(bias=False), bf16 MXU inputs, fp32 accumulate, lane-dense store.
    o_ref[...] = jnp.dot(x.astype(jnp.bfloat16), lm_w_ref[...],
                         preferred_element_type=jnp.float32).astype(o_ref.dtype)


def fused_forward(xf, params, *, groups, seq, num_heads, eps=1e-5):
    """xf: (groups*seq, D) fp32 activations (group-major rows).  Returns (groups*seq, V)."""
    M, D = xf.shape
    assert M == groups * seq
    num_layers = params["in_w"].shape[0]
    Dff = params["ff1_w"].shape[2]
    V = params["lm_w"].shape[1]

    # Split the independent `groups` axis across the grid ("parallel" -> both TensorCores
    # on v7x).  Keep row blocks (8,128)-aligned; otherwise fall back to a single block.
    g_block = groups
    if groups % 2 == 0 and ((groups // 2) * seq) % 8 == 0:
        g_block = groups // 2
    grid = (groups // g_block,)
    rows = g_block * seq

    def rep(shape):  # weight/bias blocks: full array, same block every grid step (no re-DMA)
        return pl.BlockSpec(shape, lambda i, _n=len(shape): (0,) * _n)

    return pl.pallas_call(
        functools.partial(_fused_forward_kernel, num_layers=num_layers,
                          groups=g_block, seq=seq, num_heads=num_heads, eps=eps),
        out_shape=jax.ShapeDtypeStruct((M, V), jnp.float32),
        grid=grid,
        in_specs=[
            pl.BlockSpec((rows, D), lambda i: (i, 0)),                  # x
            rep((num_layers, D, 3 * D)), rep((num_layers, 1, 3 * D)),   # in_proj w / b
            rep((num_layers, D, D)),     rep((num_layers, 1, D)),       # out_proj w / b
            rep((num_layers, 1, D)),     rep((num_layers, 1, D)),       # ln1 gamma / beta
            rep((num_layers, D, Dff)),   rep((num_layers, 1, Dff)),     # ff1 w / b
            rep((num_layers, Dff, D)),   rep((num_layers, 1, D)),       # ff2 w / b
            rep((num_layers, 1, D)),     rep((num_layers, 1, D)),       # ln2 gamma / beta
            rep((D, V)),                                                # LM head weight
        ],
        out_specs=pl.BlockSpec((rows, V), lambda i: (i, 0)),
        compiler_params=pltpu.CompilerParams(dimension_semantics=("parallel",)),
    )(xf, params["in_w"], params["in_b"], params["out_w"], params["out_b"],
      params["ln1_g"], params["ln1_b"], params["ff1_w"], params["ff1_b"],
      params["ff2_w"], params["ff2_b"], params["ln2_g"], params["ln2_b"],
      params["lm_w"])


# ----------------------------------------------------------------------------
# Model forward (thin plain-JAX glue around the single fused kernel)
# ----------------------------------------------------------------------------
def temp_llama_forward(params, input_ids, *, num_heads):
    B, S = input_ids.shape
    D = params["embed"].shape[1]
    V = params["lm_w"].shape[1]

    tok = params["embed"][input_ids] * (D ** 0.5)             # (B, S, D) gather + scale
    x = tok + params["pos"][:S][None, :, :]                   # positional encoding
    # F.dropout(p=0.1) -> identity in eval mode.

    # batch_first=False semantics: attention runs along axis 0 (B); axis 1 (S) is the
    # layer's independent axis.  Lay out group-major (S, B, D) once, flatten, fuse.
    xf = x.transpose(1, 0, 2).reshape(S * B, D)
    logits = fused_forward(xf, params, groups=S, seq=B, num_heads=num_heads)
    return logits.reshape(S, B, V).transpose(1, 0, 2)         # (B, S, V)


# ----------------------------------------------------------------------------
# Deterministic parameter init (shapes from TempLLama.__init__), layer-stacked.
# Matmul weights are cast to bf16 ONCE here (hoisted out of the forward path);
# biases / LayerNorm params stay fp32 and are pre-shaped to (1, dim).
# ----------------------------------------------------------------------------
def init_params(key, vocab_size, num_layers, model_dim, max_seq_length):
    D = model_dim
    ff = 4 * D
    scale = 0.02
    keys = jax.random.split(key, 3 + num_layers)

    def nrm(k, shape):
        return jax.random.normal(k, shape, jnp.float32) * scale

    layer = {name: [] for name in
             ("in_w", "in_b", "out_w", "out_b", "ff1_w", "ff1_b",
              "ff2_w", "ff2_b", "ln1_g", "ln1_b", "ln2_g", "ln2_b")}
    for i in range(num_layers):
        lk = jax.random.split(keys[3 + i], 8)
        layer["in_w"].append(nrm(lk[0], (D, 3 * D)))
        layer["in_b"].append(nrm(lk[1], (1, 3 * D)))
        layer["out_w"].append(nrm(lk[2], (D, D)))
        layer["out_b"].append(nrm(lk[3], (1, D)))
        layer["ff1_w"].append(nrm(lk[4], (D, ff)))
        layer["ff1_b"].append(nrm(lk[5], (1, ff)))
        layer["ff2_w"].append(nrm(lk[6], (ff, D)))
        layer["ff2_b"].append(nrm(lk[7], (1, D)))
        layer["ln1_g"].append(jnp.ones((1, D), jnp.float32))
        layer["ln1_b"].append(jnp.zeros((1, D), jnp.float32))
        layer["ln2_g"].append(jnp.ones((1, D), jnp.float32))
        layer["ln2_b"].append(jnp.zeros((1, D), jnp.float32))

    params = {
        "embed": nrm(keys[0], (vocab_size, D)),
        "pos": nrm(keys[1], (max_seq_length, D)),
        "lm_w": nrm(keys[2], (D, vocab_size)).astype(jnp.bfloat16),
    }
    for name, vals in layer.items():
        stacked = jnp.stack(vals, axis=0)
        if name.endswith("_w"):
            stacked = stacked.astype(jnp.bfloat16)
        params[name] = stacked
    return params


if __name__ == "__main__":
    # Small config consistent with the module's constructor.
    vocab_size = 256
    num_layers = 2
    num_heads = 4
    model_dim = 128
    max_seq_length = 16

    B, S = 8, 16  # input_ids: (batch, seq)

    key = jax.random.PRNGKey(0)
    pkey, ikey = jax.random.split(key)
    params = init_params(pkey, vocab_size, num_layers, model_dim, max_seq_length)
    input_ids = jax.random.randint(ikey, (B, S), 0, vocab_size, dtype=jnp.int32)

    fwd = jax.jit(functools.partial(temp_llama_forward, num_heads=num_heads))
    logits = jax.block_until_ready(fwd(params, input_ids))

    assert logits.shape == (B, S, vocab_size), logits.shape
    assert bool(jnp.all(jnp.isfinite(logits)))
    print("KERNEL_OK")
</pallas_src>

<mosaic_0001>
module attributes {stable_mosaic.version = 11 : i64} {
  func.func @_fused_forward_kernel(%arg0: i32, %arg1: memref<64x128xf32, #tpu.memory_space<vmem>>, %arg2: memref<2x128x384xbf16, #tpu.memory_space<vmem>>, %arg3: memref<2x1x384xf32, #tpu.memory_space<vmem>>, %arg4: memref<2x128x128xbf16, #tpu.memory_space<vmem>>, %arg5: memref<2x1x128xf32, #tpu.memory_space<vmem>>, %arg6: memref<2x1x128xf32, #tpu.memory_space<vmem>>, %arg7: memref<2x1x128xf32, #tpu.memory_space<vmem>>, %arg8: memref<2x128x512xbf16, #tpu.memory_space<vmem>>, %arg9: memref<2x1x512xf32, #tpu.memory_space<vmem>>, %arg10: memref<2x512x128xbf16, #tpu.memory_space<vmem>>, %arg11: memref<2x1x128xf32, #tpu.memory_space<vmem>>, %arg12: memref<2x1x128xf32, #tpu.memory_space<vmem>>, %arg13: memref<2x1x128xf32, #tpu.memory_space<vmem>>, %arg14: memref<128x256xbf16, #tpu.memory_space<vmem>>, %arg15: memref<64x256xf32, #tpu.memory_space<vmem>>) attributes {dimension_semantics = [#tpu.dimension_semantics<parallel>], iteration_bounds = array<i64: 2>, scalar_prefetch = 0 : i64, scratch_operands = 0 : i64, tpu.core_type = #tpu.core_type<tc>, window_params = [{transform_indices = @transform_0, window_bounds = array<i64: 64, 128>}, {pipeline_mode = #tpu.pipeline_mode<synchronous>, transform_indices = @transform_1, window_bounds = array<i64: 2, 128, 384>}, {pipeline_mode = #tpu.pipeline_mode<synchronous>, transform_indices = @transform_2, window_bounds = array<i64: 2, 1, 384>}, {pipeline_mode = #tpu.pipeline_mode<synchronous>, transform_indices = @transform_3, window_bounds = array<i64: 2, 128, 128>}, {pipeline_mode = #tpu.pipeline_mode<synchronous>, transform_indices = @transform_4, window_bounds = array<i64: 2, 1, 128>}, {pipeline_mode = #tpu.pipeline_mode<synchronous>, transform_indices = @transform_5, window_bounds = array<i64: 2, 1, 128>}, {pipeline_mode = #tpu.pipeline_mode<synchronous>, transform_indices = @transform_6, window_bounds = array<i64: 2, 1, 128>}, {pipeline_mode = #tpu.pipeline_mode<synchronous>, transform_indices = @transform_7, window_bounds = array<i64: 2, 128, 512>}, {pipeline_mode = #tpu.pipeline_mode<synchronous>, transform_indices = @transform_8, window_bounds = array<i64: 2, 1, 512>}, {pipeline_mode = #tpu.pipeline_mode<synchronous>, transform_indices = @transform_9, window_bounds = array<i64: 2, 512, 128>}, {pipeline_mode = #tpu.pipeline_mode<synchronous>, transform_indices = @transform_10, window_bounds = array<i64: 2, 1, 128>}, {pipeline_mode = #tpu.pipeline_mode<synchronous>, transform_indices = @transform_11, window_bounds = array<i64: 2, 1, 128>}, {pipeline_mode = #tpu.pipeline_mode<synchronous>, transform_indices = @transform_12, window_bounds = array<i64: 2, 1, 128>}, {pipeline_mode = #tpu.pipeline_mode<synchronous>, transform_indices = @transform_13, window_bounds = array<i64: 128, 256>}, {transform_indices = @transform_14, window_bounds = array<i64: 64, 256>}]} {
    %c0 = arith.constant 0 : index
    %c0_0 = arith.constant 0 : index
    %0 = vector.load %arg1[%c0, %c0_0] : memref<64x128xf32, #tpu.memory_space<vmem>>, vector<64x128xf32>
    %c0_1 = arith.constant 0 : index
    %c0_2 = arith.constant 0 : index
    %c0_3 = arith.constant 0 : index
    %1 = vector.load %arg2[%c0_1, %c0_2, %c0_3] : memref<2x128x384xbf16, #tpu.memory_space<vmem>>, vector<1x128x384xbf16>
    %2 = vector.shape_cast %1 : vector<1x128x384xbf16> to vector<128x384xbf16>
    %c0_4 = arith.constant 0 : index
    %c0_5 = arith.constant 0 : index
    %c0_6 = arith.constant 0 : index
    %3 = vector.load %arg3[%c0_4, %c0_5, %c0_6] : memref<2x1x384xf32, #tpu.memory_space<vmem>>, vector<1x1x384xf32>
    %4 = vector.shape_cast %3 : vector<1x1x384xf32> to vector<1x384xf32>
    %c0_7 = arith.constant 0 : index
    %c0_8 = arith.constant 0 : index
    %c0_9 = arith.constant 0 : index
    %5 = vector.load %arg4[%c0_7, %c0_8, %c0_9] : memref<2x128x128xbf16, #tpu.memory_space<vmem>>, vector<1x128x128xbf16>
    %6 = vector.shape_cast %5 : vector<1x128x128xbf16> to vector<128x128xbf16>
    %c0_10 = arith.constant 0 : index
    %c0_11 = arith.constant 0 : index
    %c0_12 = arith.constant 0 : index
    %7 = vector.load %arg5[%c0_10, %c0_11, %c0_12] : memref<2x1x128xf32, #tpu.memory_space<vmem>>, vector<1x1x128xf32>
    %8 = vector.shape_cast %7 : vector<1x1x128xf32> to vector<1x128xf32>
    %c0_13 = arith.constant 0 : index
    %c0_14 = arith.constant 0 : index
    %c0_15 = arith.constant 0 : index
    %9 = vector.load %arg6[%c0_13, %c0_14, %c0_15] : memref<2x1x128xf32, #tpu.memory_space<vmem>>, vector<1x1x128xf32>
    %10 = vector.shape_cast %9 : vector<1x1x128xf32> to vector<1x128xf32>
    %c0_16 = arith.constant 0 : index
    %c0_17 = arith.constant 0 : index
    %c0_18 = arith.constant 0 : index
    %11 = vector.load %arg7[%c0_16, %c0_17, %c0_18] : memref<2x1x128xf32, #tpu.memory_space<vmem>>, vector<1x1x128xf32>
    %12 = vector.shape_cast %11 : vector<1x1x128xf32> to vector<1x128xf32>
    %c0_19 = arith.constant 0 : index
    %c0_20 = arith.constant 0 : index
    %c0_21 = arith.constant 0 : index
    %13 = vector.load %arg8[%c0_19, %c0_20, %c0_21] : memref<2x128x512xbf16, #tpu.memory_space<vmem>>, vector<1x128x512xbf16>
    %14 = vector.shape_cast %13 : vector<1x128x512xbf16> to vector<128x512xbf16>
    %c0_22 = arith.constant 0 : index
    %c0_23 = arith.constant 0 : index
    %c0_24 = arith.constant 0 : index
    %15 = vector.load %arg9[%c0_22, %c0_23, %c0_24] : memref<2x1x512xf32, #tpu.memory_space<vmem>>, vector<1x1x512xf32>
    %16 = vector.shape_cast %15 : vector<1x1x512xf32> to vector<1x512xf32>
    %c0_25 = arith.constant 0 : index
    %c0_26 = arith.constant 0 : index
    %c0_27 = arith.constant 0 : index
    %17 = vector.load %arg10[%c0_25, %c0_26, %c0_27] : memref<2x512x128xbf16, #tpu.memory_space<vmem>>, vector<1x512x128xbf16>
    %18 = vector.shape_cast %17 : vector<1x512x128xbf16> to vector<512x128xbf16>
    %c0_28 = arith.constant 0 : index
    %c0_29 = arith.constant 0 : index
    %c0_30 = arith.constant 0 : index
    %19 = vector.load %arg11[%c0_28, %c0_29, %c0_30] : memref<2x1x128xf32, #tpu.memory_space<vmem>>, vector<1x1x128xf32>
    %20 = vector.shape_cast %19 : vector<1x1x128xf32> to vector<1x128xf32>
    %c0_31 = arith.constant 0 : index
    %c0_32 = arith.constant 0 : index
    %c0_33 = arith.constant 0 : index
    %21 = vector.load %arg12[%c0_31, %c0_32, %c0_33] : memref<2x1x128xf32, #tpu.memory_space<vmem>>, vector<1x1x128xf32>
    %22 = vector.shape_cast %21 : vector<1x1x128xf32> to vector<1x128xf32>
    %c0_34 = arith.constant 0 : index
    %c0_35 = arith.constant 0 : index
    %c0_36 = arith.constant 0 : index
    %23 = vector.load %arg13[%c0_34, %c0_35, %c0_36] : memref<2x1x128xf32, #tpu.memory_space<vmem>>, vector<1x1x128xf32>
    %24 = vector.shape_cast %23 : vector<1x1x128xf32> to vector<1x128xf32>
    %25 = arith.truncf %0 : vector<64x128xf32> to vector<64x128xbf16>
    %cst = arith.constant dense<0.000000e+00> : vector<64x384xf32>
    %26 = tpu.matmul %25, %2, %cst {dimension_numbers = #tpu.dot_dimension_numbers<[1], [0], [0], [1], [0, 0, 1, 1], [], []>} : vector<64x128xbf16>, vector<128x384xbf16>, vector<64x384xf32> -> vector<64x384xf32>
    %27 = vector.broadcast %4 : vector<1x384xf32> to vector<64x384xf32>
    %28 = arith.addf %26, %27 : vector<64x384xf32>
    %29 = vector.extract_strided_slice %28 {offsets = [0, 0], sizes = [64, 128], strides = [1, 1]} : vector<64x384xf32> to vector<64x128xf32>
    %30 = vector.extract_strided_slice %28 {offsets = [0, 128], sizes = [64, 128], strides = [1, 1]} : vector<64x384xf32> to vector<64x128xf32>
    %31 = vector.extract_strided_slice %28 {offsets = [0, 256], sizes = [64, 128], strides = [1, 1]} : vector<64x384xf32> to vector<64x128xf32>
    %32 = vector.extract_strided_slice %29 {offsets = [0, 0], sizes = [64, 32], strides = [1, 1]} : vector<64x128xf32> to vector<64x32xf32>
    %33 = vector.shape_cast %32 : vector<64x32xf32> to vector<8x8x32xf32>
    %34 = arith.truncf %33 : vector<8x8x32xf32> to vector<8x8x32xbf16>
    %35 = vector.extract_strided_slice %30 {offsets = [0, 0], sizes = [64, 32], strides = [1, 1]} : vector<64x128xf32> to vector<64x32xf32>
    %36 = vector.shape_cast %35 : vector<64x32xf32> to vector<8x8x32xf32>
    %37 = arith.truncf %36 : vector<8x8x32xf32> to vector<8x8x32xbf16>
    %38 = vector.extract_strided_slice %31 {offsets = [0, 0], sizes = [64, 32], strides = [1, 1]} : vector<64x128xf32> to vector<64x32xf32>
    %39 = vector.shape_cast %38 : vector<64x32xf32> to vector<8x8x32xf32>
    %40 = arith.truncf %39 : vector<8x8x32xf32> to vector<8x8x32xbf16>
    "tpu.trace_start"() <{level = 10 : i32, message = "gqd,gkd->gqk"}> : () -> ()
    %cst_37 = arith.constant dense<0.000000e+00> : vector<8x8x8xf32>
    %41 = tpu.matmul %34, %37, %cst_37 {dimension_numbers = #tpu.dot_dimension_numbers<[2], [2], [1], [1], [0, 0, 0, 1, 1, 1], [0], [0]>} : vector<8x8x32xbf16>, vector<8x8x32xbf16>, vector<8x8x8xf32> -> vector<8x8x8xf32>
    "tpu.trace_stop"() : () -> ()
    %cst_38 = arith.constant 0.176776692 : f32
    %42 = vector.broadcast %cst_38 : f32 to vector<8x8x8xf32>
    %43 = arith.mulf %41, %42 : vector<8x8x8xf32>
    %cst_39 = arith.constant dense<0xFF800000> : vector<8x8xf32>
    %44 = vector.multi_reduction <maximumf>, %43, %cst_39 [2] : vector<8x8x8xf32> to vector<8x8xf32>
    %45 = vector.shape_cast %44 : vector<8x8xf32> to vector<8x8x1xf32>
    %46 = vector.broadcast %45 : vector<8x8x1xf32> to vector<8x8x8xf32>
    %47 = arith.subf %43, %46 : vector<8x8x8xf32>
    %48 = math.exp %47 : vector<8x8x8xf32>
    %cst_40 = arith.constant dense<0.000000e+00> : vector<8x8xf32>
    %49 = vector.multi_reduction <add>, %48, %cst_40 [2] : vector<8x8x8xf32> to vector<8x8xf32>
    %50 = vector.shape_cast %49 : vector<8x8xf32> to vector<8x8x1xf32>
    %51 = tpu.reciprocal %50 {approx = true} : vector<8x8x1xf32> -> vector<8x8x1xf32>
    %52 = vector.broadcast %51 : vector<8x8x1xf32> to vector<8x8x8xf32>
    %53 = arith.mulf %48, %52 : vector<8x8x8xf32>
    %54 = arith.truncf %53 : vector<8x8x8xf32> to vector<8x8x8xbf16>
    "tpu.trace_start"() <{level = 10 : i32, message = "gqk,gkd->gqd"}> : () -> ()
    %cst_41 = arith.constant dense<0.000000e+00> : vector<8x8x32xf32>
    %55 = tpu.matmul %54, %40, %cst_41 {dimension_numbers = #tpu.dot_dimension_numbers<[2], [1], [1], [2], [0, 0, 0, 1, 1, 2], [0], [0]>} : vector<8x8x8xbf16>, vector<8x8x32xbf16>, vector<8x8x32xf32> -> vector<8x8x32xf32>
    "tpu.trace_stop"() : () -> ()
    %56 = vector.shape_cast %55 : vector<8x8x32xf32> to vector<64x32xf32>
    %57 = vector.extract_strided_slice %29 {offsets = [0, 32], sizes = [64, 32], strides = [1, 1]} : vector<64x128xf32> to vector<64x32xf32>
    %58 = vector.shape_cast %57 : vector<64x32xf32> to vector<8x8x32xf32>
    %59 = arith.truncf %58 : vector<8x8x32xf32> to vector<8x8x32xbf16>
    %60 = vector.extract_strided_slice %30 {offsets = [0, 32], sizes = [64, 32], strides = [1, 1]} : vector<64x128xf32> to vector<64x32xf32>
    %61 = vector.shape_cast %60 : vector<64x32xf32> to vector<8x8x32xf32>
    %62 = arith.truncf %61 : vector<8x8x32xf32> to vector<8x8x32xbf16>
    %63 = vector.extract_strided_slice %31 {offsets = [0, 32], sizes = [64, 32], strides = [1, 1]} : vector<64x128xf32> to vector<64x32xf32>
    %64 = vector.shape_cast %63 : vector<64x32xf32> to vector<8x8x32xf32>
    %65 = arith.truncf %64 : vector<8x8x32xf32> to vector<8x8x32xbf16>
    "tpu.trace_start"() <{level = 10 : i32, message = "gqd,gkd->gqk"}> : () -> ()
    %cst_42 = arith.constant dense<0.000000e+00> : vector<8x8x8xf32>
    %66 = tpu.matmul %59, %62, %cst_42 {dimension_numbers = #tpu.dot_dimension_numbers<[2], [2], [1], [1], [0, 0, 0, 1, 1, 1], [0], [0]>} : vector<8x8x32xbf16>, vector<8x8x32xbf16>, vector<8x8x8xf32> -> vector<8x8x8xf32>
    "tpu.trace_stop"() : () -> ()
    %cst_43 = arith.constant 0.176776692 : f32
    %67 = vector.broadcast %cst_43 : f32 to vector<8x8x8xf32>
    %68 = arith.mulf %66, %67 : vector<8x8x8xf32>
    %cst_44 = arith.constant dense<0xFF800000> : vector<8x8xf32>
    %69 = vector.multi_reduction <maximumf>, %68, %cst_44 [2] : vector<8x8x8xf32> to vector<8x8xf32>
    %70 = vector.shape_cast %69 : vector<8x8xf32> to vector<8x8x1xf32>
    %71 = vector.broadcast %70 : vector<8x8x1xf32> to vector<8x8x8xf32>
    %72 = arith.subf %68, %71 : vector<8x8x8xf32>
    %73 = math.exp %72 : vector<8x8x8xf32>
    %cst_45 = arith.constant dense<0.000000e+00> : vector<8x8xf32>
    %74 = vector.multi_reduction <add>, %73, %cst_45 [2] : vector<8x8x8xf32> to vector<8x8xf32>
    %75 = vector.shape_cast %74 : vector<8x8xf32> to vector<8x8x1xf32>
    %76 = tpu.reciprocal %75 {approx = true} : vector<8x8x1xf32> -> vector<8x8x1xf32>
    %77 = vector.broadcast %76 : vector<8x8x1xf32> to vector<8x8x8xf32>
    %78 = arith.mulf %73, %77 : vector<8x8x8xf32>
    %79 = arith.truncf %78 : vector<8x8x8xf32> to vector<8x8x8xbf16>
    "tpu.trace_start"() <{level = 10 : i32, message = "gqk,gkd->gqd"}> : () -> ()
    %cst_46 = arith.constant dense<0.000000e+00> : vector<8x8x32xf32>
    %80 = tpu.matmul %79, %65, %cst_46 {dimension_numbers = #tpu.dot_dimension_numbers<[2], [1], [1], [2], [0, 0, 0, 1, 1, 2], [0], [0]>} : vector<8x8x8xbf16>, vector<8x8x32xbf16>, vector<8x8x32xf32> -> vector<8x8x32xf32>
    "tpu.trace_stop"() : () -> ()
    %81 = vector.shape_cast %80 : vector<8x8x32xf32> to vector<64x32xf32>
    %82 = vector.extract_strided_slice %29 {offsets = [0, 64], sizes = [64, 32], strides = [1, 1]} : vector<64x128xf32> to vector<64x32xf32>
    %83 = vector.shape_cast %82 : vector<64x32xf32> to vector<8x8x32xf32>
    %84 = arith.truncf %83 : vector<8x8x32xf32> to vector<8x8x32xbf16>
    %85 = vector.extract_strided_slice %30 {offsets = [0, 64], sizes = [64, 32], strides = [1, 1]} : vector<64x128xf32> to vector<64x32xf32>
    %86 = vector.shape_cast %85 : vector<64x32xf32> to vector<8x8x32xf32>
    %87 = arith.truncf %86 : vector<8x8x32xf32> to vector<8x8x32xbf16>
    %88 = vector.extract_strided_slice %31 {offsets = [0, 64], sizes = [64, 32], strides = [1, 1]} : vector<64x128xf32> to vector<64x32xf32>
    %89 = vector.shape_cast %88 : vector<64x32xf32> to vector<8x8x32xf32>
    %90 = arith.truncf %89 : vector<8x8x32xf32> to vector<8x8x32xbf16>
    "tpu.trace_start"() <{level = 10 : i32, message = "gqd,gkd->gqk"}> : () -> ()
    %cst_47 = arith.constant dense<0.000000e+00> : vector<8x8x8xf32>
    %91 = tpu.matmul %84, %87, %cst_47 {dimension_numbers = #tpu.dot_dimension_numbers<[2], [2], [1], [1], [0, 0, 0, 1, 1, 1], [0], [0]>} : vector<8x8x32xbf16>, vector<8x8x32xbf16>, vector<8x8x8xf32> -> vector<8x8x8xf32>
    "tpu.trace_stop"() : () -> ()
    %cst_48 = arith.constant 0.176776692 : f32
    %92 = vector.broadcast %cst_48 : f32 to vector<8x8x8xf32>
    %93 = arith.mulf %91, %92 : vector<8x8x8xf32>
    %cst_49 = arith.constant dense<0xFF800000> : vector<8x8xf32>
    %94 = vector.multi_reduction <maximumf>, %93, %cst_49 [2] : vector<8x8x8xf32> to vector<8x8xf32>
    %95 = vector.shape_cast %94 : vector<8x8xf32> to vector<8x8x1xf32>
    %96 = vector.broadcast %95 : vector<8x8x1xf32> to vector<8x8x8xf32>
    %97 = arith.subf %93, %96 : vector<8x8x8xf32>
    %98 = math.exp %97 : vector<8x8x8xf32>
    %cst_50 = arith.constant dense<0.000000e+00> : vector<8x8xf32>
    %99 = vector.multi_reduction <add>, %98, %cst_50 [2] : vector<8x8x8xf32> to vector<8x8xf32>
    %100 = vector.shape_cast %99 : vector<8x8xf32> to vector<8x8x1xf32>
    %101 = tpu.reciprocal %100 {approx = true} : vector<8x8x1xf32> -> vector<8x8x1xf32>
    %102 = vector.broadcast %101 : vector<8x8x1xf32> to vector<8x8x8xf32>
    %103 = arith.mulf %98, %102 : vector<8x8x8xf32>
    %104 = arith.truncf %103 : vector<8x8x8xf32> to vector<8x8x8xbf16>
    "tpu.trace_start"() <{level = 10 : i32, message = "gqk,gkd->gqd"}> : () -> ()
    %cst_51 = arith.constant dense<0.000000e+00> : vector<8x8x32xf32>
    %105 = tpu.matmul %104, %90, %cst_51 {dimension_numbers = #tpu.dot_dimension_numbers<[2], [1], [1], [2], [0, 0, 0, 1, 1, 2], [0], [0]>} : vector<8x8x8xbf16>, vector<8x8x32xbf16>, vector<8x8x32xf32> -> vector<8x8x32xf32>
    "tpu.trace_stop"() : () -> ()
    %106 = vector.shape_cast %105 : vector<8x8x32xf32> to vector<64x32xf32>
    %107 = vector.extract_strided_slice %29 {offsets = [0, 96], sizes = [64, 32], strides = [1, 1]} : vector<64x128xf32> to vector<64x32xf32>
    %108 = vector.shape_cast %107 : vector<64x32xf32> to vector<8x8x32xf32>
    %109 = arith.truncf %108 : vector<8x8x32xf32> to vector<8x8x32xbf16>
    %110 = vector.extract_strided_slice %30 {offsets = [0, 96], sizes = [64, 32], strides = [1, 1]} : vector<64x128xf32> to vector<64x32xf32>
    %111 = vector.shape_cast %110 : vector<64x32xf32> to vector<8x8x32xf32>
    %112 = arith.truncf %111 : vector<8x8x32xf32> to vector<8x8x32xbf16>
    %113 = vector.extract_strided_slice %31 {offsets = [0, 96], sizes = [64, 32], strides = [1, 1]} : vector<64x128xf32> to vector<64x32xf32>
    %114 = vector.shape_cast %113 : vector<64x32xf32> to vector<8x8x32xf32>
    %115 = arith.truncf %114 : vector<8x8x32xf32> to vector<8x8x32xbf16>
    "tpu.trace_start"() <{level = 10 : i32, message = "gqd,gkd->gqk"}> : () -> ()
    %cst_52 = arith.constant dense<0.000000e+00> : vector<8x8x8xf32>
    %116 = tpu.matmul %109, %112, %cst_52 {dimension_numbers = #tpu.dot_dimension_numbers<[2], [2], [1], [1], [0, 0, 0, 1, 1, 1], [0], [0]>} : vector<8x8x32xbf16>, vector<8x8x32xbf16>, vector<8x8x8xf32> -> vector<8x8x8xf32>
    "tpu.trace_stop"() : () -> ()
    %cst_53 = arith.constant 0.176776692 : f32
    %117 = vector.broadcast %cst_53 : f32 to vector<8x8x8xf32>
    %118 = arith.mulf %116, %117 : vector<8x8x8xf32>
    %cst_54 = arith.constant dense<0xFF800000> : vector<8x8xf32>
    %119 = vector.multi_reduction <maximumf>, %118, %cst_54 [2] : vector<8x8x8xf32> to vector<8x8xf32>
    %120 = vector.shape_cast %119 : vector<8x8xf32> to vector<8x8x1xf32>
    %121 = vector.broadcast %120 : vector<8x8x1xf32> to vector<8x8x8xf32>
    %122 = arith.subf %118, %121 : vector<8x8x8xf32>
    %123 = math.exp %122 : vector<8x8x8xf32>
    %cst_55 = arith.constant dense<0.000000e+00> : vector<8x8xf32>
    %124 = vector.multi_reduction <add>, %123, %cst_55 [2] : vector<8x8x8xf32> to vector<8x8xf32>
    %125 = vector.shape_cast %124 : vector<8x8xf32> to vector<8x8x1xf32>
    %126 = tpu.reciprocal %125 {approx = true} : vector<8x8x1xf32> -> vector<8x8x1xf32>
    %127 = vector.broadcast %126 : vector<8x8x1xf32> to vector<8x8x8xf32>
    %128 = arith.mulf %123, %127 : vector<8x8x8xf32>
    %129 = arith.truncf %128 : vector<8x8x8xf32> to vector<8x8x8xbf16>
    "tpu.trace_start"() <{level = 10 : i32, message = "gqk,gkd->gqd"}> : () -> ()
    %cst_56 = arith.constant dense<0.000000e+00> : vector<8x8x32xf32>
    %130 = tpu.matmul %129, %115, %cst_56 {dimension_numbers = #tpu.dot_dimension_numbers<[2], [1], [1], [2], [0, 0, 0, 1, 1, 2], [0], [0]>} : vector<8x8x8xbf16>, vector<8x8x32xbf16>, vector<8x8x32xf32> -> vector<8x8x32xf32>
    "tpu.trace_stop"() : () -> ()
    %131 = vector.shape_cast %130 : vector<8x8x32xf32> to vector<64x32xf32>
    %132 = tpu.concatenate %56, %81, %106, %131 in 1 : vector<64x32xf32>, vector<64x32xf32>, vector<64x32xf32>, vector<64x32xf32> -> vector<64x128xf32>
    %133 = arith.truncf %132 : vector<64x128xf32> to vector<64x128xbf16>
    %cst_57 = arith.constant dense<0.000000e+00> : vector<64x128xf32>
    %134 = tpu.matmul %133, %6, %cst_57 {dimension_numbers = #tpu.dot_dimension_numbers<[1], [0], [0], [1], [0, 0, 1, 1], [], []>} : vector<64x128xbf16>, vector<128x128xbf16>, vector<64x128xf32> -> vector<64x128xf32>
    %135 = vector.broadcast %8 : vector<1x128xf32> to vector<64x128xf32>
    %136 = arith.addf %134, %135 : vector<64x128xf32>
    %137 = arith.addf %0, %136 : vector<64x128xf32>
    %cst_58 = arith.constant dense<0.000000e+00> : vector<64xf32>
    %138 = vector.multi_reduction <add>, %137, %cst_58 [1] : vector<64x128xf32> to vector<64xf32>
    %139 = vector.shape_cast %138 : vector<64xf32> to vector<64x1xf32>
    %cst_59 = arith.constant 1.280000e+02 : f32
    %140 = vector.broadcast %cst_59 : f32 to vector<64x1xf32>
    %141 = arith.divf %139, %140 : vector<64x1xf32>
    %142 = vector.broadcast %141 : vector<64x1xf32> to vector<64x128xf32>
    %143 = arith.subf %137, %142 : vector<64x128xf32>
    %144 = arith.mulf %143, %143 : vector<64x128xf32>
    %cst_60 = arith.constant dense<0.000000e+00> : vector<64xf32>
    %145 = vector.multi_reduction <add>, %144, %cst_60 [1] : vector<64x128xf32> to vector<64xf32>
    %146 = vector.shape_cast %145 : vector<64xf32> to vector<64x1xf32>
    %cst_61 = arith.constant 1.280000e+02 : f32
    %147 = vector.broadcast %cst_61 : f32 to vector<64x1xf32>
    %148 = arith.divf %146, %147 : vector<64x1xf32>
    %cst_62 = arith.constant 9.99999974E-6 : f32
    %149 = vector.broadcast %cst_62 : f32 to vector<64x1xf32>
    %150 = arith.addf %148, %149 : vector<64x1xf32>
    %151 = math.rsqrt %150 : vector<64x1xf32>
    %152 = vector.broadcast %151 : vector<64x1xf32> to vector<64x128xf32>
    %153 = arith.mulf %143, %152 : vector<64x128xf32>
    %154 = vector.broadcast %10 : vector<1x128xf32> to vector<64x128xf32>
    %155 = arith.mulf %153, %154 : vector<64x128xf32>
    %156 = vector.broadcast %12 : vector<1x128xf32> to vector<64x128xf32>
    %157 = arith.addf %155, %156 : vector<64x128xf32>
    %158 = arith.truncf %157 : vector<64x128xf32> to vector<64x128xbf16>
    %cst_63 = arith.constant dense<0.000000e+00> : vector<64x512xf32>
    %159 = tpu.matmul %158, %14, %cst_63 {dimension_numbers = #tpu.dot_dimension_numbers<[1], [0], [0], [1], [0, 0, 1, 1], [], []>} : vector<64x128xbf16>, vector<128x512xbf16>, vector<64x512xf32> -> vector<64x512xf32>
    %160 = vector.broadcast %16 : vector<1x512xf32> to vector<64x512xf32>
    %161 = arith.addf %159, %160 : vector<64x512xf32>
    %cst_64 = arith.constant 0.000000e+00 : f32
    %162 = vector.broadcast %cst_64 : f32 to vector<64x512xf32>
    %163 = arith.maximumf %161, %162 : vector<64x512xf32>
    %164 = arith.truncf %163 : vector<64x512xf32> to vector<64x512xbf16>
    %cst_65 = arith.constant dense<0.000000e+00> : vector<64x128xf32>
    %165 = tpu.matmul %164, %18, %cst_65 {dimension_numbers = #tpu.dot_dimension_numbers<[1], [0], [0], [1], [0, 0, 1, 1], [], []>} : vector<64x512xbf16>, vector<512x128xbf16>, vector<64x128xf32> -> vector<64x128xf32>
    %166 = vector.broadcast %20 : vector<1x128xf32> to vector<64x128xf32>
    %167 = arith.addf %165, %166 : vector<64x128xf32>
    %168 = arith.addf %157, %167 : vector<64x128xf32>
    %cst_66 = arith.constant dense<0.000000e+00> : vector<64xf32>
    %169 = vector.multi_reduction <add>, %168, %cst_66 [1] : vector<64x128xf32> to vector<64xf32>
    %170 = vector.shape_cast %169 : vector<64xf32> to vector<64x1xf32>
    %cst_67 = arith.constant 1.280000e+02 : f32
    %171 = vector.broadcast %cst_67 : f32 to vector<64x1xf32>
    %172 = arith.divf %170, %171 : vector<64x1xf32>
    %173 = vector.broadcast %172 : vector<64x1xf32> to vector<64x128xf32>
    %174 = arith.subf %168, %173 : vector<64x128xf32>
    %175 = arith.mulf %174, %174 : vector<64x128xf32>
    %cst_68 = arith.constant dense<0.000000e+00> : vector<64xf32>
    %176 = vector.multi_reduction <add>, %175, %cst_68 [1] : vector<64x128xf32> to vector<64xf32>
    %177 = vector.shape_cast %176 : vector<64xf32> to vector<64x1xf32>
    %cst_69 = arith.constant 1.280000e+02 : f32
    %178 = vector.broadcast %cst_69 : f32 to vector<64x1xf32>
    %179 = arith.divf %177, %178 : vector<64x1xf32>
    %cst_70 = arith.constant 9.99999974E-6 : f32
    %180 = vector.broadcast %cst_70 : f32 to vector<64x1xf32>
    %181 = arith.addf %179, %180 : vector<64x1xf32>
    %182 = math.rsqrt %181 : vector<64x1xf32>
    %183 = vector.broadcast %182 : vector<64x1xf32> to vector<64x128xf32>
    %184 = arith.mulf %174, %183 : vector<64x128xf32>
    %185 = vector.broadcast %22 : vector<1x128xf32> to vector<64x128xf32>
    %186 = arith.mulf %184, %185 : vector<64x128xf32>
    %187 = vector.broadcast %24 : vector<1x128xf32> to vector<64x128xf32>
    %188 = arith.addf %186, %187 : vector<64x128xf32>
    %c1 = arith.constant 1 : index
    %c0_71 = arith.constant 0 : index
    %c0_72 = arith.constant 0 : index
    %189 = vector.load %arg2[%c1, %c0_71, %c0_72] : memref<2x128x384xbf16, #tpu.memory_space<vmem>>, vector<1x128x384xbf16>
    %190 = vector.shape_cast %189 : vector<1x128x384xbf16> to vector<128x384xbf16>
    %c1_73 = arith.constant 1 : index
    %c0_74 = arith.constant 0 : index
    %c0_75 = arith.constant 0 : index
    %191 = vector.load %arg3[%c1_73, %c0_74, %c0_75] : memref<2x1x384xf32, #tpu.memory_space<vmem>>, vector<1x1x384xf32>
    %192 = vector.shape_cast %191 : vector<1x1x384xf32> to vector<1x384xf32>
    %c1_76 = arith.constant 1 : index
    %c0_77 = arith.constant 0 : index
    %c0_78 = arith.constant 0 : index
    %193 = vector.load %arg4[%c1_76, %c0_77, %c0_78] : memref<2x128x128xbf16, #tpu.memory_space<vmem>>, vector<1x128x128xbf16>
    %194 = vector.shape_cast %193 : vector<1x128x128xbf16> to vector<128x128xbf16>
    %c1_79 = arith.constant 1 : index
    %c0_80 = arith.constant 0 : index
    %c0_81 = arith.constant 0 : index
    %195 = vector.load %arg5[%c1_79, %c0_80, %c0_81] : memref<2x1x128xf32, #tpu.memory_space<vmem>>, vector<1x1x128xf32>
    %196 = vector.shape_cast %195 : vector<1x1x128xf32> to vector<1x128xf32>
    %c1_82 = arith.constant 1 : index
    %c0_83 = arith.constant 0 : index
    %c0_84 = arith.constant 0 : index
    %197 = vector.load %arg6[%c1_82, %c0_83, %c0_84] : memref<2x1x128xf32, #tpu.memory_space<vmem>>, vector<1x1x128xf32>
    %198 = vector.shape_cast %197 : vector<1x1x128xf32> to vector<1x128xf32>
    %c1_85 = arith.constant 1 : index
    %c0_86 = arith.constant 0 : index
    %c0_87 = arith.constant 0 : index
    %199 = vector.load %arg7[%c1_85, %c0_86, %c0_87] : memref<2x1x128xf32, #tpu.memory_space<vmem>>, vector<1x1x128xf32>
    %200 = vector.shape_cast %199 : vector<1x1x128xf32> to vector<1x128xf32>
    %c1_88 = arith.constant 1 : index
    %c0_89 = arith.constant 0 : index
    %c0_90 = arith.constant 0 : index
    %201 = vector.load %arg8[%c1_88, %c0_89, %c0_90] : memref<2x128x512xbf16, #tpu.memory_space<vmem>>, vector<1x128x512xbf16>
    %202 = vector.shape_cast %201 : vector<1x128x512xbf16> to vector<128x512xbf16>
    %c1_91 = arith.constant 1 : index
    %c0_92 = arith.constant 0 : index
    %c0_93 = arith.constant 0 : index
    %203 = vector.load %arg9[%c1_91, %c0_92, %c0_93] : memref<2x1x512xf32, #tpu.memory_space<vmem>>, vector<1x1x512xf32>
    %204 = vector.shape_cast %203 : vector<1x1x512xf32> to vector<1x512xf32>
    %c1_94 = arith.constant 1 : index
    %c0_95 = arith.constant 0 : index
    %c0_96 = arith.constant 0 : index
    %205 = vector.load %arg10[%c1_94, %c0_95, %c0_96] : memref<2x512x128xbf16, #tpu.memory_space<vmem>>, vector<1x512x128xbf16>
    %206 = vector.shape_cast %205 : vector<1x512x128xbf16> to vector<512x128xbf16>
    %c1_97 = arith.constant 1 : index
    %c0_98 = arith.constant 0 : index
    %c0_99 = arith.constant 0 : index
    %207 = vector.load %arg11[%c1_97, %c0_98, %c0_99] : memref<2x1x128xf32, #tpu.memory_space<vmem>>, vector<1x1x128xf32>
    %208 = vector.shape_cast %207 : vector<1x1x128xf32> to vector<1x128xf32>
    %c1_100 = arith.constant 1 : index
    %c0_101 = arith.constant 0 : index
    %c0_102 = arith.constant 0 : index
    %209 = vector.load %arg12[%c1_100, %c0_101, %c0_102] : memref<2x1x128xf32, #tpu.memory_space<vmem>>, vector<1x1x128xf32>
    %210 = vector.shape_cast %209 : vector<1x1x128xf32> to vector<1x128xf32>
    %c1_103 = arith.constant 1 : index
    %c0_104 = arith.constant 0 : index
    %c0_105 = arith.constant 0 : index
    %211 = vector.load %arg13[%c1_103, %c0_104, %c0_105] : memref<2x1x128xf32, #tpu.memory_space<vmem>>, vector<1x1x128xf32>
    %212 = vector.shape_cast %211 : vector<1x1x128xf32> to vector<1x128xf32>
    %213 = arith.truncf %188 : vector<64x128xf32> to vector<64x128xbf16>
    %cst_106 = arith.constant dense<0.000000e+00> : vector<64x384xf32>
    %214 = tpu.matmul %213, %190, %cst_106 {dimension_numbers = #tpu.dot_dimension_numbers<[1], [0], [0], [1], [0, 0, 1, 1], [], []>} : vector<64x128xbf16>, vector<128x384xbf16>, vector<64x384xf32> -> vector<64x384xf32>
    %215 = vector.broadcast %192 : vector<1x384xf32> to vector<64x384xf32>
    %216 = arith.addf %214, %215 : vector<64x384xf32>
    %217 = vector.extract_strided_slice %216 {offsets = [0, 0], sizes = [64, 128], strides = [1, 1]} : vector<64x384xf32> to vector<64x128xf32>
    %218 = vector.extract_strided_slice %216 {offsets = [0, 128], sizes = [64, 128], strides = [1, 1]} : vector<64x384xf32> to vector<64x128xf32>
    %219 = vector.extract_strided_slice %216 {offsets = [0, 256], sizes = [64, 128], strides = [1, 1]} : vector<64x384xf32> to vector<64x128xf32>
    %220 = vector.extract_strided_slice %217 {offsets = [0, 0], sizes = [64, 32], strides = [1, 1]} : vector<64x128xf32> to vector<64x32xf32>
    %221 = vector.shape_cast %220 : vector<64x32xf32> to vector<8x8x32xf32>
    %222 = arith.truncf %221 : vector<8x8x32xf32> to vector<8x8x32xbf16>
    %223 = vector.extract_strided_slice %218 {offsets = [0, 0], sizes = [64, 32], strides = [1, 1]} : vector<64x128xf32> to vector<64x32xf32>
    %224 = vector.shape_cast %223 : vector<64x32xf32> to vector<8x8x32xf32>
    %225 = arith.truncf %224 : vector<8x8x32xf32> to vector<8x8x32xbf16>
    %226 = vector.extract_strided_slice %219 {offsets = [0, 0], sizes = [64, 32], strides = [1, 1]} : vector<64x128xf32> to vector<64x32xf32>
    %227 = vector.shape_cast %226 : vector<64x32xf32> to vector<8x8x32xf32>
    %228 = arith.truncf %227 : vector<8x8x32xf32> to vector<8x8x32xbf16>
    "tpu.trace_start"() <{level = 10 : i32, message = "gqd,gkd->gqk"}> : () -> ()
    %cst_107 = arith.constant dense<0.000000e+00> : vector<8x8x8xf32>
    %229 = tpu.matmul %222, %225, %cst_107 {dimension_numbers = #tpu.dot_dimension_numbers<[2], [2], [1], [1], [0, 0, 0, 1, 1, 1], [0], [0]>} : vector<8x8x32xbf16>, vector<8x8x32xbf16>, vector<8x8x8xf32> -> vector<8x8x8xf32>
    "tpu.trace_stop"() : () -> ()
    %cst_108 = arith.constant 0.176776692 : f32
    %230 = vector.broadcast %cst_108 : f32 to vector<8x8x8xf32>
    %231 = arith.mulf %229, %230 : vector<8x8x8xf32>
    %cst_109 = arith.constant dense<0xFF800000> : vector<8x8xf32>
    %232 = vector.multi_reduction <maximumf>, %231, %cst_109 [2] : vector<8x8x8xf32> to vector<8x8xf32>
    %233 = vector.shape_cast %232 : vector<8x8xf32> to vector<8x8x1xf32>
    %234 = vector.broadcast %233 : vector<8x8x1xf32> to vector<8x8x8xf32>
    %235 = arith.subf %231, %234 : vector<8x8x8xf32>
    %236 = math.exp %235 : vector<8x8x8xf32>
    %cst_110 = arith.constant dense<0.000000e+00> : vector<8x8xf32>
    %237 = vector.multi_reduction <add>, %236, %cst_110 [2] : vector<8x8x8xf32> to vector<8x8xf32>
    %238 = vector.shape_cast %237 : vector<8x8xf32> to vector<8x8x1xf32>
    %239 = tpu.reciprocal %238 {approx = true} : vector<8x8x1xf32> -> vector<8x8x1xf32>
    %240 = vector.broadcast %239 : vector<8x8x1xf32> to vector<8x8x8xf32>
    %241 = arith.mulf %236, %240 : vector<8x8x8xf32>
    %242 = arith.truncf %241 : vector<8x8x8xf32> to vector<8x8x8xbf16>
    "tpu.trace_start"() <{level = 10 : i32, message = "gqk,gkd->gqd"}> : () -> ()
    %cst_111 = arith.constant dense<0.000000e+00> : vector<8x8x32xf32>
    %243 = tpu.matmul %242, %228, %cst_111 {dimension_numbers = #tpu.dot_dimension_numbers<[2], [1], [1], [2], [0, 0, 0, 1, 1, 2], [0], [0]>} : vector<8x8x8xbf16>, vector<8x8x32xbf16>, vector<8x8x32xf32> -> vector<8x8x32xf32>
    "tpu.trace_stop"() : () -> ()
    %244 = vector.shape_cast %243 : vector<8x8x32xf32> to vector<64x32xf32>
    %245 = vector.extract_strided_slice %217 {offsets = [0, 32], sizes = [64, 32], strides = [1, 1]} : vector<64x128xf32> to vector<64x32xf32>
    %246 = vector.shape_cast %245 : vector<64x32xf32> to vector<8x8x32xf32>
    %247 = arith.truncf %246 : vector<8x8x32xf32> to vector<8x8x32xbf16>
    %248 = vector.extract_strided_slice %218 {offsets = [0, 32], sizes = [64, 32], strides = [1, 1]} : vector<64x128xf32> to vector<64x32xf32>
    %249 = vector.shape_cast %248 : vector<64x32xf32> to vector<8x8x32xf32>
    %250 = arith.truncf %249 : vector<8x8x32xf32> to vector<8x8x32xbf16>
    %251 = vector.extract_strided_slice %219 {offsets = [0, 32], sizes = [64, 32], strides = [1, 1]} : vector<64x128xf32> to vector<64x32xf32>
    %252 = vector.shape_cast %251 : vector<64x32xf32> to vector<8x8x32xf32>
    %253 = arith.truncf %252 : vector<8x8x32xf32> to vector<8x8x32xbf16>
    "tpu.trace_start"() <{level = 10 : i32, message = "gqd,gkd->gqk"}> : () -> ()
    %cst_112 = arith.constant dense<0.000000e+00> : vector<8x8x8xf32>
    %254 = tpu.matmul %247, %250, %cst_112 {dimension_numbers = #tpu.dot_dimension_numbers<[2], [2], [1], [1], [0, 0, 0, 1, 1, 1], [0], [0]>} : vector<8x8x32xbf16>, vector<8x8x32xbf16>, vector<8x8x8xf32> -> vector<8x8x8xf32>
    "tpu.trace_stop"() : () -> ()
    %cst_113 = arith.constant 0.176776692 : f32
    %255 = vector.broadcast %cst_113 : f32 to vector<8x8x8xf32>
    %256 = arith.mulf %254, %255 : vector<8x8x8xf32>
    %cst_114 = arith.constant dense<0xFF800000> : vector<8x8xf32>
    %257 = vector.multi_reduction <maximumf>, %256, %cst_114 [2] : vector<8x8x8xf32> to vector<8x8xf32>
    %258 = vector.shape_cast %257 : vector<8x8xf32> to vector<8x8x1xf32>
    %259 = vector.broadcast %258 : vector<8x8x1xf32> to vector<8x8x8xf32>
    %260 = arith.subf %256, %259 : vector<8x8x8xf32>
    %261 = math.exp %260 : vector<8x8x8xf32>
    %cst_115 = arith.constant dense<0.000000e+00> : vector<8x8xf32>
    %262 = vector.multi_reduction <add>, %261, %cst_115 [2] : vector<8x8x8xf32> to vector<8x8xf32>
    %263 = vector.shape_cast %262 : vector<8x8xf32> to vector<8x8x1xf32>
    %264 = tpu.reciprocal %263 {approx = true} : vector<8x8x1xf32> -> vector<8x8x1xf32>
    %265 = vector.broadcast %264 : vector<8x8x1xf32> to vector<8x8x8xf32>
    %266 = arith.mulf %261, %265 : vector<8x8x8xf32>
    %267 = arith.truncf %266 : vector<8x8x8xf32> to vector<8x8x8xbf16>
    "tpu.trace_start"() <{level = 10 : i32, message = "gqk,gkd->gqd"}> : () -> ()
    %cst_116 = arith.constant dense<0.000000e+00> : vector<8x8x32xf32>
    %268 = tpu.matmul %267, %253, %cst_116 {dimension_numbers = #tpu.dot_dimension_numbers<[2], [1], [1], [2], [0, 0, 0, 1, 1, 2], [0], [0]>} : vector<8x8x8xbf16>, vector<8x8x32xbf16>, vector<8x8x32xf32> -> vector<8x8x32xf32>
    "tpu.trace_stop"() : () -> ()
    %269 = vector.shape_cast %268 : vector<8x8x32xf32> to vector<64x32xf32>
    %270 = vector.extract_strided_slice %217 {offsets = [0, 64], sizes = [64, 32], strides = [1, 1]} : vector<64x128xf32> to vector<64x32xf32>
    %271 = vector.shape_cast %270 : vector<64x32xf32> to vector<8x8x32xf32>
    %272 = arith.truncf %271 : vector<8x8x32xf32> to vector<8x8x32xbf16>
    %273 = vector.extract_strided_slice %218 {offsets = [0, 64], sizes = [64, 32], strides = [1, 1]} : vector<64x128xf32> to vector<64x32xf32>
    %274 = vector.shape_cast %273 : vector<64x32xf32> to vector<8x8x32xf32>
    %275 = arith.truncf %274 : vector<8x8x32xf32> to vector<8x8x32xbf16>
    %276 = vector.extract_strided_slice %219 {offsets = [0, 64], sizes = [64, 32], strides = [1, 1]} : vector<64x128xf32> to vector<64x32xf32>
    %277 = vector.shape_cast %276 : vector<64x32xf32> to vector<8x8x32xf32>
    %278 = arith.truncf %277 : vector<8x8x32xf32> to vector<8x8x32xbf16>
    "tpu.trace_start"() <{level = 10 : i32, message = "gqd,gkd->gqk"}> : () -> ()
    %cst_117 = arith.constant dense<0.000000e+00> : vector<8x8x8xf32>
    %279 = tpu.matmul %272, %275, %cst_117 {dimension_numbers = #tpu.dot_dimension_numbers<[2], [2], [1], [1], [0, 0, 0, 1, 1, 1], [0], [0]>} : vector<8x8x32xbf16>, vector<8x8x32xbf16>, vector<8x8x8xf32> -> vector<8x8x8xf32>
    "tpu.trace_stop"() : () -> ()
    %cst_118 = arith.constant 0.176776692 : f32
    %280 = vector.broadcast %cst_118 : f32 to vector<8x8x8xf32>
    %281 = arith.mulf %279, %280 : vector<8x8x8xf32>
    %cst_119 = arith.constant dense<0xFF800000> : vector<8x8xf32>
    %282 = vector.multi_reduction <maximumf>, %281, %cst_119 [2] : vector<8x8x8xf32> to vector<8x8xf32>
    %283 = vector.shape_cast %282 : vector<8x8xf32> to vector<8x8x1xf32>
    %284 = vector.broadcast %283 : vector<8x8x1xf32> to vector<8x8x8xf32>
    %285 = arith.subf %281, %284 : vector<8x8x8xf32>
    %286 = math.exp %285 : vector<8x8x8xf32>
    %cst_120 = arith.constant dense<0.000000e+00> : vector<8x8xf32>
    %287 = vector.multi_reduction <add>, %286, %cst_120 [2] : vector<8x8x8xf32> to vector<8x8xf32>
    %288 = vector.shape_cast %287 : vector<8x8xf32> to vector<8x8x1xf32>
    %289 = tpu.reciprocal %288 {approx = true} : vector<8x8x1xf32> -> vector<8x8x1xf32>
    %290 = vector.broadcast %289 : vector<8x8x1xf32> to vector<8x8x8xf32>
    %291 = arith.mulf %286, %290 : vector<8x8x8xf32>
    %292 = arith.truncf %291 : vector<8x8x8xf32> to vector<8x8x8xbf16>
    "tpu.trace_start"() <{level = 10 : i32, message = "gqk,gkd->gqd"}> : () -> ()
    %cst_121 = arith.constant dense<0.000000e+00> : vector<8x8x32xf32>
    %293 = tpu.matmul %292, %278, %cst_121 {dimension_numbers = #tpu.dot_dimension_numbers<[2], [1], [1], [2], [0, 0, 0, 1, 1, 2], [0], [0]>} : vector<8x8x8xbf16>, vector<8x8x32xbf16>, vector<8x8x32xf32> -> vector<8x8x32xf32>
    "tpu.trace_stop"() : () -> ()
    %294 = vector.shape_cast %293 : vector<8x8x32xf32> to vector<64x32xf32>
    %295 = vector.extract_strided_slice %217 {offsets = [0, 96], sizes = [64, 32], strides = [1, 1]} : vector<64x128xf32> to vector<64x32xf32>
    %296 = vector.shape_cast %295 : vector<64x32xf32> to vector<8x8x32xf32>
    %297 = arith.truncf %296 : vector<8x8x32xf32> to vector<8x8x32xbf16>
    %298 = vector.extract_strided_slice %218 {offsets = [0, 96], sizes = [64, 32], strides = [1, 1]} : vector<64x128xf32> to vector<64x32xf32>
    %299 = vector.shape_cast %298 : vector<64x32xf32> to vector<8x8x32xf32>
    %300 = arith.truncf %299 : vector<8x8x32xf32> to vector<8x8x32xbf16>
    %301 = vector.extract_strided_slice %219 {offsets = [0, 96], sizes = [64, 32], strides = [1, 1]} : vector<64x128xf32> to vector<64x32xf32>
    %302 = vector.shape_cast %301 : vector<64x32xf32> to vector<8x8x32xf32>
    %303 = arith.truncf %302 : vector<8x8x32xf32> to vector<8x8x32xbf16>
    "tpu.trace_start"() <{level = 10 : i32, message = "gqd,gkd->gqk"}> : () -> ()
    %cst_122 = arith.constant dense<0.000000e+00> : vector<8x8x8xf32>
    %304 = tpu.matmul %297, %300, %cst_122 {dimension_numbers = #tpu.dot_dimension_numbers<[2], [2], [1], [1], [0, 0, 0, 1, 1, 1], [0], [0]>} : vector<8x8x32xbf16>, vector<8x8x32xbf16>, vector<8x8x8xf32> -> vector<8x8x8xf32>
    "tpu.trace_stop"() : () -> ()
    %cst_123 = arith.constant 0.176776692 : f32
    %305 = vector.broadcast %cst_123 : f32 to vector<8x8x8xf32>
    %306 = arith.mulf %304, %305 : vector<8x8x8xf32>
    %cst_124 = arith.constant dense<0xFF800000> : vector<8x8xf32>
    %307 = vector.multi_reduction <maximumf>, %306, %cst_124 [2] : vector<8x8x8xf32> to vector<8x8xf32>
    %308 = vector.shape_cast %307 : vector<8x8xf32> to vector<8x8x1xf32>
    %309 = vector.broadcast %308 : vector<8x8x1xf32> to vector<8x8x8xf32>
    %310 = arith.subf %306, %309 : vector<8x8x8xf32>
    %311 = math.exp %310 : vector<8x8x8xf32>
    %cst_125 = arith.constant dense<0.000000e+00> : vector<8x8xf32>
    %312 = vector.multi_reduction <add>, %311, %cst_125 [2] : vector<8x8x8xf32> to vector<8x8xf32>
    %313 = vector.shape_cast %312 : vector<8x8xf32> to vector<8x8x1xf32>
    %314 = tpu.reciprocal %313 {approx = true} : vector<8x8x1xf32> -> vector<8x8x1xf32>
    %315 = vector.broadcast %314 : vector<8x8x1xf32> to vector<8x8x8xf32>
    %316 = arith.mulf %311, %315 : vector<8x8x8xf32>
    %317 = arith.truncf %316 : vector<8x8x8xf32> to vector<8x8x8xbf16>
    "tpu.trace_start"() <{level = 10 : i32, message = "gqk,gkd->gqd"}> : () -> ()
    %cst_126 = arith.constant dense<0.000000e+00> : vector<8x8x32xf32>
    %318 = tpu.matmul %317, %303, %cst_126 {dimension_numbers = #tpu.dot_dimension_numbers<[2], [1], [1], [2], [0, 0, 0, 1, 1, 2], [0], [0]>} : vector<8x8x8xbf16>, vector<8x8x32xbf16>, vector<8x8x32xf32> -> vector<8x8x32xf32>
    "tpu.trace_stop"() : () -> ()
    %319 = vector.shape_cast %318 : vector<8x8x32xf32> to vector<64x32xf32>
    %320 = tpu.concatenate %244, %269, %294, %319 in 1 : vector<64x32xf32>, vector<64x32xf32>, vector<64x32xf32>, vector<64x32xf32> -> vector<64x128xf32>
    %321 = arith.truncf %320 : vector<64x128xf32> to vector<64x128xbf16>
    %cst_127 = arith.constant dense<0.000000e+00> : vector<64x128xf32>
    %322 = tpu.matmul %321, %194, %cst_127 {dimension_numbers = #tpu.dot_dimension_numbers<[1], [0], [0], [1], [0, 0, 1, 1], [], []>} : vector<64x128xbf16>, vector<128x128xbf16>, vector<64x128xf32> -> vector<64x128xf32>
    %323 = vector.broadcast %196 : vector<1x128xf32> to vector<64x128xf32>
    %324 = arith.addf %322, %323 : vector<64x128xf32>
    %325 = arith.addf %188, %324 : vector<64x128xf32>
    %cst_128 = arith.constant dense<0.000000e+00> : vector<64xf32>
    %326 = vector.multi_reduction <add>, %325, %cst_128 [1] : vector<64x128xf32> to vector<64xf32>
    %327 = vector.shape_cast %326 : vector<64xf32> to vector<64x1xf32>
    %cst_129 = arith.constant 1.280000e+02 : f32
    %328 = vector.broadcast %cst_129 : f32 to vector<64x1xf32>
    %329 = arith.divf %327, %328 : vector<64x1xf32>
    %330 = vector.broadcast %329 : vector<64x1xf32> to vector<64x128xf32>
    %331 = arith.subf %325, %330 : vector<64x128xf32>
    %332 = arith.mulf %331, %331 : vector<64x128xf32>
    %cst_130 = arith.constant dense<0.000000e+00> : vector<64xf32>
    %333 = vector.multi_reduction <add>, %332, %cst_130 [1] : vector<64x128xf32> to vector<64xf32>
    %334 = vector.shape_cast %333 : vector<64xf32> to vector<64x1xf32>
    %cst_131 = arith.constant 1.280000e+02 : f32
    %335 = vector.broadcast %cst_131 : f32 to vector<64x1xf32>
    %336 = arith.divf %334, %335 : vector<64x1xf32>
    %cst_132 = arith.constant 9.99999974E-6 : f32
    %337 = vector.broadcast %cst_132 : f32 to vector<64x1xf32>
    %338 = arith.addf %336, %337 : vector<64x1xf32>
    %339 = math.rsqrt %338 : vector<64x1xf32>
    %340 = vector.broadcast %339 : vector<64x1xf32> to vector<64x128xf32>
    %341 = arith.mulf %331, %340 : vector<64x128xf32>
    %342 = vector.broadcast %198 : vector<1x128xf32> to vector<64x128xf32>
    %343 = arith.mulf %341, %342 : vector<64x128xf32>
    %344 = vector.broadcast %200 : vector<1x128xf32> to vector<64x128xf32>
    %345 = arith.addf %343, %344 : vector<64x128xf32>
    %346 = arith.truncf %345 : vector<64x128xf32> to vector<64x128xbf16>
    %cst_133 = arith.constant dense<0.000000e+00> : vector<64x512xf32>
    %347 = tpu.matmul %346, %202, %cst_133 {dimension_numbers = #tpu.dot_dimension_numbers<[1], [0], [0], [1], [0, 0, 1, 1], [], []>} : vector<64x128xbf16>, vector<128x512xbf16>, vector<64x512xf32> -> vector<64x512xf32>
    %348 = vector.broadcast %204 : vector<1x512xf32> to vector<64x512xf32>
    %349 = arith.addf %347, %348 : vector<64x512xf32>
    %cst_134 = arith.constant 0.000000e+00 : f32
    %350 = vector.broadcast %cst_134 : f32 to vector<64x512xf32>
    %351 = arith.maximumf %349, %350 : vector<64x512xf32>
    %352 = arith.truncf %351 : vector<64x512xf32> to vector<64x512xbf16>
    %cst_135 = arith.constant dense<0.000000e+00> : vector<64x128xf32>
    %353 = tpu.matmul %352, %206, %cst_135 {dimension_numbers = #tpu.dot_dimension_numbers<[1], [0], [0], [1], [0, 0, 1, 1], [], []>} : vector<64x512xbf16>, vector<512x128xbf16>, vector<64x128xf32> -> vector<64x128xf32>
    %354 = vector.broadcast %208 : vector<1x128xf32> to vector<64x128xf32>
    %355 = arith.addf %353, %354 : vector<64x128xf32>
    %356 = arith.addf %345, %355 : vector<64x128xf32>
    %cst_136 = arith.constant dense<0.000000e+00> : vector<64xf32>
    %357 = vector.multi_reduction <add>, %356, %cst_136 [1] : vector<64x128xf32> to vector<64xf32>
    %358 = vector.shape_cast %357 : vector<64xf32> to vector<64x1xf32>
    %cst_137 = arith.constant 1.280000e+02 : f32
    %359 = vector.broadcast %cst_137 : f32 to vector<64x1xf32>
    %360 = arith.divf %358, %359 : vector<64x1xf32>
    %361 = vector.broadcast %360 : vector<64x1xf32> to vector<64x128xf32>
    %362 = arith.subf %356, %361 : vector<64x128xf32>
    %363 = arith.mulf %362, %362 : vector<64x128xf32>
    %cst_138 = arith.constant dense<0.000000e+00> : vector<64xf32>
    %364 = vector.multi_reduction <add>, %363, %cst_138 [1] : vector<64x128xf32> to vector<64xf32>
    %365 = vector.shape_cast %364 : vector<64xf32> to vector<64x1xf32>
    %cst_139 = arith.constant 1.280000e+02 : f32
    %366 = vector.broadcast %cst_139 : f32 to vector<64x1xf32>
    %367 = arith.divf %365, %366 : vector<64x1xf32>
    %cst_140 = arith.constant 9.99999974E-6 : f32
    %368 = vector.broadcast %cst_140 : f32 to vector<64x1xf32>
    %369 = arith.addf %367, %368 : vector<64x1xf32>
    %370 = math.rsqrt %369 : vector<64x1xf32>
    %371 = vector.broadcast %370 : vector<64x1xf32> to vector<64x128xf32>
    %372 = arith.mulf %362, %371 : vector<64x128xf32>
    %373 = vector.broadcast %210 : vector<1x128xf32> to vector<64x128xf32>
    %374 = arith.mulf %372, %373 : vector<64x128xf32>
    %375 = vector.broadcast %212 : vector<1x128xf32> to vector<64x128xf32>
    %376 = arith.addf %374, %375 : vector<64x128xf32>
    %377 = arith.truncf %376 : vector<64x128xf32> to vector<64x128xbf16>
    %c0_141 = arith.constant 0 : index
    %c0_142 = arith.constant 0 : index
    %378 = vector.load %arg14[%c0_141, %c0_142] : memref<128x256xbf16, #tpu.memory_space<vmem>>, vector<128x256xbf16>
    %cst_143 = arith.constant dense<0.000000e+00> : vector<64x256xf32>
    %379 = tpu.matmul %377, %378, %cst_143 {dimension_numbers = #tpu.dot_dimension_numbers<[1], [0], [0], [1], [0, 0, 1, 1], [], []>} : vector<64x128xbf16>, vector<128x256xbf16>, vector<64x256xf32> -> vector<64x256xf32>
    %c0_144 = arith.constant 0 : index
    %c0_145 = arith.constant 0 : index
    %380 = vector.load %arg15[%c0_144, %c0_145] : memref<64x256xf32, #tpu.memory_space<vmem>>, vector<64x256xf32>
    tpu.vector_store %arg15[%c0_144, %c0_145], %379 {strides = array<i32>} : memref<64x256xf32, #tpu.memory_space<vmem>>, vector<64x256xf32>,
    return
  }
  func.func @transform_0(%arg0: i32) -> (i32, i32) {
    %c0_i32 = arith.constant 0 : i32
    %c0_i32_0 = arith.constant 0 : i32
    return %arg0, %c0_i32 : i32, i32
  }
  func.func @transform_1(%arg0: i32) -> (i32, i32, i32) {
    %c0_i32 = arith.constant 0 : i32
    %c0_i32_0 = arith.constant 0 : i32
    %c0_i32_1 = arith.constant 0 : i32
    %c0_i32_2 = arith.constant 0 : i32
    return %c0_i32, %c0_i32_0, %c0_i32_1 : i32, i32, i32
  }
  func.func @transform_2(%arg0: i32) -> (i32, i32, i32) {
    %c0_i32 = arith.constant 0 : i32
    %c0_i32_0 = arith.constant 0 : i32
    %c0_i32_1 = arith.constant 0 : i32
    %c0_i32_2 = arith.constant 0 : i32
    return %c0_i32, %c0_i32_0, %c0_i32_1 : i32, i32, i32
  }
  func.func @transform_3(%arg0: i32) -> (i32, i32, i32) {
    %c0_i32 = arith.constant 0 : i32
    %c0_i32_0 = arith.constant 0 : i32
    %c0_i32_1 = arith.constant 0 : i32
    %c0_i32_2 = arith.constant 0 : i32
    return %c0_i32, %c0_i32_0, %c0_i32_1 : i32, i32, i32
  }
  func.func @transform_4(%arg0: i32) -> (i32, i32, i32) {
    %c0_i32 = arith.constant 0 : i32
    %c0_i32_0 = arith.constant 0 : i32
    %c0_i32_1 = arith.constant 0 : i32
    %c0_i32_2 = arith.constant 0 : i32
    return %c0_i32, %c0_i32_0, %c0_i32_1 : i32, i32, i32
  }
  func.func @transform_5(%arg0: i32) -> (i32, i32, i32) {
    %c0_i32 = arith.constant 0 : i32
    %c0_i32_0 = arith.constant 0 : i32
    %c0_i32_1 = arith.constant 0 : i32
    %c0_i32_2 = arith.constant 0 : i32
    return %c0_i32, %c0_i32_0, %c0_i32_1 : i32, i32, i32
  }
  func.func @transform_6(%arg0: i32) -> (i32, i32, i32) {
    %c0_i32 = arith.constant 0 : i32
    %c0_i32_0 = arith.constant 0 : i32
    %c0_i32_1 = arith.constant 0 : i32
    %c0_i32_2 = arith.constant 0 : i32
    return %c0_i32, %c0_i32_0, %c0_i32_1 : i32, i32, i32
  }
  func.func @transform_7(%arg0: i32) -> (i32, i32, i32) {
    %c0_i32 = arith.constant 0 : i32
    %c0_i32_0 = arith.constant 0 : i32
    %c0_i32_1 = arith.constant 0 : i32
    %c0_i32_2 = arith.constant 0 : i32
    return %c0_i32, %c0_i32_0, %c0_i32_1 : i32, i32, i32
  }
  func.func @transform_8(%arg0: i32) -> (i32, i32, i32) {
    %c0_i32 = arith.constant 0 : i32
    %c0_i32_0 = arith.constant 0 : i32
    %c0_i32_1 = arith.constant 0 : i32
    %c0_i32_2 = arith.constant 0 : i32
    return %c0_i32, %c0_i32_0, %c0_i32_1 : i32, i32, i32
  }
  func.func @transform_9(%arg0: i32) -> (i32, i32, i32) {
    %c0_i32 = arith.constant 0 : i32
    %c0_i32_0 = arith.constant 0 : i32
    %c0_i32_1 = arith.constant 0 : i32
    %c0_i32_2 = arith.constant 0 : i32
    return %c0_i32, %c0_i32_0, %c0_i32_1 : i32, i32, i32
  }
  func.func @transform_10(%arg0: i32) -> (i32, i32, i32) {
    %c0_i32 = arith.constant 0 : i32
    %c0_i32_0 = arith.constant 0 : i32
    %c0_i32_1 = arith.constant 0 : i32
    %c0_i32_2 = arith.constant 0 : i32
    return %c0_i32, %c0_i32_0, %c0_i32_1 : i32, i32, i32
  }
  func.func @transform_11(%arg0: i32) -> (i32, i32, i32) {
    %c0_i32 = arith.constant 0 : i32
    %c0_i32_0 = arith.constant 0 : i32
    %c0_i32_1 = arith.constant 0 : i32
    %c0_i32_2 = arith.constant 0 : i32
    return %c0_i32, %c0_i32_0, %c0_i32_1 : i32, i32, i32
  }
  func.func @transform_12(%arg0: i32) -> (i32, i32, i32) {
    %c0_i32 = arith.constant 0 : i32
    %c0_i32_0 = arith.constant 0 : i32
    %c0_i32_1 = arith.constant 0 : i32
    %c0_i32_2 = arith.constant 0 : i32
    return %c0_i32, %c0_i32_0, %c0_i32_1 : i32, i32, i32
  }
  func.func @transform_13(%arg0: i32) -> (i32, i32) {
    %c0_i32 = arith.constant 0 : i32
    %c0_i32_0 = arith.constant 0 : i32
    %c0_i32_1 = arith.constant 0 : i32
    return %c0_i32, %c0_i32_0 : i32, i32
  }
  func.func @transform_14(%arg0: i32) -> (i32, i32) {
    %c0_i32 = arith.constant 0 : i32
    %c0_i32_0 = arith.constant 0 : i32
    return %arg0, %c0_i32 : i32, i32
  }
}

</mosaic_0001>

<bundles_post_ra>
// kernel: temp_llama_forward.1
= control target key start
LH: loop header
LB: loop body
LE: loop exit
PB: predicated region body
PF: predicated region fallthrough
CT: control target
= control target key end

     0   :  { %s9604_s29 = smov 0   ;;  %s12993_s0 = inlined_call_operand.vmem [shape: f32[128,128], index: 0, kind: input, shape index: {}]   ;;  %s12994_s1 = inlined_call_operand.vmem [shape: bf16[2,128,384], index: 1, kind: input, shape index: {}]   ;;  %s12995_s2 = inlined_call_operand.vmem [shape: f32[2,1,384], index: 2, kind: input, shape index: {}]   ;;  %s12996_s3 = inlined_call_operand.vmem [shape: bf16[2,128,128], index: 3, kind: input, shape index: {}]   ;;  %s12997_s4 = inlined_call_operand.vmem [shape: f32[2,1,128], index: 4, kind: input, shape index: {}]   ;;  %s12998_s5 = inlined_call_operand.vmem [shape: f32[2,1,128], index: 5, kind: input, shape index: {}]   ;;  %s12999_s6 = inlined_call_operand.vmem [shape: f32[2,1,128], index: 6, kind: input, shape index: {}]   ;;  %s13000_s7 = inlined_call_operand.vmem [shape: bf16[2,128,512], index: 7, kind: input, shape index: {}]   ;;  %s13001_s8 = inlined_call_operand.vmem [shape: f32[2,1,512], index: 8, kind: input, shape index: {}]   ;;  %s13002_s9 = inlined_call_operand.vmem [shape: bf16[2,512,128], index: 9, kind: input, shape index: {}]   ;;  %s13003_s10 = inlined_call_operand.vmem [shape: f32[2,1,128], index: 10, kind: input, shape index: {}]   ;;  %s13004_s11 = inlined_call_operand.vmem [shape: f32[2,1,128], index: 11, kind: input, shape index: {}]   ;;  %s13005_s12 = inlined_call_operand.vmem [shape: f32[2,1,128], index: 12, kind: input, shape index: {}]   ;;  %s13006_s13 = inlined_call_operand.vmem [shape: bf16[128,256], index: 13, kind: input, shape index: {}]   ;;  %s13007_s14 = inlined_call_operand.vmem [shape: f32[128,256], index: 14, kind: output, shape index: {}]  }
   0x1 LB: > { %s7702_s30 = sadd.s32 4294967295, %s9523_s29   ;;  %p7706_p0 = scmp.ge.s32.totalorder %s9523_s29, 1  ;;  %s9523_s29 = sphi %s9604_s29, %s24_s29  }
   0x2   : > { %p413_p1 = scmp.lt.s32.totalorder %s9523_s29, 3 }
   0x4   : > { %p414_p2 = pnand %p7706_p0, %p413_p1 }
   0x6   : > { %417 = sbr.rel (%p414_p2) target bundleno = 6981 (0x1b45), region = 76 }
   0xb   : > { %v7798_v0 = vld [vmem:[%s12994_s1 + $0xa8] sm:$0xf]  ;;  %v8849_v1 = vld [vmem:[%s12994_s1 + $0xb0] sm:$0xf0]  ;;  %v8848_v2 = vld [vmem:[%s12994_s1 + $0xac] sm:$0xf] }
   0xc   : > { %v7799_v3 = vor.u32 %v8849_v1, %v7798_v0  ;;  %v7800_v4 = vld [vmem:[%s12994_s1 + $0xb4] sm:$0xf0]  ;;  %v7786_v5 = vld [vmem:[%s12994_s1 + $0x90] sm:$0xf]  ;;  %v8846_v6 = vld [vmem:[%s12994_s1 + $0x98] sm:$0xf0] }
   0xd   : > { %v7803_v7 = vor.u32 %v8848_v2, %v7800_v4  ;;  %v8845_v8 = vld [vmem:[%s12994_s1 + $0x94] sm:$0xf]  ;;  %v7788_v9 = vld [vmem:[%s12994_s1 + $0x9c] sm:$0xf0]  ;;  %v7787_v10 = vor.u32 %v8846_v6, %v7786_v5  ;;  %v7774_v12 = vld [vmem:[%s12994_s1 + $0x78] sm:$0xf] }
   0xe   : > { %773 = vmatpush.bf16.msra.mxu0 %v7799_v3  ;;  %v7791_v11 = vor.u32 %v8845_v8, %v7788_v9  ;;  %v8843_v13 = vld [vmem:[%s12994_s1 + $0x80] sm:$0xf0]  ;;  %v8842_v14 = vld [vmem:[%s12994_s1 + $0x7c] sm:$0xf]  ;;  %v7776_v15 = vld [vmem:[%s12994_s1 + $0x84] sm:$0xf0] }
   0xf   : > { %802 = vmatpush.bf16.msra.mxu1 %v7803_v7  ;;  %v7775_v16 = vor.u32 %v8843_v13, %v7774_v12  ;;  %v7779_v17 = vor.u32 %v8842_v14, %v7776_v15  ;;  %v7762_v18 = vld [vmem:[%s12994_s1 + $0x60] sm:$0xf]  ;;  %v8840_v19 = vld [vmem:[%s12994_s1 + $0x68] sm:$0xf0]  ;;  %v8839_v20 = vld [vmem:[%s12994_s1 + $0x64] sm:$0xf] }
  0x10   : > { %v7764_v21 = vld [vmem:[%s12994_s1 + $0x6c] sm:$0xf0]  ;;  %v7750_v22 = vld [vmem:[%s12994_s1 + $0x48] sm:$0xf]  ;;  %v8837_v23 = vld [vmem:[%s12994_s1 + $0x50] sm:$0xf0]  ;;  %v7763_v24 = vor.u32 %v8840_v19, %v7762_v18 }
  0x11   : > { %s7707_s23 = sshll.u32 %s7702_s30, 3  ;;  %v8836_v25 = vld [vmem:[%s12994_s1 + $0x4c] sm:$0xf]  ;;  %v7752_v26 = vld [vmem:[%s12994_s1 + $0x54] sm:$0xf0]  ;;  %v7767_v27 = vor.u32 %v8839_v20, %v7764_v21  ;;  %v7751_v28 = vor.u32 %v8837_v23, %v7750_v22  ;;  %vm884_vm0 = vcmask 261120  }
  0x12   : > { %774 = vmatpush.bf16.msra.mxu0 %v7787_v10  ;;  %p461_p3 = scmp.lt.s32.totalorder %s7707_s23, 15  ;;  %v7755_v29 = vor.u32 %v8836_v25, %v7752_v26  ;;  %v7738_v30 = vld [vmem:[%s12994_s1 + $0x30] sm:$0xf]  ;;  %v8834_v31 = vld [vmem:[%s12994_s1 + $0x38] sm:$0xf0]  ;;  %vm1045_vm1 = vcmask 64512  }
  0x13   : > { %803 = vmatpush.bf16.msra.mxu1 %v7791_v11  ;;  %v8833_v32 = vld [vmem:[%s12994_s1 + $0x34] sm:$0xf]  ;;  %v7740_v33 = vld [vmem:[%s12994_s1 + $0x3c] sm:$0xf0]  ;;  %v7739_v34 = vor.u32 %v8834_v31, %v7738_v30  ;;  %v7726_v36 = vld [vmem:[%s12994_s1 + $0x18] sm:$0xf] }
  0x14   : > { %s13045_s23 = smov (!%p461_p3, %s7707_s23), 15  ;;  %v7743_v35 = vor.u32 %v8833_v32, %v7740_v33  ;;  %v8831_v37 = vld [vmem:[%s12994_s1 + $0x20] sm:$0xf0]  ;;  %v8830_v38 = vld [vmem:[%s12994_s1 + $0x1c] sm:$0xf]  ;;  %vm1145_vm2 = vcmask 1043456  }
  0x15   : > { %v7728_v39 = vld [vmem:[%s12994_s1 + $0x24] sm:$0xf0]  ;;  %s7708_s30 = sshll.u32 %s13045_s23, 3  ;;  %v7727_v40 = vor.u32 %v8831_v37, %v7726_v36  ;;  %v7714_v42 = vld [vmem:[%s12994_s1] sm:$0xf]  ;;  %s9526_s26 = smov 64  }
  0x16   : > { %775 = vmatpush.bf16.msra.mxu0 %v7775_v16  ;;  %v7731_v41 = vor.u32 %v8830_v38, %v7728_v39  ;;  %v8828_v43 = vld [vmem:[%s12994_s1 + $0x8] sm:$0xf0]  ;;  %s9710_s22 = scalar_lea.vmem %s12993_s0, %s7708_s30  ;;  %v8827_v44 = vld [vmem:[%s12994_s1 + $0x4] sm:$0xf]  ;;  %v7716_v45 = vld [vmem:[%s12994_s1 + $0xc] sm:$0xf0] }
  0x17   : > { %804 = vmatpush.bf16.msra.mxu1 %v7779_v17  ;;  %v7715_v46 = vor.u32 %v8828_v43, %v7714_v42  ;;  %v474_v47 = vld [vmem:[%s9710_s22] sm:$0xff]  ;;  %v475_v48 = vld [vmem:[%s9710_s22 + $0x8] sm:$0xff]  ;;  %v7719_v49 = vor.u32 %v8827_v44, %v7716_v45  ;;  %v476_v51 = vld [vmem:[%s9710_s22 + $0x10] sm:$0xff]  ;;  %s9525_s30 = smov 96   ;;  %s9527_s27 = smov 32   ;;  %vm2839_vm3 = vcmask 523264  }
  0x18   : > { %v9720_v50 = vpack.c.bf16 %v475_v48, %v474_v47  ;;  %v477_v52 = vld [vmem:[%s9710_s22 + $0x18] sm:$0xff]  ;;  %v478_v54 = vld [vmem:[%s9710_s22 + $0x20] sm:$0xff]  ;;  %v479_v55 = vld [vmem:[%s9710_s22 + $0x28] sm:$0xff]  ;;  %vm2848_vm4 = vcmask 785408  }
  0x19   : > { %v9726_v53 = vpack.c.bf16 %v477_v52, %v476_v51  ;;  %v9732_v56 = vpack.c.bf16 %v479_v55, %v478_v54  ;;  %v480_v57 = vld [vmem:[%s9710_s22 + $0x30] sm:$0xff]  ;;  %v481_v58 = vld [vmem:[%s9710_s22 + $0x38] sm:$0xff]  ;;  %v9745_v60 = vld [vmem:[%s12995_s2] sm:$0x7] }
  0x1a   : > { %776 = vmatpush.bf16.msra.mxu0 %v7763_v24  ;;  %v9738_v59 = vpack.c.bf16 %v481_v58, %v480_v57  ;;  %v9748_v61 = vperm.slane %v9745_v60, 0  ;;  %v9751_v62 = vperm.slane %v9745_v60, 1 }
  0x1b   : > { %805 = vmatpush.bf16.msra.mxu1 %v7767_v27 }
  0x1e   : > { %777 = vmatpush.bf16.msra.mxu0 %v7751_v28 }
  0x1f   : > { %806 = vmatpush.bf16.msra.mxu1 %v7755_v29 }
  0x22   : > { %778 = vmatpush.bf16.msra.mxu0 %v7739_v34 }
  0x23   : > { %807 = vmatpush.bf16.msra.mxu1 %v7743_v35 }
  0x26   : > { %779 = vmatpush.bf16.msra.mxu0 %v7727_v40 }
  0x27   : > { %808 = vmatpush.bf16.msra.mxu1 %v7731_v41 }
  0x2a   : > { %780 = vmatpush.bf16.msra.mxu0 %v7715_v46 }
  0x2b   : > { %809 = vmatpush.bf16.msra.mxu1 %v7719_v49 }
  0x2d   : > { %781 = vmatmul.bf16.vlgmr.msra.gmra.mxu0 %v9720_v50 }
  0x2e   : > { %810 = vmatmul.bf16.vlgmr.msra.gmra.mxu1 %v9720_v50 }
  0x3d   : > { %786 = vmatmul.bf16.gmra.mxu0 %v9726_v53 }
  0x3e   : > { %815 = vmatmul.bf16.gmra.mxu1 %v9726_v53 }
  0x4d   : > { %791 = vmatmul.bf16.gmra.mxu0 %v9732_v56 }
  0x4e   : > { %820 = vmatmul.bf16.gmra.mxu1 %v9732_v56 }
  0x5d   : > { %796 = vmatmul.bf16.gmra.mxu0 %v9738_v59 }
  0x5e   : > { %825 = vmatmul.bf16.gmra.mxu1 %v9738_v59 }
  0xaa   : > { %v782_v63 = vpop.f32.mrf.mxu0 }
  0xab   : > { %v783_v0 = vadd.f32 %v782_v63, %v9748_v61  ;;  %v811_v1 = vpop.f32.mrf.mxu1 }
  0xac   : > { %v812_v2 = vadd.f32 %v811_v1, %v9751_v62 }
  0xad   : > { %v860_v3 = vpack.c.bf16 %v783_v0, %v783_v0 }
  0xae   : > { %v868_v4 = vpack.c.bf16 %v812_v2, %v812_v2 }
  0xaf   : > { %v1296_v5 = vunpack.c.l.b16 %v860_v3 }
  0xb0   : > { %v1301_v6 = vunpack.c.l.b16 %v868_v4  ;;  %v889_v7 = vsel %vm884_vm0, %v868_v4, 0 }
  0xb1   : > { %v9756_v8 = vpack.c.b16 %v1296_v5, %v1296_v5  ;;  %898 = vmatpush.bf16.xpose.msrb.mxu0 %v889_v7 }
  0xb2   : > { %v9758_v9 = vpack.c.b16 %v1301_v6, %v1301_v6  ;;  %v784_v10 = vpop.f32.mrf.mxu0 }
  0xb3   : > { %v813_v11 = vpop.f32.mrf.mxu1  ;;  %1298 = vrot.lane.b32.xlu2 %v9756_v8, %s9525_s30  ;;  %v785_v16 = vadd.f32 %v784_v10, %v9748_v61 }
  0xb4   : > { %v814_v12 = vadd.f32 %v813_v11, %v9751_v62  ;;  %1303 = vrot.lane.b32.xlu0 %v9758_v9, %s9525_s30 }
  0xb5   : > { %v9773_v21 = vpack.c.bf16 %v785_v16, %v785_v16  ;;  %v8847_v16 = vld [vmem:[%s12994_s1 + $0xa0] sm:$0xf0] }
  0xb6   : > { %v869_v13 = vpack.c.bf16 %v814_v12, %v814_v12  ;;  %v7806_v12 = vld [vmem:[%s12994_s1 + $0xb0] sm:$0xf] }
  0xb8   : > { %7808 = vmatmul.msk.bf16.vlgmr.msrb.gmra.mxu0 %vm884_vm0, %v860_v3  ;;  %v908_v14 = vsel %vm884_vm0, %v869_v13, 0  ;;  %v1330_v15 = vunpack.c.l.b16 %v869_v13  ;;  %v8850_v13 = vld [vmem:[%s12994_s1 + $0xb8] sm:$0xf0] }
  0xb9   : > { %917 = vmatpush.bf16.xpose.msra.mxu3 %v908_v14  ;;  %v7807_v14 = vor.u32 %v8850_v13, %v7806_v12 }
  0xba   : > { %v9768_v17 = vpack.c.b16 %v1330_v15, %v1330_v15  ;;  %v787_v18 = vpop.f32.mrf.mxu0  ;;  %v7794_v15 = vld [vmem:[%s12994_s1 + $0x98] sm:$0xf] }
  0xbb   : > { %v816_v19 = vpop.f32.mrf.mxu1  ;;  %v788_v28 = vadd.f32 %v787_v18, %v9748_v61  ;;  %831 = vmatpush.bf16.msra.mxu2 %v7807_v14  ;;  %v7795_v18 = vor.u32 %v8847_v16, %v7794_v15 }
  0xbc   : > { %v817_v20 = vadd.f32 %v816_v19, %v9751_v62  ;;  %1332 = vrot.lane.b32.xlu1 %v9768_v17, %s9525_s30 }
  0xbd   : > { %v9787_v32 = vpack.c.bf16 %v788_v28, %v788_v28 }
  0xbe   : > { %v9775_v22 = vpack.c.bf16 %v817_v20, %v817_v20 }
  0xbf   : > { %832 = vmatpush.bf16.msra.mxu2 %v7795_v18 }
  0xc0   : > { %7809 = vmatmul.msk.bf16.vlgmr.msra.gmra.mxu3 %vm884_vm0, %v9773_v21  ;;  %v927_v23 = vsel %vm884_vm0, %v9775_v22, 0 }
  0xc1   : > { %936 = vmatpush.bf16.xpose.msrb.mxu3 %v927_v23  ;;  %v7782_v23 = vld [vmem:[%s12994_s1 + $0x80] sm:$0xf] }
  0xc2   : > { %v789_v24 = vpop.f32.mrf.mxu0 }
  0xc3   : > { %v818_v25 = vpop.f32.mrf.mxu1  ;;  %v790_v39 = vadd.f32 %v789_v24, %v9748_v61  ;;  %v8844_v24 = vld [vmem:[%s12994_s1 + $0x88] sm:$0xf0] }
  0xc4   : > { %v819_v26 = vadd.f32 %v818_v25, %v9751_v62  ;;  %v1325_v25 = vunpack.c.l.b16 %v9773_v21  ;;  %v7758_v21 = vld [vmem:[%s12994_s1 + $0x50] sm:$0xf] }
  0xc5   : > { %v9801_v44 = vpack.c.bf16 %v790_v39, %v790_v39  ;;  %v8835_v39 = vld [vmem:[%s12994_s1 + $0x40] sm:$0xf0] }
  0xc6   : > { %v9782_v27 = vpack.c.bf16 %v819_v26, %v819_v26  ;;  %v7783_v26 = vor.u32 %v8844_v24, %v7782_v23 }
  0xc8   : > { %v946_v29 = vsel %vm884_vm0, %v9782_v27, 0  ;;  %833 = vmatpush.bf16.msra.mxu2 %v7783_v26 }
  0xc9   : > { %955 = vmatpush.bf16.xpose.msra.mxu3 %v946_v29  ;;  %v7770_v29 = vld [vmem:[%s12994_s1 + $0x68] sm:$0xf] }
  0xca   : > { %v792_v30 = vpop.f32.mrf.mxu0 }
  0xcb   : > { %v821_v31 = vpop.f32.mrf.mxu1  ;;  %v793_v57 = vadd.f32 %v792_v30, %v9748_v61  ;;  %v8841_v30 = vld [vmem:[%s12994_s1 + $0x70] sm:$0xf0] }
  0xcc   : > { %v822_v33 = vadd.f32 %v821_v31, %v9751_v62  ;;  %v7771_v31 = vor.u32 %v8841_v30, %v7770_v29 }
  0xcd   : > { %v9823_v0 = vpack.c.bf16 %v793_v57, %v793_v57  ;;  %v8829_v57 = vld [vmem:[%s12994_s1 + $0x10] sm:$0xf0] }
  0xce   : > { %v9790_v34 = vpack.c.bf16 %v822_v33, %v822_v33  ;;  %v9873_v33 = vpack.c.b16 %v1325_v25, %v1325_v25  ;;  %834 = vmatpush.bf16.msra.mxu2 %v7771_v31 }
  0xd0   : > { %7810 = vmatmul.msk.bf16.vlgmr.msrb.gmra.mxu3 %vm884_vm0, %v9787_v32  ;;  %v965_v35 = vsel %vm884_vm0, %v9790_v34, 0 }
  0xd1   : > { %974 = vmatpush.bf16.xpose.msrb.mxu3 %v965_v35 }
  0xd2   : > { %v794_v37 = vpop.f32.mrf.mxu0 }
  0xd3   : > { %v823_v36 = vpop.f32.mrf.mxu1 }
  0xd4   : > { %v824_v38 = vadd.f32 %v823_v36, %v9751_v62  ;;  %v8838_v36 = vld [vmem:[%s12994_s1 + $0x58] sm:$0xf0] }
  0xd6   : > { %v9798_v40 = vpack.c.bf16 %v824_v38, %v824_v38  ;;  %v7746_v38 = vld [vmem:[%s12994_s1 + $0x38] sm:$0xf] }
  0xd8   : > { %v984_v46 = vsel %vm884_vm0, %v9798_v40, 0 }
  0xda   : > { %v797_v43 = vpop.f32.mrf.mxu0 }
  0xdb   : > { %v826_v41 = vpop.f32.mrf.mxu1  ;;  %v798_v48 = vadd.f32 %v797_v43, %v9748_v61 }
  0xdc   : > { %v827_v42 = vadd.f32 %v826_v41, %v9751_v62  ;;  %v7747_v41 = vor.u32 %v8835_v39, %v7746_v38 }
  0xdd   : > { %v9812_v51 = vpack.c.bf16 %v798_v48, %v798_v48 }
  0xde   : > { %v9803_v45 = vpack.c.bf16 %v827_v42, %v827_v42 }
  0xe0   : > { %7811 = vmatmul.msk.bf16.vlgmr.msra.gmra.mxu3 %vm884_vm0, %v9801_v44  ;;  %v1003_v47 = vsel %vm884_vm0, %v9803_v45, 0 }
  0xe1   : > { %1012 = vmatpush.bf16.xpose.msra.mxu0 %v1003_v47  ;;  %993 = vmatpush.bf16.xpose.msra.mxu3 %v984_v46  ;;  %v7734_v46 = vld [vmem:[%s12994_s1 + $0x20] sm:$0xf]  ;;  %v8832_v47 = vld [vmem:[%s12994_s1 + $0x28] sm:$0xf0] }
  0xe2   : > { %v799_v54 = vpop.f32.mrf.mxu0 }
  0xe3   : > { %v828_v49 = vpop.f32.mrf.mxu1  ;;  %v800_v63 = vadd.f32 %v799_v54, %v9748_v61  ;;  %v7722_v54 = vld [vmem:[%s12994_s1 + $0x8] sm:$0xf] }
  0xe4   : > { %v829_v52 = vadd.f32 %v828_v49, %v9751_v62  ;;  %v795_v62 = vadd.f32 %v794_v37, %v9748_v61  ;;  %v7759_v37 = vor.u32 %v8838_v36, %v7758_v21  ;;  %v7735_v49 = vor.u32 %v8832_v47, %v7734_v46 }
  0xe5   : > { %v9825_v1 = vpack.c.bf16 %v800_v63, %v800_v63  ;;  %v7723_v63 = vor.u32 %v8829_v57, %v7722_v54 }
  0xe6   : > { %v9815_v55 = vpack.c.bf16 %v829_v52, %v829_v52  ;;  %v9832_v2 = vpack.c.bf16 %v795_v62, %v795_v62  ;;  %835 = vmatpush.bf16.msra.mxu2 %v7759_v37 }
  0xe8   : > { %7814 = vmatmul.msk.bf16.vlgmr.msra.gmra.mxu0 %vm884_vm0, %v9812_v51  ;;  %v1022_v58 = vsel %vm884_vm0, %v9815_v55, 0 }
  0xe9   : > { %1031 = vmatpush.bf16.xpose.msrb.mxu1 %v1022_v58 }
  0xea   : > { %836 = vmatpush.bf16.msra.mxu2 %v7747_v41 }
  0xee   : > { %837 = vmatpush.bf16.msra.mxu2 %v7735_v49 }
  0xf0   : > { %7812 = vmatmul.msk.bf16.vlgmr.msrb.gmra.mxu3 %vm884_vm0, %v9823_v0  ;;  %7815 = vmatmul.msk.bf16.vlgmr.msrb.gmra.mxu1 %vm884_vm0, %v9825_v1 }
  0xf2   : > { %838 = vmatpush.bf16.msra.mxu2 %v7723_v63 }
  0xf5   : > { %839 = vmatmul.bf16.vlgmr.msra.gmra.mxu2 %v9720_v50 }
 0x100   : > { %7813 = vmatmul.msk.bf16.vlgmr.msra.gmra.mxu3 %vm884_vm0, %v9832_v2 }
 0x105   : > { %844 = vmatmul.bf16.gmra.mxu2 %v9726_v53 }
 0x115   : > { %849 = vmatmul.bf16.gmra.mxu2 %v9732_v56  ;;  %v9927_v56 = vpop.permute.xlu2 %1298 }
 0x125   : > { %854 = vmatmul.bf16.gmra.mxu2 %v9738_v59 }
 0x126   : > { %v9919_v23 = vpop.permute.xlu0 %1303 }
 0x12e   : > { %v9944_v46 = vpop.permute.xlu1 %1332 }
 0x135   : > { %v900_v3 = vpop.f32.mrf.mxu0 }
 0x136   : > { %v9836_v4 = vmul.f32 0.17677669, %v900_v3 }
 0x138   : > { %v1046_v5 = vsel %vm1045_vm1, %v9836_v4, -inf }
 0x139   : > { %1047 = vmax.xlane.f32.xlu0 %v1046_v5 }
 0x13d   : > { %v902_v6 = vpop.f32.mrf.mxu0 }
 0x143   : > { %v919_v7 = vpop.f32.mrf.mxu3 }
 0x144   : > { %v9840_v10 = vmul.f32 0.17677669, %v919_v7 }
 0x146   : > { %v1049_v61 = vsel %vm1045_vm1, %v9840_v10, -inf }
 0x147   : > { %1050 = vmax.xlane.f32.xlu0 %v1049_v61 }
 0x14b   : > { %v921_v11 = vpop.f32.mrf.mxu3 }
 0x153   : > { %v938_v19 = vpop.f32.mrf.mxu3 }
 0x154   : > { %v9856_v20 = vmul.f32 0.17677669, %v938_v19 }
 0x156   : > { %v1052_v28 = vsel %vm1045_vm1, %v9856_v20, -inf }
 0x157   : > { %1053 = vmax.xlane.f32.xlu2 %v1052_v28 }
 0x15b   : > { %v940_v35 = vpop.f32.mrf.mxu3  ;;  %1327 = vrot.lane.b32.xlu0 %v9873_v33, %s9525_s30 }
 0x15c   : > { %v1446_v35 = vunpack.c.l.b16 %v9798_v40 }
 0x15e   : > { %v9935_v37 = vpack.c.b16 %v1446_v35, %v1446_v35 }
 0x163   : > { %v957_v42 = vpop.f32.mrf.mxu3 }
 0x164   : > { %v9889_v43 = vmul.f32 0.17677669, %v957_v42 }
 0x165   : > { %v1014_v48 = vpop.f32.mrf.mxu0 }
 0x166   : > { %v1055_v52 = vsel %vm1045_vm1, %v9889_v43, -inf  ;;  %v9905_v58 = vmul.f32 0.17677669, %v1014_v48 }
 0x167   : > { %1056 = vmax.xlane.f32.xlu2 %v1055_v52 }
 0x168   : > { %v1064_v3 = vsel %vm1045_vm1, %v9905_v58, -inf }
 0x16b   : > { %v959_v62 = vpop.f32.mrf.mxu3 }
 0x16d   : > { %v1033_v5 = vpop.f32.mrf.mxu1  ;;  %v1016_v6 = vpop.f32.mrf.mxu0 }
 0x16e   : > { %v1044_v14 = vmul.f32 0.17677669, %v1033_v5 }
 0x16f   : > { %1065 = vmax.xlane.f32.xlu2 %v1064_v3  ;;  %v1412_v3 = vunpack.c.l.b16 %v9823_v0 }
 0x170   : > { %v1067_v15 = vsel %vm1045_vm1, %v1044_v14, -inf }
 0x173   : > { %v976_v7 = vpop.f32.mrf.mxu3 }
 0x174   : > { %v1041_v61 = vmul.f32 0.17677669, %v976_v7 }
 0x175   : > { %v1035_v11 = vpop.f32.mrf.mxu1 }
 0x176   : > { %v1058_v12 = vsel %vm1045_vm1, %v1041_v61, -inf  ;;  %v9957_v11 = vpack.c.b16 %v1412_v3, %v1412_v3 }
 0x177   : > { %1059 = vmax.xlane.f32.xlu1 %v1058_v12 }
 0x178   : > { %v840_v57 = vpop.f32.mrf.mxu2 }
 0x17b   : > { %v978_v13 = vpop.f32.mrf.mxu3 }
 0x180   : > { %v842_v6 = vpop.f32.mrf.mxu2 }
 0x183   : > { %v995_v16 = vpop.f32.mrf.mxu3 }
 0x184   : > { %v9913_v18 = vmul.f32 0.17677669, %v995_v16 }
 0x185   : > { %1068 = vmax.xlane.f32.xlu0 %v1067_v15 }
 0x186   : > { %v1061_v50 = vsel %vm1045_vm1, %v9913_v18, -inf }
 0x187   : > { %1062 = vmax.xlane.f32.xlu1 %v1061_v50 }
 0x188   : > { %v845_v12 = vpop.f32.mrf.mxu2 }
 0x18b   : > { %v997_v19 = vpop.f32.mrf.mxu3 }
 0x190   : > { %v847_v19 = vpop.f32.mrf.mxu2 }
 0x1ac   : > { %v1048_v24 = vpop.xlane.xlu0 %1047 }
 0x1ad   : > { %v1070_v53 = vsub.f32 %v9836_v4, %v1048_v24  ;;  %v1417_v24 = vunpack.c.l.b16 %v9790_v34 }
 0x1af   : > { %v1078_v25 = vmul.f32 1.442695, %v1070_v53 }
 0x1b1   : > { %9187 = vpow2.f32 %v1078_v25  ;;  %v9979_v25 = vpack.c.b16 %v1417_v24, %v1417_v24 }
 0x1b7   : > { %v9922_v26 = vpop.eup %9187 }
 0x1b8   : > { %v1094_v28 = vsel %vm1045_vm1, %v9922_v26, 0.0 }
 0x1b9   : > { %1095 = vadd.xlane.f32.xlu0 %v1094_v28  ;;  %v850_v28 = vpop.f32.mrf.mxu2 }
 0x1ba   : > { %v1051_v29 = vpop.xlane.xlu0 %1050 }
 0x1bb   : > { %v1071_v30 = vsub.f32 %v9840_v10, %v1051_v29 }
 0x1bd   : > { %v1080_v31 = vmul.f32 1.442695, %v1071_v30  ;;  %v1475_v30 = vunpack.c.l.b16 %v9803_v45 }
 0x1bf   : > { %9189 = vpow2.f32 %v1080_v31 }
 0x1c1   : > { %v852_v45 = vpop.f32.mrf.mxu2 }
 0x1c5   : > { %v9929_v59 = vpop.eup %9189 }
 0x1c6   : > { %v1097_v4 = vsel %vm1045_vm1, %v9929_v59, 0.0 }
 0x1c7   : > { %1098 = vadd.xlane.f32.xlu1 %v1097_v4 }
 0x1ca   : > { %v1054_v21 = vpop.xlane.xlu2 %1053 }
 0x1cb   : > { %v1072_v36 = vsub.f32 %v9856_v20, %v1054_v21  ;;  %v9990_v21 = vpack.c.b16 %v1475_v30, %v1475_v30 }
 0x1cd   : > { %v1082_v38 = vmul.f32 1.442695, %v1072_v36  ;;  %1448 = vrot.lane.b32.xlu0 %v9935_v37, %s9525_s30  ;;  %v9950_v54 = vpop.permute.xlu0 %1327 }
 0x1cf   : > { %9191 = vpow2.f32 %v1082_v38 }
 0x1d5   : > { %v9939_v10 = vpop.eup %9191 }
 0x1d6   : > { %v1100_v39 = vsel %vm1045_vm1, %v9939_v10, 0.0 }
 0x1d7   : > { %1101 = vadd.xlane.f32.xlu2 %v1100_v39 }
 0x1da   : > { %v1057_v41 = vpop.xlane.xlu2 %1056 }
 0x1db   : > { %v1073_v40 = vsub.f32 %v9889_v43, %v1057_v41 }
 0x1dd   : > { %v1084_v42 = vmul.f32 1.442695, %v1073_v40 }
 0x1df   : > { %9193 = vpow2.f32 %v1084_v42 }
 0x1e5   : > { %v9946_v20 = vpop.eup %9193 }
 0x1e6   : > { %v1103_v47 = vsel %vm1045_vm1, %v9946_v20, 0.0 }
 0x1e7   : > { %1104 = vadd.xlane.f32.xlu2 %v1103_v47  ;;  %v1066_v47 = vpop.xlane.xlu2 %1065 }
 0x1ea   : > { %v1060_v48 = vpop.xlane.xlu1 %1059 }
 0x1eb   : > { %v1074_v49 = vsub.f32 %v1041_v61, %v1060_v48  ;;  %v9962_v61 = vperm.slane %v9745_v60, 2 }
 0x1ed   : > { %v1086_v52 = vmul.f32 1.442695, %v1074_v49  ;;  %v846_v13 = vadd.f32 %v845_v12, %v9962_v61  ;;  %v841_v16 = vadd.f32 %v840_v57, %v9962_v61  ;;  %v851_v29 = vadd.f32 %v850_v28, %v9962_v61 }
 0x1ee   : > { %v843_v38 = vadd.f32 %v842_v6, %v9962_v61  ;;  %v853_v41 = vadd.f32 %v852_v45, %v9962_v61  ;;  %v1441_v12 = vunpack.c.l.b16 %v9832_v2 }
 0x1ef   : > { %9195 = vpow2.f32 %v1086_v52  ;;  %v9974_v60 = vpack.c.bf16 %v841_v16, %v841_v16  ;;  %v9985_v4 = vpack.c.bf16 %v851_v29, %v851_v29  ;;  %v1076_v52 = vsub.f32 %v9905_v58, %v1066_v47 }
 0x1f0   : > { %v9995_v39 = vpack.c.bf16 %v843_v38, %v843_v38  ;;  %v10000_v40 = vpack.c.bf16 %v853_v41, %v853_v41  ;;  %v855_v38 = vpop.f32.mrf.mxu2 }
 0x1f1   : > { %v1147_v53 = vsel %vm1145_vm2, %v9974_v60, 0  ;;  %v1223_v34 = vsel %vm1145_vm2, %v9985_v4, 0  ;;  %v1090_v57 = vmul.f32 1.442695, %v1076_v52 }
 0x1f2   : > { %1156 = vmatpush.bf16.msrb.mxu2 %v1147_v53  ;;  %v1242_v48 = vsel %vm1145_vm2, %v10000_v40, 0 }
 0x1f5   : > { %v9952_v63 = vpop.eup %9195 }
 0x1f6   : > { %v1106_v43 = vsel %vm1045_vm1, %v9952_v63, 0.0  ;;  %1232 = vmatpush.bf16.msra.mxu2 %v1223_v34 }
 0x1f7   : > { %1107 = vadd.xlane.f32.xlu1 %v1106_v43 }
 0x1f8   : > { %v1069_v62 = vpop.xlane.xlu0 %1068  ;;  %v857_v47 = vpop.f32.mrf.mxu2 }
 0x1f9   : > { %v1077_v5 = vsub.f32 %v1044_v14, %v1069_v62  ;;  %v9969_v14 = vpack.c.bf16 %v846_v13, %v846_v13 }
 0x1fa   : > { %v1063_v31 = vpop.xlane.xlu1 %1062 }
 0x1fb   : > { %v1092_v7 = vmul.f32 1.442695, %v1077_v5  ;;  %v1185_v50 = vsel %vm1145_vm2, %v9969_v14, 0  ;;  %v1075_v35 = vsub.f32 %v9913_v18, %v1063_v31  ;;  %v1166_v18 = vsel %vm1145_vm2, %v9995_v39, 0 }
 0x1fc   : > { %1194 = vmatpush.bf16.msrb.mxu0 %v1185_v50  ;;  %1175 = vmatpush.bf16.msrb.mxu3 %v1166_v18  ;;  %v1359_v50 = vunpack.c.l.b16 %v9775_v22  ;;  %v1388_v22 = vunpack.c.l.b16 %v9782_v27 }
 0x1fd   : > { %9197 = vpow2.f32 %v1092_v7  ;;  %v1088_v36 = vmul.f32 1.442695, %v1075_v35  ;;  %v1309_v7 = vsel %vm884_vm0, %v9919_v23, 0 }
 0x1fe   : > { %v10029_v28 = vpack.c.b16 %v1359_v50, %v1359_v50  ;;  %v10038_v30 = vpack.c.b16 %v1388_v22, %v1388_v22 }
 0x1ff   : > { %1414 = vrot.lane.b32.xlu2 %v9957_v11, %s9525_s30  ;;  %9199 = vpow2.f32 %v1088_v36  ;;  %v1632_v36 = vunpack.c.l.b16 %v9974_v60 }
 0x200   : > { %1251 = vmatpush.bf16.msra.mxu3 %v1242_v48  ;;  %v858_v48 = vadd.f32 %v857_v47, %v9962_v61 }
 0x201   : > { %v10053_v41 = vpack.c.b16 %v1632_v36, %v1632_v36 }
 0x202   : > { %v10067_v52 = vpack.c.bf16 %v858_v48, %v858_v48 }
 0x203   : > { %v9965_v15 = vpop.eup %9197 }
 0x204   : > { %v1115_v0 = vsel %vm1045_vm1, %v9965_v15, 0.0 }
 0x205   : > { %1116 = vadd.xlane.f32.xlu0 %v1115_v0  ;;  %v10002_v42 = vpop.eup %9199  ;;  %v848_v0 = vadd.f32 %v847_v19, %v9962_v61  ;;  %v1338_v19 = vsel %vm884_vm0, %v9944_v46, 0  ;;  %v1354_v46 = vunpack.c.l.b16 %v9787_v32 }
 0x206   : > { %v1109_v49 = vsel %vm1045_vm1, %v10002_v42, 0.0 }
 0x207   : > { %v10021_v16 = vpack.c.bf16 %v848_v0, %v848_v0  ;;  %v10050_v45 = vpack.c.b16 %v1354_v46, %v1354_v46 }
 0x209   : > { %v1204_v2 = vsel %vm1145_vm2, %v10021_v16, 0 }
 0x20a   : > { %1213 = vmatpush.bf16.msra.mxu1 %v1204_v2 }
 0x210   : > { %1419 = vrot.lane.b32.xlu1 %v9979_v25, %s9525_s30 }
 0x219   : > { %1477 = vrot.lane.b32.xlu0 %v9990_v21, %s9525_s30 }
 0x228   : > { %1110 = vadd.xlane.f32.xlu2 %v1109_v49 }
 0x22c   : > { %v1096_v43 = vpop.xlane.xlu0 %1095 }
 0x22d   : > { %9201 = vrcp.f32 %v1096_v43  ;;  %v1470_v43 = vunpack.c.l.b16 %v9812_v51 }
 0x22e   : > { %9203 = vpow2.f32 %v1090_v57 }
 0x233   : > { %v9202_v62 = vpop.eup %9201 }
 0x234   : > { %v1126_v3 = vmul.f32 %v9202_v62, %v9922_v26  ;;  %v10010_v5 = vpop.eup %9203  ;;  %v10019_v26 = vpack.c.b16 %v1441_v12, %v1441_v12 }
 0x235   : > { %v1112_v58 = vsel %vm1045_vm1, %v10010_v5, 0.0 }
 0x236   : > { %v1134_v6 = vpack.c.bf16 %v1126_v3, %v1126_v3 }
 0x238   : > { %7816 = vmatmul.msk.bf16.vlgmr.msrb.gmra.mxu2 %vm1045_vm1, %v1134_v6  ;;  %v10075_v6 = vpack.c.b16 %v1470_v43, %v1470_v43 }
 0x239   : > { %1318 = vmatpush.bf16.xpose.msrb.mxu2 %v1309_v7 }
 0x23a   : > { %v1099_v13 = vpop.xlane.xlu1 %1098  ;;  %1113 = vadd.xlane.f32.xlu1 %v1112_v58 }
 0x23b   : > { %9205 = vrcp.f32 %v1099_v13 }
 0x23f   : > { %v1449_v12 = vpop.permute.xlu0 %1448 }
 0x240   : > { %1443 = vrot.lane.b32.xlu2 %v10019_v26, %s9525_s30 }
 0x241   : > { %v9206_v23 = vpop.eup %9205 }
 0x242   : > { %v1127_v24 = vmul.f32 %v9206_v23, %v9929_v59  ;;  %v1383_v59 = vunpack.c.l.b16 %v9801_v44  ;;  %v856_v44 = vadd.f32 %v855_v38, %v9962_v61  ;;  %v1499_v61 = vunpack.c.l.b16 %v9825_v1 }
 0x244   : > { %v1135_v53 = vpack.c.bf16 %v1127_v24, %v1127_v24  ;;  %v10042_v35 = vpack.c.b16 %v1383_v59, %v1383_v59  ;;  %v10055_v18 = vpack.c.bf16 %v856_v44, %v856_v44  ;;  %v10081_v58 = vpack.c.b16 %v1499_v61, %v1499_v61 }
 0x245   : > { %v1454_v59 = vsel %vm884_vm0, %v1449_v12, 0 }
 0x246   : > { %7817 = vmatmul.msk.bf16.vlgmr.msrb.gmra.mxu3 %vm1045_vm1, %v1135_v53  ;;  %v1261_v32 = vsel %vm1145_vm2, %v10055_v18, 0 }
 0x247   : > { %1347 = vmatpush.bf16.xpose.msrb.mxu3 %v1338_v19  ;;  %1270 = vmatpush.bf16.msra.mxu0 %v1261_v32 }
 0x248   : > { %1361 = vrot.lane.b32.xlu2 %v10029_v28, %s9525_s30 }
 0x24a   : > { %v1102_v29 = vpop.xlane.xlu2 %1101 }
 0x24b   : > { %9207 = vrcp.f32 %v1102_v29 }
 0x250   : > { %1390 = vrot.lane.b32.xlu2 %v10038_v30, %s9525_s30 }
 0x251   : > { %v9208_v31 = vpop.eup %9207 }
 0x252   : > { %v1128_v34 = vmul.f32 %v9208_v31, %v9939_v10  ;;  %v1504_v10 = vunpack.c.l.b16 %v9815_v55  ;;  %v1280_v55 = vsel %vm1145_vm2, %v10067_v52, 0 }
 0x253   : > { %1385 = vrot.lane.b32.xlu1 %v10042_v35, %s9525_s30  ;;  %1289 = vmatpush.bf16.msrb.mxu1 %v1280_v55 }
 0x254   : > { %v1136_v27 = vpack.c.bf16 %v1128_v34, %v1128_v34  ;;  %v10065_v49 = vpack.c.b16 %v1504_v10, %v1504_v10 }
 0x256   : > { %7818 = vmatmul.msk.bf16.vlgmr.msrb.gmra.mxu0 %vm1045_vm1, %v1136_v27 }
 0x258   : > { %1356 = vrot.lane.b32.xlu2 %v10050_v45, %s9525_s30 }
 0x25a   : > { %v1105_v60 = vpop.xlane.xlu2 %1104 }
 0x25b   : > { %9209 = vrcp.f32 %v1105_v60  ;;  %1634 = vrot.lane.b32.xlu1 %v10053_v41, %s9525_s30 }
 0x260   : > { %1506 = vrot.lane.b32.xlu2 %v10065_v49, %s9525_s30 }
 0x261   : > { %v9210_v57 = vpop.eup %9209 }
 0x262   : > { %v1129_v62 = vmul.f32 %v9210_v57, %v9946_v20  ;;  %v1415_v53 = vpop.permute.xlu2 %1414 }
 0x264   : > { %v1137_v3 = vpack.c.bf16 %v1129_v62, %v1129_v62 }
 0x266   : > { %7819 = vmatmul.msk.bf16.vlgmr.msra.gmra.mxu1 %vm1045_vm1, %v1137_v3 }
 0x268   : > { %1472 = vrot.lane.b32.xlu2 %v10075_v6, %s9525_s30 }
 0x26a   : > { %v1108_v7 = vpop.xlane.xlu1 %1107 }
 0x26b   : > { %9211 = vrcp.f32 %v1108_v7 }
 0x270   : > { %1501 = vrot.lane.b32.xlu2 %v10081_v58, %s9525_s30 }
 0x271   : > { %v9212_v51 = vpop.eup %9211 }
 0x272   : > { %v1130_v20 = vmul.f32 %v9212_v51, %v9952_v63 }
 0x274   : > { %v1138_v13 = vpack.c.bf16 %v1130_v20, %v1130_v20 }
 0x276   : > { %7820 = vmatmul.msk.bf16.vlgmr.msra.gmra.mxu2 %vm1045_vm1, %v1138_v13 }
 0x278   : > { %v1117_v0 = vpop.xlane.xlu0 %1116 }
 0x279   : > { %9213 = vrcp.f32 %v1117_v0 }
 0x27f   : > { %v9214_v23 = vpop.eup %9213 }
 0x280   : > { %v1133_v50 = vmul.f32 %v9214_v23, %v9965_v15 }
 0x282   : > { %v1141_v1 = vpack.c.bf16 %v1133_v50, %v1133_v50  ;;  %v1420_v24 = vpop.permute.xlu1 %1419 }
 0x283   : > { %v1425_v2 = vsel %vm884_vm0, %v1420_v24, 0 }
 0x284   : > { %7823 = vmatmul.msk.bf16.vlgmr.msrb.gmra.mxu1 %vm1045_vm1, %v1141_v1  ;;  %1434 = vmatpush.bf16.xpose.msra.mxu2 %v1425_v2 }
 0x286   : > { %7824 = vmatmul.msk.bf16.vlgmr.msrb.gmra.mxu2 %vm884_vm0, %v9927_v56 }
 0x296   : > { %7828 = vmatmul.msk.bf16.vlgmr.msra.gmra.mxu2 %vm884_vm0, %v1415_v53 }
 0x29b   : > { %v1111_v63 = vpop.xlane.xlu2 %1110 }
 0x29c   : > { %9215 = vrcp.f32 %v1111_v63 }
 0x2a2   : > { %v9216_v19 = vpop.eup %9215 }
 0x2a3   : > { %v1131_v22 = vmul.f32 %v9216_v19, %v10002_v42  ;;  %v1444_v29 = vpop.permute.xlu2 %1443  ;;  %v1478_v42 = vpop.permute.xlu0 %1477 }
 0x2a4   : > { %v1483_v32 = vsel %vm884_vm0, %v1478_v42, 0 }
 0x2a5   : > { %v1139_v15 = vpack.c.bf16 %v1131_v22, %v1131_v22 }
 0x2a7   : > { %7821 = vmatmul.msk.bf16.vlgmr.msra.gmra.mxu3 %vm1045_vm1, %v1139_v15 }
 0x2a8   : > { %1463 = vmatpush.bf16.xpose.msra.mxu3 %v1454_v59 }
 0x2ab   : > { %v1362_v31 = vpop.permute.xlu2 %1361 }
 0x2ac   : > { %v1367_v46 = vsel %vm884_vm0, %v1362_v31, 0 }
 0x2ad   : > { %v1114_v34 = vpop.xlane.xlu1 %1113  ;;  %1376 = vmatpush.bf16.xpose.msrb.mxu0 %v1367_v46 }
 0x2ae   : > { %9217 = vrcp.f32 %v1114_v34 }
 0x2b3   : > { %v1391_v56 = vpop.permute.xlu2 %1390 }
 0x2b4   : > { %v9218_v36 = vpop.eup %9217  ;;  %v1396_v27 = vsel %vm884_vm0, %v1391_v56, 0 }
 0x2b5   : > { %v1132_v38 = vmul.f32 %v9218_v36, %v10010_v5  ;;  %1405 = vmatpush.bf16.xpose.msra.mxu1 %v1396_v27 }
 0x2b7   : > { %v1140_v44 = vpack.c.bf16 %v1132_v38, %v1132_v38  ;;  %7825 = vmatmul.msk.bf16.vlgmr.msrb.gmra.mxu3 %vm884_vm0, %v9950_v54 }
 0x2b9   : > { %7822 = vmatmul.msk.bf16.vlgmr.msra.gmra.mxu0 %vm1045_vm1, %v1140_v44 }
 0x2ba   : > { %1492 = vmatpush.bf16.xpose.msra.mxu0 %v1483_v32 }
 0x2bb   : > { %v10103_v10 = vpop.f32.mrf.mxu2  ;;  %v1357_v60 = vpop.permute.xlu2 %1356 }
 0x2c3   : > { %v1160_v47 = vpop.f32.mrf.mxu2  ;;  %v1507_v48 = vpop.permute.xlu2 %1506 }
 0x2c4   : > { %v1512_v57 = vsel %vm884_vm0, %v1507_v48, 0 }
 0x2c5   : > { %v1386_v55 = vpop.permute.xlu1 %1385  ;;  %1521 = vmatpush.bf16.xpose.msrb.mxu1 %v1512_v57 }
 0x2c6   : > { %7827 = vmatmul.msk.bf16.vlgmr.msra.gmra.mxu1 %vm884_vm0, %v1386_v55 }
 0x2c7   : > { %7829 = vmatmul.msk.bf16.vlgmr.msra.gmra.mxu3 %vm884_vm0, %v1444_v29 }
 0x2c9   : > { %v10108_v5 = vpop.f32.mrf.mxu3  ;;  %7826 = vmatmul.msk.bf16.vlgmr.msrb.gmra.mxu0 %vm884_vm0, %v1357_v60 }
 0x2cb   : > { %v1473_v54 = vpop.permute.xlu2 %1472 }
 0x2cd   : > { %v1635_v61 = vpop.permute.xlu1 %1634 }
 0x2ce   : > { %v1640_v7 = vsel %vm1145_vm2, %v1635_v61, 0 }
 0x2cf   : > { %1649 = vmatpush.bf16.msrb.mxu2 %v1640_v7 }
 0x2d1   : > { %v1179_v43 = vpop.f32.mrf.mxu3 }
 0x2d3   : > { %v10111_v62 = vpop.f32.mrf.mxu0  ;;  %v1502_v3 = vpop.permute.xlu2 %1501 }
 0x2d6   : > { %7831 = vmatmul.msk.bf16.vlgmr.msrb.gmra.mxu1 %vm884_vm0, %v1502_v3 }
 0x2d9   : > { %7830 = vmatmul.msk.bf16.vlgmr.msra.gmra.mxu0 %vm884_vm0, %v1473_v54 }
 0x2db   : > { %v1198_v12 = vpop.f32.mrf.mxu0 }
 0x2e3   : > { %v10116_v51 = vpop.f32.mrf.mxu1 }
 0x2eb   : > { %v1217_v20 = vpop.f32.mrf.mxu1 }
 0x2f9   : > { %v10118_v13 = vpop.f32.mrf.mxu2 }
 0x301   : > { %v1236_v0 = vpop.f32.mrf.mxu2  ;;  %v10120_v23 = vpop.f32.mrf.mxu1 }
 0x309   : > { %v1293_v50 = vpop.f32.mrf.mxu1  ;;  %v1320_v1 = vpop.f32.mrf.mxu2 }
 0x30a   : > { %v1527_v12 = vmul.f32 0.17677669, %v1320_v1  ;;  %v1656_v50 = vunpack.c.l.b16 %v9995_v39 }
 0x311   : > { %v1322_v24 = vpop.f32.mrf.mxu2 }
 0x312   : > { %v1535_v24 = vsel %vm1045_vm1, %v1527_v12, -inf }
 0x319   : > { %v1436_v2 = vpop.f32.mrf.mxu2 }
 0x31a   : > { %v10128_v38 = vmul.f32 0.17677669, %v1436_v2  ;;  %v10140_v2 = vpack.c.b16 %v1656_v50, %v1656_v50 }
 0x31c   : > { %v1547_v60 = vsel %vm1045_vm1, %v10128_v38, -inf }
 0x321   : > { %v1438_v53 = vpop.f32.mrf.mxu2 }
 0x322   : > { %v1728_v53 = vunpack.c.l.b16 %v9985_v4  ;;  %v1680_v4 = vunpack.c.l.b16 %v9969_v14 }
 0x324   : > { %v10159_v39 = vpack.c.b16 %v1680_v4, %v1680_v4 }
 0x32a   : > { %v10122_v63 = vpop.f32.mrf.mxu3 }
 0x332   : > { %v1255_v19 = vpop.f32.mrf.mxu3 }
 0x333   : > { %v1752_v19 = vunpack.c.l.b16 %v10000_v40  ;;  %v1704_v40 = vunpack.c.l.b16 %v10021_v16 }
 0x335   : > { %v10150_v1 = vpack.c.b16 %v1752_v19, %v1752_v19 }
 0x336   : > { %v10124_v22 = vpop.f32.mrf.mxu0 }
 0x33a   : > { %v1349_v29 = vpop.f32.mrf.mxu3 }
 0x33b   : > { %v1528_v61 = vmul.f32 0.17677669, %v1349_v29  ;;  %v10146_v29 = vpack.c.b16 %v1728_v53, %v1728_v53 }
 0x33d   : > { %v1538_v0 = vsel %vm1045_vm1, %v1528_v61, -inf }
 0x33e   : > { %v1274_v15 = vpop.f32.mrf.mxu0 }
 0x33f   : > { %v10164_v15 = vpack.c.b16 %v1704_v40, %v1704_v40 }
 0x342   : > { %v1351_v59 = vpop.f32.mrf.mxu3 }
 0x343   : > { %v1407_v31 = vpop.f32.mrf.mxu1 }
 0x344   : > { %v1530_v46 = vmul.f32 0.17677669, %v1407_v31 }
 0x346   : > { %v1378_v34 = vpop.f32.mrf.mxu0  ;;  %v1544_v56 = vsel %vm1045_vm1, %v1530_v46, -inf }
 0x347   : > { %v1529_v36 = vmul.f32 0.17677669, %v1378_v34  ;;  %1545 = vmax.xlane.f32.xlu2 %v1544_v56 }
 0x349   : > { %v1541_v27 = vsel %vm1045_vm1, %v1529_v36, -inf }
 0x34a   : > { %v1465_v42 = vpop.f32.mrf.mxu3  ;;  %1542 = vmax.xlane.f32.xlu1 %v1541_v27 }
 0x34b   : > { %v1409_v44 = vpop.f32.mrf.mxu1  ;;  %v10168_v31 = vmul.f32 0.17677669, %v1465_v42 }
 0x34d   : > { %v1550_v14 = vsel %vm1045_vm1, %v10168_v31, -inf }
 0x34e   : > { %v1380_v32 = vpop.f32.mrf.mxu0 }
 0x34f   : > { %1548 = vmax.xlane.f32.xlu2 %v1547_v60 }
 0x352   : > { %v1467_v47 = vpop.f32.mrf.mxu3 }
 0x353   : > { %v1523_v48 = vpop.f32.mrf.mxu1 }
 0x354   : > { %v10132_v57 = vmul.f32 0.17677669, %v1523_v48 }
 0x356   : > { %v1494_v55 = vpop.f32.mrf.mxu0  ;;  %v1556_v54 = vsel %vm1045_vm1, %v10132_v57, -inf }
 0x357   : > { %v1533_v43 = vmul.f32 0.17677669, %v1494_v55  ;;  %1557 = vmax.xlane.f32.xlu1 %v1556_v54 }
 0x359   : > { %v1553_v3 = vsel %vm1045_vm1, %v1533_v43, -inf }
 0x35a   : > { %1554 = vmax.xlane.f32.xlu0 %v1553_v3 }
 0x35b   : > { %v1525_v7 = vpop.f32.mrf.mxu1 }
 0x35e   : > { %v1496_v20 = vpop.f32.mrf.mxu0 }
 0x35f   : > { %1539 = vmax.xlane.f32.xlu1 %v1538_v0 }
 0x362   : > { %1536 = vmax.xlane.f32.xlu0 %v1535_v24 }
 0x367   : > { %1658 = vrot.lane.b32.xlu2 %v10140_v2, %s9525_s30 }
 0x376   : > { %1730 = vrot.lane.b32.xlu0 %v10146_v29, %s9525_s30 }
 0x378   : > { %1754 = vrot.lane.b32.xlu1 %v10150_v1, %s9525_s30 }
 0x37e   : > { %1825 = vrot.lane.b32.xlu0 %v9758_v9, %s9526_s26 }
 0x386   : > { %1848 = vrot.lane.b32.xlu0 %v9768_v17, %s9526_s26 }
 0x38e   : > { %1682 = vrot.lane.b32.xlu0 %v10159_v39, %s9525_s30 }
 0x396   : > { %1706 = vrot.lane.b32.xlu0 %v10164_v15, %s9525_s30 }
 0x3ba   : > { %v1546_v59 = vpop.xlane.xlu2 %1545 }
 0x3bb   : > { %v1562_v34 = vsub.f32 %v1530_v46, %v1546_v59 }
 0x3bd   : > { %v1573_v56 = vmul.f32 1.442695, %v1562_v34  ;;  %v1543_v27 = vpop.xlane.xlu1 %1542 }
 0x3be   : > { %v1561_v44 = vsub.f32 %v1529_v36, %v1543_v27 }
 0x3bf   : > { %9219 = vpow2.f32 %v1573_v56 }
 0x3c0   : > { %v1571_v32 = vmul.f32 1.442695, %v1561_v44  ;;  %1551 = vmax.xlane.f32.xlu0 %v1550_v14 }
 0x3c2   : > { %9221 = vpow2.f32 %v1571_v32  ;;  %v1549_v16 = vpop.xlane.xlu2 %1548 }
 0x3c3   : > { %v1563_v50 = vsub.f32 %v10128_v38, %v1549_v16 }
 0x3c5   : > { %v10172_v60 = vpop.eup %9219  ;;  %v1575_v59 = vmul.f32 1.442695, %v1563_v50 }
 0x3c6   : > { %v1592_v47 = vsel %vm1045_vm1, %v10172_v60, 0.0 }
 0x3c7   : > { %1593 = vadd.xlane.f32.xlu1 %v1592_v47 }
 0x3c8   : > { %v10176_v42 = vpop.eup %9221 }
 0x3c9   : > { %v1589_v46 = vsel %vm1045_vm1, %v10176_v42, 0.0 }
 0x3ca   : > { %v1659_v36 = vpop.permute.xlu2 %1658  ;;  %1590 = vadd.xlane.f32.xlu2 %v1589_v46  ;;  %v10180_v48 = vpop.xlane.xlu1 %1557  ;;  %v1800_v46 = vunpack.c.l.b16 %v10067_v52  ;;  %v1776_v52 = vunpack.c.l.b16 %v10055_v18 }
 0x3cb   : > { %v1664_v55 = vsel %vm1145_vm2, %v1659_v36, 0 }
 0x3cc   : > { %1673 = vmatpush.bf16.msrb.mxu3 %v1664_v55  ;;  %v10207_v55 = vpack.c.b16 %v1800_v46, %v1800_v46 }
 0x3cd   : > { %v1555_v54 = vpop.xlane.xlu0 %1554 }
 0x3ce   : > { %v1565_v3 = vsub.f32 %v1533_v43, %v1555_v54 }
 0x3d0   : > { %v1579_v7 = vmul.f32 1.442695, %v1565_v3 }
 0x3d2   : > { %9223 = vpow2.f32 %v1579_v7  ;;  %v1540_v20 = vpop.xlane.xlu1 %1539  ;;  %v10219_v7 = vpack.c.b16 %v1776_v52, %v1776_v52 }
 0x3d3   : > { %v1560_v0 = vsub.f32 %v1528_v61, %v1540_v20 }
 0x3d5   : > { %v1569_v24 = vmul.f32 1.442695, %v1560_v0  ;;  %v1537_v53 = vpop.xlane.xlu0 %1536 }
 0x3d6   : > { %v1559_v19 = vsub.f32 %v1527_v12, %v1537_v53 }
 0x3d7   : > { %9225 = vpow2.f32 %v1569_v24 }
 0x3d8   : > { %v10184_v4 = vpop.eup %9223  ;;  %v1567_v40 = vmul.f32 1.442695, %v1559_v19 }
 0x3d9   : > { %v1601_v34 = vsel %vm1045_vm1, %v10184_v4, 0.0 }
 0x3da   : > { %9227 = vpow2.f32 %v1567_v40  ;;  %1602 = vadd.xlane.f32.xlu1 %v1601_v34 }
 0x3db   : > { %9229 = vpow2.f32 %v1575_v59 }
 0x3dd   : > { %v10188_v43 = vpop.eup %9225 }
 0x3de   : > { %v1586_v61 = vsel %vm1045_vm1, %v10188_v43, 0.0 }
 0x3df   : > { %1587 = vadd.xlane.f32.xlu0 %v1586_v61 }
 0x3e0   : > { %v10192_v38 = vpop.eup %9227 }
 0x3e1   : > { %v1583_v12 = vsel %vm1045_vm1, %v10192_v38, 0.0  ;;  %v10196_v56 = vpop.eup %9229 }
 0x3e2   : > { %1584 = vadd.xlane.f32.xlu2 %v1583_v12  ;;  %v1595_v27 = vsel %vm1045_vm1, %v10196_v56, 0.0 }
 0x3e7   : > { %1596 = vadd.xlane.f32.xlu0 %v1595_v27 }
 0x3e8   : > { %v1731_v44 = vpop.permute.xlu0 %1730 }
 0x3e9   : > { %v1736_v14 = vsel %vm1145_vm2, %v1731_v44, 0 }
 0x3ea   : > { %v1755_v32 = vpop.permute.xlu1 %1754  ;;  %1745 = vmatpush.bf16.msra.mxu2 %v1736_v14 }
 0x3eb   : > { %v1760_v16 = vsel %vm1145_vm2, %v1755_v32, 0 }
 0x3ec   : > { %1769 = vmatpush.bf16.msra.mxu3 %v1760_v16 }
 0x3f0   : > { %v10202_v47 = vpop.permute.xlu0 %1825 }
 0x3f3   : > { %1917 = vrot.lane.b32.xlu1 %v9979_v25, %s9526_s26 }
 0x3f8   : > { %v1849_v36 = vpop.permute.xlu0 %1848 }
 0x3fa   : > { %1823 = vrot.lane.b32.xlu2 %v9756_v8, %s9526_s26 }
 0x3fb   : > { %1802 = vrot.lane.b32.xlu1 %v10207_v55, %s9525_s30 }
 0x400   : > { %v1683_v54 = vpop.permute.xlu0 %1682 }
 0x401   : > { %v1688_v3 = vsel %vm1145_vm2, %v1683_v54, 0 }
 0x402   : > { %1940 = vrot.lane.b32.xlu2 %v9935_v37, %s9526_s26  ;;  %1697 = vmatpush.bf16.msrb.mxu0 %v1688_v3 }
 0x403   : > { %1938 = vrot.lane.b32.xlu1 %v10019_v26, %s9526_s26 }
 0x408   : > { %v1707_v20 = vpop.permute.xlu0 %1706 }
 0x409   : > { %v1712_v0 = vsel %vm1145_vm2, %v1707_v20, 0  ;;  %v1854_v20 = vsel %vm884_vm0, %v1849_v36, 0  ;;  %v1566_v36 = vsub.f32 %v10132_v57, %v10180_v48 }
 0x40a   : > { %1778 = vrot.lane.b32.xlu2 %v10219_v7, %s9525_s30  ;;  %1721 = vmatpush.bf16.msra.mxu1 %v1712_v0 }
 0x40b   : > { %1869 = vrot.lane.b32.xlu1 %v10050_v45, %s9526_s26 }
 0x412   : > { %1915 = vrot.lane.b32.xlu2 %v9957_v11, %s9526_s26 }
 0x413   : > { %1963 = vrot.lane.b32.xlu1 %v9990_v21, %s9526_s26 }
 0x41a   : > { %1871 = vrot.lane.b32.xlu2 %v10029_v28, %s9526_s26 }
 0x41b   : > { %1961 = vrot.lane.b32.xlu1 %v10075_v6, %s9526_s26 }
 0x422   : > { %1892 = vrot.lane.b32.xlu2 %v10042_v35, %s9526_s26 }
 0x42a   : > { %1986 = vrot.lane.b32.xlu2 %v10065_v49, %s9526_s26 }
 0x432   : > { %1984 = vrot.lane.b32.xlu2 %v10081_v58, %s9526_s26 }
 0x433   : > { %v1552_v18 = vpop.xlane.xlu0 %1551 }
 0x434   : > { %v1564_v50 = vsub.f32 %v10168_v31, %v1552_v18 }
 0x436   : > { %v1577_v24 = vmul.f32 1.442695, %v1564_v50  ;;  %v1831_v50 = vsel %vm884_vm0, %v10202_v47, 0 }
 0x438   : > { %9231 = vpow2.f32 %v1577_v24 }
 0x43a   : > { %v1594_v53 = vpop.xlane.xlu1 %1593  ;;  %2111 = vrot.lane.b32.xlu2 %v10053_v41, %s9526_s26 }
 0x43b   : > { %9233 = vrcp.f32 %v1594_v53 }
 0x43d   : > { %v1591_v19 = vpop.xlane.xlu2 %1590 }
 0x43e   : > { %v10243_v40 = vpop.eup %9231  ;;  %9235 = vrcp.f32 %v1591_v19 }
 0x43f   : > { %v1598_v59 = vsel %vm1045_vm1, %v10243_v40, 0.0 }
 0x440   : > { %1599 = vadd.xlane.f32.xlu0 %v1598_v59 }
 0x441   : > { %v9234_v34 = vpop.eup %9233 }
 0x442   : > { %v1618_v61 = vmul.f32 %v9234_v34, %v10172_v60 }
 0x444   : > { %v9236_v12 = vpop.eup %9235  ;;  %v1626_v31 = vpack.c.bf16 %v1618_v61, %v1618_v61 }
 0x445   : > { %v1617_v27 = vmul.f32 %v9236_v12, %v10176_v42 }
 0x446   : > { %7835 = vmatmul.msk.bf16.vlgmr.msra.gmra.mxu1 %vm1045_vm1, %v1626_v31 }
 0x447   : > { %v1625_v44 = vpack.c.bf16 %v1617_v27, %v1617_v27  ;;  %v1581_v27 = vmul.f32 1.442695, %v1566_v36 }
 0x449   : > { %7834 = vmatmul.msk.bf16.vlgmr.msrb.gmra.mxu0 %vm1045_vm1, %v1625_v44 }
 0x44d   : > { %v1603_v3 = vpop.xlane.xlu1 %1602 }
 0x452   : > { %v1588_v14 = vpop.xlane.xlu0 %1587 }
 0x453   : > { %9237 = vrcp.f32 %v1588_v14 }
 0x454   : > { %1846 = vrot.lane.b32.xlu0 %v9873_v33, %s9526_s26 }
 0x455   : > { %v1585_v32 = vpop.xlane.xlu2 %1584 }
 0x456   : > { %9239 = vrcp.f32 %v1585_v32 }
 0x459   : > { %v9238_v16 = vpop.eup %9237 }
 0x45a   : > { %v1616_v46 = vmul.f32 %v9238_v16, %v10188_v43  ;;  %v1597_v18 = vpop.xlane.xlu0 %1596 }
 0x45b   : > { %9241 = vrcp.f32 %v1597_v18 }
 0x45c   : > { %v9240_v60 = vpop.eup %9239  ;;  %v1624_v54 = vpack.c.bf16 %v1616_v46, %v1616_v46  ;;  %9243 = vrcp.f32 %v1603_v3 }
 0x45d   : > { %v1615_v42 = vmul.f32 %v9240_v60, %v10192_v38  ;;  %v1824_v52 = vpop.permute.xlu2 %1823  ;;  %9245 = vpow2.f32 %v1581_v27 }
 0x45e   : > { %7833 = vmatmul.msk.bf16.vlgmr.msrb.gmra.mxu3 %vm1045_vm1, %v1624_v54 }
 0x45f   : > { %v1623_v0 = vpack.c.bf16 %v1615_v42, %v1615_v42  ;;  %1863 = vmatpush.bf16.xpose.msrb.mxu3 %v1854_v20 }
 0x461   : > { %7832 = vmatmul.msk.bf16.vlgmr.msrb.gmra.mxu2 %vm1045_vm1, %v1623_v0  ;;  %v9242_v53 = vpop.eup %9241 }
 0x462   : > { %1840 = vmatpush.bf16.xpose.msrb.mxu2 %v1831_v50  ;;  %v9244_v38 = vpop.eup %9243  ;;  %v1619_v19 = vmul.f32 %v9242_v53, %v10196_v56 }
 0x463   : > { %v1621_v59 = vmul.f32 %v9244_v38, %v10184_v4  ;;  %v9246_v4 = vpop.eup %9245 }
 0x464   : > { %v1627_v31 = vpack.c.bf16 %v1619_v19, %v1619_v19  ;;  %v1604_v16 = vsel %vm1045_vm1, %v9246_v4, 0.0 }
 0x465   : > { %v1918_v43 = vpop.permute.xlu1 %1917  ;;  %v1941_v24 = vpop.permute.xlu2 %1940  ;;  %v1629_v44 = vpack.c.bf16 %v1621_v59, %v1621_v59 }
 0x466   : > { %v1923_v14 = vsel %vm884_vm0, %v1918_v43, 0  ;;  %v1946_v19 = vsel %vm884_vm0, %v1941_v24, 0 }
 0x46d   : > { %v1803_v34 = vpop.permute.xlu1 %1802  ;;  %v1779_v61 = vpop.permute.xlu2 %1778 }
 0x46e   : > { %v1808_v47 = vsel %vm1145_vm2, %v1803_v34, 0  ;;  %v1784_v12 = vsel %vm1145_vm2, %v1779_v61, 0 }
 0x46f   : > { %1793 = vmatpush.bf16.msra.mxu0 %v1784_v12  ;;  %1817 = vmatpush.bf16.msrb.mxu1 %v1808_v47 }
 0x471   : > { %7836 = vmatmul.msk.bf16.vlgmr.msra.gmra.mxu2 %vm1045_vm1, %v1627_v31 }
 0x472   : > { %1932 = vmatpush.bf16.xpose.msra.mxu2 %v1923_v14  ;;  %7838 = vmatmul.msk.bf16.vlgmr.msra.gmra.mxu0 %vm1045_vm1, %v1629_v44 }
 0x475   : > { %v1939_v57 = vpop.permute.xlu1 %1938  ;;  %v1916_v48 = vpop.permute.xlu2 %1915 }
 0x47d   : > { %v1870_v56 = vpop.permute.xlu1 %1869  ;;  %v1872_v32 = vpop.permute.xlu2 %1871 }
 0x47e   : > { %v1877_v46 = vsel %vm884_vm0, %v1872_v32, 0  ;;  %1605 = vadd.xlane.f32.xlu0 %v1604_v16 }
 0x47f   : > { %1886 = vmatpush.bf16.xpose.msrb.mxu0 %v1877_v46 }
 0x481   : > { %7840 = vmatmul.msk.bf16.vlgmr.msrb.gmra.mxu2 %vm884_vm0, %v1824_v52 }
 0x485   : > { %v1964_v60 = vpop.permute.xlu1 %1963  ;;  %v1893_v54 = vpop.permute.xlu2 %1892 }
 0x486   : > { %v1969_v3 = vsel %vm884_vm0, %v1964_v60, 0  ;;  %7842 = vmatmul.msk.bf16.vlgmr.msrb.gmra.mxu0 %vm884_vm0, %v1870_v56 }
 0x487   : > { %1978 = vmatpush.bf16.xpose.msra.mxu0 %v1969_v3 }
 0x48d   : > { %v1987_v42 = vpop.permute.xlu2 %1986  ;;  %v1962_v20 = vpop.permute.xlu1 %1961 }
 0x491   : > { %7844 = vmatmul.msk.bf16.vlgmr.msra.gmra.mxu2 %vm884_vm0, %v1916_v48 }
 0x492   : > { %1894 = vrot.lane.b32.xlu0 %v10038_v30, %s9526_s26 }
 0x495   : > { %v1985_v0 = vpop.permute.xlu2 %1984 }
 0x496   : > { %7846 = vmatmul.msk.bf16.vlgmr.msra.gmra.mxu0 %vm884_vm0, %v1962_v20 }
 0x49d   : > { %v2112_v18 = vpop.permute.xlu2 %2111 }
 0x49e   : > { %v2117_v52 = vsel %vm1145_vm2, %v2112_v18, 0 }
 0x49f   : > { %2126 = vmatpush.bf16.msrb.mxu2 %v2117_v52 }
 0x4b3   : > { %v1600_v50 = vpop.xlane.xlu0 %1599 }
 0x4b4   : > { %9247 = vrcp.f32 %v1600_v50 }
 0x4ba   : > { %v9248_v43 = vpop.eup %9247 }
 0x4bb   : > { %v1620_v53 = vmul.f32 %v9248_v43, %v10243_v40  ;;  %v1992_v43 = vsel %vm884_vm0, %v1987_v42, 0 }
 0x4bd   : > { %v1628_v38 = vpack.c.bf16 %v1620_v53, %v1620_v53 }
 0x4bf   : > { %7837 = vmatmul.msk.bf16.vlgmr.msra.gmra.mxu3 %vm1045_vm1, %v1628_v38 }
 0x4c0   : > { %1955 = vmatpush.bf16.xpose.msra.mxu3 %v1946_v19 }
 0x4c3   : > { %v10282_v36 = vpop.f32.mrf.mxu1 }
 0x4c6   : > { %v10284_v59 = vpop.f32.mrf.mxu0  ;;  %v1847_v47 = vpop.permute.xlu0 %1846 }
 0x4c7   : > { %v9070_v34 = vpack.i.bf16 %v10282_v36, %v10284_v59 }
 0x4cb   : > { %v1725_v61 = vpop.f32.mrf.mxu1 }
 0x4ce   : > { %v1701_v12 = vpop.f32.mrf.mxu0 }
 0x4cf   : > { %7841 = vmatmul.msk.bf16.vlgmr.msrb.gmra.mxu3 %vm884_vm0, %v1847_v47 }
 0x4df   : > { %7845 = vmatmul.msk.bf16.vlgmr.msra.gmra.mxu3 %vm884_vm0, %v1939_v57 }
 0x4e1   : > { %v10290_v40 = vpop.f32.mrf.mxu3 }
 0x4e4   : > { %v10292_v24 = vpop.f32.mrf.mxu2 }
 0x4e5   : > { %v9055_v31 = vpack.i.bf16 %v10290_v40, %v10292_v24 }
 0x4e9   : > { %v1677_v27 = vpop.f32.mrf.mxu3 }
 0x4ec   : > { %v1653_v44 = vpop.f32.mrf.mxu2 }
 0x4ef   : > { %v10296_v14 = vpop.f32.mrf.mxu0 }
 0x4f1   : > { %v1606_v48 = vpop.xlane.xlu0 %1605 }
 0x4f2   : > { %9249 = vrcp.f32 %v1606_v48 }
 0x4f4   : > { %v10298_v56 = vpop.f32.mrf.mxu2 }
 0x4f7   : > { %v1797_v32 = vpop.f32.mrf.mxu0 }
 0x4f8   : > { %v9250_v16 = vpop.eup %9249 }
 0x4f9   : > { %v1622_v46 = vmul.f32 %v9250_v16, %v9246_v4 }
 0x4fb   : > { %v1630_v60 = vpack.c.bf16 %v1622_v46, %v1622_v46 }
 0x4fc   : > { %v1749_v57 = vpop.f32.mrf.mxu2 }
 0x4fd   : > { %7839 = vmatmul.msk.bf16.vlgmr.msrb.gmra.mxu1 %vm1045_vm1, %v1630_v60 }
 0x503   : > { %v1888_v3 = vpop.f32.mrf.mxu0 }
 0x504   : > { %v10301_v20 = vmul.f32 0.17677669, %v1888_v3  ;;  %v1842_v18 = vpop.f32.mrf.mxu2  ;;  %v1895_v52 = vpop.permute.xlu0 %1894 }
 0x505   : > { %v1900_v50 = vsel %vm884_vm0, %v1895_v52, 0  ;;  %v2007_v27 = vmul.f32 0.17677669, %v1842_v18 }
 0x506   : > { %1909 = vmatpush.bf16.xpose.msra.mxu1 %v1900_v50  ;;  %v2021_v53 = vsel %vm1045_vm1, %v10301_v20, -inf }
 0x507   : > { %2022 = vmax.xlane.f32.xlu2 %v2021_v53  ;;  %v2015_v48 = vsel %vm1045_vm1, %v2007_v27, -inf }
 0x50b   : > { %v1890_v4 = vpop.f32.mrf.mxu0 }
 0x50c   : > { %v1844_v38 = vpop.f32.mrf.mxu2 }
 0x50d   : > { %7843 = vmatmul.msk.bf16.vlgmr.msra.gmra.mxu1 %vm884_vm0, %v1893_v54 }
 0x50e   : > { %2001 = vmatpush.bf16.xpose.msrb.mxu1 %v1992_v43 }
 0x513   : > { %v1980_v19 = vpop.f32.mrf.mxu0 }
 0x514   : > { %v10308_v61 = vmul.f32 0.17677669, %v1980_v19  ;;  %v1934_v47 = vpop.f32.mrf.mxu2 }
 0x516   : > { %v2033_v12 = vsel %vm1045_vm1, %v10308_v61, -inf }
 0x517   : > { %2034 = vmax.xlane.f32.xlu0 %v2033_v12 }
 0x51b   : > { %v1982_v42 = vpop.f32.mrf.mxu0 }
 0x51c   : > { %v1936_v44 = vpop.f32.mrf.mxu2 }
 0x51d   : > { %7847 = vmatmul.msk.bf16.vlgmr.msrb.gmra.mxu1 %vm884_vm0, %v1985_v0 }
 0x51f   : > { %2016 = vmax.xlane.f32.xlu0 %v2015_v48 }
 0x533   : > { %2195 = vrot.lane.b32.xlu0 %v10146_v29, %s9526_s26 }
 0x53b   : > { %2153 = vrot.lane.b32.xlu0 %v10159_v39, %s9526_s26 }
 0x542   : > { %v10318_v54 = vpop.f32.mrf.mxu3 }
 0x543   : > { %2174 = vrot.lane.b32.xlu0 %v10164_v15, %s9526_s26 }
 0x54a   : > { %v1773_v32 = vpop.f32.mrf.mxu3 }
 0x54b   : > { %2281 = vrot.lane.b32.xlu0 %v9758_v9, %s9527_s27  ;;  %v2011_v32 = vmul.f32 0.17677669, %v1934_v47 }
 0x552   : > { %v1865_v0 = vpop.f32.mrf.mxu3 }
 0x553   : > { %v2008_v4 = vmul.f32 0.17677669, %v1865_v0 }
 0x555   : > { %v2018_v19 = vsel %vm1045_vm1, %v2008_v4, -inf }
 0x55a   : > { %v1867_v16 = vpop.f32.mrf.mxu3 }
 0x562   : > { %v1957_v46 = vpop.f32.mrf.mxu3 }
 0x563   : > { %v10324_v57 = vmul.f32 0.17677669, %v1957_v46 }
 0x565   : > { %v2030_v3 = vsel %vm1045_vm1, %v10324_v57, -inf }
 0x56a   : > { %v1959_v60 = vpop.f32.mrf.mxu3 }
 0x56b   : > { %v2027_v60 = vsel %vm1045_vm1, %v2011_v32, -inf }
 0x575   : > { %2031 = vmax.xlane.f32.xlu0 %v2030_v3 }
 0x57a   : > { %v10328_v18 = vpop.f32.mrf.mxu1  ;;  %v2023_v47 = vpop.xlane.xlu2 %2022 }
 0x582   : > { %v1821_v52 = vpop.f32.mrf.mxu1 }
 0x58a   : > { %v1911_v50 = vpop.f32.mrf.mxu1  ;;  %v2035_v38 = vpop.xlane.xlu0 %2034 }
 0x58b   : > { %v2010_v43 = vmul.f32 0.17677669, %v1911_v50 }
 0x58d   : > { %v2024_v53 = vsel %vm1045_vm1, %v2010_v43, -inf }
 0x58e   : > { %2025 = vmax.xlane.f32.xlu1 %v2024_v53 }
 0x592   : > { %v1913_v9 = vpop.f32.mrf.mxu1  ;;  %v2017_v44 = vpop.xlane.xlu0 %2016 }
 0x593   : > { %v2041_v9 = vsub.f32 %v10301_v20, %v2023_v47 }
 0x596   : > { %2019 = vmax.xlane.f32.xlu1 %v2018_v19  ;;  %v2051_v19 = vmul.f32 1.442695, %v2041_v9 }
 0x598   : > { %9251 = vpow2.f32 %v2051_v19 }
 0x59a   : > { %v2003_v12 = vpop.f32.mrf.mxu1 }
 0x59b   : > { %v10332_v42 = vmul.f32 0.17677669, %v2003_v12  ;;  %v2039_v12 = vsub.f32 %v2007_v27, %v2017_v44 }
 0x59d   : > { %v2036_v48 = vsel %vm1045_vm1, %v10332_v42, -inf }
 0x59e   : > { %2037 = vmax.xlane.f32.xlu2 %v2036_v48  ;;  %v2047_v48 = vmul.f32 1.442695, %v2039_v12 }
 0x5a0   : > { %9253 = vpow2.f32 %v2047_v48 }
 0x5a2   : > { %v2005_v16 = vpop.f32.mrf.mxu1 }
 0x5a3   : > { %v10345_v16 = vpop.eup %9251 }
 0x5a5   : > { %v2196_v46 = vpop.permute.xlu0 %2195 }
 0x5a6   : > { %v2201_v0 = vsel %vm1145_vm2, %v2196_v46, 0  ;;  %2028 = vmax.xlane.f32.xlu2 %v2027_v60  ;;  %v2045_v46 = vsub.f32 %v10308_v61, %v2035_v38  ;;  %v2069_v60 = vsel %vm1045_vm1, %v10345_v16, 0.0 }
 0x5a7   : > { %2210 = vmatpush.bf16.msra.mxu2 %v2201_v0 }
 0x5a8   : > { %v2059_v0 = vmul.f32 1.442695, %v2045_v46 }
 0x5aa   : > { %9255 = vpow2.f32 %v2059_v0 }
 0x5ad   : > { %v2154_v3 = vpop.permute.xlu0 %2153 }
 0x5ae   : > { %v2159_v52 = vsel %vm1145_vm2, %v2154_v3, 0  ;;  %v10350_v3 = vpop.eup %9253 }
 0x5af   : > { %2132 = vrot.lane.b32.xlu1 %v10140_v2, %s9526_s26  ;;  %2168 = vmatpush.bf16.msrb.mxu0 %v2159_v52  ;;  %v2063_v20 = vsel %vm1045_vm1, %v10350_v3, 0.0 }
 0x5b0   : > { %v10354_v52 = vpop.eup %9255 }
 0x5b1   : > { %v2081_v27 = vsel %vm1045_vm1, %v10354_v52, 0.0 }
 0x5b5   : > { %v2175_v50 = vpop.permute.xlu0 %2174 }
 0x5b6   : > { %v2180_v53 = vsel %vm1145_vm2, %v2175_v50, 0 }
 0x5b7   : > { %2189 = vmatpush.bf16.msra.mxu1 %v2180_v53 }
 0x5bd   : > { %v2282_v12 = vpop.permute.xlu0 %2281 }
 0x5be   : > { %2216 = vrot.lane.b32.xlu2 %v10150_v1, %s9526_s26 }
 0x5d9   : > { %2070 = vadd.xlane.f32.xlu1 %v2069_v60 }
 0x5e1   : > { %2064 = vadd.xlane.f32.xlu1 %v2063_v20 }
 0x5e8   : > { %v2032_v48 = vpop.xlane.xlu0 %2031 }
 0x5e9   : > { %2082 = vadd.xlane.f32.xlu1 %v2081_v27  ;;  %v2044_v0 = vsub.f32 %v10324_v57, %v2032_v48 }
 0x5eb   : > { %v2057_v27 = vmul.f32 1.442695, %v2044_v0 }
 0x601   : > { %v2026_v61 = vpop.xlane.xlu1 %2025 }
 0x602   : > { %v2042_v38 = vsub.f32 %v2010_v43, %v2026_v61  ;;  %2302 = vrot.lane.b32.xlu1 %v9873_v33, %s9527_s27 }
 0x604   : > { %v2053_v44 = vmul.f32 1.442695, %v2042_v38 }
 0x606   : > { %9257 = vpow2.f32 %v2053_v44 }
 0x609   : > { %v2020_v50 = vpop.xlane.xlu1 %2019 }
 0x60a   : > { %v2040_v53 = vsub.f32 %v2008_v4, %v2020_v50  ;;  %2258 = vrot.lane.b32.xlu1 %v10207_v55, %s9526_s26 }
 0x60c   : > { %v10362_v47 = vpop.eup %9257  ;;  %v2049_v9 = vmul.f32 1.442695, %v2040_v53 }
 0x60d   : > { %v2072_v19 = vsel %vm1045_vm1, %v10362_v47, 0.0 }
 0x60e   : > { %9259 = vpow2.f32 %v2049_v9  ;;  %2073 = vadd.xlane.f32.xlu2 %v2072_v19 }
 0x611   : > { %v2038_v43 = vpop.xlane.xlu2 %2037 }
 0x612   : > { %2350 = vrot.lane.b32.xlu1 %v10038_v30, %s9527_s27 }
 0x614   : > { %v10368_v33 = vpop.eup %9259 }
 0x615   : > { %v2066_v4 = vsel %vm1045_vm1, %v10368_v33, 0.0 }
 0x616   : > { %2067 = vadd.xlane.f32.xlu0 %v2066_v4 }
 0x619   : > { %v2029_v46 = vpop.xlane.xlu2 %2028 }
 0x61a   : > { %v2043_v60 = vsub.f32 %v2011_v32, %v2029_v46  ;;  %2325 = vrot.lane.b32.xlu1 %v10050_v45, %s9527_s27 }
 0x61c   : > { %v2055_v20 = vmul.f32 1.442695, %v2043_v60 }
 0x61e   : > { %9261 = vpow2.f32 %v2055_v20 }
 0x61f   : > { %9263 = vpow2.f32 %v2057_v27 }
 0x621   : > { %v2133_v61 = vpop.permute.xlu1 %2132  ;;  %v2217_v38 = vpop.permute.xlu2 %2216 }
 0x622   : > { %v2138_v30 = vsel %vm1145_vm2, %v2133_v61, 0  ;;  %v2222_v44 = vsel %vm1145_vm2, %v2217_v38, 0  ;;  %2371 = vrot.lane.b32.xlu1 %v9957_v11, %s9527_s27 }
 0x623   : > { %2147 = vmatpush.bf16.msrb.mxu3 %v2138_v30 }
 0x624   : > { %v10379_v50 = vpop.eup %9261 }
 0x625   : > { %v2075_v45 = vsel %vm1045_vm1, %v10379_v50, 0.0  ;;  %v10385_v57 = vpop.eup %9263 }
 0x626   : > { %2279 = vrot.lane.b32.xlu2 %v9756_v8, %s9527_s27  ;;  %2076 = vadd.xlane.f32.xlu0 %v2075_v45  ;;  %v2078_v11 = vsel %vm1045_vm1, %v10385_v57, 0.0 }
 0x627   : > { %2231 = vmatpush.bf16.msra.mxu3 %v2222_v44 }
 0x62a   : > { %2419 = vrot.lane.b32.xlu1 %v9990_v21, %s9527_s27 }
 0x62e   : > { %2237 = vrot.lane.b32.xlu2 %v10219_v7, %s9526_s26  ;;  %2079 = vadd.xlane.f32.xlu0 %v2078_v11 }
 0x632   : > { %2440 = vrot.lane.b32.xlu1 %v10081_v58, %s9527_s27 }
 0x636   : > { %2327 = vrot.lane.b32.xlu2 %v10029_v28, %s9527_s27 }
 0x63e   : > { %2373 = vrot.lane.b32.xlu2 %v9979_v25, %s9527_s27 }
 0x642   : > { %2304 = vrot.lane.b32.xlu0 %v9768_v17, %s9527_s27  ;;  %v2046_v17 = vsub.f32 %v10332_v42, %v2038_v43 }
 0x644   : > { %v2061_v53 = vmul.f32 1.442695, %v2046_v17 }
 0x646   : > { %2348 = vrot.lane.b32.xlu2 %v10042_v35, %s9527_s27 }
 0x64c   : > { %v2071_v8 = vpop.xlane.xlu1 %2070 }
 0x64d   : > { %9265 = vrcp.f32 %v2071_v8 }
 0x64e   : > { %2394 = vrot.lane.b32.xlu2 %v10019_v26, %s9527_s27  ;;  %v2287_v26 = vsel %vm884_vm0, %v2282_v12, 0 }
 0x653   : > { %v9266_v21 = vpop.eup %9265 }
 0x654   : > { %v2097_v58 = vmul.f32 %v9266_v21, %v10345_v16  ;;  %v2065_v32 = vpop.xlane.xlu1 %2064 }
 0x655   : > { %9267 = vrcp.f32 %v2065_v32 }
 0x656   : > { %v2105_v28 = vpack.c.bf16 %v2097_v58, %v2097_v58  ;;  %2417 = vrot.lane.b32.xlu2 %v10075_v6, %s9527_s27  ;;  %9269 = vpow2.f32 %v2061_v53 }
 0x658   : > { %7850 = vmatmul.msk.bf16.vlgmr.msrb.gmra.mxu0 %vm1045_vm1, %v2105_v28 }
 0x65b   : > { %v9268_v25 = vpop.eup %9267 }
 0x65c   : > { %v2095_v35 = vmul.f32 %v9268_v25, %v10350_v3  ;;  %v10415_v16 = vpop.eup %9269  ;;  %v2083_v42 = vpop.xlane.xlu1 %2082 }
 0x65d   : > { %v2084_v6 = vsel %vm1045_vm1, %v10415_v16, 0.0 }
 0x65e   : > { %v2103_v9 = vpack.c.bf16 %v2095_v35, %v2095_v35  ;;  %2567 = vrot.lane.b32.xlu2 %v10053_v41, %s9527_s27 }
 0x660   : > { %7848 = vmatmul.msk.bf16.vlgmr.msrb.gmra.mxu2 %vm1045_vm1, %v2103_v9 }
 0x661   : > { %2296 = vmatpush.bf16.xpose.msrb.mxu2 %v2287_v26 }
 0x66c   : > { %2085 = vadd.xlane.f32.xlu0 %v2084_v6 }
 0x674   : > { %v2303_v19 = vpop.permute.xlu1 %2302 }
 0x67c   : > { %v2259_v3 = vpop.permute.xlu1 %2258 }
 0x67d   : > { %v2264_v43 = vsel %vm1145_vm2, %v2259_v3, 0 }
 0x67e   : > { %2273 = vmatpush.bf16.msrb.mxu1 %v2264_v43 }
 0x680   : > { %2396 = vrot.lane.b32.xlu0 %v9935_v37, %s9527_s27 }
 0x681   : > { %v2074_v41 = vpop.xlane.xlu2 %2073 }
 0x682   : > { %9271 = vrcp.f32 %v2074_v41 }
 0x683   : > { %9273 = vrcp.f32 %v2083_v42 }
 0x684   : > { %v2351_v12 = vpop.permute.xlu1 %2350 }
 0x685   : > { %v2356_v61 = vsel %vm884_vm0, %v2351_v12, 0 }
 0x688   : > { %v9272_v4 = vpop.eup %9271  ;;  %2442 = vrot.lane.b32.xlu0 %v10065_v49, %s9527_s27 }
 0x689   : > { %v2098_v48 = vmul.f32 %v9272_v4, %v10362_v47  ;;  %v2280_v46 = vpop.permute.xlu2 %2279  ;;  %v2068_v60 = vpop.xlane.xlu0 %2067 }
 0x68a   : > { %9275 = vrcp.f32 %v2068_v60  ;;  %v9274_v27 = vpop.eup %9273 }
 0x68b   : > { %v2106_v0 = vpack.c.bf16 %v2098_v48, %v2098_v48  ;;  %v2101_v38 = vmul.f32 %v9274_v27, %v10354_v52 }
 0x68c   : > { %v2326_v20 = vpop.permute.xlu1 %2325 }
 0x68d   : > { %7851 = vmatmul.msk.bf16.vlgmr.msra.gmra.mxu1 %vm1045_vm1, %v2106_v0  ;;  %v2109_v45 = vpack.c.bf16 %v2101_v38, %v2101_v38 }
 0x68e   : > { %2365 = vmatpush.bf16.xpose.msra.mxu1 %v2356_v61 }
 0x690   : > { %v9276_v37 = vpop.eup %9275 }
 0x691   : > { %v2096_v30 = vmul.f32 %v9276_v37, %v10368_v33  ;;  %v2238_v44 = vpop.permute.xlu2 %2237 }
 0x692   : > { %v2243_v49 = vsel %vm1145_vm2, %v2238_v44, 0 }
 0x693   : > { %v2104_v47 = vpack.c.bf16 %v2096_v30, %v2096_v30  ;;  %2252 = vmatpush.bf16.msra.mxu0 %v2243_v49 }
 0x694   : > { %v2372_v11 = vpop.permute.xlu1 %2371 }
 0x695   : > { %7849 = vmatmul.msk.bf16.vlgmr.msrb.gmra.mxu3 %vm1045_vm1, %v2104_v47 }
 0x696   : > { %7854 = vmatmul.msk.bf16.vlgmr.msra.gmra.mxu0 %vm1045_vm1, %v2109_v45 }
 0x699   : > { %v2328_v8 = vpop.permute.xlu2 %2327  ;;  %v2077_v21 = vpop.xlane.xlu0 %2076 }
 0x69a   : > { %v2333_v58 = vsel %vm884_vm0, %v2328_v8, 0  ;;  %9277 = vrcp.f32 %v2077_v21 }
 0x69b   : > { %2342 = vmatpush.bf16.xpose.msrb.mxu0 %v2333_v58 }
 0x69c   : > { %v2420_v52 = vpop.permute.xlu1 %2419 }
 0x69d   : > { %v2425_v33 = vsel %vm884_vm0, %v2420_v52, 0 }
 0x6a0   : > { %v9278_v32 = vpop.eup %9277 }
 0x6a1   : > { %v2099_v28 = vmul.f32 %v9278_v32, %v10379_v50  ;;  %v2374_v17 = vpop.permute.xlu2 %2373  ;;  %v2080_v25 = vpop.xlane.xlu0 %2079 }
 0x6a2   : > { %9279 = vrcp.f32 %v2080_v25  ;;  %v2379_v53 = vsel %vm884_vm0, %v2374_v17, 0 }
 0x6a3   : > { %2434 = vmatpush.bf16.xpose.msra.mxu0 %v2425_v33  ;;  %v2107_v35 = vpack.c.bf16 %v2099_v28, %v2099_v28 }
 0x6a4   : > { %v2441_v44 = vpop.permute.xlu1 %2440 }
 0x6a5   : > { %7852 = vmatmul.msk.bf16.vlgmr.msra.gmra.mxu2 %vm1045_vm1, %v2107_v35 }
 0x6a6   : > { %2388 = vmatpush.bf16.xpose.msra.mxu2 %v2379_v53  ;;  %7858 = vmatmul.msk.bf16.vlgmr.msrb.gmra.mxu0 %vm884_vm0, %v2326_v20 }
 0x6a8   : > { %v9280_v9 = vpop.eup %9279 }
 0x6a9   : > { %v2100_v26 = vmul.f32 %v9280_v9, %v10385_v57  ;;  %v2349_v6 = vpop.permute.xlu2 %2348 }
 0x6ab   : > { %v2108_v42 = vpack.c.bf16 %v2100_v26, %v2100_v26 }
 0x6ad   : > { %7853 = vmatmul.msk.bf16.vlgmr.msra.gmra.mxu3 %vm1045_vm1, %v2108_v42 }
 0x6b1   : > { %v2395_v3 = vpop.permute.xlu2 %2394 }
 0x6b4   : > { %v2305_v50 = vpop.permute.xlu0 %2304 }
 0x6b5   : > { %v2310_v43 = vsel %vm884_vm0, %v2305_v50, 0  ;;  %7856 = vmatmul.msk.bf16.vlgmr.msrb.gmra.mxu2 %vm884_vm0, %v2280_v46 }
 0x6b6   : > { %2319 = vmatpush.bf16.xpose.msrb.mxu3 %v2310_v43 }
 0x6b9   : > { %v2418_v41 = vpop.permute.xlu2 %2417 }
 0x6ba   : > { %7862 = vmatmul.msk.bf16.vlgmr.msra.gmra.mxu0 %vm884_vm0, %v2418_v41 }
 0x6bd   : > { %7857 = vmatmul.msk.bf16.vlgmr.msrb.gmra.mxu3 %vm884_vm0, %v2303_v19 }
 0x6c1   : > { %v2568_v12 = vpop.permute.xlu2 %2567 }
 0x6c2   : > { %v2573_v4 = vsel %vm1145_vm2, %v2568_v12, 0 }
 0x6c3   : > { %2582 = vmatpush.bf16.msrb.mxu2 %v2573_v4 }
 0x6c5   : > { %7860 = vmatmul.msk.bf16.vlgmr.msra.gmra.mxu2 %vm884_vm0, %v2372_v11 }
 0x6d5   : > { %v10446_v57 = vpop.f32.mrf.mxu0 }
 0x6dd   : > { %v2172_v48 = vpop.f32.mrf.mxu0 }
 0x6df   : > { %v2086_v60 = vpop.xlane.xlu0 %2085 }
 0x6e0   : > { %9281 = vrcp.f32 %v2086_v60 }
 0x6e3   : > { %v10448_v0 = vpop.f32.mrf.mxu2 }
 0x6e6   : > { %v9282_v46 = vpop.eup %9281 }
 0x6e7   : > { %v2102_v20 = vmul.f32 %v9282_v46, %v10415_v16 }
 0x6e9   : > { %v2110_v27 = vpack.c.bf16 %v2102_v20, %v2102_v20 }
 0x6eb   : > { %v2130_v61 = vpop.f32.mrf.mxu2  ;;  %7855 = vmatmul.msk.bf16.vlgmr.msrb.gmra.mxu1 %vm1045_vm1, %v2110_v27 }
 0x6f2   : > { %v2397_v19 = vpop.permute.xlu0 %2396 }
 0x6f3   : > { %v2402_v37 = vsel %vm884_vm0, %v2397_v19, 0 }
 0x6f4   : > { %2411 = vmatpush.bf16.xpose.msra.mxu3 %v2402_v37 }
 0x6fa   : > { %v2443_v38 = vpop.permute.xlu0 %2442 }
 0x6fb   : > { %v2448_v30 = vsel %vm884_vm0, %v2443_v38, 0  ;;  %7859 = vmatmul.msk.bf16.vlgmr.msra.gmra.mxu1 %vm884_vm0, %v2349_v6  ;;  %7861 = vmatmul.msk.bf16.vlgmr.msra.gmra.mxu3 %vm884_vm0, %v2395_v3 }
 0x6fc   : > { %2457 = vmatpush.bf16.xpose.msrb.mxu1 %v2448_v30 }
 0x70a   : > { %v10456_v49 = vpop.f32.mrf.mxu1 }
 0x70b   : > { %v9075_v16 = vpack.i.bf16 %v10456_v49, %v10446_v57  ;;  %7863 = vmatmul.msk.bf16.vlgmr.msrb.gmra.mxu1 %vm884_vm0, %v2441_v44  ;;  %v8858_v49 = vld [vmem:[%s12996_s3 + $0x38] sm:$0xff] }
 0x712   : > { %v2193_v47 = vpop.f32.mrf.mxu1 }
 0x713   : > { %v10461_v45 = vpop.f32.mrf.mxu0 }
 0x718   : > { %v10463_v11 = vpop.f32.mrf.mxu3 }
 0x719   : > { %v9060_v8 = vpack.i.bf16 %v10463_v11, %v10448_v0 }
 0x71b   : > { %v2256_v21 = vpop.f32.mrf.mxu0 }
 0x720   : > { %v2151_v58 = vpop.f32.mrf.mxu3 }
 0x723   : > { %v2344_v52 = vpop.f32.mrf.mxu0 }
 0x724   : > { %v2465_v33 = vmul.f32 0.17677669, %v2344_v52 }
 0x726   : > { %v2477_v32 = vsel %vm1045_vm1, %v2465_v33, -inf }
 0x727   : > { %2478 = vmax.xlane.f32.xlu1 %v2477_v32 }
 0x728   : > { %v10468_v28 = vpop.f32.mrf.mxu2 }
 0x72b   : > { %v2346_v17 = vpop.f32.mrf.mxu0 }
 0x730   : > { %v2214_v25 = vpop.f32.mrf.mxu2  ;;  %v10470_v35 = vpop.f32.mrf.mxu3 }
 0x731   : > { %v9090_v53 = vpack.i.bf16 %v10470_v35, %v10468_v28  ;;  %v8856_v28 = vld [vmem:[%s12996_s3 + $0x28] sm:$0xff]  ;;  %v8854_v35 = vld [vmem:[%s12996_s3 + $0x18] sm:$0xff] }
 0x737   : > { %v2436_v9 = vpop.f32.mrf.mxu0 }
 0x738   : > { %v10474_v26 = vmul.f32 0.17677669, %v2436_v9  ;;  %v2235_v6 = vpop.f32.mrf.mxu3  ;;  %v2298_v42 = vpop.f32.mrf.mxu2 }
 0x739   : > { %v2463_v9 = vmul.f32 0.17677669, %v2298_v42 }
 0x73a   : > { %v2489_v3 = vsel %vm1045_vm1, %v10474_v26, -inf }
 0x73b   : > { %2490 = vmax.xlane.f32.xlu1 %v2489_v3  ;;  %v2471_v3 = vsel %vm1045_vm1, %v2463_v9, -inf }
 0x73f   : > { %v2438_v50 = vpop.f32.mrf.mxu0 }
 0x740   : > { %v2300_v43 = vpop.f32.mrf.mxu2  ;;  %v2321_v41 = vpop.f32.mrf.mxu3 }
 0x741   : > { %v2464_v12 = vmul.f32 0.17677669, %v2321_v41 }
 0x743   : > { %v2474_v4 = vsel %vm1045_vm1, %v2464_v12, -inf }
 0x744   : > { %2475 = vmax.xlane.f32.xlu2 %v2474_v4 }
 0x748   : > { %v2323_v48 = vpop.f32.mrf.mxu3  ;;  %v2390_v60 = vpop.f32.mrf.mxu2 }
 0x749   : > { %v2467_v46 = vmul.f32 0.17677669, %v2390_v60 }
 0x74b   : > { %v2483_v20 = vsel %vm1045_vm1, %v2467_v46, -inf }
 0x74c   : > { %2484 = vmax.xlane.f32.xlu2 %v2483_v20 }
 0x750   : > { %v2392_v27 = vpop.f32.mrf.mxu2 }
 0x768   : > { %v10480_v61 = vpop.f32.mrf.mxu1 }
 0x770   : > { %v2277_v19 = vpop.f32.mrf.mxu1 }
 0x778   : > { %v2367_v37 = vpop.f32.mrf.mxu1 }
 0x779   : > { %v2466_v38 = vmul.f32 0.17677669, %v2367_v37 }
 0x77b   : > { %v2480_v30 = vsel %vm1045_vm1, %v2466_v38, -inf }
 0x77c   : > { %2481 = vmax.xlane.f32.xlu0 %v2480_v30 }
 0x77e   : > { %v2413_v44 = vpop.f32.mrf.mxu3 }
 0x77f   : > { %v2468_v47 = vmul.f32 0.17677669, %v2413_v44 }
 0x780   : > { %v2369_v21 = vpop.f32.mrf.mxu1 }
 0x781   : > { %v2486_v58 = vsel %vm1045_vm1, %v2468_v47, -inf }
 0x782   : > { %2487 = vmax.xlane.f32.xlu1 %v2486_v58 }
 0x786   : > { %v2415_v52 = vpop.f32.mrf.mxu3 }
 0x788   : > { %v2459_v32 = vpop.f32.mrf.mxu1 }
 0x789   : > { %v2470_v17 = vmul.f32 0.17677669, %v2459_v32 }
 0x78b   : > { %v2492_v25 = vsel %vm1045_vm1, %v2470_v17, -inf }
 0x78c   : > { %2493 = vmax.xlane.f32.xlu0 %v2492_v25 }
 0x790   : > { %v2461_v6 = vpop.f32.mrf.mxu1 }
 0x794   : > { %2472 = vmax.xlane.f32.xlu0 %v2471_v3 }
 0x79a   : > { %v2479_v4 = vpop.xlane.xlu1 %2478 }
 0x79b   : > { %2588 = vrot.lane.b32.xlu1 %v10140_v2, %s9527_s27  ;;  %v2497_v48 = vsub.f32 %v2465_v33, %v2479_v4 }
 0x79d   : > { %v2507_v42 = vmul.f32 1.442695, %v2497_v48 }
 0x7a8   : > { %2609 = vrot.lane.b32.xlu0 %v10159_v39, %s9527_s27 }
 0x7ae   : > { %v2491_v39 = vpop.xlane.xlu1 %2490 }
 0x7b7   : > { %v2476_v50 = vpop.xlane.xlu2 %2475 }
 0x7b8   : > { %v2496_v43 = vsub.f32 %v2464_v12, %v2476_v50 }
 0x7ba   : > { %v2505_v41 = vmul.f32 1.442695, %v2496_v43 }
 0x7bc   : > { %9283 = vpow2.f32 %v2505_v41 }
 0x7bd   : > { %9285 = vpow2.f32 %v2507_v42 }
 0x7bf   : > { %v2485_v52 = vpop.xlane.xlu2 %2484 }
 0x7c2   : > { %v9284_v60 = vpop.eup %9283 }
 0x7c3   : > { %v2522_v20 = vsel %vm1045_vm1, %v9284_v60, 0.0  ;;  %v10491_v27 = vpop.eup %9285 }
 0x7c4   : > { %2523 = vadd.xlane.f32.xlu2 %v2522_v20  ;;  %v2525_v2 = vsel %vm1045_vm1, %v10491_v27, 0.0 }
 0x7d2   : > { %2526 = vadd.xlane.f32.xlu0 %v2525_v2 }
 0x7dc   : > { %2630 = vrot.lane.b32.xlu2 %v10164_v15, %s9527_s27  ;;  %v2499_v15 = vsub.f32 %v2467_v46, %v2485_v52 }
 0x7ef   : > { %v2482_v12 = vpop.xlane.xlu0 %2481 }
 0x7f0   : > { %v2498_v19 = vsub.f32 %v2466_v38, %v2482_v12 }
 0x7f2   : > { %v2509_v37 = vmul.f32 1.442695, %v2498_v19 }
 0x7f4   : > { %9287 = vpow2.f32 %v2509_v37 }
 0x7f5   : > { %v2488_v33 = vpop.xlane.xlu1 %2487 }
 0x7f6   : > { %v2500_v30 = vsub.f32 %v2468_v47, %v2488_v33  ;;  %v2511_v47 = vmul.f32 1.442695, %v2499_v15 }
 0x7f8   : > { %v2513_v44 = vmul.f32 1.442695, %v2500_v30 }
 0x7fa   : > { %v10497_v21 = vpop.eup %9287  ;;  %9289 = vpow2.f32 %v2513_v44 }
 0x7fb   : > { %v2528_v58 = vsel %vm1045_vm1, %v10497_v21, 0.0 }
 0x7fc   : > { %2529 = vadd.xlane.f32.xlu0 %v2528_v58 }
 0x7ff   : > { %v2494_v32 = vpop.xlane.xlu0 %2493 }
 0x800   : > { %v2502_v25 = vsub.f32 %v2470_v17, %v2494_v32  ;;  %v10501_v6 = vpop.eup %9289  ;;  %v9100_v32 = vpack.i.bf16 %v10328_v18, %v10296_v14 }
 0x801   : > { %v2534_v38 = vsel %vm1045_vm1, %v10501_v6, 0.0 }
 0x802   : > { %v2517_v3 = vmul.f32 1.442695, %v2502_v25 }
 0x804   : > { %9291 = vpow2.f32 %v2517_v3 }
 0x805   : > { %2535 = vadd.xlane.f32.xlu2 %v2534_v38  ;;  %9293 = vpow2.f32 %v2511_v47 }
 0x807   : > { %v2473_v50 = vpop.xlane.xlu0 %2472 }
 0x808   : > { %v2495_v43 = vsub.f32 %v2463_v9, %v2473_v50 }
 0x80a   : > { %v10505_v41 = vpop.eup %9291  ;;  %v2503_v4 = vmul.f32 1.442695, %v2495_v43 }
 0x80b   : > { %v2540_v48 = vsel %vm1045_vm1, %v10505_v41, 0.0  ;;  %v10510_v20 = vpop.eup %9293 }
 0x80c   : > { %9295 = vpow2.f32 %v2503_v4  ;;  %2541 = vadd.xlane.f32.xlu1 %v2540_v48  ;;  %v2531_v9 = vsel %vm1045_vm1, %v10510_v20, 0.0 }
 0x80d   : > { %v2589_v17 = vpop.permute.xlu1 %2588 }
 0x80e   : > { %v2594_v46 = vsel %vm1145_vm2, %v2589_v17, 0 }
 0x80f   : > { %2603 = vmatpush.bf16.msrb.mxu3 %v2594_v46 }
 0x812   : > { %v9296_v42 = vpop.eup %9295 }
 0x813   : > { %v2519_v2 = vsel %vm1045_vm1, %v9296_v42, 0.0 }
 0x814   : > { %2520 = vadd.xlane.f32.xlu0 %v2519_v2  ;;  %2532 = vadd.xlane.f32.xlu1 %v2531_v9 }
 0x81a   : > { %v2610_v12 = vpop.permute.xlu0 %2609 }
 0x81b   : > { %v2615_v19 = vsel %vm1145_vm2, %v2610_v12, 0 }
 0x81c   : > { %2624 = vmatpush.bf16.msrb.mxu0 %v2615_v19 }
 0x81d   : > { %2693 = vrot.lane.b32.xlu2 %v10219_v7, %s9527_s27 }
 0x825   : > { %9056 = vrot.lane.b32.xlu2 %v9055_v31, %s9527_s27 }
 0x828   : > { %2651 = vrot.lane.b32.xlu0 %v10146_v29, %s9527_s27 }
 0x82d   : > { %2714 = vrot.lane.b32.xlu1 %v10207_v55, %s9527_s27  ;;  %9071 = vrot.lane.b32.xlu2 %v9070_v34, %s9527_s27  ;;  %v2501_v55 = vsub.f32 %v10474_v26, %v2491_v39  ;;  %v9085_v26 = vpack.i.bf16 %v10318_v54, %v10298_v56 }
 0x82f   : > { %v2515_v59 = vmul.f32 1.442695, %v2501_v55 }
 0x830   : > { %2672 = vrot.lane.b32.xlu0 %v10150_v1, %s9527_s27 }
 0x837   : > { %v2524_v7 = vpop.xlane.xlu2 %2523 }
 0x838   : > { %9297 = vrcp.f32 %v2524_v7 }
 0x83e   : > { %v9298_v37 = vpop.eup %9297 }
 0x83f   : > { %v2552_v33 = vmul.f32 %v9298_v37, %v9284_v60  ;;  %v2631_v40 = vpop.permute.xlu2 %2630 }
 0x840   : > { %v2636_v24 = vsel %vm1145_vm2, %v2631_v40, 0 }
 0x841   : > { %v2560_v31 = vpack.c.bf16 %v2552_v33, %v2552_v33  ;;  %2645 = vmatpush.bf16.msra.mxu1 %v2636_v24 }
 0x843   : > { %7865 = vmatmul.msk.bf16.vlgmr.msrb.gmra.mxu3 %vm1045_vm1, %v2560_v31 }
 0x845   : > { %v2527_v29 = vpop.xlane.xlu0 %2526 }
 0x846   : > { %9299 = vrcp.f32 %v2527_v29 }
 0x847   : > { %9301 = vpow2.f32 %v2515_v59 }
 0x84c   : > { %v9300_v36 = vpop.eup %9299 }
 0x84d   : > { %v2553_v34 = vmul.f32 %v9300_v36, %v10491_v27  ;;  %v9302_v60 = vpop.eup %9301 }
 0x84e   : > { %v2537_v30 = vsel %vm1045_vm1, %v9302_v60, 0.0 }
 0x84f   : > { %v2561_v1 = vpack.c.bf16 %v2553_v34, %v2553_v34 }
 0x851   : > { %7866 = vmatmul.msk.bf16.vlgmr.msrb.gmra.mxu0 %vm1045_vm1, %v2561_v1 }
 0x85a   : > { %2538 = vadd.xlane.f32.xlu0 %v2537_v30 }
 0x86e   : > { %9061 = vrot.lane.b32.xlu0 %v9060_v8, %s9526_s26 }
 0x86f   : > { %v2530_v44 = vpop.xlane.xlu0 %2529 }
 0x870   : > { %9303 = vrcp.f32 %v2530_v44 }
 0x876   : > { %v9304_v39 = vpop.eup %9303  ;;  %9086 = vrot.lane.b32.xlu0 %v9085_v26, %s9527_s27 }
 0x877   : > { %v2554_v27 = vmul.f32 %v9304_v39, %v10497_v21  ;;  %v9105_v39 = vpack.i.bf16 %v10480_v61, %v10461_v45  ;;  %v8855_v45 = vld [vmem:[%s12996_s3 + $0x20] sm:$0xff] }
 0x878   : > { %v2536_v58 = vpop.xlane.xlu2 %2535 }
 0x879   : > { %v2562_v52 = vpack.c.bf16 %v2554_v27, %v2554_v27 }
 0x87b   : > { %7867 = vmatmul.msk.bf16.vlgmr.msra.gmra.mxu1 %vm1045_vm1, %v2562_v52  ;;  %v8852_v52 = vld [vmem:[%s12996_s3 + $0x8] sm:$0xff] }
 0x87e   : > { %9101 = vrot.lane.b32.xlu0 %v9100_v32, %s9527_s27  ;;  %v8851_v32 = vld [vmem:[%s12996_s3] sm:$0xff] }
 0x87f   : > { %v2542_v8 = vpop.xlane.xlu1 %2541 }
 0x880   : > { %v2694_v0 = vpop.permute.xlu2 %2693 }
 0x881   : > { %v2699_v11 = vsel %vm1145_vm2, %v2694_v0, 0 }
 0x882   : > { %2708 = vmatpush.bf16.msra.mxu0 %v2699_v11 }
 0x887   : > { %v2521_v56 = vpop.xlane.xlu0 %2520  ;;  %v2533_v21 = vpop.xlane.xlu1 %2532 }
 0x888   : > { %9305 = vrcp.f32 %v2521_v56  ;;  %v9057_v0 = vpop.permute.xlu2 %9056 }
 0x889   : > { %9307 = vrcp.f32 %v2533_v21  ;;  %v9058_v56 = vunpack.i.l.bf16 %v9057_v0 }
 0x88a   : > { %9309 = vrcp.f32 %v2542_v8  ;;  %v9059_v8 = vunpack.i.h.bf16 %v9057_v0 }
 0x88b   : > { %9311 = vrcp.f32 %v2536_v58 }
 0x88c   : > { %v2832_v21 = vsel %vm884_vm0, %v10108_v5, %v9059_v8  ;;  %v9175_v8 = vld [vmem:[%s12997_s4] ss:$0 sm:$0xff] }
 0x88e   : > { %v9306_v54 = vpop.eup %9305 }
 0x88f   : > { %v2551_v25 = vmul.f32 %v9306_v54, %v9296_v42  ;;  %v9308_v3 = vpop.eup %9307 }
 0x890   : > { %v9310_v18 = vpop.eup %9309  ;;  %v2555_v47 = vmul.f32 %v9308_v3, %v10510_v20  ;;  %v2831_v3 = vsel %vm884_vm0, %v10103_v10, %v9058_v56 }
 0x891   : > { %v2559_v15 = vpack.c.bf16 %v2551_v25, %v2551_v25  ;;  %v9312_v50 = vpop.eup %9311  ;;  %v2558_v43 = vmul.f32 %v9310_v18, %v10505_v41 }
 0x892   : > { %v2556_v17 = vmul.f32 %v9312_v50, %v10501_v6  ;;  %v2563_v46 = vpack.c.bf16 %v2555_v47, %v2555_v47 }
 0x893   : > { %7864 = vmatmul.msk.bf16.vlgmr.msrb.gmra.mxu2 %vm1045_vm1, %v2559_v15  ;;  %v2566_v42 = vpack.c.bf16 %v2558_v43, %v2558_v43 }
 0x894   : > { %v2564_v20 = vpack.c.bf16 %v2556_v17, %v2556_v17 }
 0x89a   : > { %v2652_v14 = vpop.permute.xlu0 %2651 }
 0x89b   : > { %v2657_v38 = vsel %vm1145_vm2, %v2652_v14, 0 }
 0x89c   : > { %2666 = vmatpush.bf16.msra.mxu2 %v2657_v38 }
 0x89f   : > { %v2715_v4 = vpop.permute.xlu1 %2714 }
 0x8a0   : > { %v2720_v48 = vsel %vm1145_vm2, %v2715_v4, 0  ;;  %2912 = vmatpush.bf16.msrb.mxu2 %v8858_v49  ;;  %v9072_v4 = vpop.permute.xlu2 %9071 }
 0x8a1   : > { %2729 = vmatpush.bf16.msrb.mxu1 %v2720_v48 }
 0x8a2   : > { %v2673_v2 = vpop.permute.xlu0 %2672 }
 0x8a3   : > { %v2678_v9 = vsel %vm1145_vm2, %v2673_v2, 0  ;;  %7868 = vmatmul.msk.bf16.vlgmr.msra.gmra.mxu2 %vm1045_vm1, %v2563_v46  ;;  %v9074_v46 = vunpack.i.h.bf16 %v9072_v4 }
 0x8a4   : > { %2687 = vmatpush.bf16.msra.mxu3 %v2678_v9  ;;  %7871 = vmatmul.msk.bf16.vlgmr.msrb.gmra.mxu1 %vm1045_vm1, %v2566_v42  ;;  %v9073_v42 = vunpack.i.l.bf16 %v9072_v4 }
 0x8a5   : > { %v2834_v10 = vsel %vm884_vm0, %v10116_v51, %v9074_v46 }
 0x8a7   : > { %7869 = vmatmul.msk.bf16.vlgmr.msra.gmra.mxu3 %vm1045_vm1, %v2564_v20  ;;  %v2833_v20 = vsel %vm884_vm0, %v10111_v62, %v9073_v42 }
 0x8c6   : > { %v2605_v41 = vpop.f32.mrf.mxu3 }
 0x8cd   : > { %v2539_v12 = vpop.xlane.xlu0 %2538 }
 0x8ce   : > { %9313 = vrcp.f32 %v2539_v12  ;;  %v2607_v19 = vpop.f32.mrf.mxu3  ;;  %v2626_v7 = vpop.f32.mrf.mxu0 }
 0x8d4   : > { %v9314_v6 = vpop.eup %9313 }
 0x8d5   : > { %v2557_v37 = vmul.f32 %v9314_v6, %v9302_v60 }
 0x8d6   : > { %v2628_v33 = vpop.f32.mrf.mxu0 }
 0x8d7   : > { %v2565_v40 = vpack.c.bf16 %v2557_v37, %v2557_v37 }
 0x8d9   : > { %7870 = vmatmul.msk.bf16.vlgmr.msra.gmra.mxu0 %vm1045_vm1, %v2565_v40 }
 0x8e0   : > { %v9062_v11 = vpop.permute.xlu0 %9061 }
 0x8e1   : > { %v9064_v54 = vunpack.i.h.bf16 %v9062_v11  ;;  %v9063_v25 = vunpack.i.l.bf16 %v9062_v11 }
 0x8e3   : > { %v2840_v38 = vsel %vm2839_vm3, %v2831_v3, %v9063_v25  ;;  %v2841_v47 = vsel %vm2839_vm3, %v2832_v21, %v9064_v54  ;;  %v9509_v54 = vld [vmem:[%s9710_s22] sm:$0xff]  ;;  %v9510_v21 = vld [vmem:[%s9710_s22 + $0x8] sm:$0xff] }
 0x8e8   : > { %v9087_v40 = vpop.permute.xlu0 %9086 }
 0x8f8   : > { %v2647_v24 = vpop.f32.mrf.mxu1 }
 0x8f9   : > { %v9080_v31 = vpack.i.bf16 %v2647_v24, %v2626_v7 }
 0x8fb   : > { %9081 = vrot.lane.b32.xlu2 %v9080_v31, %s9525_s30  ;;  %v9089_v31 = vunpack.i.h.bf16 %v9087_v40 }
 0x8fd   : > { %v2836_v62 = vsel %vm884_vm0, %v10122_v63, %v9089_v31 }
 0x900   : > { %v2649_v29 = vpop.f32.mrf.mxu1 }
 0x901   : > { %v9088_v29 = vunpack.i.l.bf16 %v9087_v40 }
 0x916   : > { %v2584_v55 = vpop.f32.mrf.mxu2 }
 0x917   : > { %v9065_v36 = vpack.i.bf16 %v2605_v41, %v2584_v55 }
 0x919   : > { %9066 = vrot.lane.b32.xlu1 %v9065_v36, %s9525_s30 }
 0x91e   : > { %v2586_v59 = vpop.f32.mrf.mxu2 }
 0x91f   : > { %v2835_v59 = vsel %vm884_vm0, %v10118_v13, %v9088_v29 }
 0x921   : > { %9076 = vrot.lane.b32.xlu1 %v9075_v16, %s9526_s26  ;;  %v2731_v34 = vpop.f32.mrf.mxu1  ;;  %v8857_v16 = vld [vmem:[%s12996_s3 + $0x30] sm:$0xff] }
 0x922   : > { %2913 = vmatpush.bf16.msrb.mxu2 %v8857_v16 }
 0x926   : > { %v2668_v1 = vpop.f32.mrf.mxu2  ;;  %2914 = vmatpush.bf16.msrb.mxu2 %v8856_v28 }
 0x929   : > { %9091 = vrot.lane.b32.xlu1 %v9090_v53, %s9526_s26  ;;  %v2733_v60 = vpop.f32.mrf.mxu1  ;;  %v8853_v53 = vld [vmem:[%s12996_s3 + $0x10] sm:$0xff] }
 0x92a   : > { %v2689_v30 = vpop.f32.mrf.mxu3  ;;  %2915 = vmatpush.bf16.msrb.mxu2 %v8855_v45 }
 0x92b   : > { %v9095_v44 = vpack.i.bf16 %v2689_v30, %v2668_v1 }
 0x92d   : > { %9096 = vrot.lane.b32.xlu2 %v9095_v44, %s9525_s30 }
 0x92e   : > { %v2670_v26 = vpop.f32.mrf.mxu2  ;;  %2916 = vmatpush.bf16.msrb.mxu2 %v8854_v35 }
 0x931   : > { %9106 = vrot.lane.b32.xlu1 %v9105_v39, %s9526_s26 }
 0x932   : > { %v2691_v57 = vpop.f32.mrf.mxu3  ;;  %2917 = vmatpush.bf16.msrb.mxu2 %v8853_v53 }
 0x933   : > { %v9102_v57 = vpop.permute.xlu0 %9101 }
 0x934   : > { %v9104_v28 = vunpack.i.h.bf16 %v9102_v57  ;;  %v9103_v63 = vunpack.i.l.bf16 %v9102_v57 }
 0x936   : > { %2918 = vmatpush.bf16.msrb.mxu2 %v8852_v52 }
 0x93a   : > { %2919 = vmatpush.bf16.msrb.mxu2 %v8851_v32 }
 0x955   : > { %v9082_v9 = vpop.permute.xlu2 %9081 }
 0x956   : > { %v2710_v61 = vpop.f32.mrf.mxu0  ;;  %v9084_v19 = vunpack.i.h.bf16 %v9082_v9  ;;  %v9083_v7 = vunpack.i.l.bf16 %v9082_v9 }
 0x957   : > { %v9110_v27 = vpack.i.bf16 %v2731_v34, %v2710_v61  ;;  %v2838_v61 = vsel %vm884_vm0, %v10120_v23, %v9104_v28 }
 0x959   : > { %9111 = vrot.lane.b32.xlu2 %v9110_v27, %s9525_s30  ;;  %v2837_v27 = vsel %vm884_vm0, %v10124_v22, %v9103_v63 }
 0x95e   : > { %v2712_v58 = vpop.f32.mrf.mxu0 }
 0x987   : > { %v9097_v36 = vpop.permute.xlu2 %9096 }
 0x988   : > { %v9099_v60 = vunpack.i.h.bf16 %v9097_v36  ;;  %v9098_v30 = vunpack.i.l.bf16 %v9097_v36 }
 0x98b   : > { %v9067_v15 = vpop.permute.xlu1 %9066 }
 0x98c   : > { %v9069_v14 = vunpack.i.h.bf16 %v9067_v15  ;;  %v9068_v18 = vunpack.i.l.bf16 %v9067_v15 }
 0x98e   : > { %v2850_v50 = vsel %vm2848_vm4, %v2841_v47, %v9069_v14  ;;  %v2849_v43 = vsel %vm2848_vm4, %v2840_v38, %v9068_v18  ;;  %v9511_v38 = vld [vmem:[%s9710_s22 + $0x10] sm:$0xff] }
 0x98f   : > { %v2857_v48 = vpack.c.bf16 %v2850_v50, %v2849_v43 }
 0x991   : > { %2920 = vmatmul.bf16.vlgmr.msrb.gmra.mxu2 %v2857_v48  ;;  %v9512_v48 = vld [vmem:[%s9710_s22 + $0x20] sm:$0xff] }
 0x993   : > { %v9077_v17 = vpop.permute.xlu1 %9076 }
 0x994   : > { %v9079_v5 = vunpack.i.h.bf16 %v9077_v17  ;;  %v9078_v2 = vunpack.i.l.bf16 %v9077_v17 }
 0x996   : > { %v2842_v41 = vsel %vm2839_vm3, %v2833_v20, %v9078_v2  ;;  %v2843_v12 = vsel %vm2839_vm3, %v2834_v10, %v9079_v5  ;;  %v9513_v5 = vld [vmem:[%s9710_s22 + $0x28] sm:$0xff]  ;;  %v9514_v20 = vld [vmem:[%s9710_s22 + $0x30] sm:$0xff] }
 0x997   : > { %v2851_v6 = vsel %vm2848_vm4, %v2842_v41, %v9083_v7  ;;  %v2852_v37 = vsel %vm2848_vm4, %v2843_v12, %v9084_v19 }
 0x998   : > { %v2858_v33 = vpack.c.bf16 %v2852_v37, %v2851_v6  ;;  %v9515_v6 = vld [vmem:[%s9710_s22 + $0x18] sm:$0xff] }
 0x99b   : > { %v9092_v24 = vpop.permute.xlu1 %9091 }
 0x99c   : > { %v9094_v51 = vunpack.i.h.bf16 %v9092_v24  ;;  %v9093_v55 = vunpack.i.l.bf16 %v9092_v24  ;;  %v9528_v24 = vmov 128.0  }
 0x99d   : > { %9315 = vrcp.f32 %v9528_v24  ;;  %v7996_v24 = vld [vmem:[%s13000_s7 + $0xb8] sm:$0xf0] }
 0x99e   : > { %v2844_v34 = vsel %vm2839_vm3, %v2835_v59, %v9093_v55  ;;  %v2845_v1 = vsel %vm2839_vm3, %v2836_v62, %v9094_v51 }
 0x99f   : > { %v2853_v44 = vsel %vm2848_vm4, %v2844_v34, %v9098_v30  ;;  %v2854_v26 = vsel %vm2848_vm4, %v2845_v1, %v9099_v60 }
 0x9a0   : > { %v2859_v39 = vpack.c.bf16 %v2854_v26, %v2853_v44 }
 0x9a1   : > { %2925 = vmatmul.bf16.gmra.mxu2 %v2858_v33  ;;  %v9516_v33 = vld [vmem:[%s9710_s22 + $0x38] sm:$0xff]  ;;  %s8826_s22 = sshll.u32 %s13045_s23, 4 }
 0x9a2   : > { %s12972_s28 = scalar_lea.vmem %s13007_s14, %s8826_s22 }
 0x9a3   : > { %v9107_v49 = vpop.permute.xlu1 %9106  ;;  %v9316_v31 = vpop.eup %9315 }
 0x9a4   : > { %v9109_v45 = vunpack.i.h.bf16 %v9107_v49  ;;  %v9108_v13 = vunpack.i.l.bf16 %v9107_v49  ;;  %v2966_v29 = vmul.f32 128.0, %v9316_v31  ;;  %vm2970_vm5 = vweird.f32 %v9316_v31 }
 0x9a6   : > { %v2846_v58 = vsel %vm2839_vm3, %v2837_v27, %v9108_v13  ;;  %v2847_v52 = vsel %vm2839_vm3, %v2838_v61, %v9109_v45  ;;  %v2967_v51 = vsub.f32 1.0, %v2966_v29 }
 0x9a8   : > { %v2968_v55 = vmul.f32 %v9316_v31, %v2967_v51 }
 0x9aa   : > { %v2969_v36 = vadd.f32 %v9316_v31, %v2968_v55  ;;  %v7970_v55 = vld [vmem:[%s13000_s7 + $0x80] sm:$0xf] }
 0x9ac   : > { %v10644_v62 = vsel %vm2970_vm5, %v9316_v31, %v2969_v36  ;;  %v8877_v36 = vld [vmem:[%s13000_s7 + $0x8c] sm:$0xf0] }
 0x9ad   : > { %13018 = vst [vmem:[#allocation2_spill] sm:$0xff] %v10644_v62 }
 0x9b1   : > { %2930 = vmatmul.bf16.gmra.mxu2 %v2859_v39 }
 0x9b3   : > { %v9112_v16 = vpop.permute.xlu2 %9111 }
 0x9b4   : > { %v9114_v35 = vunpack.i.h.bf16 %v9112_v16  ;;  %v9113_v53 = vunpack.i.l.bf16 %v9112_v16 }
 0x9b6   : > { %v2855_v32 = vsel %vm2848_vm4, %v2846_v58, %v9113_v53  ;;  %v2856_v0 = vsel %vm2848_vm4, %v2847_v52, %v9114_v35 }
 0x9b7   : > { %v2860_v11 = vpack.c.bf16 %v2856_v0, %v2855_v32 }
 0x9c1   : > { %2935 = vmatmul.bf16.gmra.mxu2 %v2860_v11 }
 0xa14   : > { %v2921_v23 = vpop.f32.mrf.mxu2 }
 0xa15   : > { %v2922_v56 = vadd.f32 %v9175_v8, %v2921_v23 }
 0xa17   : > { %v2941_v22 = vadd.f32 %v9509_v54, %v2922_v56 }
 0xa19   : > { %2949 = vadd.xlane.f32.xlu2 %v2941_v22 }
 0xa1c   : > { %v2923_v25 = vpop.f32.mrf.mxu2 }
 0xa1d   : > { %v2924_v15 = vadd.f32 %v9175_v8, %v2923_v25 }
 0xa1f   : > { %v2942_v3 = vadd.f32 %v9510_v21, %v2924_v15 }
 0xa21   : > { %2951 = vadd.xlane.f32.xlu2 %v2942_v3 }
 0xa24   : > { %v2926_v14 = vpop.f32.mrf.mxu2 }
 0xa25   : > { %v2927_v18 = vadd.f32 %v9175_v8, %v2926_v14  ;;  %v8889_v14 = vld [vmem:[%s13000_s7 + $0xec] sm:$0xf0] }
 0xa27   : > { %v2943_v47 = vadd.f32 %v9511_v38, %v2927_v18  ;;  %v8887_v18 = vld [vmem:[%s13000_s7 + $0xe4] sm:$0xf] }
 0xa29   : > { %2953 = vadd.xlane.f32.xlu2 %v2943_v47 }
 0xa2c   : > { %v2928_v50 = vpop.f32.mrf.mxu2 }
 0xa2d   : > { %v2929_v12 = vadd.f32 %v9175_v8, %v2928_v50  ;;  %v8888_v50 = vld [vmem:[%s13000_s7 + $0xec] sm:$0xf] }
 0xa2f   : > { %v2944_v37 = vadd.f32 %v9515_v6, %v2929_v12  ;;  %v8879_v6 = vld [vmem:[%s13000_s7 + $0xa4] sm:$0xf] }
 0xa34   : > { %v2931_v43 = vpop.f32.mrf.mxu2 }
 0xa35   : > { %v2932_v4 = vadd.f32 %v9175_v8, %v2931_v43  ;;  %v8028_v43 = vld [vmem:[%s13000_s7 + $0xf8] sm:$0xf0] }
 0xa37   : > { %v2945_v17 = vadd.f32 %v9512_v48, %v2932_v4  ;;  %v8031_v48 = vor.u32 %v8888_v50, %v8028_v43  ;;  %v8863_v50 = vld [vmem:[%s13000_s7 + $0x24] sm:$0xf] }
 0xa39   : > { %2957 = vadd.xlane.f32.xlu0 %v2945_v17  ;;  %3398 = vmatpush.bf16.msra.mxu2 %v8031_v48  ;;  %v7924_v48 = vld [vmem:[%s13000_s7 + $0x30] sm:$0xf0] }
 0xa3c   : > { %v2933_v46 = vpop.f32.mrf.mxu2 }
 0xa3d   : > { %v2934_v42 = vadd.f32 %v9175_v8, %v2933_v46  ;;  %v8885_v46 = vld [vmem:[%s13000_s7 + $0xcc] sm:$0xf0] }
 0xa3f   : > { %v2946_v2 = vadd.f32 %v9513_v5, %v2934_v42  ;;  %v8883_v42 = vld [vmem:[%s13000_s7 + $0xc4] sm:$0xf] }
 0xa41   : > { %2959 = vadd.xlane.f32.xlu1 %v2946_v2 }
 0xa44   : > { %v2936_v9 = vpop.f32.mrf.mxu2 }
 0xa45   : > { %v2937_v10 = vadd.f32 %v9175_v8, %v2936_v9  ;;  %v8884_v9 = vld [vmem:[%s13000_s7 + $0xcc] sm:$0xf] }
 0xa47   : > { %v2947_v41 = vadd.f32 %v9514_v20, %v2937_v10  ;;  %v8012_v10 = vld [vmem:[%s13000_s7 + $0xd8] sm:$0xf0] }
 0xa49   : > { %2961 = vadd.xlane.f32.xlu0 %v2947_v41 }
 0xa4c   : > { %v2938_v19 = vpop.f32.mrf.mxu2 }
 0xa4d   : > { %v2939_v7 = vadd.f32 %v9175_v8, %v2938_v19  ;;  %v7986_v19 = vld [vmem:[%s13000_s7 + $0xa0] sm:$0xf] }
 0xa4f   : > { %v2948_v40 = vadd.f32 %v9516_v33, %v2939_v7  ;;  %v8881_v7 = vld [vmem:[%s13000_s7 + $0xac] sm:$0xf0]  ;;  %v7988_v33 = vld [vmem:[%s13000_s7 + $0xb0] sm:$0xf0] }
 0xa50   : > { %v7991_v29 = vor.u32 %v8879_v6, %v7988_v33  ;;  %v8860_v6 = vld [vmem:[%s13000_s7 + $0xc] sm:$0xf] }
 0xa51   : > { %2963 = vadd.xlane.f32.xlu1 %v2948_v40  ;;  %2955 = vadd.xlane.f32.xlu0 %v2944_v37 }
 0xa8c   : > { %v2950_v59 = vpop.xlane.xlu2 %2949 }
 0xa8d   : > { %v2972_v34 = vmul.f32 %v10644_v62, %v2950_v59  ;;  %v7971_v59 = vor.u32 %v8877_v36, %v7970_v55 }
 0xa8f   : > { %v10647_v1 = vsub.f32 %v2941_v22, %v2972_v34  ;;  %v8875_v34 = vld [vmem:[%s13000_s7 + $0x84] sm:$0xf] }
 0xa91   : > { %v2988_v60 = vmul.f32 %v10647_v1, %v10647_v1 }
 0xa93   : > { %2996 = vadd.xlane.f32.xlu0 %v2988_v60  ;;  %v7972_v60 = vld [vmem:[%s13000_s7 + $0x90] sm:$0xf0] }
 0xa94   : > { %v2952_v30 = vpop.xlane.xlu2 %2951 }
 0xa95   : > { %v2973_v57 = vmul.f32 %v10644_v62, %v2952_v30  ;;  %v8876_v30 = vld [vmem:[%s13000_s7 + $0x8c] sm:$0xf] }
 0xa97   : > { %v10658_v63 = vsub.f32 %v2942_v3, %v2973_v57  ;;  %v8018_v3 = vld [vmem:[%s13000_s7 + $0xe0] sm:$0xf]  ;;  %v7980_v57 = vld [vmem:[%s13000_s7 + $0x98] sm:$0xf0] }
 0xa98   : > { %v8019_v38 = vor.u32 %v8889_v14, %v8018_v3 }
 0xa99   : > { %v2989_v61 = vmul.f32 %v10658_v63, %v10658_v63 }
 0xa9a   : > { %3311 = vmatpush.bf16.msrb.mxu3 %v8019_v38  ;;  %v7922_v38 = vld [vmem:[%s13000_s7 + $0x20] sm:$0xf] }
 0xa9c   : > { %v2954_v45 = vpop.xlane.xlu2 %2953 }
 0xa9d   : > { %v2974_v35 = vmul.f32 %v10644_v62, %v2954_v45  ;;  %v8871_v45 = vld [vmem:[%s13000_s7 + $0x64] sm:$0xf] }
 0xa9f   : > { %v10667_v58 = vsub.f32 %v2943_v47, %v2974_v35  ;;  %v8020_v47 = vld [vmem:[%s13000_s7 + $0xf0] sm:$0xf0] }
 0xaa0   : > { %v8023_v4 = vor.u32 %v8887_v18, %v8020_v47  ;;  %v8865_v47 = vld [vmem:[%s13000_s7 + $0x2c] sm:$0xf0] }
 0xaa1   : > { %v2990_v0 = vmul.f32 %v10667_v58, %v10667_v58 }
 0xaa2   : > { %3340 = vmatpush.bf16.msrb.mxu0 %v8023_v4  ;;  %9035 = vmatpush.bf16.msra.mxu1 %v8023_v4  ;;  %v7923_v4 = vor.u32 %v8865_v47, %v7922_v38 }
 0xaac   : > { %v2958_v44 = vpop.xlane.xlu0 %2957 }
 0xaad   : > { %v2976_v26 = vmul.f32 %v10644_v62, %v2958_v44 }
 0xaaf   : > { %v10652_v39 = vsub.f32 %v2945_v17, %v2976_v26  ;;  %v8002_v17 = vld [vmem:[%s13000_s7 + $0xc0] sm:$0xf]  ;;  %v7975_v26 = vor.u32 %v8875_v34, %v7972_v60 }
 0xab0   : > { %v8003_v5 = vor.u32 %v8885_v46, %v8002_v17  ;;  %v8864_v17 = vld [vmem:[%s13000_s7 + $0x2c] sm:$0xf]  ;;  %v7932_v46 = vld [vmem:[%s13000_s7 + $0x38] sm:$0xf0] }
 0xab1   : > { %v2992_v49 = vmul.f32 %v10652_v39, %v10652_v39 }
 0xab2   : > { %3312 = vmatpush.bf16.msrb.mxu3 %v8003_v5 }
 0xab3   : > { %3004 = vadd.xlane.f32.xlu1 %v2992_v49  ;;  %v7983_v49 = vor.u32 %v8876_v30, %v7980_v57 }
 0xab4   : > { %v2960_v16 = vpop.xlane.xlu1 %2959 }
 0xab5   : > { %v2977_v28 = vmul.f32 %v10644_v62, %v2960_v16  ;;  %v7954_v16 = vld [vmem:[%s13000_s7 + $0x60] sm:$0xf] }
 0xab7   : > { %v10660_v13 = vsub.f32 %v2946_v2, %v2977_v28  ;;  %v8004_v2 = vld [vmem:[%s13000_s7 + $0xd0] sm:$0xf0]  ;;  %v8873_v28 = vld [vmem:[%s13000_s7 + $0x6c] sm:$0xf0] }
 0xab8   : > { %v8007_v20 = vor.u32 %v8883_v42, %v8004_v2  ;;  %v7955_v35 = vor.u32 %v8873_v28, %v7954_v16  ;;  %v7927_v2 = vor.u32 %v8863_v50, %v7924_v48  ;;  %v8886_v28 = vld [vmem:[%s13000_s7 + $0xd4] sm:$0xf0] }
 0xab9   : > { %v2993_v53 = vmul.f32 %v10660_v13, %v10660_v13 }
 0xaba   : > { %3341 = vmatpush.bf16.msrb.mxu0 %v8007_v20  ;;  %9036 = vmatpush.bf16.msra.mxu1 %v8007_v20  ;;  %v7906_v20 = vld [vmem:[%s13000_s7] sm:$0xf] }
 0xabb   : > { %3006 = vadd.xlane.f32.xlu2 %v2993_v53  ;;  %2998 = vadd.xlane.f32.xlu1 %v2989_v61  ;;  %v7956_v53 = vld [vmem:[%s13000_s7 + $0x70] sm:$0xf0]  ;;  %v8872_v61 = vld [vmem:[%s13000_s7 + $0x6c] sm:$0xf] }
 0xabc   : > { %v2962_v27 = vpop.xlane.xlu0 %2961 }
 0xabd   : > { %v2978_v52 = vmul.f32 %v10644_v62, %v2962_v27  ;;  %v7964_v27 = vld [vmem:[%s13000_s7 + $0x78] sm:$0xf0] }
 0xabe   : > { %3342 = vmatpush.bf16.msrb.mxu0 %v7991_v29  ;;  %9037 = vmatpush.bf16.msra.mxu1 %v7991_v29  ;;  %v8890_v29 = vld [vmem:[%s13000_s7 + $0xf4] sm:$0xf0] }
 0xabf   : > { %v10670_v32 = vsub.f32 %v2947_v41, %v2978_v52  ;;  %v8015_v41 = vor.u32 %v8884_v9, %v8012_v10  ;;  %v7959_v52 = vor.u32 %v8871_v45, %v7956_v53  ;;  %v7935_v9 = vor.u32 %v8864_v17, %v7932_v46 }
 0xac1   : > { %v2994_v11 = vmul.f32 %v10670_v32, %v10670_v32  ;;  %3399 = vmatpush.bf16.msra.mxu2 %v8015_v41  ;;  %v8861_v41 = vld [vmem:[%s13000_s7 + $0xc] sm:$0xf0] }
 0xac2   : > { %3343 = vmatpush.bf16.msrb.mxu0 %v7975_v26  ;;  %9038 = vmatpush.bf16.msra.mxu1 %v7975_v26 }
 0xac3   : > { %3000 = vadd.xlane.f32.xlu1 %v2990_v0  ;;  %3008 = vadd.xlane.f32.xlu2 %v2994_v11  ;;  %v7967_v0 = vor.u32 %v8872_v61, %v7964_v27  ;;  %v7938_v11 = vld [vmem:[%s13000_s7 + $0x40] sm:$0xf]  ;;  %v7994_v61 = vld [vmem:[%s13000_s7 + $0xa8] sm:$0xf]  ;;  %v8882_v27 = vld [vmem:[%s13000_s7 + $0xb4] sm:$0xf0] }
 0xac4   : > { %v2964_v8 = vpop.xlane.xlu1 %2963  ;;  %v2956_v23 = vpop.xlane.xlu0 %2955 }
 0xac5   : > { %v2979_v56 = vmul.f32 %v10644_v62, %v2964_v8  ;;  %v2975_v54 = vmul.f32 %v10644_v62, %v2956_v23  ;;  %v8869_v8 = vld [vmem:[%s13000_s7 + $0x4c] sm:$0xf0]  ;;  %v8867_v23 = vld [vmem:[%s13000_s7 + $0x44] sm:$0xf] }
 0xac6   : > { %3344 = vmatpush.bf16.msrb.mxu0 %v7959_v52  ;;  %9039 = vmatpush.bf16.msra.mxu1 %v7959_v52 }
 0xac7   : > { %v10678_v22 = vsub.f32 %v2948_v40, %v2979_v56  ;;  %v10680_v25 = vsub.f32 %v2944_v37, %v2975_v54  ;;  %v7987_v37 = vor.u32 %v8881_v7, %v7986_v19  ;;  %v8880_v40 = vld [vmem:[%s13000_s7 + $0xac] sm:$0xf]  ;;  %v7939_v56 = vor.u32 %v8869_v8, %v7938_v11  ;;  %v7940_v54 = vld [vmem:[%s13000_s7 + $0x50] sm:$0xf0]  ;;  %v8859_v19 = vld [vmem:[%s13000_s7 + $0x4] sm:$0xf] }
 0xac8   : > { %v7999_v51 = vor.u32 %v8880_v40, %v7996_v24  ;;  %v7943_v3 = vor.u32 %v8867_v23, %v7940_v54  ;;  %v7908_v7 = vld [vmem:[%s13000_s7 + $0x10] sm:$0xf0]  ;;  %v7916_v40 = vld [vmem:[%s13000_s7 + $0x18] sm:$0xf0]  ;;  %v7995_v8 = vor.u32 %v8882_v27, %v7994_v61  ;;  %v7978_v23 = vld [vmem:[%s13000_s7 + $0x88] sm:$0xf] }
 0xac9   : > { %v2995_v15 = vmul.f32 %v10678_v22, %v10678_v22  ;;  %v2991_v21 = vmul.f32 %v10680_v25, %v10680_v25  ;;  %3313 = vmatpush.bf16.msrb.mxu3 %v7987_v37  ;;  %v7911_v33 = vor.u32 %v8859_v19, %v7908_v7  ;;  %v7919_v24 = vor.u32 %v8860_v6, %v7916_v40  ;;  %v10954_v27 = vld [vmem:[%s12999_s6] ss:$0 sm:$0xff] }
 0xaca   : > { %3400 = vmatpush.bf16.msra.mxu2 %v7999_v51  ;;  %3345 = vmatpush.bf16.msrb.mxu0 %v7943_v3 }
 0xacb   : > { %3010 = vadd.xlane.f32.xlu0 %v2995_v15  ;;  %3002 = vadd.xlane.f32.xlu2 %v2991_v21  ;;  %v8868_v15 = vld [vmem:[%s13000_s7 + $0x4c] sm:$0xf]  ;;  %v7948_v21 = vld [vmem:[%s13000_s7 + $0x58] sm:$0xf0] }
 0xacc   : > { %v7951_v14 = vor.u32 %v8868_v15, %v7948_v21  ;;  %9040 = vmatpush.bf16.msra.mxu1 %v7943_v3 }
 0xacd   : > { %3314 = vmatpush.bf16.msrb.mxu3 %v7971_v59 }
 0xace   : > { %3401 = vmatpush.bf16.msra.mxu2 %v7983_v49  ;;  %3346 = vmatpush.bf16.msrb.mxu0 %v7927_v2  ;;  %v8010_v49 = vld [vmem:[%s13000_s7 + $0xc8] sm:$0xf] }
 0xad0   : > { %9041 = vmatpush.bf16.msra.mxu1 %v7927_v2 }
 0xad1   : > { %3315 = vmatpush.bf16.msrb.mxu3 %v7955_v35  ;;  %v8011_v35 = vor.u32 %v8886_v28, %v8010_v49  ;;  %v8866_v28 = vld [vmem:[%s13000_s7 + $0x34] sm:$0xf0] }
 0xad2   : > { %3402 = vmatpush.bf16.msra.mxu2 %v7967_v0  ;;  %3347 = vmatpush.bf16.msrb.mxu0 %v7911_v33 }
 0xad4   : > { %9042 = vmatpush.bf16.msra.mxu1 %v7911_v33 }
 0xad5   : > { %3316 = vmatpush.bf16.msrb.mxu3 %v7939_v56  ;;  %v8878_v56 = vld [vmem:[%s13000_s7 + $0x94] sm:$0xf0] }
 0xad6   : > { %3403 = vmatpush.bf16.msra.mxu2 %v7951_v14  ;;  %v7979_v50 = vor.u32 %v8878_v56, %v7978_v23 }
 0xad9   : > { %3317 = vmatpush.bf16.msrb.mxu3 %v7923_v4 }
 0xada   : > { %3404 = vmatpush.bf16.msra.mxu2 %v7935_v9 }
 0xade   : > { %3405 = vmatpush.bf16.msra.mxu2 %v7919_v24  ;;  %v7946_v24 = vld [vmem:[%s13000_s7 + $0x48] sm:$0xf] }
 0xb06   : > { %v2997_v12 = vpop.xlane.xlu0 %2996 }
 0xb07   : > { %v3012_v31 = vmul.f32 %v2997_v12, %v10644_v62  ;;  %v7907_v12 = vor.u32 %v8861_v41, %v7906_v20  ;;  %v10912_v20 = vld [vmem:[%s12998_s5] ss:$0 sm:$0xff] }
 0xb09   : > { %v10756_v44 = vadd.f32 1e-05, %v3012_v31  ;;  %3318 = vmatpush.bf16.msrb.mxu3 %v7907_v12  ;;  %v8026_v31 = vld [vmem:[%s13000_s7 + $0xe8] sm:$0xf] }
 0xb0a   : > { %v8027_v36 = vor.u32 %v8890_v29, %v8026_v31  ;;  %v8870_v31 = vld [vmem:[%s13000_s7 + $0x54] sm:$0xf0] }
 0xb0b   : > { %9317 = vrsqrt.f32 %v10756_v44  ;;  %vm3034_vm7 = vweird.f32 %v10756_v44 }
 0xb0c   : > { %3369 = vmatpush.bf16.msrb.mxu1 %v8027_v36 }
 0xb10   : > { %3370 = vmatpush.bf16.msrb.mxu1 %v8011_v35 }
 0xb11   : > { %v10798_v18 = vpop.eup %9317 }
 0xb12   : > { %v3029_v42 = vmul.f32 %v10798_v18, %v10756_v44  ;;  %vm3035_vm6 = vweird.f32 %v10798_v18 }
 0xb13   : > { %vm10885_vm9 = vmor %vm3034_vm7, %vm3035_vm6 }
 0xb14   : > { %v3030_v37 = vmul.f32 %v10798_v18, %v3029_v42  ;;  %3371 = vmatpush.bf16.msrb.mxu1 %v7995_v8 }
 0xb16   : > { %v3031_v59 = vmul.f32 0.5, %v3030_v37 }
 0xb18   : > { %v3032_v45 = vsub.f32 1.5, %v3031_v59  ;;  %3372 = vmatpush.bf16.msrb.mxu1 %v7979_v50 }
 0xb1a   : > { %v3033_v54 = vmul.f32 %v10798_v18, %v3032_v45 }
 0xb1c   : > { %v3037_v44 = vsel %vm10885_vm9, %v10798_v18, %v3033_v54  ;;  %v7962_v18 = vld [vmem:[%s13000_s7 + $0x68] sm:$0xf] }
 0xb1d   : > { %v3108_v41 = vmul.f32 %v3037_v44, %v10647_v1 }
 0xb26   : > { %v3005_v43 = vpop.xlane.xlu1 %3004 }
 0xb27   : > { %v3016_v5 = vmul.f32 %v3005_v43, %v10644_v62 }
 0xb29   : > { %v10821_v10 = vadd.f32 1e-05, %v3016_v5 }
 0xb2b   : > { %9319 = vrsqrt.f32 %v10821_v10  ;;  %vm3074_vm10 = vweird.f32 %v10821_v10 }
 0xb2e   : > { %v3007_v51 = vpop.xlane.xlu2 %3006  ;;  %v2999_v55 = vpop.xlane.xlu1 %2998 }
 0xb2f   : > { %v3017_v34 = vmul.f32 %v3007_v51, %v10644_v62  ;;  %v3013_v60 = vmul.f32 %v2999_v55, %v10644_v62 }
 0xb31   : > { %v9320_v30 = vpop.eup %9319  ;;  %v10851_v26 = vadd.f32 1e-05, %v3017_v34  ;;  %v10853_v57 = vadd.f32 1e-05, %v3013_v60  ;;  %v7947_v34 = vor.u32 %v8870_v31, %v7946_v24 }
 0xb32   : > { %v3069_v16 = vmul.f32 %v9320_v30, %v10821_v10  ;;  %vm3075_vm8 = vweird.f32 %v9320_v30  ;;  %v8874_v10 = vld [vmem:[%s13000_s7 + $0x74] sm:$0xf0] }
 0xb33   : > { %9321 = vrsqrt.f32 %v10851_v26  ;;  %vm10896_vm11 = vmor %vm3074_vm10, %vm3075_vm8  ;;  %v7963_v6 = vor.u32 %v8874_v10, %v7962_v18  ;;  %vm3084_vm14 = vweird.f32 %v10851_v26  ;;  %vm3044_vm5 = vweird.f32 %v10853_v57 }
 0xb34   : > { %v3070_v53 = vmul.f32 %v9320_v30, %v3069_v16  ;;  %9323 = vrsqrt.f32 %v10853_v57  ;;  %v7930_v16 = vld [vmem:[%s13000_s7 + $0x28] sm:$0xf] }
 0xb35   : > { %3373 = vmatpush.bf16.msrb.mxu1 %v7963_v6 }
 0xb36   : > { %v3071_v52 = vmul.f32 0.5, %v3070_v53  ;;  %v3001_v0 = vpop.xlane.xlu1 %3000  ;;  %v3009_v11 = vpop.xlane.xlu2 %3008 }
 0xb37   : > { %v3014_v15 = vmul.f32 %v3001_v0, %v10644_v62  ;;  %v3018_v21 = vmul.f32 %v3009_v11, %v10644_v62  ;;  %v7931_v11 = vor.u32 %v8866_v28, %v7930_v16  ;;  %v8905_v16 = vld [vmem:[%s13002_s9 + $0x70] sm:$0xff] }
 0xb38   : > { %v3072_v3 = vsub.f32 1.5, %v3071_v52  ;;  %v8897_v28 = vld [vmem:[%s13002_s9 + $0x30] sm:$0xff] }
 0xb39   : > { %v9322_v14 = vpop.eup %9321  ;;  %v10881_v38 = vadd.f32 1e-05, %v3014_v15  ;;  %v10883_v47 = vadd.f32 1e-05, %v3018_v21  ;;  %3374 = vmatpush.bf16.msrb.mxu1 %v7947_v34 }
 0xb3a   : > { %v9324_v43 = vpop.eup %9323  ;;  %v3073_v48 = vmul.f32 %v9320_v30, %v3072_v3  ;;  %v3079_v17 = vmul.f32 %v9322_v14, %v10851_v26  ;;  %vm3085_vm12 = vweird.f32 %v9322_v14 }
 0xb3b   : > { %v3039_v46 = vmul.f32 %v9324_v43, %v10853_v57  ;;  %9325 = vrsqrt.f32 %v10881_v38  ;;  %vm3045_vm13 = vweird.f32 %v9324_v43  ;;  %vm3086_vm15 = vmor %vm3084_vm14, %vm3085_vm12  ;;  %vm3054_vm9 = vweird.f32 %v10881_v38 }
 0xb3c   : > { %v3080_v5 = vmul.f32 %v9322_v14, %v3079_v17  ;;  %9327 = vrsqrt.f32 %v10883_v47  ;;  %v3077_v2 = vsel %vm10896_vm11, %v9320_v30, %v3073_v48  ;;  %v3119_v30 = vmul.f32 %v10912_v20, %v3108_v41  ;;  %vm3046_vm6 = vmor %vm3044_vm5, %vm3045_vm13 }
 0xb3d   : > { %v3040_v9 = vmul.f32 %v9324_v43, %v3039_v46  ;;  %v3112_v29 = vmul.f32 %v3077_v2, %v10652_v39  ;;  %3375 = vmatpush.bf16.msrb.mxu1 %v7931_v11  ;;  %vm3094_vm11 = vweird.f32 %v10883_v47  ;;  %v8901_v11 = vld [vmem:[%s13002_s9 + $0x50] sm:$0xff] }
 0xb3e   : > { %v3081_v12 = vmul.f32 0.5, %v3080_v5  ;;  %v3003_v19 = vpop.xlane.xlu2 %3002  ;;  %v3011_v7 = vpop.xlane.xlu0 %3010  ;;  %v10962_v3 = vadd.f32 %v10954_v27, %v3119_v30 }
 0xb3f   : > { %v3041_v37 = vmul.f32 0.5, %v3040_v9  ;;  %v3015_v33 = vmul.f32 %v3003_v19, %v10644_v62  ;;  %v3019_v40 = vmul.f32 %v3011_v7, %v10644_v62  ;;  %v3123_v26 = vmul.f32 %v10912_v20, %v3112_v29 }
 0xb40   : > { %v3082_v1 = vsub.f32 1.5, %v3081_v12 }
 0xb41   : > { %v10924_v51 = vpop.eup %9325  ;;  %v3042_v55 = vsub.f32 1.5, %v3041_v37  ;;  %v10926_v36 = vadd.f32 1e-05, %v3015_v33  ;;  %v10928_v59 = vadd.f32 1e-05, %v3019_v40 }
 0xb42   : > { %v10930_v60 = vpop.eup %9327  ;;  %v3083_v49 = vmul.f32 %v9322_v14, %v3082_v1  ;;  %v3049_v39 = vmul.f32 %v10924_v51, %v10881_v38  ;;  %vm3055_vm7 = vweird.f32 %v10924_v51 }
 0xb43   : > { %v3043_v45 = vmul.f32 %v9324_v43, %v3042_v55  ;;  %v3089_v35 = vmul.f32 %v10930_v60, %v10883_v47  ;;  %9329 = vrsqrt.f32 %v10926_v36  ;;  %vm3095_vm8 = vweird.f32 %v10930_v60  ;;  %vm3056_vm10 = vmor %vm3054_vm9, %vm3055_vm7 }
 0xb44   : > { %v3087_v53 = vsel %vm3086_vm15, %v9322_v14, %v3083_v49  ;;  %v3050_v61 = vmul.f32 %v10924_v51, %v3049_v39  ;;  %9331 = vrsqrt.f32 %v10928_v59  ;;  %v8862_v14 = vld [vmem:[%s13000_s7 + $0x14] sm:$0xf0]  ;;  %vm3096_vm12 = vmor %vm3094_vm11, %vm3095_vm8  ;;  %vm3064_vm15 = vweird.f32 %v10926_v36 }
 0xb45   : > { %v3113_v57 = vmul.f32 %v3087_v53, %v10660_v13  ;;  %v3047_v52 = vsel %vm3046_vm6, %v9324_v43, %v3043_v45  ;;  %v3090_v0 = vmul.f32 %v10930_v60, %v3089_v35  ;;  %v7914_v13 = vld [vmem:[%s13000_s7 + $0x8] sm:$0xf]  ;;  %v10972_v43 = vadd.f32 %v10954_v27, %v3123_v26  ;;  %v8898_v49 = vld [vmem:[%s13002_s9 + $0x38] sm:$0xff]  ;;  %v8921_v45 = vld [vmem:[%s13002_s9 + $0xf0] sm:$0xff] }
 0xb46   : > { %v3109_v8 = vmul.f32 %v3047_v52, %v10658_v63  ;;  %v3051_v23 = vmul.f32 0.5, %v3050_v61  ;;  %v7915_v9 = vor.u32 %v8862_v14, %v7914_v13  ;;  %vm3104_vm6 = vweird.f32 %v10928_v59  ;;  %v8922_v39 = vld [vmem:[%s13002_s9 + $0xf8] sm:$0xff]  ;;  %3670 = vmatpush.bf16.msra.mxu3 %v8898_v49  ;;  %v8904_v26 = vld [vmem:[%s13002_s9 + $0x68] sm:$0xff]  ;;  %v8895_v52 = vld [vmem:[%s13002_s9 + $0x20] sm:$0xff] }
 0xb47   : > { %v3124_v56 = vmul.f32 %v10912_v20, %v3113_v57  ;;  %v3091_v54 = vmul.f32 0.5, %v3090_v0  ;;  %3757 = vmatpush.bf16.msrb.mxu2 %v8922_v39  ;;  %v8914_v35 = vld [vmem:[%s13002_s9 + $0xb8] sm:$0xff]  ;;  %v8896_v53 = vld [vmem:[%s13002_s9 + $0x28] sm:$0xff]  ;;  %v8919_v0 = vld [vmem:[%s13002_s9 + $0xe0] sm:$0xff] }
 0xb48   : > { %v3120_v15 = vmul.f32 %v10912_v20, %v3109_v8  ;;  %v3052_v21 = vsub.f32 1.5, %v3051_v23  ;;  %3376 = vmatpush.bf16.msrb.mxu1 %v7915_v9  ;;  %v8920_v61 = vld [vmem:[%s13002_s9 + $0xe8] sm:$0xff]  ;;  %v8902_v57 = vld [vmem:[%s13002_s9 + $0x58] sm:$0xff]  ;;  %v8899_v13 = vld [vmem:[%s13002_s9 + $0x40] sm:$0xff] }
 0xb49   : > { %v9330_v50 = vpop.eup %9329  ;;  %v3092_v63 = vsub.f32 1.5, %v3091_v54  ;;  %v10975_v4 = vadd.f32 %v10954_v27, %v3124_v56  ;;  %v8894_v8 = vld [vmem:[%s13002_s9 + $0x18] sm:$0xff]  ;;  %v8900_v56 = vld [vmem:[%s13002_s9 + $0x48] sm:$0xff]  ;;  %v8893_v54 = vld [vmem:[%s13002_s9 + $0x10] sm:$0xff] }
 0xb4a   : > { %v9332_v48 = vpop.eup %9331  ;;  %v3053_v17 = vmul.f32 %v10924_v51, %v3052_v21  ;;  %v3059_v44 = vmul.f32 %v9330_v50, %v10926_v36  ;;  %v10981_v46 = vadd.f32 %v10954_v27, %v3120_v15  ;;  %vm3065_vm13 = vweird.f32 %v9330_v50  ;;  %3671 = vmatpush.bf16.msra.mxu3 %v8897_v28  ;;  %v8918_v23 = vld [vmem:[%s13002_s9 + $0xd8] sm:$0xff]  ;;  %v8917_v15 = vld [vmem:[%s13002_s9 + $0xd0] sm:$0xff]  ;;  %v8892_v14 = vld [vmem:[%s13002_s9 + $0x8] sm:$0xff] }
 0xb4b   : > { %v3093_v42 = vmul.f32 %v10930_v60, %v3092_v63  ;;  %v3099_v5 = vmul.f32 %v9332_v48, %v10928_v59  ;;  %v10987_v2 = vpack.c.bf16 %v10975_v4, %v10972_v43  ;;  %vm3105_vm14 = vweird.f32 %v9332_v48  ;;  %vm3066_vm5 = vmor %vm3064_vm15, %vm3065_vm13  ;;  %3758 = vmatpush.bf16.msrb.mxu2 %v8921_v45  ;;  %v8913_v21 = vld [vmem:[%s13002_s9 + $0xb0] sm:$0xff]  ;;  %v8891_v63 = vld [vmem:[%s13002_s9] sm:$0xff] }
 0xb4c   : > { %v3060_v18 = vmul.f32 %v9330_v50, %v3059_v44  ;;  %v3138_v10 = vpack.c.bf16 %v10981_v46, %v10962_v3  ;;  %v3057_v12 = vsel %vm3056_vm10, %v10924_v51, %v3053_v17  ;;  %vm3106_vm7 = vmor %vm3104_vm6, %vm3105_vm14  ;;  %v8912_v17 = vld [vmem:[%s13002_s9 + $0xa8] sm:$0xff]  ;;  %v8911_v44 = vld [vmem:[%s13002_s9 + $0xa0] sm:$0xff] }
 0xb4d   : > { %v3100_v41 = vmul.f32 %v9332_v48, %v3099_v5  ;;  %3358 = vmatmul.bf16.vlgmr.msra.gmra.mxu1 %v10987_v2  ;;  %v3097_v38 = vsel %vm3096_vm12, %v10930_v60, %v3093_v42  ;;  %v3110_v47 = vmul.f32 %v3057_v12, %v10667_v58  ;;  %v8910_v5 = vld [vmem:[%s13002_s9 + $0x98] sm:$0xff] }
 0xb4e   : > { %v3061_v19 = vmul.f32 0.5, %v3060_v18  ;;  %3319 = vmatmul.bf16.vlgmr.msrb.gmra.mxu3 %v3138_v10  ;;  %3348 = vmatmul.bf16.vlgmr.msrb.gmra.mxu0 %v3138_v10  ;;  %v3114_v33 = vmul.f32 %v3097_v38, %v10670_v32 }
 0xb4f   : > { %v3101_v7 = vmul.f32 0.5, %v3100_v41  ;;  %3406 = vmatmul.bf16.vlgmr.msra.gmra.mxu2 %v3138_v10  ;;  %v3121_v51 = vmul.f32 %v10912_v20, %v3110_v47  ;;  %3728 = vmatpush.bf16.msra.mxu1 %v8914_v35 }
 0xb50   : > { %v3062_v6 = vsub.f32 1.5, %v3061_v19  ;;  %v3125_v55 = vmul.f32 %v10912_v20, %v3114_v33  ;;  %3672 = vmatpush.bf16.msra.mxu3 %v8896_v53  ;;  %3759 = vmatpush.bf16.msrb.mxu2 %v8920_v61 }
 0xb51   : > { %v3102_v37 = vsub.f32 1.5, %v3101_v7  ;;  %v11011_v36 = vadd.f32 %v10954_v27, %v3121_v51  ;;  %v8908_v7 = vld [vmem:[%s13002_s9 + $0x88] sm:$0xff] }
 0xb52   : > { %v3063_v40 = vmul.f32 %v9330_v50, %v3062_v6  ;;  %v11017_v60 = vadd.f32 %v10954_v27, %v3125_v55 }
 0xb53   : > { %v3103_v24 = vmul.f32 %v9332_v48, %v3102_v37  ;;  %3729 = vmatpush.bf16.msra.mxu1 %v8913_v21 }
 0xb54   : > { %v3067_v31 = vsel %vm3066_vm5, %v9330_v50, %v3063_v40  ;;  %3673 = vmatpush.bf16.msra.mxu3 %v8895_v52  ;;  %3760 = vmatpush.bf16.msrb.mxu2 %v8919_v0  ;;  %v8916_v50 = vld [vmem:[%s13002_s9 + $0xc8] sm:$0xff] }
 0xb55   : > { %v3111_v29 = vmul.f32 %v3067_v31, %v10680_v25  ;;  %v3107_v1 = vsel %vm3106_vm7, %v9332_v48, %v3103_v24  ;;  %v8915_v48 = vld [vmem:[%s13002_s9 + $0xc0] sm:$0xff] }
 0xb56   : > { %v3115_v58 = vmul.f32 %v3107_v1, %v10678_v22  ;;  %v8907_v31 = vld [vmem:[%s13002_s9 + $0x80] sm:$0xff] }
 0xb57   : > { %v3122_v32 = vmul.f32 %v10912_v20, %v3111_v29  ;;  %3730 = vmatpush.bf16.msra.mxu1 %v8912_v17 }
 0xb58   : > { %v3126_v34 = vmul.f32 %v10912_v20, %v3115_v58  ;;  %v8906_v20 = vld [vmem:[%s13002_s9 + $0x78] sm:$0xff]  ;;  %3674 = vmatpush.bf16.msra.mxu3 %v8894_v8  ;;  %3761 = vmatpush.bf16.msrb.mxu2 %v8918_v23 }
 0xb59   : > { %v11014_v59 = vadd.f32 %v10954_v27, %v3122_v32  ;;  %3699 = vmatpush.bf16.msra.mxu0 %v8906_v20 }
 0xb5a   : > { %v11020_v25 = vadd.f32 %v10954_v27, %v3126_v34  ;;  %v8903_v27 = vld [vmem:[%s13002_s9 + $0x60] sm:$0xff] }
 0xb5b   : > { %v3139_v22 = vpack.c.bf16 %v11014_v59, %v11011_v36  ;;  %3731 = vmatpush.bf16.msra.mxu1 %v8911_v44 }
 0xb5c   : > { %v3141_v30 = vpack.c.bf16 %v11020_v25, %v11017_v60  ;;  %3675 = vmatpush.bf16.msra.mxu3 %v8893_v54  ;;  %3762 = vmatpush.bf16.msrb.mxu2 %v8917_v15 }
 0xb5d   : > { %3700 = vmatpush.bf16.msra.mxu0 %v8905_v16 }
 0xb5e   : > { %3324 = vmatmul.bf16.gmra.mxu3 %v3139_v22  ;;  %3353 = vmatmul.bf16.gmra.mxu0 %v3139_v22 }
 0xb5f   : > { %3363 = vmatmul.bf16.gmra.mxu1 %v3141_v30  ;;  %3411 = vmatmul.bf16.gmra.mxu2 %v3139_v22 }
 0xb60   : > { %3676 = vmatpush.bf16.msra.mxu3 %v8892_v14  ;;  %3763 = vmatpush.bf16.msrb.mxu2 %v8916_v50 }
 0xb61   : > { %3701 = vmatpush.bf16.msra.mxu0 %v8904_v26  ;;  %3732 = vmatpush.bf16.msra.mxu1 %v8910_v5 }
 0xb64   : > { %3677 = vmatpush.bf16.msra.mxu3 %v8891_v63  ;;  %3764 = vmatpush.bf16.msrb.mxu2 %v8915_v48 }
 0xb65   : > { %3702 = vmatpush.bf16.msra.mxu0 %v8903_v27 }
 0xb69   : > { %3703 = vmatpush.bf16.msra.mxu0 %v8902_v57 }
 0xb6d   : > { %3704 = vmatpush.bf16.msra.mxu0 %v8901_v11 }
 0xb6e   : > { %3329 = vmatmul.bf16.gmra.mxu3 %v10987_v2 }
 0xb6f   : > { %3377 = vmatmul.bf16.vlgmr.msrb.gmra.mxu1 %v3138_v10  ;;  %3416 = vmatmul.bf16.gmra.mxu2 %v10987_v2  ;;  %v8909_v10 = vld [vmem:[%s13002_s9 + $0x90] sm:$0xff] }
 0xb70   : > { %3733 = vmatpush.bf16.msra.mxu1 %v8909_v10 }
 0xb71   : > { %3705 = vmatpush.bf16.msra.mxu0 %v8900_v56 }
 0xb74   : > { %3734 = vmatpush.bf16.msra.mxu1 %v8908_v7 }
 0xb75   : > { %3706 = vmatpush.bf16.msra.mxu0 %v8899_v13 }
 0xb78   : > { %3735 = vmatpush.bf16.msra.mxu1 %v8907_v31 }
 0xb7e   : > { %3334 = vmatmul.bf16.gmra.mxu3 %v3141_v30 }
 0xb7f   : > { %3382 = vmatmul.bf16.gmra.mxu1 %v3139_v22  ;;  %3421 = vmatmul.bf16.gmra.mxu2 %v3141_v30 }
 0xb8f   : > { %3387 = vmatmul.bf16.gmra.mxu1 %v10987_v2  ;;  %v566_v2 = vld [vmem:[%s13001_s8] sm:$0xf] }
 0xb90   : > { %v11121_v18 = vperm.slane %v566_v2, 1  ;;  %v11130_v47 = vperm.slane %v566_v2, 0  ;;  %v11133_v33 = vperm.slane %v566_v2, 3  ;;  %v11150_v44 = vperm.slane %v566_v2, 2 }
 0xb9f   : > { %3392 = vmatmul.bf16.gmra.mxu1 %v3141_v30 }
 0xbca   : > { %v11113_v42 = vpop.f32.mrf.mxu1 }
 0xbcb   : > { %v3349_v9 = vpop.f32.mrf.mxu0 }
 0xbcc   : > { %v3350_v12 = vadd.f32 %v3349_v9, %v11121_v18 }
 0xbce   : > { %v3428_v40 = vmax.f32 %v3350_v12, 0.0 }
 0xbd1   : > { %v3320_v41 = vpop.f32.mrf.mxu3 }
 0xbd2   : > { %v3407_v19 = vpop.f32.mrf.mxu2  ;;  %v3361_v38 = vpop.f32.mrf.mxu1  ;;  %v3321_v29 = vadd.f32 %v3320_v41, %v11130_v47  ;;  %v3360_v41 = vadd.f32 %v11113_v42, %v11121_v18 }
 0xbd3   : > { %v3351_v6 = vpop.f32.mrf.mxu0  ;;  %v3408_v51 = vadd.f32 %v3407_v19, %v11133_v33  ;;  %v3362_v9 = vadd.f32 %v3361_v38, %v11121_v18 }
 0xbd4   : > { %v3352_v37 = vadd.f32 %v3351_v6, %v11121_v18  ;;  %v3427_v30 = vmax.f32 %v3321_v29, 0.0 }
 0xbd5   : > { %v3430_v39 = vmax.f32 %v3408_v51, 0.0  ;;  %v3448_v7 = vmax.f32 %v3362_v9, 0.0 }
 0xbd6   : > { %v3432_v24 = vmax.f32 %v3352_v37, 0.0 }
 0xbd8   : > { %v3460_v1 = vpack.c.bf16 %v3432_v24, %v3428_v40  ;;  %v3444_v40 = vmax.f32 %v3360_v41, 0.0 }
 0xbd9   : > { %v3322_v58 = vpop.f32.mrf.mxu3 }
 0xbda   : > { %v3323_v55 = vadd.f32 %v3322_v58, %v11130_v47  ;;  %v3409_v32 = vpop.f32.mrf.mxu2  ;;  %3707 = vmatmul.bf16.vlgmr.msra.gmra.mxu0 %v3460_v1  ;;  %v3468_v29 = vpack.c.bf16 %v3448_v7, %v3444_v40 }
 0xbdb   : > { %v3410_v34 = vadd.f32 %v3409_v32, %v11133_v33  ;;  %v3354_v22 = vpop.f32.mrf.mxu0 }
 0xbdc   : > { %v3431_v20 = vmax.f32 %v3323_v55, 0.0  ;;  %v11142_v49 = vpop.f32.mrf.mxu1  ;;  %v3355_v26 = vadd.f32 %v3354_v22, %v11121_v18 }
 0xbdd   : > { %v3434_v16 = vmax.f32 %v3410_v34, 0.0 }
 0xbde   : > { %v3459_v28 = vpack.c.bf16 %v3431_v20, %v3427_v30  ;;  %v3436_v52 = vmax.f32 %v3355_v26, 0.0 }
 0xbdf   : > { %v3462_v45 = vpack.c.bf16 %v3434_v16, %v3430_v39 }
 0xbe0   : > { %3678 = vmatmul.bf16.vlgmr.msra.gmra.mxu3 %v3459_v28 }
 0xbe1   : > { %3765 = vmatmul.bf16.vlgmr.msrb.gmra.mxu2 %v3462_v45  ;;  %v3325_v35 = vpop.f32.mrf.mxu3 }
 0xbe2   : > { %v3412_v53 = vpop.f32.mrf.mxu2  ;;  %v3326_v11 = vadd.f32 %v3325_v35, %v11130_v47  ;;  %v3365_v35 = vadd.f32 %v11142_v49, %v11121_v18 }
 0xbe3   : > { %v3356_v61 = vpop.f32.mrf.mxu0  ;;  %v3413_v23 = vadd.f32 %v3412_v53, %v11133_v33 }
 0xbe4   : > { %v3357_v27 = vadd.f32 %v3356_v61, %v11121_v18  ;;  %v3366_v57 = vpop.f32.mrf.mxu1  ;;  %v3435_v13 = vmax.f32 %v3326_v11, 0.0 }
 0xbe5   : > { %v3438_v63 = vmax.f32 %v3413_v23, 0.0  ;;  %v3367_v28 = vadd.f32 %v3366_v57, %v11121_v18 }
 0xbe6   : > { %v3440_v0 = vmax.f32 %v3357_v27, 0.0 }
 0xbe7   : > { %v3456_v61 = vmax.f32 %v3367_v28, 0.0 }
 0xbe8   : > { %v3464_v8 = vpack.c.bf16 %v3440_v0, %v3436_v52  ;;  %v3452_v0 = vmax.f32 %v3365_v35, 0.0 }
 0xbe9   : > { %v3327_v56 = vpop.f32.mrf.mxu3 }
 0xbea   : > { %v3328_v54 = vadd.f32 %v3327_v56, %v11130_v47  ;;  %v3414_v15 = vpop.f32.mrf.mxu2  ;;  %3712 = vmatmul.bf16.gmra.mxu0 %v3464_v8  ;;  %v3472_v56 = vpack.c.bf16 %v3456_v61, %v3452_v0 }
 0xbeb   : > { %v3415_v21 = vadd.f32 %v3414_v15, %v11133_v33 }
 0xbec   : > { %v3439_v14 = vmax.f32 %v3328_v54, 0.0  ;;  %v3378_v50 = vpop.f32.mrf.mxu1 }
 0xbed   : > { %v3442_v48 = vmax.f32 %v3415_v21, 0.0  ;;  %v3379_v19 = vadd.f32 %v3378_v50, %v11150_v44 }
 0xbee   : > { %v3463_v17 = vpack.c.bf16 %v3439_v14, %v3435_v13 }
 0xbef   : > { %v3466_v5 = vpack.c.bf16 %v3442_v48, %v3438_v63  ;;  %v3429_v24 = vmax.f32 %v3379_v19, 0.0 }
 0xbf0   : > { %3683 = vmatmul.bf16.gmra.mxu3 %v3463_v17 }
 0xbf1   : > { %3770 = vmatmul.bf16.gmra.mxu2 %v3466_v5  ;;  %v3330_v10 = vpop.f32.mrf.mxu3 }
 0xbf2   : > { %v3417_v12 = vpop.f32.mrf.mxu2  ;;  %v3331_v31 = vadd.f32 %v3330_v10, %v11130_v47 }
 0xbf3   : > { %v3418_v38 = vadd.f32 %v3417_v12, %v11133_v33 }
 0xbf4   : > { %v3380_v6 = vpop.f32.mrf.mxu1  ;;  %v3443_v32 = vmax.f32 %v3331_v31, 0.0 }
 0xbf5   : > { %v3381_v37 = vadd.f32 %v3380_v6, %v11150_v44  ;;  %v3446_v30 = vmax.f32 %v3418_v38, 0.0  ;;  %v11177_v38 = vld [vmem:[%s13003_s10] ss:$0 sm:$0xff] }
 0xbf7   : > { %v3433_v2 = vmax.f32 %v3381_v37, 0.0 }
 0xbf9   : > { %v3461_v1 = vpack.c.bf16 %v3433_v2, %v3429_v24  ;;  %v3332_v51 = vpop.f32.mrf.mxu3 }
 0xbfa   : > { %v3333_v58 = vadd.f32 %v3332_v51, %v11130_v47  ;;  %v3419_v42 = vpop.f32.mrf.mxu2  ;;  %3717 = vmatmul.bf16.gmra.mxu0 %v3468_v29 }
 0xbfb   : > { %v3420_v55 = vadd.f32 %v3419_v42, %v11133_v33  ;;  %3736 = vmatmul.bf16.vlgmr.msra.gmra.mxu1 %v3461_v1 }
 0xbfc   : > { %v3447_v34 = vmax.f32 %v3333_v58, 0.0  ;;  %v3383_v22 = vpop.f32.mrf.mxu1 }
 0xbfd   : > { %v3450_v20 = vmax.f32 %v3420_v55, 0.0  ;;  %v3384_v53 = vadd.f32 %v3383_v22, %v11150_v44 }
 0xbfe   : > { %v3467_v39 = vpack.c.bf16 %v3447_v34, %v3443_v32 }
 0xbff   : > { %v3470_v16 = vpack.c.bf16 %v3450_v20, %v3446_v30  ;;  %v3437_v11 = vmax.f32 %v3384_v53, 0.0 }
 0xc00   : > { %3688 = vmatmul.bf16.gmra.mxu3 %v3467_v39 }
 0xc01   : > { %3775 = vmatmul.bf16.gmra.mxu2 %v3470_v16  ;;  %v3335_v45 = vpop.f32.mrf.mxu3 }
 0xc02   : > { %v3422_v26 = vpop.f32.mrf.mxu2  ;;  %v3336_v23 = vadd.f32 %v3335_v45, %v11130_v47 }
 0xc03   : > { %v3423_v57 = vadd.f32 %v3422_v26, %v11133_v33 }
 0xc04   : > { %v3385_v27 = vpop.f32.mrf.mxu1  ;;  %v3451_v13 = vmax.f32 %v3336_v23, 0.0 }
 0xc05   : > { %v3386_v52 = vadd.f32 %v3385_v27, %v11150_v44  ;;  %v3454_v63 = vmax.f32 %v3423_v57, 0.0 }
 0xc07   : > { %v3441_v8 = vmax.f32 %v3386_v52, 0.0 }
 0xc09   : > { %v3337_v54 = vpop.f32.mrf.mxu3  ;;  %v3465_v15 = vpack.c.bf16 %v3441_v8, %v3437_v11 }
 0xc0a   : > { %v3338_v21 = vadd.f32 %v3337_v54, %v11130_v47  ;;  %v3424_v18 = vpop.f32.mrf.mxu2  ;;  %3722 = vmatmul.bf16.gmra.mxu0 %v3472_v56 }
 0xc0b   : > { %v3425_v49 = vadd.f32 %v3424_v18, %v11133_v33  ;;  %3741 = vmatmul.bf16.gmra.mxu1 %v3465_v15 }
 0xc0c   : > { %v3455_v14 = vmax.f32 %v3338_v21, 0.0  ;;  %v3388_v50 = vpop.f32.mrf.mxu1 }
 0xc0d   : > { %v3458_v48 = vmax.f32 %v3425_v49, 0.0  ;;  %v3389_v9 = vadd.f32 %v3388_v50, %v11150_v44 }
 0xc0e   : > { %v3471_v17 = vpack.c.bf16 %v3455_v14, %v3451_v13 }
 0xc0f   : > { %v3474_v5 = vpack.c.bf16 %v3458_v48, %v3454_v63  ;;  %v3445_v47 = vmax.f32 %v3389_v9, 0.0 }
 0xc10   : > { %3693 = vmatmul.bf16.gmra.mxu3 %v3471_v17 }
 0xc11   : > { %3780 = vmatmul.bf16.gmra.mxu2 %v3474_v5 }
 0xc14   : > { %v3390_v10 = vpop.f32.mrf.mxu1 }
 0xc15   : > { %v3391_v41 = vadd.f32 %v3390_v10, %v11150_v44 }
 0xc17   : > { %v3449_v12 = vmax.f32 %v3391_v41, 0.0 }
 0xc19   : > { %v3469_v19 = vpack.c.bf16 %v3449_v12, %v3445_v47 }
 0xc1b   : > { %3746 = vmatmul.bf16.gmra.mxu1 %v3469_v19 }
 0xc1c   : > { %v3393_v33 = vpop.f32.mrf.mxu1 }
 0xc1d   : > { %v3394_v7 = vadd.f32 %v3393_v33, %v11150_v44 }
 0xc1f   : > { %v3453_v40 = vmax.f32 %v3394_v7, 0.0 }
 0xc24   : > { %v3395_v6 = vpop.f32.mrf.mxu1 }
 0xc25   : > { %v3396_v37 = vadd.f32 %v3395_v6, %v11150_v44 }
 0xc27   : > { %v3457_v24 = vmax.f32 %v3396_v37, 0.0 }
 0xc29   : > { %v3473_v2 = vpack.c.bf16 %v3457_v24, %v3453_v40 }
 0xc2b   : > { %3751 = vmatmul.bf16.gmra.mxu1 %v3473_v2 }
 0xc57   : > { %v3708_v29 = vpop.f32.mrf.mxu0 }
 0xc5f   : > { %v3710_v42 = vpop.f32.mrf.mxu0 }
 0xc63   : > { %v3679_v31 = vpop.f32.mrf.mxu3 }
 0xc64   : > { %v3766_v1 = vpop.f32.mrf.mxu2  ;;  %v3680_v58 = vadd.f32 %v11177_v38, %v3679_v31 }
 0xc66   : > { %v3709_v55 = vadd.f32 %v3708_v29, %v3680_v58 }
 0xc67   : > { %v3713_v28 = vpop.f32.mrf.mxu0 }
 0xc6b   : > { %v3681_v51 = vpop.f32.mrf.mxu3 }
 0xc6c   : > { %v3768_v34 = vpop.f32.mrf.mxu2  ;;  %v3682_v30 = vadd.f32 %v11177_v38, %v3681_v51 }
 0xc6e   : > { %v3711_v16 = vadd.f32 %v3710_v42, %v3682_v30 }
 0xc6f   : > { %v3715_v23 = vpop.f32.mrf.mxu0 }
 0xc73   : > { %v3684_v22 = vpop.f32.mrf.mxu3 }
 0xc74   : > { %v3685_v26 = vadd.f32 %v11177_v38, %v3684_v22  ;;  %v3771_v53 = vpop.f32.mrf.mxu2 }
 0xc76   : > { %v3714_v0 = vadd.f32 %v3713_v28, %v3685_v26 }
 0xc78   : > { %v3737_v32 = vpop.f32.mrf.mxu1 }
 0xc79   : > { %v3738_v44 = vadd.f32 %v3737_v32, %v3709_v55 }
 0xc7b   : > { %v3767_v20 = vadd.f32 %v3766_v1, %v3738_v44  ;;  %v3686_v27 = vpop.f32.mrf.mxu3 }
 0xc7c   : > { %v3687_v56 = vadd.f32 %v11177_v38, %v3686_v27  ;;  %v3773_v57 = vpop.f32.mrf.mxu2 }
 0xc7d   : > { %v3786_v39 = vadd.f32 %v3767_v20, %v10962_v3 }
 0xc7e   : > { %v3716_v21 = vadd.f32 %v3715_v23, %v3687_v56 }
 0xc7f   : > { %3794 = vadd.xlane.f32.xlu0 %v3786_v39 }
 0xc80   : > { %v3739_v45 = vpop.f32.mrf.mxu1 }
 0xc81   : > { %v3740_v35 = vadd.f32 %v3739_v45, %v3711_v16 }
 0xc83   : > { %v3769_v61 = vadd.f32 %v3768_v34, %v3740_v35  ;;  %v3689_v15 = vpop.f32.mrf.mxu3 }
 0xc84   : > { %v3690_v13 = vadd.f32 %v11177_v38, %v3689_v15  ;;  %v3776_v63 = vpop.f32.mrf.mxu2 }
 0xc85   : > { %v3787_v52 = vadd.f32 %v3769_v61, %v10981_v46  ;;  %v3718_v46 = vpop.f32.mrf.mxu0 }
 0xc86   : > { %v3719_v48 = vadd.f32 %v3718_v46, %v3690_v13  ;;  %v8944_v13 = vld [vmem:[%s12994_s1 + $0x16c] sm:$0xf]  ;;  %v8400_v46 = vld [vmem:[%s12994_s1 + $0x174] sm:$0xf0] }
 0xc87   : > { %3796 = vadd.xlane.f32.xlu1 %v3787_v52 }
 0xc88   : > { %v3742_v11 = vpop.f32.mrf.mxu1 }
 0xc89   : > { %v3743_v8 = vadd.f32 %v3742_v11, %v3714_v0 }
 0xc8b   : > { %v3772_v3 = vadd.f32 %v3771_v53, %v3743_v8  ;;  %v3691_v17 = vpop.f32.mrf.mxu3 }
 0xc8c   : > { %v3692_v10 = vadd.f32 %v11177_v38, %v3691_v17  ;;  %v3778_v7 = vpop.f32.mrf.mxu2 }
 0xc8d   : > { %v3788_v54 = vadd.f32 %v3772_v3, %v11011_v36  ;;  %v3720_v47 = vpop.f32.mrf.mxu0 }
 0xc8e   : > { %v3721_v12 = vadd.f32 %v3720_v47, %v3692_v10  ;;  %v8941_v10 = vld [vmem:[%s12994_s1 + $0x154] sm:$0xf]  ;;  %v8394_v47 = vld [vmem:[%s12994_s1 + $0x158] sm:$0xf] }
 0xc8f   : > { %3798 = vadd.xlane.f32.xlu2 %v3788_v54 }
 0xc90   : > { %v3744_v18 = vpop.f32.mrf.mxu1 }
 0xc91   : > { %v3745_v49 = vadd.f32 %v3744_v18, %v3716_v21  ;;  %v8398_v18 = vld [vmem:[%s12994_s1 + $0x168] sm:$0xf] }
 0xc93   : > { %v3774_v14 = vadd.f32 %v3773_v57, %v3745_v49  ;;  %v3694_v24 = vpop.f32.mrf.mxu3  ;;  %v8945_v49 = vld [vmem:[%s12994_s1 + $0x170] sm:$0xf0] }
 0xc94   : > { %v3695_v29 = vadd.f32 %v11177_v38, %v3694_v24  ;;  %v3781_v44 = vpop.f32.mrf.mxu2  ;;  %v8382_v24 = vld [vmem:[%s12994_s1 + $0x140] sm:$0xf] }
 0xc95   : > { %v3789_v50 = vadd.f32 %v3774_v14, %v11014_v59  ;;  %v8399_v14 = vor.u32 %v8945_v49, %v8398_v18  ;;  %v8927_v18 = vld [vmem:[%s12994_s1 + $0xe0] sm:$0xf0]  ;;  %v8926_v49 = vld [vmem:[%s12994_s1 + $0xdc] sm:$0xf] }
 0xc97   : > { %3800 = vadd.xlane.f32.xlu0 %v3789_v50  ;;  %4279 = vmatpush.bf16.msrb.mxu3 %v8399_v14  ;;  %v8328_v14 = vld [vmem:[%s12994_s1 + $0xe4] sm:$0xf0] }
 0xc98   : > { %v3747_v5 = vpop.f32.mrf.mxu1 }
 0xc99   : > { %v3748_v9 = vadd.f32 %v3747_v5, %v3719_v48  ;;  %v8403_v48 = vor.u32 %v8944_v13, %v8400_v46  ;;  %v8386_v5 = vld [vmem:[%s12994_s1 + $0x150] sm:$0xf]  ;;  %v8334_v46 = vld [vmem:[%s12994_s1 + $0xe0] sm:$0xf] }
 0xc9b   : > { %v3777_v36 = vadd.f32 %v3776_v63, %v3748_v9  ;;  %v3696_v55 = vpop.f32.mrf.mxu3  ;;  %v8946_v63 = vld [vmem:[%s12994_s1 + $0x178] sm:$0xf0]  ;;  %4308 = vmatpush.bf16.msrb.mxu0 %v8403_v48 }
 0xc9c   : > { %v3697_v22 = vadd.f32 %v11177_v38, %v3696_v55  ;;  %v3783_v38 = vpop.f32.mrf.mxu2  ;;  %v8942_v9 = vld [vmem:[%s12994_s1 + $0x158] sm:$0xf0]  ;;  %v8364_v55 = vld [vmem:[%s12994_s1 + $0x12c] sm:$0xf0] }
 0xc9d   : > { %v3790_v41 = vadd.f32 %v3777_v36, %v10972_v43  ;;  %v3723_v43 = vpop.f32.mrf.mxu0  ;;  %v8387_v36 = vor.u32 %v8942_v9, %v8386_v5  ;;  %v8314_v9 = vld [vmem:[%s12994_s1 + $0xc0] sm:$0xf] }
 0xc9e   : > { %v3724_v42 = vadd.f32 %v3723_v43, %v3695_v29 }
 0xc9f   : > { %3802 = vadd.xlane.f32.xlu1 %v3790_v41  ;;  %4280 = vmatpush.bf16.msrb.mxu3 %v8387_v36  ;;  %v8923_v36 = vld [vmem:[%s12994_s1 + $0xc4] sm:$0xf] }
 0xca0   : > { %v3749_v19 = vpop.f32.mrf.mxu1 }
 0xca1   : > { %v3750_v33 = vadd.f32 %v3749_v19, %v3721_v12  ;;  %v8943_v12 = vld [vmem:[%s12994_s1 + $0x160] sm:$0xf0] }
 0xca3   : > { %v3779_v6 = vadd.f32 %v3778_v7, %v3750_v33  ;;  %v8395_v33 = vor.u32 %v8943_v12, %v8394_v47  ;;  %v8374_v7 = vld [vmem:[%s12994_s1 + $0x138] sm:$0xf]  ;;  %v8316_v47 = vld [vmem:[%s12994_s1 + $0xcc] sm:$0xf0]  ;;  %v8322_v12 = vld [vmem:[%s12994_s1 + $0xc8] sm:$0xf] }
 0xca5   : > { %v3791_v59 = vadd.f32 %v3779_v6, %v10975_v4  ;;  %v3725_v16 = vpop.f32.mrf.mxu0  ;;  %v8939_v6 = vld [vmem:[%s12994_s1 + $0x140] sm:$0xf0] }
 0xca6   : > { %v3726_v45 = vadd.f32 %v3725_v16, %v3697_v22 }
 0xca7   : > { %3804 = vadd.xlane.f32.xlu2 %v3791_v59 }
 0xca8   : > { %v3752_v1 = vpop.f32.mrf.mxu1 }
 0xca9   : > { %v3753_v32 = vadd.f32 %v3752_v1, %v3724_v42  ;;  %v8362_v1 = vld [vmem:[%s12994_s1 + $0x120] sm:$0xf] }
 0xcab   : > { %v3782_v20 = vadd.f32 %v3781_v44, %v3753_v32  ;;  %v8370_v32 = vld [vmem:[%s12994_s1 + $0x128] sm:$0xf] }
 0xcad   : > { %v11209_v61 = vadd.f32 %v3782_v20, %v11017_v60  ;;  %v8933_v20 = vld [vmem:[%s12994_s1 + $0x110] sm:$0xf0] }
 0xcb0   : > { %v3754_v28 = vpop.f32.mrf.mxu1 }
 0xcb1   : > { %v3755_v26 = vadd.f32 %v3754_v28, %v3726_v45  ;;  %v8352_v28 = vld [vmem:[%s12994_s1 + $0x114] sm:$0xf0]  ;;  %v8358_v45 = vld [vmem:[%s12994_s1 + $0x110] sm:$0xf] }
 0xcf2   : > { %v3795_v37 = vpop.xlane.xlu0 %3794 }
 0xcf3   : > { %v3810_v40 = vmul.f32 %v3795_v37, %v10644_v62  ;;  %v8375_v37 = vor.u32 %v8939_v6, %v8374_v7  ;;  %v8319_v7 = vor.u32 %v8923_v36, %v8316_v47 }
 0xcf5   : > { %v11192_v2 = vsub.f32 %v3786_v39, %v3810_v40  ;;  %v8376_v40 = vld [vmem:[%s12994_s1 + $0x144] sm:$0xf0]  ;;  %4281 = vmatpush.bf16.msrb.mxu3 %v8375_v37 }
 0xcf7   : > { %v3826_v31 = vmul.f32 %v11192_v2, %v11192_v2 }
 0xcf9   : > { %3834 = vadd.xlane.f32.xlu0 %v3826_v31  ;;  %v8940_v31 = vld [vmem:[%s12994_s1 + $0x148] sm:$0xf0] }
 0xcfa   : > { %v3797_v51 = vpop.xlane.xlu1 %3796  ;;  %v8383_v29 = vor.u32 %v8940_v31, %v8382_v24 }
 0xcfb   : > { %v3811_v58 = vmul.f32 %v3797_v51, %v10644_v62  ;;  %v8936_v51 = vld [vmem:[%s12994_s1 + $0x128] sm:$0xf0] }
 0xcfc   : > { %v8363_v42 = vor.u32 %v8936_v51, %v8362_v1 }
 0xcfd   : > { %v11198_v4 = vsub.f32 %v3787_v52, %v3811_v58  ;;  %v3784_v52 = vadd.f32 %v3783_v38, %v3755_v26  ;;  %v8935_v58 = vld [vmem:[%s12994_s1 + $0x124] sm:$0xf]  ;;  %v8934_v26 = vld [vmem:[%s12994_s1 + $0x118] sm:$0xf0] }
 0xcfe   : > { %v8367_v44 = vor.u32 %v8935_v58, %v8364_v55  ;;  %4282 = vmatpush.bf16.msrb.mxu3 %v8363_v42  ;;  %v8359_v38 = vor.u32 %v8934_v26, %v8358_v45 }
 0xcff   : > { %v3827_v34 = vmul.f32 %v11198_v4, %v11198_v4  ;;  %v11216_v8 = vadd.f32 %v3784_v52, %v11020_v25  ;;  %v8930_v52 = vld [vmem:[%s12994_s1 + $0xf8] sm:$0xf0] }
 0xd01   : > { %3836 = vadd.xlane.f32.xlu1 %v3827_v34  ;;  %v8937_v34 = vld [vmem:[%s12994_s1 + $0x130] sm:$0xf0] }
 0xd02   : > { %v3799_v30 = vpop.xlane.xlu2 %3798  ;;  %v8371_v22 = vor.u32 %v8937_v34, %v8370_v32 }
 0xd03   : > { %v3812_v39 = vmul.f32 %v3799_v30, %v10644_v62  ;;  %v8350_v30 = vld [vmem:[%s12994_s1 + $0x108] sm:$0xf] }
 0xd04   : > { %v8351_v16 = vor.u32 %v8933_v20, %v8350_v30 }
 0xd05   : > { %v11204_v35 = vsub.f32 %v3788_v54, %v3812_v39  ;;  %v8932_v39 = vld [vmem:[%s12994_s1 + $0x10c] sm:$0xf] }
 0xd06   : > { %4283 = vmatpush.bf16.msrb.mxu3 %v8351_v16 }
 0xd07   : > { %v3828_v53 = vmul.f32 %v11204_v35, %v11204_v35 }
 0xd09   : > { %3838 = vadd.xlane.f32.xlu2 %v3828_v53  ;;  %3806 = vadd.xlane.f32.xlu1 %v11209_v61  ;;  %v8355_v53 = vor.u32 %v8932_v39, %v8352_v28 }
 0xd0a   : > { %v3801_v27 = vpop.xlane.xlu0 %3800 }
 0xd0b   : > { %v3813_v0 = vmul.f32 %v3801_v27, %v10644_v62  ;;  %v8338_v27 = vld [vmem:[%s12994_s1 + $0xf0] sm:$0xf] }
 0xd0d   : > { %v11213_v11 = vsub.f32 %v3789_v50, %v3813_v0  ;;  %v8406_v50 = vld [vmem:[%s12994_s1 + $0x170] sm:$0xf]  ;;  %v8929_v0 = vld [vmem:[%s12994_s1 + $0xf4] sm:$0xf] }
 0xd0e   : > { %v8407_v17 = vor.u32 %v8946_v63, %v8406_v50  ;;  %v8928_v50 = vld [vmem:[%s12994_s1 + $0xe8] sm:$0xf0]  ;;  %v8331_v63 = vor.u32 %v8926_v49, %v8328_v14 }
 0xd0f   : > { %v3829_v23 = vmul.f32 %v11213_v11, %v11213_v11  ;;  %v8335_v48 = vor.u32 %v8928_v50, %v8334_v46 }
 0xd10   : > { %4337 = vmatpush.bf16.msrb.mxu1 %v8407_v17 }
 0xd11   : > { %3808 = vadd.xlane.f32.xlu2 %v11216_v8  ;;  %3840 = vadd.xlane.f32.xlu0 %v3829_v23  ;;  %v8339_v23 = vor.u32 %v8930_v52, %v8338_v27  ;;  %v11389_v52 = vld [vmem:[%s13004_s11] ss:$0 sm:$0xff] }
 0xd12   : > { %v3803_v60 = vpop.xlane.xlu1 %3802 }
 0xd13   : > { %v3814_v56 = vmul.f32 %v3803_v60, %v10644_v62  ;;  %v8340_v60 = vld [vmem:[%s12994_s1 + $0xfc] sm:$0xf0]  ;;  %4284 = vmatpush.bf16.msrb.mxu3 %v8339_v23 }
 0xd14   : > { %4338 = vmatpush.bf16.msrb.mxu1 %v8395_v33 }
 0xd15   : > { %v11222_v3 = vsub.f32 %v3790_v41, %v3814_v56  ;;  %v8388_v41 = vld [vmem:[%s12994_s1 + $0x15c] sm:$0xf0]  ;;  %v8346_v56 = vld [vmem:[%s12994_s1 + $0xf8] sm:$0xf] }
 0xd16   : > { %v8391_v19 = vor.u32 %v8941_v10, %v8388_v41  ;;  %v8924_v10 = vld [vmem:[%s12994_s1 + $0xc8] sm:$0xf0] }
 0xd17   : > { %v3830_v57 = vmul.f32 %v11222_v3, %v11222_v3  ;;  %v8315_v41 = vor.u32 %v8924_v10, %v8314_v9 }
 0xd18   : > { %4309 = vmatpush.bf16.msrb.mxu0 %v8391_v19  ;;  %4339 = vmatpush.bf16.msrb.mxu1 %v8383_v29  ;;  %v8925_v19 = vld [vmem:[%s12994_s1 + $0xd0] sm:$0xf0] }
 0xd19   : > { %3842 = vadd.xlane.f32.xlu0 %v3830_v57  ;;  %v8931_v57 = vld [vmem:[%s12994_s1 + $0x100] sm:$0xf0]  ;;  %v8323_v6 = vor.u32 %v8925_v19, %v8322_v12 }
 0xd1a   : > { %v3805_v54 = vpop.xlane.xlu2 %3804 }
 0xd1b   : > { %v3815_v15 = vmul.f32 %v3805_v54, %v10644_v62  ;;  %v8343_v54 = vor.u32 %v8929_v0, %v8340_v60 }
 0xd1c   : > { %4340 = vmatpush.bf16.msrb.mxu1 %v8371_v22 }
 0xd1d   : > { %v11227_v25 = vsub.f32 %v3791_v59, %v3815_v15  ;;  %v8938_v59 = vld [vmem:[%s12994_s1 + $0x13c] sm:$0xf]  ;;  %v8347_v15 = vor.u32 %v8931_v57, %v8346_v56 }
 0xd1e   : > { %v8379_v43 = vor.u32 %v8938_v59, %v8376_v40 }
 0xd1f   : > { %v3831_v21 = vmul.f32 %v11227_v25, %v11227_v25 }
 0xd20   : > { %4310 = vmatpush.bf16.msrb.mxu0 %v8379_v43  ;;  %4341 = vmatpush.bf16.msrb.mxu1 %v8359_v38 }
 0xd21   : > { %3844 = vadd.xlane.f32.xlu1 %v3831_v21  ;;  %v8326_v21 = vld [vmem:[%s12994_s1 + $0xd8] sm:$0xf] }
 0xd22   : > { %v8327_v13 = vor.u32 %v8927_v18, %v8326_v21 }
 0xd24   : > { %4311 = vmatpush.bf16.msrb.mxu0 %v8367_v44  ;;  %4342 = vmatpush.bf16.msrb.mxu1 %v8347_v15 }
 0xd25   : > { %4285 = vmatpush.bf16.msrb.mxu3 %v8327_v13 }
 0xd28   : > { %4312 = vmatpush.bf16.msrb.mxu0 %v8355_v53  ;;  %4343 = vmatpush.bf16.msrb.mxu1 %v8335_v48 }
 0xd29   : > { %4286 = vmatpush.bf16.msrb.mxu3 %v8315_v41 }
 0xd2c   : > { %4313 = vmatpush.bf16.msrb.mxu0 %v8343_v54  ;;  %4344 = vmatpush.bf16.msrb.mxu1 %v8323_v6 }
 0xd30   : > { %4314 = vmatpush.bf16.msrb.mxu0 %v8331_v63 }
 0xd34   : > { %4315 = vmatpush.bf16.msrb.mxu0 %v8319_v7 }
 0xd6c   : > { %v3835_v17 = vpop.xlane.xlu0 %3834 }
 0xd6d   : > { %v3850_v5 = vmul.f32 %v3835_v17, %v10644_v62 }
 0xd6f   : > { %v3858_v33 = vadd.f32 1e-05, %v3850_v5 }
 0xd71   : > { %9333 = vrsqrt.f32 %v3858_v33  ;;  %vm3872_vm9 = vweird.f32 %v3858_v33 }
 0xd74   : > { %v3837_v59 = vpop.xlane.xlu1 %3836 }
 0xd75   : > { %v3851_v37 = vmul.f32 %v3837_v59, %v10644_v62 }
 0xd77   : > { %v9334_v40 = vpop.eup %9333  ;;  %v3859_v24 = vadd.f32 1e-05, %v3851_v37 }
 0xd78   : > { %v3867_v31 = vmul.f32 %v9334_v40, %v3858_v33  ;;  %vm3873_vm8 = vweird.f32 %v9334_v40 }
 0xd79   : > { %9335 = vrsqrt.f32 %v3859_v24  ;;  %vm3874_vm10 = vmor %vm3872_vm9, %vm3873_vm8  ;;  %vm3882_vm12 = vweird.f32 %v3859_v24 }
 0xd7a   : > { %v3868_v43 = vmul.f32 %v9334_v40, %v3867_v31 }
 0xd7c   : > { %v3869_v29 = vmul.f32 0.5, %v3868_v43  ;;  %v3839_v1 = vpop.xlane.xlu2 %3838  ;;  %v3807_v51 = vpop.xlane.xlu1 %3806 }
 0xd7d   : > { %v3852_v58 = vmul.f32 %v3839_v1, %v10644_v62  ;;  %v3816_v42 = vmul.f32 %v3807_v51, %v10644_v62 }
 0xd7e   : > { %v3870_v55 = vsub.f32 1.5, %v3869_v29 }
 0xd7f   : > { %v9336_v32 = vpop.eup %9335  ;;  %v3860_v34 = vadd.f32 1e-05, %v3852_v58  ;;  %v11380_v44 = vsub.f32 %v11209_v61, %v3816_v42 }
 0xd80   : > { %v3871_v22 = vmul.f32 %v9334_v40, %v3870_v55  ;;  %v3877_v30 = vmul.f32 %v9336_v32, %v3859_v24  ;;  %vm3883_vm11 = vweird.f32 %v9336_v32 }
 0xd81   : > { %9337 = vrsqrt.f32 %v3860_v34  ;;  %v3832_v20 = vmul.f32 %v11380_v44, %v11380_v44  ;;  %vm3884_vm13 = vmor %vm3882_vm12, %vm3883_vm11  ;;  %vm3892_vm15 = vweird.f32 %v3860_v34 }
 0xd82   : > { %v3878_v39 = vmul.f32 %v9336_v32, %v3877_v30  ;;  %v3875_v16 = vsel %vm3874_vm10, %v9334_v40, %v3871_v22 }
 0xd83   : > { %3846 = vadd.xlane.f32.xlu2 %v3832_v20  ;;  %v3946_v0 = vmul.f32 %v3875_v16, %v11192_v2  ;;  %v11402_v2 = vld [vmem:[%s13005_s12] ss:$0 sm:$0xff] }
 0xd84   : > { %v3879_v28 = vmul.f32 0.5, %v3878_v39  ;;  %v3809_v45 = vpop.xlane.xlu2 %3808  ;;  %v3841_v26 = vpop.xlane.xlu0 %3840 }
 0xd85   : > { %v3817_v53 = vmul.f32 %v3809_v45, %v10644_v62  ;;  %v3853_v61 = vmul.f32 %v3841_v26, %v10644_v62  ;;  %v3957_v18 = vmul.f32 %v11389_v52, %v3946_v0 }
 0xd86   : > { %v3880_v38 = vsub.f32 1.5, %v3879_v28 }
 0xd87   : > { %v9338_v27 = vpop.eup %9337  ;;  %v11393_v23 = vsub.f32 %v11216_v8, %v3817_v53  ;;  %v3861_v60 = vadd.f32 1e-05, %v3853_v61  ;;  %v11407_v17 = vadd.f32 %v11402_v2, %v3957_v18 }
 0xd88   : > { %v3881_v56 = vmul.f32 %v9336_v32, %v3880_v38  ;;  %v3887_v57 = vmul.f32 %v9338_v27, %v3860_v34  ;;  %vm3893_vm14 = vweird.f32 %v9338_v27 }
 0xd89   : > { %9339 = vrsqrt.f32 %v3861_v60  ;;  %v3833_v54 = vmul.f32 %v11393_v23, %v11393_v23  ;;  %13023 = vst [vmem:[#allocation3_spill] sm:$0xff] %v11407_v17  ;;  %vm3894_vm5 = vmor %vm3892_vm15, %vm3893_vm14  ;;  %vm3902_vm7 = vweird.f32 %v3861_v60 }
 0xd8a   : > { %v3885_v15 = vsel %vm3884_vm13, %v9336_v32, %v3881_v56  ;;  %v3888_v21 = vmul.f32 %v9338_v27, %v3887_v57 }
 0xd8b   : > { %v3947_v49 = vmul.f32 %v3885_v15, %v11198_v4  ;;  %3848 = vadd.xlane.f32.xlu0 %v3833_v54 }
 0xd8c   : > { %v3889_v8 = vmul.f32 0.5, %v3888_v21  ;;  %v3843_v13 = vpop.xlane.xlu0 %3842 }
 0xd8d   : > { %v3958_v14 = vmul.f32 %v11389_v52, %v3947_v49  ;;  %v3854_v46 = vmul.f32 %v3843_v13, %v10644_v62 }
 0xd8e   : > { %v3890_v50 = vsub.f32 1.5, %v3889_v8 }
 0xd8f   : > { %v9340_v63 = vpop.eup %9339  ;;  %v3862_v48 = vadd.f32 1e-05, %v3854_v46  ;;  %v11410_v4 = vadd.f32 %v11402_v2, %v3958_v14 }
 0xd90   : > { %v3891_v5 = vmul.f32 %v9338_v27, %v3890_v50  ;;  %v3897_v9 = vmul.f32 %v9340_v63, %v3861_v60  ;;  %vm3903_vm6 = vweird.f32 %v9340_v63  ;;  %v8192_v50 = vld [vmem:[%s12995_s2 + $0x3] sm:$0x7] }
 0xd91   : > { %13024 = vst [vmem:[#allocation4_spill] sm:$0xff] %v11410_v4  ;;  %9341 = vrsqrt.f32 %v3862_v48  ;;  %v4140_v10 = vpack.c.bf16 %v11410_v4, %v11407_v17  ;;  %vm3904_vm8 = vmor %vm3902_vm7, %vm3903_vm6  ;;  %vm3912_vm10 = vweird.f32 %v3862_v48 }
 0xd92   : > { %v3898_v36 = vmul.f32 %v9340_v63, %v3897_v9  ;;  %v3895_v41 = vsel %vm3894_vm5, %v9338_v27, %v3891_v5 }
 0xd93   : > { %4287 = vmatmul.bf16.vlgmr.msrb.gmra.mxu3 %v4140_v10  ;;  %4316 = vmatmul.bf16.vlgmr.msrb.gmra.mxu0 %v4140_v10  ;;  %v3948_v59 = vmul.f32 %v3895_v41, %v11204_v35 }
 0xd94   : > { %v3899_v47 = vmul.f32 0.5, %v3898_v36  ;;  %4345 = vmatmul.bf16.vlgmr.msrb.gmra.mxu1 %v4140_v10  ;;  %v3845_v12 = vpop.xlane.xlu1 %3844 }
 0xd95   : > { %v3855_v19 = vmul.f32 %v3845_v12, %v10644_v62  ;;  %v3959_v29 = vmul.f32 %v11389_v52, %v3948_v59 }
 0xd96   : > { %v3900_v33 = vsub.f32 1.5, %v3899_v47 }
 0xd97   : > { %v9342_v7 = vpop.eup %9341  ;;  %v3863_v6 = vadd.f32 1e-05, %v3855_v19  ;;  %v11420_v55 = vadd.f32 %v11402_v2, %v3959_v29 }
 0xd98   : > { %v3901_v37 = vmul.f32 %v9340_v63, %v3900_v33  ;;  %v3907_v40 = vmul.f32 %v9342_v7, %v3862_v48  ;;  %vm3913_vm9 = vweird.f32 %v9342_v7  ;;  %v11444_v48 = vperm.slane %v8192_v50, 1 }
 0xd99   : > { %9343 = vrsqrt.f32 %v3863_v6  ;;  %13025 = vst [vmem:[#allocation5_spill] sm:$0xff] %v11420_v55  ;;  %vm3914_vm11 = vmor %vm3912_vm10, %vm3913_vm9  ;;  %vm3922_vm13 = vweird.f32 %v3863_v6 }
 0xd9a   : > { %v3905_v24 = vsel %vm3904_vm8, %v9340_v63, %v3901_v37  ;;  %v3908_v31 = vmul.f32 %v9342_v7, %v3907_v40 }
 0xd9b   : > { %v3949_v43 = vmul.f32 %v3905_v24, %v11213_v11 }
 0xd9c   : > { %v3909_v1 = vmul.f32 0.5, %v3908_v31 }
 0xd9d   : > { %v3960_v51 = vmul.f32 %v11389_v52, %v3949_v43 }
 0xd9e   : > { %v3910_v58 = vsub.f32 1.5, %v3909_v1 }
 0xd9f   : > { %v9344_v42 = vpop.eup %9343  ;;  %v11423_v35 = vadd.f32 %v11402_v2, %v3960_v51 }
 0xda0   : > { %v3911_v32 = vmul.f32 %v9342_v7, %v3910_v58  ;;  %v3917_v34 = vmul.f32 %v9344_v42, %v3863_v6  ;;  %vm3923_vm12 = vweird.f32 %v9344_v42 }
 0xda1   : > { %13026 = vst [vmem:[#allocation6_spill] sm:$0xff] %v11423_v35  ;;  %v4141_v22 = vpack.c.bf16 %v11423_v35, %v11420_v55  ;;  %vm3924_vm14 = vmor %vm3922_vm13, %vm3923_vm12 }
 0xda2   : > { %v3918_v11 = vmul.f32 %v9344_v42, %v3917_v34  ;;  %v3915_v30 = vsel %vm3914_vm11, %v9342_v7, %v3911_v32  ;;  %v11448_v7 = vperm.slane %v8192_v50, 0 }
 0xda3   : > { %4292 = vmatmul.bf16.gmra.mxu3 %v4141_v22  ;;  %4321 = vmatmul.bf16.gmra.mxu0 %v4141_v22  ;;  %v3950_v16 = vmul.f32 %v3915_v30, %v11222_v3 }
 0xda4   : > { %v3919_v20 = vmul.f32 0.5, %v3918_v11  ;;  %4350 = vmatmul.bf16.gmra.mxu1 %v4141_v22 }
 0xda5   : > { %v3961_v53 = vmul.f32 %v11389_v52, %v3950_v16 }
 0xda6   : > { %v3920_v39 = vsub.f32 1.5, %v3919_v20 }
 0xda7   : > { %v11432_v38 = vadd.f32 %v11402_v2, %v3961_v53 }
 0xda8   : > { %v3921_v28 = vmul.f32 %v9344_v42, %v3920_v39 }
 0xda9   : > { %13027 = vst [vmem:[#allocation7_spill] sm:$0xff] %v11432_v38 }
 0xdaa   : > { %v3925_v45 = vsel %vm3924_vm14, %v9344_v42, %v3921_v28 }
 0xdab   : > { %v3951_v26 = vmul.f32 %v3925_v45, %v11227_v25 }
 0xdad   : > { %v3962_v61 = vmul.f32 %v11389_v52, %v3951_v26 }
 0xdaf   : > { %v11435_v27 = vadd.f32 %v11402_v2, %v3962_v61 }
 0xdb1   : > { %13028 = vst [vmem:[#allocation8_spill] sm:$0xff] %v11435_v27  ;;  %v4142_v0 = vpack.c.bf16 %v11435_v27, %v11432_v38 }
 0xdb3   : > { %4297 = vmatmul.bf16.gmra.mxu3 %v4142_v0  ;;  %4326 = vmatmul.bf16.gmra.mxu0 %v4142_v0 }
 0xdb4   : > { %4355 = vmatmul.bf16.gmra.mxu1 %v4142_v0 }
 0xdf6   : > { %v3847_v3 = vpop.xlane.xlu2 %3846 }
 0xdf7   : > { %v3856_v60 = vmul.f32 %v3847_v3, %v10644_v62 }
 0xdf9   : > { %v3864_v25 = vadd.f32 1e-05, %v3856_v60 }
 0xdfb   : > { %9345 = vrsqrt.f32 %v3864_v25  ;;  %vm3932_vm5 = vweird.f32 %v3864_v25 }
 0xdfe   : > { %v3849_v56 = vpop.xlane.xlu0 %3848 }
 0xdff   : > { %v3857_v57 = vmul.f32 %v3849_v56, %v10644_v62 }
 0xe01   : > { %v9346_v54 = vpop.eup %9345  ;;  %v3865_v15 = vadd.f32 1e-05, %v3857_v57  ;;  %v11486_v57 = vperm.slane %v8192_v50, 2 }
 0xe02   : > { %v3927_v21 = vmul.f32 %v9346_v54, %v3864_v25  ;;  %vm3933_vm15 = vweird.f32 %v9346_v54 }
 0xe03   : > { %9347 = vrsqrt.f32 %v3865_v15  ;;  %vm3934_vm6 = vmor %vm3932_vm5, %vm3933_vm15  ;;  %vm3942_vm8 = vweird.f32 %v3865_v15 }
 0xe04   : > { %v3928_v18 = vmul.f32 %v9346_v54, %v3927_v21 }
 0xe06   : > { %v3929_v49 = vmul.f32 0.5, %v3928_v18 }
 0xe08   : > { %v3930_v8 = vsub.f32 1.5, %v3929_v49 }
 0xe09   : > { %v9348_v13 = vpop.eup %9347 }
 0xe0a   : > { %v3931_v14 = vmul.f32 %v9346_v54, %v3930_v8  ;;  %v3937_v46 = vmul.f32 %v9348_v13, %v3865_v15  ;;  %vm3943_vm7 = vweird.f32 %v9348_v13 }
 0xe0b   : > { %vm3944_vm9 = vmor %vm3942_vm8, %vm3943_vm7 }
 0xe0c   : > { %v3938_v63 = vmul.f32 %v9348_v13, %v3937_v46  ;;  %v3935_v5 = vsel %vm3934_vm6, %v9346_v54, %v3931_v14 }
 0xe0d   : > { %v3952_v12 = vmul.f32 %v3935_v5, %v11380_v44 }
 0xe0e   : > { %v3939_v9 = vmul.f32 0.5, %v3938_v63 }
 0xe0f   : > { %v3963_v24 = vmul.f32 %v11389_v52, %v3952_v12 }
 0xe10   : > { %v3940_v10 = vsub.f32 1.5, %v3939_v9  ;;  %v4317_v36 = vpop.f32.mrf.mxu0 }
 0xe11   : > { %v4318_v41 = vadd.f32 %v4317_v36, %v11444_v48  ;;  %v4346_v47 = vpop.f32.mrf.mxu1 }
 0xe12   : > { %v3941_v19 = vmul.f32 %v9348_v13, %v3940_v10  ;;  %v4347_v49 = vadd.f32 %v4346_v47, %v11486_v57 }
 0xe13   : > { %v4374_v33 = vpack.c.bf16 %v4318_v41, %v4318_v41 }
 0xe14   : > { %v3945_v6 = vsel %vm3944_vm9, %v9348_v13, %v3941_v19  ;;  %v11503_v63 = vpack.c.bf16 %v4347_v49, %v4347_v49 }
 0xe15   : > { %v4394_v59 = vsel %vm884_vm0, %v4374_v33, 0  ;;  %v4804_v37 = vunpack.c.l.b16 %v4374_v33  ;;  %v3953_v40 = vmul.f32 %v3945_v6, %v11393_v23  ;;  %v11461_v23 = vadd.f32 %v11402_v2, %v3963_v24 }
 0xe16   : > { %v4288_v31 = vpop.f32.mrf.mxu3  ;;  %4403 = vmatpush.bf16.xpose.msra.mxu2 %v4394_v59  ;;  %v4650_v41 = vsel %vm1145_vm2, %v11503_v63, 0 }
 0xe17   : > { %v11453_v43 = vpack.c.b16 %v4804_v37, %v4804_v37  ;;  %v4289_v44 = vadd.f32 %v4288_v31, %v11448_v7  ;;  %v3964_v29 = vmul.f32 %v11389_v52, %v3953_v40  ;;  %13029 = vst [vmem:[#allocation9_spill] sm:$0xff] %v11461_v23 }
 0xe18   : > { %v4319_v1 = vpop.f32.mrf.mxu0 }
 0xe19   : > { %v4366_v51 = vpack.c.bf16 %v4289_v44, %v4289_v44  ;;  %v4320_v58 = vadd.f32 %v4319_v1, %v11444_v48  ;;  %v4348_v42 = vpop.f32.mrf.mxu1  ;;  %4806 = vrot.lane.b32.xlu1 %v11453_v43, %s9525_s30  ;;  %v11464_v32 = vadd.f32 %v11402_v2, %v3964_v29 }
 0xe1a   : > { %v4349_v47 = vadd.f32 %v4348_v42, %v11486_v57 }
 0xe1b   : > { %13030 = vst [vmem:[#allocation10_spill] sm:$0xff] %v11464_v32  ;;  %v4799_v34 = vunpack.c.l.b16 %v4366_v51  ;;  %v4375_v22 = vpack.c.bf16 %v4320_v58, %v4320_v58  ;;  %v4143_v11 = vpack.c.bf16 %v11464_v32, %v11461_v23 }
 0xe1c   : > { %v11521_v37 = vpack.c.bf16 %v4349_v47, %v4349_v47 }
 0xe1d   : > { %v11468_v52 = vpack.c.b16 %v4799_v34, %v4799_v34  ;;  %v4833_v30 = vunpack.c.l.b16 %v4375_v22  ;;  %4302 = vmatmul.bf16.gmra.mxu3 %v4143_v11  ;;  %4331 = vmatmul.bf16.gmra.mxu0 %v4143_v11  ;;  %v4413_v20 = vsel %vm884_vm0, %v4375_v22, 0 }
 0xe1e   : > { %4360 = vmatmul.bf16.gmra.mxu1 %v4143_v11  ;;  %8408 = vmatmul.msk.bf16.vlgmr.msra.gmra.mxu2 %vm884_vm0, %v4366_v51  ;;  %v4290_v39 = vpop.f32.mrf.mxu3  ;;  %v4669_v58 = vsel %vm1145_vm2, %v11521_v37, 0 }
 0xe1f   : > { %v11472_v16 = vpack.c.b16 %v4833_v30, %v4833_v30  ;;  %4422 = vmatpush.bf16.xpose.msra.mxu3 %v4413_v20  ;;  %4801 = vrot.lane.b32.xlu0 %v11468_v52, %s9525_s30  ;;  %v4291_v0 = vadd.f32 %v4290_v39, %v11448_v7 }
 0xe20   : > { %v4322_v2 = vpop.f32.mrf.mxu0 }
 0xe21   : > { %v4323_v28 = vadd.f32 %v4322_v2, %v11444_v48  ;;  %v4351_v45 = vpop.f32.mrf.mxu1  ;;  %4835 = vrot.lane.b32.xlu2 %v11472_v16, %s9525_s30  ;;  %v11488_v54 = vpack.c.bf16 %v4291_v0, %v4291_v0 }
 0xe22   : > { %v4352_v30 = vadd.f32 %v4351_v45, %v11486_v57 }
 0xe23   : > { %v11479_v26 = vpack.c.bf16 %v4323_v28, %v4323_v28 }
 0xe24   : > { %v11547_v28 = vpack.c.bf16 %v4352_v30, %v4352_v30 }
 0xe25   : > { %v4432_v53 = vsel %vm884_vm0, %v11479_v26, 0 }
 0xe26   : > { %v4293_v61 = vpop.f32.mrf.mxu3  ;;  %4441 = vmatpush.bf16.xpose.msra.mxu0 %v4432_v53 }
 0xe27   : > { %v4294_v3 = vadd.f32 %v4293_v61, %v11448_v7 }
 0xe28   : > { %v4324_v60 = vpop.f32.mrf.mxu0 }
 0xe29   : > { %v4325_v25 = vadd.f32 %v4324_v60, %v11444_v48  ;;  %v4353_v56 = vpop.f32.mrf.mxu1  ;;  %v11490_v15 = vpack.c.bf16 %v4294_v3, %v4294_v3  ;;  %v4688_v3 = vsel %vm1145_vm2, %v11547_v28, 0 }
 0xe2a   : > { %v4354_v60 = vadd.f32 %v4353_v56, %v11486_v57 }
 0xe2b   : > { %v11492_v21 = vpack.c.bf16 %v4325_v25, %v4325_v25 }
 0xe2d   : > { %8409 = vmatmul.msk.bf16.vlgmr.msra.gmra.mxu3 %vm884_vm0, %v11488_v54  ;;  %8410 = vmatmul.msk.bf16.vlgmr.msra.gmra.mxu0 %vm884_vm0, %v11490_v15  ;;  %v4451_v18 = vsel %vm884_vm0, %v11492_v21, 0 }
 0xe2e   : > { %v4295_v8 = vpop.f32.mrf.mxu3  ;;  %4460 = vmatpush.bf16.xpose.msra.mxu1 %v4451_v18 }
 0xe2f   : > { %v4296_v13 = vadd.f32 %v4295_v8, %v11448_v7 }
 0xe30   : > { %v4327_v14 = vpop.f32.mrf.mxu0 }
 0xe31   : > { %v4328_v46 = vadd.f32 %v4327_v14, %v11444_v48  ;;  %v4356_v50 = vpop.f32.mrf.mxu1  ;;  %v11505_v5 = vpack.c.bf16 %v4296_v13, %v4296_v13 }
 0xe32   : > { %v4357_v36 = vadd.f32 %v4356_v50, %v11486_v57 }
 0xe33   : > { %v11507_v9 = vpack.c.bf16 %v4328_v46, %v4328_v46  ;;  %v11563_v46 = vpack.c.bf16 %v4354_v60, %v4354_v60 }
 0xe34   : > { %v11518_v6 = vpack.c.bf16 %v4357_v36, %v4357_v36 }
 0xe35   : > { %v4470_v10 = vsel %vm884_vm0, %v11507_v9, 0  ;;  %8411 = vmatmul.msk.bf16.vlgmr.msra.gmra.mxu1 %vm884_vm0, %v11505_v5 }
 0xe36   : > { %v4298_v12 = vpop.f32.mrf.mxu3  ;;  %4479 = vmatpush.bf16.xpose.msrb.mxu2 %v4470_v10  ;;  %v4726_v44 = vsel %vm1145_vm2, %v11518_v6, 0 }
 0xe37   : > { %v4299_v19 = vadd.f32 %v4298_v12, %v11448_v7 }
 0xe38   : > { %v4329_v33 = vpop.f32.mrf.mxu0 }
 0xe39   : > { %v4330_v59 = vadd.f32 %v4329_v33, %v11444_v48  ;;  %v4358_v40 = vpop.f32.mrf.mxu1  ;;  %v11523_v24 = vpack.c.bf16 %v4299_v19, %v4299_v19  ;;  %v4707_v19 = vsel %vm1145_vm2, %v11563_v46, 0 }
 0xe3a   : > { %v4359_v29 = vadd.f32 %v4358_v40, %v11486_v57 }
 0xe3b   : > { %v11525_v31 = vpack.c.bf16 %v4330_v59, %v4330_v59 }
 0xe3c   : > { %v11537_v34 = vpack.c.bf16 %v4359_v29, %v4359_v29 }
 0xe3d   : > { %8412 = vmatmul.msk.bf16.vlgmr.msrb.gmra.mxu2 %vm884_vm0, %v11523_v24  ;;  %v4489_v1 = vsel %vm884_vm0, %v11525_v31, 0 }
 0xe3e   : > { %4659 = vmatpush.bf16.msra.mxu2 %v4650_v41  ;;  %v4300_v51 = vpop.f32.mrf.mxu3  ;;  %4498 = vmatpush.bf16.xpose.msrb.mxu3 %v4489_v1  ;;  %v4745_v11 = vsel %vm1145_vm2, %v11537_v34, 0 }
 0xe3f   : > { %v4301_v42 = vadd.f32 %v4300_v51, %v11448_v7 }
 0xe41   : > { %v11539_v22 = vpack.c.bf16 %v4301_v42, %v4301_v42 }
 0xe42   : > { %4735 = vmatpush.bf16.msrb.mxu2 %v4726_v44 }
 0xe45   : > { %8413 = vmatmul.msk.bf16.vlgmr.msrb.gmra.mxu3 %vm884_vm0, %v11539_v22 }
 0xe46   : > { %4678 = vmatpush.bf16.msra.mxu3 %v4669_v58 }
 0xe4a   : > { %4754 = vmatpush.bf16.msrb.mxu3 %v4745_v11 }
 0xe9a   : > { %v4332_v20 = vpop.f32.mrf.mxu0 }
 0xe9b   : > { %v4333_v39 = vadd.f32 %v4332_v20, %v11444_v48  ;;  %v4361_v2 = vpop.f32.mrf.mxu1 }
 0xe9c   : > { %v4362_v0 = vadd.f32 %v4361_v2, %v11486_v57 }
 0xe9d   : > { %v11549_v53 = vpack.c.bf16 %v4333_v39, %v4333_v39 }
 0xe9e   : > { %v11560_v13 = vpack.c.bf16 %v4362_v0, %v4362_v0 }
 0xe9f   : > { %v4508_v61 = vsel %vm884_vm0, %v11549_v53, 0 }
 0xea0   : > { %v4303_v25 = vpop.f32.mrf.mxu3  ;;  %4517 = vmatpush.bf16.xpose.msrb.mxu0 %v4508_v61  ;;  %v4764_v41 = vsel %vm1145_vm2, %v11560_v13, 0 }
 0xea1   : > { %v4304_v45 = vadd.f32 %v4303_v25, %v11448_v7  ;;  %v4405_v18 = vpop.f32.mrf.mxu2 }
 0xea2   : > { %v11558_v49 = vmul.f32 0.17677669, %v4405_v18  ;;  %v4334_v8 = vpop.f32.mrf.mxu0 }
 0xea3   : > { %v4335_v14 = vadd.f32 %v4334_v8, %v11444_v48  ;;  %v4363_v50 = vpop.f32.mrf.mxu1  ;;  %v11567_v56 = vpack.c.bf16 %v4304_v45, %v4304_v45 }
 0xea4   : > { %v4550_v10 = vsel %vm1045_vm1, %v11558_v49, -inf  ;;  %v4364_v47 = vadd.f32 %v4363_v50, %v11486_v57 }
 0xea5   : > { %v11569_v36 = vpack.c.bf16 %v4335_v14, %v4335_v14  ;;  %4551 = vmax.xlane.f32.xlu1 %v4550_v10  ;;  %v4920_v14 = vunpack.c.l.b16 %v11507_v9 }
 0xea6   : > { %v11581_v44 = vpack.c.bf16 %v4364_v47, %v4364_v47 }
 0xea7   : > { %8414 = vmatmul.msk.bf16.vlgmr.msrb.gmra.mxu0 %vm884_vm0, %v11567_v56  ;;  %v4527_v48 = vsel %vm884_vm0, %v11569_v36, 0  ;;  %v11604_v10 = vpack.c.b16 %v4920_v14, %v4920_v14 }
 0xea8   : > { %4697 = vmatpush.bf16.msra.mxu0 %v4688_v3  ;;  %v4305_v12 = vpop.f32.mrf.mxu3  ;;  %4536 = vmatpush.bf16.xpose.msrb.mxu1 %v4527_v48  ;;  %v4783_v29 = vsel %vm1145_vm2, %v11581_v44, 0  ;;  %v11613_v48 = vpop.permute.xlu1 %4806 }
 0xea9   : > { %v4306_v33 = vadd.f32 %v4305_v12, %v11448_v7  ;;  %v4407_v59 = vpop.f32.mrf.mxu2  ;;  %v11615_v12 = vpop.permute.xlu2 %4835 }
 0xeaa   : > { %v4443_v40 = vpop.f32.mrf.mxu0 }
 0xeab   : > { %v11583_v57 = vpack.c.bf16 %v4306_v33, %v4306_v33  ;;  %v11594_v20 = vmul.f32 0.17677669, %v4443_v40  ;;  %v11620_v40 = vpop.permute.xlu0 %4801 }
 0xeac   : > { %4773 = vmatpush.bf16.msrb.mxu0 %v4764_v41  ;;  %v4828_v41 = vunpack.c.l.b16 %v11488_v54 }
 0xead   : > { %v4556_v61 = vsel %vm1045_vm1, %v11594_v20, -inf }
 0xeae   : > { %v11609_v47 = vpack.c.b16 %v4828_v41, %v4828_v41 }
 0xeaf   : > { %8415 = vmatmul.msk.bf16.vlgmr.msrb.gmra.mxu1 %vm884_vm0, %v11583_v57 }
 0xeb0   : > { %4716 = vmatpush.bf16.msra.mxu1 %v4707_v19  ;;  %v4424_v1 = vpop.f32.mrf.mxu3 }
 0xeb1   : > { %v4543_v51 = vmul.f32 0.17677669, %v4424_v1 }
 0xeb2   : > { %v4445_v58 = vpop.f32.mrf.mxu0  ;;  %v4462_v42 = vpop.f32.mrf.mxu1 }
 0xeb3   : > { %v11589_v11 = vmul.f32 0.17677669, %v4462_v42  ;;  %v4553_v7 = vsel %vm1045_vm1, %v4543_v51, -inf }
 0xeb4   : > { %4792 = vmatpush.bf16.msrb.mxu1 %v4783_v29  ;;  %4554 = vmax.xlane.f32.xlu2 %v4553_v7 }
 0xeb5   : > { %v4559_v30 = vsel %vm1045_vm1, %v11589_v11, -inf }
 0xeb6   : > { %4560 = vmax.xlane.f32.xlu0 %v4559_v30 }
 0xeb8   : > { %v4426_v39 = vpop.f32.mrf.mxu3 }
 0xeba   : > { %v4464_v2 = vpop.f32.mrf.mxu1 }
 0xebc   : > { %4557 = vmax.xlane.f32.xlu2 %v4556_v61 }
 0xec0   : > { %v4481_v0 = vpop.f32.mrf.mxu2 }
 0xec1   : > { %v4546_v3 = vmul.f32 0.17677669, %v4481_v0 }
 0xec3   : > { %v4562_v60 = vsel %vm1045_vm1, %v4546_v3, -inf }
 0xec4   : > { %4563 = vmax.xlane.f32.xlu0 %v4562_v60 }
 0xec8   : > { %v4483_v25 = vpop.f32.mrf.mxu2  ;;  %v4500_v45 = vpop.f32.mrf.mxu3 }
 0xec9   : > { %v11599_v18 = vmul.f32 0.17677669, %v4500_v45  ;;  %v4915_v25 = vunpack.c.l.b16 %v11523_v24  ;;  %v4949_v24 = vunpack.c.l.b16 %v11525_v31 }
 0xecb   : > { %v4565_v8 = vsel %vm1045_vm1, %v11599_v18, -inf }
 0xecc   : > { %4566 = vmax.xlane.f32.xlu1 %v4565_v8 }
 0xed0   : > { %v4502_v50 = vpop.f32.mrf.mxu3 }
 0xed1   : > { %v11637_v50 = vpack.c.b16 %v4915_v25, %v4915_v25 }
 0xed4   : > { %4922 = vrot.lane.b32.xlu2 %v11604_v10, %s9525_s30 }
 0xee5   : > { %4830 = vrot.lane.b32.xlu1 %v11609_v47, %s9525_s30 }
 0xf18   : > { %v4552_v19 = vpop.xlane.xlu1 %4551 }
 0xf19   : > { %v4574_v59 = vsub.f32 %v11558_v49, %v4552_v19 }
 0xf1b   : > { %v4582_v58 = vmul.f32 1.442695, %v4574_v59  ;;  %v11646_v59 = vpack.c.b16 %v4949_v24, %v4949_v24  ;;  %v4857_v24 = vunpack.c.l.b16 %v11490_v15 }
 0xf24   : > { %v4519_v33 = vpop.f32.mrf.mxu0 }
 0xf25   : > { %v11617_v9 = vmul.f32 0.17677669, %v4519_v33 }
 0xf27   : > { %v4555_v29 = vpop.xlane.xlu2 %4554  ;;  %v4568_v54 = vsel %vm1045_vm1, %v11617_v9, -inf }
 0xf28   : > { %v4575_v1 = vsub.f32 %v4543_v51, %v4555_v29  ;;  %4569 = vmax.xlane.f32.xlu0 %v4568_v54  ;;  %v4886_v54 = vunpack.c.l.b16 %v11505_v5 }
 0xf29   : > { %v4561_v2 = vpop.xlane.xlu0 %4560 }
 0xf2a   : > { %v4584_v42 = vmul.f32 1.442695, %v4575_v1 }
 0xf2c   : > { %9349 = vpow2.f32 %v4584_v42  ;;  %v4521_v7 = vpop.f32.mrf.mxu0  ;;  %v4538_v30 = vpop.f32.mrf.mxu1  ;;  %v4577_v42 = vsub.f32 %v11589_v11, %v4561_v2 }
 0xf2d   : > { %v11624_v39 = vmul.f32 0.17677669, %v4538_v30  ;;  %9351 = vpow2.f32 %v4582_v58  ;;  %v11652_v58 = vpack.c.b16 %v4886_v54, %v4886_v54  ;;  %v11689_v54 = vpack.c.b16 %v4857_v24, %v4857_v24 }
 0xf2e   : > { %v4588_v31 = vmul.f32 1.442695, %v4577_v42  ;;  %v5002_v24 = vunpack.c.l.b16 %v11583_v57  ;;  %v5135_v57 = vunpack.c.l.b16 %v11503_v63 }
 0xf2f   : > { %v4571_v49 = vsel %vm1045_vm1, %v11624_v39, -inf  ;;  %v4558_v29 = vpop.xlane.xlu2 %4557 }
 0xf30   : > { %4572 = vmax.xlane.f32.xlu1 %v4571_v49 }
 0xf32   : > { %v11628_v61 = vpop.eup %9349 }
 0xf33   : > { %v4601_v0 = vsel %vm1045_vm1, %v11628_v61, 0.0  ;;  %v11632_v51 = vpop.eup %9351 }
 0xf34   : > { %4602 = vadd.xlane.f32.xlu2 %v4601_v0  ;;  %v4540_v60 = vpop.f32.mrf.mxu1  ;;  %v4598_v8 = vsel %vm1045_vm1, %v11632_v51, 0.0 }
 0xf37   : > { %v4564_v45 = vpop.xlane.xlu0 %4563 }
 0xf38   : > { %v4578_v14 = vsub.f32 %v4546_v3, %v4564_v45  ;;  %4599 = vadd.xlane.f32.xlu1 %v4598_v8  ;;  %v4576_v3 = vsub.f32 %v11594_v20, %v4558_v29  ;;  %v4862_v45 = vunpack.c.l.b16 %v11479_v26 }
 0xf3a   : > { %v4590_v41 = vmul.f32 1.442695, %v4578_v14  ;;  %v4586_v1 = vmul.f32 1.442695, %v4576_v3  ;;  %v11676_v8 = vpack.c.b16 %v4862_v45, %v4862_v45  ;;  %v4891_v14 = vunpack.c.l.b16 %v11492_v21  ;;  %v4923_v3 = vpop.permute.xlu2 %4922 }
 0xf3b   : > { %v4928_v63 = vsel %vm884_vm0, %v4923_v3, 0 }
 0xf3c   : > { %9353 = vpow2.f32 %v4590_v41  ;;  %4917 = vrot.lane.b32.xlu0 %v11637_v50, %s9525_s30  ;;  %v11681_v41 = vpack.c.b16 %v4891_v14, %v4891_v14 }
 0xf3d   : > { %9355 = vpow2.f32 %v4586_v1  ;;  %v5007_v1 = vunpack.c.l.b16 %v11569_v36  ;;  %v4973_v36 = vunpack.c.l.b16 %v11567_v56  ;;  %v4841_v56 = vsel %vm884_vm0, %v11615_v12, 0 }
 0xf3e   : > { %9357 = vpow2.f32 %v4588_v31 }
 0xf3f   : > { %v4567_v7 = vpop.xlane.xlu1 %4566 }
 0xf40   : > { %v4579_v49 = vsub.f32 %v11599_v18, %v4567_v7  ;;  %v4944_v18 = vunpack.c.l.b16 %v11539_v22 }
 0xf42   : > { %v11641_v19 = vpop.eup %9353  ;;  %v4592_v5 = vmul.f32 1.442695, %v4579_v49  ;;  %v11671_v25 = vpack.c.b16 %v4944_v18, %v4944_v18 }
 0xf43   : > { %v4610_v33 = vsel %vm1045_vm1, %v11641_v19, 0.0  ;;  %v11657_v30 = vpop.eup %9355 }
 0xf44   : > { %4611 = vadd.xlane.f32.xlu2 %v4610_v33  ;;  %v4604_v20 = vsel %vm1045_vm1, %v11657_v30, 0.0  ;;  %v11662_v0 = vpop.eup %9357  ;;  %9359 = vpow2.f32 %v4592_v5 }
 0xf45   : > { %v4607_v11 = vsel %vm1045_vm1, %v11662_v0, 0.0 }
 0xf4a   : > { %v11666_v2 = vpop.eup %9359 }
 0xf4b   : > { %v4613_v60 = vsel %vm1045_vm1, %v11666_v2, 0.0 }
 0xf51   : > { %4951 = vrot.lane.b32.xlu1 %v11646_v59, %s9525_s30 }
 0xf57   : > { %v11685_v22 = vpop.permute.xlu1 %4830 }
 0xf5c   : > { %4888 = vrot.lane.b32.xlu2 %v11652_v58, %s9525_s30 }
 0xf66   : > { %4605 = vadd.xlane.f32.xlu0 %v4604_v20 }
 0xf6e   : > { %4608 = vadd.xlane.f32.xlu0 %v4607_v11 }
 0xf76   : > { %4614 = vadd.xlane.f32.xlu0 %v4613_v60  ;;  %v11708_v60 = vpack.c.b16 %v4973_v36, %v4973_v36 }
 0xf8a   : > { %4946 = vrot.lane.b32.xlu0 %v11671_v25, %s9525_s30 }
 0xf92   : > { %4864 = vrot.lane.b32.xlu0 %v11676_v8, %s9525_s30 }
 0xf9a   : > { %4893 = vrot.lane.b32.xlu0 %v11681_v41, %s9525_s30 }
 0xf9b   : > { %v4570_v33 = vpop.xlane.xlu0 %4569 }
 0xf9c   : > { %v4580_v29 = vsub.f32 %v11617_v9, %v4570_v33  ;;  %v11699_v9 = vpack.c.b16 %v5007_v1, %v5007_v1 }
 0xf9e   : > { %v4594_v26 = vmul.f32 1.442695, %v4580_v29 }
 0xfa0   : > { %9361 = vpow2.f32 %v4594_v26 }
 0xfa2   : > { %4859 = vrot.lane.b32.xlu0 %v11689_v54, %s9525_s30 }
 0xfa3   : > { %v4573_v21 = vpop.xlane.xlu1 %4572 }
 0xfa4   : > { %v4581_v42 = vsub.f32 %v11624_v39, %v4573_v21  ;;  %v11721_v21 = vpack.c.b16 %v5002_v24, %v5002_v24 }
 0xfa6   : > { %v11695_v31 = vpop.eup %9361  ;;  %v4596_v7 = vmul.f32 1.442695, %v4581_v42  ;;  %v11729_v42 = vpack.c.b16 %v5135_v57, %v5135_v57 }
 0xfa7   : > { %v4603_v49 = vpop.xlane.xlu2 %4602  ;;  %v4616_v15 = vsel %vm1045_vm1, %v11695_v31, 0.0 }
 0xfa8   : > { %9363 = vpow2.f32 %v4596_v7  ;;  %4617 = vadd.xlane.f32.xlu2 %v4616_v15  ;;  %v5159_v15 = vunpack.c.l.b16 %v11521_v37 }
 0xfa9   : > { %9365 = vrcp.f32 %v4603_v49 }
 0xfaa   : > { %5009 = vrot.lane.b32.xlu0 %v11699_v9, %s9525_s30 }
 0xfab   : > { %v4600_v20 = vpop.xlane.xlu1 %4599 }
 0xfac   : > { %9367 = vrcp.f32 %v4600_v20  ;;  %v11744_v20 = vpack.c.b16 %v5159_v15, %v5159_v15 }
 0xfae   : > { %v11704_v39 = vpop.eup %9363 }
 0xfaf   : > { %v9366_v5 = vpop.eup %9365  ;;  %v4619_v11 = vsel %vm1045_vm1, %v11704_v39, 0.0 }
 0xfb0   : > { %v4631_v18 = vmul.f32 %v9366_v5, %v11628_v61  ;;  %4620 = vadd.xlane.f32.xlu1 %v4619_v11  ;;  %v4812_v61 = vsel %vm884_vm0, %v11613_v48, 0 }
 0xfb2   : > { %v9368_v45 = vpop.eup %9367  ;;  %v4639_v14 = vpack.c.bf16 %v4631_v18, %v4631_v18  ;;  %4975 = vrot.lane.b32.xlu0 %v11708_v60, %s9525_s30 }
 0xfb3   : > { %v4630_v33 = vmul.f32 %v9368_v45, %v11632_v51  ;;  %v5231_v51 = vunpack.c.l.b16 %v11518_v6  ;;  %v4978_v6 = vunpack.c.l.b16 %v11549_v53 }
 0xfb4   : > { %8417 = vmatmul.msk.bf16.vlgmr.msra.gmra.mxu3 %vm1045_vm1, %v4639_v14 }
 0xfb5   : > { %v4638_v29 = vpack.c.bf16 %v4630_v33, %v4630_v33  ;;  %4850 = vmatpush.bf16.xpose.msra.mxu3 %v4841_v56  ;;  %v11727_v1 = vpack.c.b16 %v5231_v51, %v5231_v51  ;;  %v11737_v49 = vpack.c.b16 %v4978_v6, %v4978_v6 }
 0xfb7   : > { %8416 = vmatmul.msk.bf16.vlgmr.msra.gmra.mxu2 %vm1045_vm1, %v4638_v29  ;;  %v4612_v26 = vpop.xlane.xlu2 %4611 }
 0xfb8   : > { %4821 = vmatpush.bf16.xpose.msra.mxu2 %v4812_v61  ;;  %9369 = vrcp.f32 %v4612_v26 }
 0xfba   : > { %5004 = vrot.lane.b32.xlu0 %v11721_v21, %s9525_s30 }
 0xfbe   : > { %v9370_v12 = vpop.eup %9369 }
 0xfbf   : > { %v4634_v48 = vmul.f32 %v9370_v12, %v11641_v19  ;;  %v4918_v19 = vpop.permute.xlu0 %4917 }
 0xfc0   : > { %5233 = vrot.lane.b32.xlu2 %v11727_v1, %s9525_s30 }
 0xfc1   : > { %v4642_v7 = vpack.c.bf16 %v4634_v48, %v4634_v48 }
 0xfc2   : > { %5137 = vrot.lane.b32.xlu0 %v11729_v42, %s9525_s30 }
 0xfc3   : > { %v4952_v56 = vpop.permute.xlu1 %4951 }
 0xfc4   : > { %v4957_v24 = vsel %vm884_vm0, %v4952_v56, 0 }
 0xfc7   : > { %8420 = vmatmul.msk.bf16.vlgmr.msrb.gmra.mxu2 %vm1045_vm1, %v4642_v7 }
 0xfc8   : > { %4937 = vmatpush.bf16.xpose.msrb.mxu2 %v4928_v63 }
 0xfc9   : > { %4980 = vrot.lane.b32.xlu1 %v11737_v49, %s9525_s30 }
 0xfd1   : > { %5161 = vrot.lane.b32.xlu1 %v11744_v20, %s9525_s30 }
 0xfd7   : > { %8424 = vmatmul.msk.bf16.vlgmr.msra.gmra.mxu2 %vm884_vm0, %v11620_v40 }
 0xfd9   : > { %v4606_v53 = vpop.xlane.xlu0 %4605 }
 0xfda   : > { %9371 = vrcp.f32 %v4606_v53 }
 0xfe0   : > { %v9372_v3 = vpop.eup %9371 }
 0xfe1   : > { %v4632_v36 = vmul.f32 %v9372_v3, %v11657_v30  ;;  %v4609_v5 = vpop.xlane.xlu0 %4608 }
 0xfe2   : > { %9373 = vrcp.f32 %v4609_v5 }
 0xfe3   : > { %v4640_v11 = vpack.c.bf16 %v4632_v36, %v4632_v36 }
 0xfe5   : > { %8418 = vmatmul.msk.bf16.vlgmr.msra.gmra.mxu0 %vm1045_vm1, %v4640_v11 }
 0xfe7   : > { %8428 = vmatmul.msk.bf16.vlgmr.msrb.gmra.mxu2 %vm884_vm0, %v4918_v19 }
 0xfe8   : > { %v9374_v37 = vpop.eup %9373 }
 0xfe9   : > { %v4633_v18 = vmul.f32 %v9374_v37, %v11662_v0  ;;  %v4615_v45 = vpop.xlane.xlu0 %4614 }
 0xfea   : > { %9375 = vrcp.f32 %v4615_v45 }
 0xfeb   : > { %v4641_v14 = vpack.c.bf16 %v4633_v18, %v4633_v18 }
 0xfed   : > { %8419 = vmatmul.msk.bf16.vlgmr.msra.gmra.mxu1 %vm1045_vm1, %v4641_v14 }
 0xff0   : > { %v9376_v40 = vpop.eup %9375 }
 0xff1   : > { %v4635_v33 = vmul.f32 %v9376_v40, %v11666_v2  ;;  %v4889_v2 = vpop.permute.xlu2 %4888 }
 0xff3   : > { %v4643_v30 = vpack.c.bf16 %v4635_v33, %v4635_v33 }
 0xff5   : > { %8421 = vmatmul.msk.bf16.vlgmr.msrb.gmra.mxu3 %vm1045_vm1, %v4643_v30 }
 0xff6   : > { %4966 = vmatpush.bf16.xpose.msrb.mxu3 %v4957_v24 }
 0xffc   : > { %v4947_v29 = vpop.permute.xlu0 %4946 }
0x1004   : > { %v4865_v61 = vpop.permute.xlu0 %4864 }
0x1005   : > { %v4870_v26 = vsel %vm884_vm0, %v4865_v61, 0  ;;  %8425 = vmatmul.msk.bf16.vlgmr.msra.gmra.mxu3 %vm884_vm0, %v11685_v22 }
0x1006   : > { %4879 = vmatpush.bf16.xpose.msra.mxu0 %v4870_v26 }
0x100c   : > { %v4894_v0 = vpop.permute.xlu0 %4893 }
0x100d   : > { %v4899_v51 = vsel %vm884_vm0, %v4894_v0, 0 }
0x100e   : > { %4908 = vmatpush.bf16.xpose.msra.mxu1 %v4899_v51 }
0x1014   : > { %v4860_v57 = vpop.permute.xlu0 %4859 }
0x1015   : > { %8429 = vmatmul.msk.bf16.vlgmr.msrb.gmra.mxu3 %vm884_vm0, %v4947_v29 }
0x101b   : > { %v4618_v12 = vpop.xlane.xlu2 %4617 }
0x101c   : > { %9377 = vrcp.f32 %v4618_v12  ;;  %v5010_v48 = vpop.permute.xlu0 %5009 }
0x101d   : > { %v5015_v5 = vsel %vm884_vm0, %v5010_v48, 0 }
0x1022   : > { %v9378_v6 = vpop.eup %9377 }
0x1023   : > { %v4636_v7 = vmul.f32 %v9378_v6, %v11695_v31  ;;  %v4621_v63 = vpop.xlane.xlu1 %4620  ;;  %v5234_v11 = vpop.permute.xlu2 %5233 }
0x1024   : > { %9379 = vrcp.f32 %v4621_v63  ;;  %v4976_v15 = vpop.permute.xlu0 %4975  ;;  %v5239_v18 = vsel %vm1145_vm2, %v5234_v11, 0 }
0x1025   : > { %v4644_v19 = vpack.c.bf16 %v4636_v7, %v4636_v7 }
0x1027   : > { %8422 = vmatmul.msk.bf16.vlgmr.msrb.gmra.mxu0 %vm1045_vm1, %v4644_v19  ;;  %v5183_v19 = vunpack.c.l.b16 %v11547_v28 }
0x102a   : > { %v9380_v22 = vpop.eup %9379 }
0x102b   : > { %v4637_v53 = vmul.f32 %v9380_v22, %v11704_v39 }
0x102c   : > { %v5005_v3 = vpop.permute.xlu0 %5004 }
0x102d   : > { %v4645_v36 = vpack.c.bf16 %v4637_v53, %v4637_v53  ;;  %v11797_v53 = vpack.c.b16 %v5183_v19, %v5183_v19 }
0x102f   : > { %8423 = vmatmul.msk.bf16.vlgmr.msrb.gmra.mxu1 %vm1045_vm1, %v4645_v36 }
0x1030   : > { %5024 = vmatpush.bf16.xpose.msrb.mxu1 %v5015_v5 }
0x1034   : > { %v5138_v37 = vpop.permute.xlu0 %5137 }
0x1035   : > { %v5143_v31 = vsel %vm1145_vm2, %v5138_v37, 0 }
0x1036   : > { %5152 = vmatpush.bf16.msra.mxu2 %v5143_v31 }
0x1037   : > { %v11770_v45 = vpop.f32.mrf.mxu3  ;;  %8426 = vmatmul.msk.bf16.vlgmr.msra.gmra.mxu0 %vm884_vm0, %v4860_v57 }
0x103a   : > { %5248 = vmatpush.bf16.msrb.mxu2 %v5239_v18  ;;  %v11773_v39 = vpop.f32.mrf.mxu2 }
0x103b   : > { %v4981_v14 = vpop.permute.xlu1 %4980 }
0x103c   : > { %v4986_v40 = vsel %vm884_vm0, %v4981_v14, 0 }
0x103d   : > { %4995 = vmatpush.bf16.xpose.msrb.mxu0 %v4986_v40 }
0x103f   : > { %v4682_v33 = vpop.f32.mrf.mxu3  ;;  %8427 = vmatmul.msk.bf16.vlgmr.msra.gmra.mxu1 %vm884_vm0, %v4889_v2 }
0x1042   : > { %v4663_v56 = vpop.f32.mrf.mxu2 }
0x1043   : > { %v5162_v30 = vpop.permute.xlu1 %5161 }
0x1044   : > { %v5167_v24 = vsel %vm1145_vm2, %v5162_v30, 0 }
0x1045   : > { %5176 = vmatpush.bf16.msra.mxu3 %v5167_v24 }
0x1047   : > { %8430 = vmatmul.msk.bf16.vlgmr.msrb.gmra.mxu0 %vm884_vm0, %v4976_v15 }
0x104a   : > { %v11779_v29 = vpop.f32.mrf.mxu2 }
0x104f   : > { %8431 = vmatmul.msk.bf16.vlgmr.msrb.gmra.mxu1 %vm884_vm0, %v5005_v3 }
0x1052   : > { %v4739_v61 = vpop.f32.mrf.mxu2 }
0x105a   : > { %v4823_v26 = vpop.f32.mrf.mxu2 }
0x105b   : > { %v11782_v0 = vmul.f32 0.17677669, %v4823_v26 }
0x105d   : > { %v5038_v51 = vsel %vm1045_vm1, %v11782_v0, -inf }
0x105e   : > { %5039 = vmax.xlane.f32.xlu2 %v5038_v51 }
0x1062   : > { %v11786_v2 = vpop.f32.mrf.mxu0  ;;  %v4825_v57 = vpop.f32.mrf.mxu2 }
0x106a   : > { %v4701_v12 = vpop.f32.mrf.mxu0  ;;  %v11788_v48 = vpop.f32.mrf.mxu1 }
0x106b   : > { %v4939_v6 = vpop.f32.mrf.mxu2 }
0x106c   : > { %v5034_v57 = vmul.f32 0.17677669, %v4939_v6 }
0x106e   : > { %v5050_v19 = vsel %vm1045_vm1, %v5034_v57, -inf }
0x1072   : > { %v4720_v7 = vpop.f32.mrf.mxu1 }
0x1073   : > { %v4941_v63 = vpop.f32.mrf.mxu2 }
0x1076   : > { %5328 = vrot.lane.b32.xlu2 %v11453_v43, %s9526_s26 }
0x1078   : > { %v11792_v15 = vpop.f32.mrf.mxu3 }
0x107e   : > { %5351 = vrot.lane.b32.xlu2 %v11472_v16, %s9526_s26 }
0x1080   : > { %v4758_v22 = vpop.f32.mrf.mxu3 }
0x1086   : > { %5185 = vrot.lane.b32.xlu2 %v11797_v53, %s9525_s30 }
0x1088   : > { %v4852_v3 = vpop.f32.mrf.mxu3 }
0x1089   : > { %v5031_v56 = vmul.f32 0.17677669, %v4852_v3 }
0x108b   : > { %v5041_v51 = vsel %vm1045_vm1, %v5031_v56, -inf }
0x1090   : > { %v4854_v36 = vpop.f32.mrf.mxu3 }
0x1098   : > { %v4968_v5 = vpop.f32.mrf.mxu3 }
0x1099   : > { %v5035_v3 = vmul.f32 0.17677669, %v4968_v5 }
0x10a0   : > { %v4970_v11 = vpop.f32.mrf.mxu3 }
0x10a4   : > { %v11801_v37 = vpop.f32.mrf.mxu0 }
0x10ac   : > { %v4777_v31 = vpop.f32.mrf.mxu0  ;;  %v11803_v18 = vpop.f32.mrf.mxu1 }
0x10ad   : > { %v5255_v31 = vunpack.c.l.b16 %v11537_v34 }
0x10b4   : > { %v4796_v14 = vpop.f32.mrf.mxu1  ;;  %v4881_v40 = vpop.f32.mrf.mxu0 }
0x10b5   : > { %v5032_v33 = vmul.f32 0.17677669, %v4881_v40  ;;  %v5053_v14 = vsel %vm1045_vm1, %v5035_v3, -inf  ;;  %v11815_v40 = vpack.c.b16 %v5255_v31, %v5255_v31 }
0x10b7   : > { %v5044_v28 = vsel %vm1045_vm1, %v5032_v33, -inf }
0x10b8   : > { %5045 = vmax.xlane.f32.xlu0 %v5044_v28 }
0x10bc   : > { %v4883_v30 = vpop.f32.mrf.mxu0  ;;  %v4910_v24 = vpop.f32.mrf.mxu1 }
0x10bd   : > { %v5033_v61 = vmul.f32 0.17677669, %v4910_v24  ;;  %v5207_v24 = vunpack.c.l.b16 %v11563_v46 }
0x10bf   : > { %v5047_v26 = vsel %vm1045_vm1, %v5033_v61, -inf }
0x10c0   : > { %5048 = vmax.xlane.f32.xlu1 %v5047_v26  ;;  %5042 = vmax.xlane.f32.xlu0 %v5041_v51  ;;  %v11822_v26 = vpack.c.b16 %v5207_v24, %v5207_v24 }
0x10c4   : > { %v4912_v12 = vpop.f32.mrf.mxu1  ;;  %v4997_v7 = vpop.f32.mrf.mxu0 }
0x10c5   : > { %v11808_v63 = vmul.f32 0.17677669, %v4997_v7 }
0x10c7   : > { %v5056_v22 = vsel %vm1045_vm1, %v11808_v63, -inf }
0x10c8   : > { %5051 = vmax.xlane.f32.xlu1 %v5050_v19  ;;  %5057 = vmax.xlane.f32.xlu2 %v5056_v22 }
0x10cc   : > { %v4999_v36 = vpop.f32.mrf.mxu0  ;;  %v5026_v11 = vpop.f32.mrf.mxu1 }
0x10cd   : > { %v11831_v12 = vmul.f32 0.17677669, %v5026_v11 }
0x10cf   : > { %v5059_v46 = vsel %vm1045_vm1, %v11831_v12, -inf }
0x10d0   : > { %5054 = vmax.xlane.f32.xlu2 %v5053_v14 }
0x10d1   : > { %v5040_v6 = vpop.xlane.xlu2 %5039 }
0x10d2   : > { %v5062_v7 = vsub.f32 %v11782_v0, %v5040_v6 }
0x10d4   : > { %5257 = vrot.lane.b32.xlu0 %v11815_v40, %s9525_s30  ;;  %v5028_v28 = vpop.f32.mrf.mxu1  ;;  %v5070_v19 = vmul.f32 1.442695, %v5062_v7 }
0x10d6   : > { %9381 = vpow2.f32 %v5070_v19 }
0x10d9   : > { %v11819_v30 = vpop.permute.xlu2 %5328 }
0x10dc   : > { %v11836_v22 = vpop.eup %9381 }
0x10dd   : > { %v5086_v36 = vsel %vm1045_vm1, %v11836_v22, 0.0 }
0x10e1   : > { %v11824_v5 = vpop.permute.xlu2 %5351  ;;  %5209 = vrot.lane.b32.xlu1 %v11822_v26, %s9525_s30 }
0x10e8   : > { %5326 = vrot.lane.b32.xlu2 %v11468_v52, %s9526_s26 }
0x10e9   : > { %v5186_v34 = vpop.permute.xlu2 %5185 }
0x10ea   : > { %v5191_v51 = vsel %vm1145_vm2, %v5186_v34, 0 }
0x10eb   : > { %5200 = vmatpush.bf16.msra.mxu0 %v5191_v51 }
0x10fe   : > { %5060 = vmax.xlane.f32.xlu0 %v5059_v46 }
0x110b   : > { %5087 = vadd.xlane.f32.xlu1 %v5086_v36 }
0x1112   : > { %5349 = vrot.lane.b32.xlu0 %v11609_v47, %s9526_s26 }
0x112b   : > { %v5046_v31 = vpop.xlane.xlu0 %5045 }
0x112c   : > { %v5064_v11 = vsub.f32 %v5032_v33, %v5046_v31 }
0x112e   : > { %v5074_v14 = vmul.f32 1.442695, %v5064_v11 }
0x1130   : > { %9383 = vpow2.f32 %v5074_v14 }
0x1133   : > { %v5049_v0 = vpop.xlane.xlu1 %5048  ;;  %v5043_v6 = vpop.xlane.xlu0 %5042 }
0x1134   : > { %v5065_v28 = vsub.f32 %v5033_v61, %v5049_v0  ;;  %v5063_v24 = vsub.f32 %v5031_v56, %v5043_v6 }
0x1136   : > { %v11842_v34 = vpop.eup %9383  ;;  %v5076_v51 = vmul.f32 1.442695, %v5065_v28  ;;  %v5072_v7 = vmul.f32 1.442695, %v5063_v24 }
0x1137   : > { %v5092_v19 = vsel %vm1045_vm1, %v11842_v34, 0.0 }
0x1138   : > { %9385 = vpow2.f32 %v5076_v51  ;;  %5093 = vadd.xlane.f32.xlu1 %v5092_v19 }
0x1139   : > { %9387 = vpow2.f32 %v5072_v7 }
0x113b   : > { %v5052_v46 = vpop.xlane.xlu1 %5051  ;;  %v5058_v36 = vpop.xlane.xlu2 %5057 }
0x113c   : > { %v5066_v32 = vsub.f32 %v5034_v57, %v5052_v46  ;;  %v5068_v24 = vsub.f32 %v11808_v63, %v5058_v36 }
0x113e   : > { %v11846_v33 = vpop.eup %9385  ;;  %v5078_v31 = vmul.f32 1.442695, %v5066_v32  ;;  %v5082_v7 = vmul.f32 1.442695, %v5068_v24 }
0x113f   : > { %v11848_v11 = vpop.eup %9387  ;;  %v5095_v56 = vsel %vm1045_vm1, %v11846_v33, 0.0 }
0x1140   : > { %9389 = vpow2.f32 %v5078_v31  ;;  %5096 = vadd.xlane.f32.xlu0 %v5095_v56  ;;  %v5089_v61 = vsel %vm1045_vm1, %v11848_v11, 0.0  ;;  %v5279_v56 = vunpack.c.l.b16 %v11560_v13 }
0x1141   : > { %5090 = vadd.xlane.f32.xlu2 %v5089_v61 }
0x1142   : > { %v11874_v61 = vpack.c.b16 %v5279_v56, %v5279_v56 }
0x1143   : > { %v5055_v14 = vpop.xlane.xlu2 %5054 }
0x1144   : > { %v5067_v0 = vsub.f32 %v5035_v3, %v5055_v14  ;;  %v5303_v14 = vunpack.c.l.b16 %v11581_v44 }
0x1146   : > { %v11854_v6 = vpop.eup %9389  ;;  %v5080_v28 = vmul.f32 1.442695, %v5067_v0  ;;  %v5258_v57 = vpop.permute.xlu0 %5257  ;;  %v11879_v0 = vpack.c.b16 %v5303_v14, %v5303_v14 }
0x1147   : > { %v5263_v32 = vsel %vm1145_vm2, %v5258_v57, 0  ;;  %v5098_v51 = vsel %vm1045_vm1, %v11854_v6, 0.0 }
0x1148   : > { %9391 = vpow2.f32 %v5080_v28  ;;  %5272 = vmatpush.bf16.msrb.mxu3 %v5263_v32 }
0x1149   : > { %5099 = vadd.xlane.f32.xlu2 %v5098_v51  ;;  %9393 = vpow2.f32 %v5082_v7 }
0x114e   : > { %v11860_v19 = vpop.eup %9391 }
0x114f   : > { %v5101_v3 = vsel %vm1045_vm1, %v11860_v19, 0.0  ;;  %v11867_v36 = vpop.eup %9393 }
0x1150   : > { %v5104_v31 = vsel %vm1045_vm1, %v11867_v36, 0.0 }
0x1151   : > { %5102 = vadd.xlane.f32.xlu2 %v5101_v3  ;;  %5420 = vrot.lane.b32.xlu1 %v11604_v10, %s9526_s26  ;;  %v5334_v3 = vsel %vm884_vm0, %v11819_v30, 0 }
0x1153   : > { %v5210_v63 = vpop.permute.xlu1 %5209 }
0x1154   : > { %v5215_v46 = vsel %vm1145_vm2, %v5210_v63, 0 }
0x1155   : > { %5224 = vmatpush.bf16.msra.mxu1 %v5215_v46  ;;  %v5327_v46 = vpop.permute.xlu2 %5326 }
0x1159   : > { %5105 = vadd.xlane.f32.xlu2 %v5104_v31  ;;  %5443 = vrot.lane.b32.xlu1 %v11646_v59, %s9526_s26 }
0x1161   : > { %5281 = vrot.lane.b32.xlu1 %v11874_v61, %s9525_s30 }
0x1169   : > { %5305 = vrot.lane.b32.xlu1 %v11879_v0, %s9525_s30 }
0x1171   : > { %5418 = vrot.lane.b32.xlu2 %v11637_v50, %s9526_s26  ;;  %5441 = vrot.lane.b32.xlu1 %v11671_v25, %s9526_s26  ;;  %v5061_v28 = vpop.xlane.xlu0 %5060 }
0x1172   : > { %v5069_v13 = vsub.f32 %v11831_v12, %v5061_v28 }
0x1174   : > { %v5084_v57 = vmul.f32 1.442695, %v5069_v13 }
0x1176   : > { %9395 = vpow2.f32 %v5084_v57 }
0x1179   : > { %5395 = vrot.lane.b32.xlu2 %v11652_v58, %s9526_s26  ;;  %5397 = vrot.lane.b32.xlu1 %v11681_v41, %s9526_s26 }
0x117c   : > { %v11892_v44 = vpop.eup %9395 }
0x117d   : > { %v5107_v24 = vsel %vm1045_vm1, %v11892_v44, 0.0 }
0x117e   : > { %v5088_v32 = vpop.xlane.xlu1 %5087  ;;  %5108 = vadd.xlane.f32.xlu0 %v5107_v24 }
0x117f   : > { %9397 = vrcp.f32 %v5088_v32 }
0x1181   : > { %5489 = vrot.lane.b32.xlu2 %v11699_v9, %s9526_s26  ;;  %5372 = vrot.lane.b32.xlu1 %v11689_v54, %s9526_s26 }
0x1185   : > { %v9398_v12 = vpop.eup %9397 }
0x1186   : > { %v5118_v51 = vmul.f32 %v9398_v12, %v11836_v22  ;;  %v5350_v22 = vpop.permute.xlu0 %5349 }
0x1188   : > { %v5126_v7 = vpack.c.bf16 %v5118_v51, %v5118_v51 }
0x1189   : > { %5466 = vrot.lane.b32.xlu1 %v11737_v49, %s9526_s26 }
0x118a   : > { %8432 = vmatmul.msk.bf16.vlgmr.msra.gmra.mxu2 %vm1045_vm1, %v5126_v7 }
0x118b   : > { %5343 = vmatpush.bf16.xpose.msra.mxu2 %v5334_v3 }
0x1191   : > { %5487 = vrot.lane.b32.xlu1 %v11721_v21, %s9526_s26 }
0x1192   : > { %5374 = vrot.lane.b32.xlu0 %v11676_v8, %s9526_s26 }
0x119a   : > { %5464 = vrot.lane.b32.xlu0 %v11708_v60, %s9526_s26 }
0x11a2   : > { %5614 = vrot.lane.b32.xlu0 %v11729_v42, %s9526_s26 }
0x11ab   : > { %v5094_v63 = vpop.xlane.xlu1 %5093 }
0x11ac   : > { %9399 = vrcp.f32 %v5094_v63 }
0x11b2   : > { %v9400_v30 = vpop.eup %9399 }
0x11b3   : > { %v5120_v31 = vmul.f32 %v9400_v30, %v11842_v34  ;;  %v5097_v56 = vpop.xlane.xlu0 %5096  ;;  %v5357_v34 = vsel %vm884_vm0, %v11824_v5, 0 }
0x11b4   : > { %v5091_v14 = vpop.xlane.xlu2 %5090  ;;  %9401 = vrcp.f32 %v5097_v56 }
0x11b5   : > { %v5128_v28 = vpack.c.bf16 %v5120_v31, %v5120_v31  ;;  %9403 = vrcp.f32 %v5091_v14 }
0x11b7   : > { %8434 = vmatmul.msk.bf16.vlgmr.msra.gmra.mxu0 %vm1045_vm1, %v5128_v28 }
0x11ba   : > { %v9402_v13 = vpop.eup %9401 }
0x11bb   : > { %v9404_v57 = vpop.eup %9403  ;;  %v5121_v24 = vmul.f32 %v9402_v13, %v11846_v33 }
0x11bc   : > { %v5119_v32 = vmul.f32 %v9404_v57, %v11848_v11  ;;  %v5100_v12 = vpop.xlane.xlu2 %5099 }
0x11bd   : > { %v5129_v51 = vpack.c.bf16 %v5121_v24, %v5121_v24  ;;  %9405 = vrcp.f32 %v5100_v12 }
0x11be   : > { %v5127_v7 = vpack.c.bf16 %v5119_v32, %v5119_v32 }
0x11bf   : > { %8435 = vmatmul.msk.bf16.vlgmr.msra.gmra.mxu1 %vm1045_vm1, %v5129_v51 }
0x11c0   : > { %8433 = vmatmul.msk.bf16.vlgmr.msra.gmra.mxu3 %vm1045_vm1, %v5127_v7 }
0x11c1   : > { %5366 = vmatpush.bf16.xpose.msra.mxu3 %v5357_v34 }
0x11c3   : > { %v9406_v3 = vpop.eup %9405  ;;  %v5421_v63 = vpop.permute.xlu1 %5420 }
0x11c4   : > { %v5122_v30 = vmul.f32 %v9406_v3, %v11854_v6  ;;  %v5103_v31 = vpop.xlane.xlu2 %5102  ;;  %v5426_v11 = vsel %vm884_vm0, %v5421_v63, 0 }
0x11c5   : > { %9407 = vrcp.f32 %v5103_v31 }
0x11c6   : > { %v5130_v33 = vpack.c.bf16 %v5122_v30, %v5122_v30 }
0x11c8   : > { %8436 = vmatmul.msk.bf16.vlgmr.msrb.gmra.mxu2 %vm1045_vm1, %v5130_v33 }
0x11c9   : > { %5435 = vmatpush.bf16.xpose.msrb.mxu2 %v5426_v11 }
0x11cb   : > { %v9408_v56 = vpop.eup %9407  ;;  %v5444_v14 = vpop.permute.xlu1 %5443 }
0x11cc   : > { %v5123_v28 = vmul.f32 %v9408_v56, %v11860_v19  ;;  %v5106_v5 = vpop.xlane.xlu2 %5105  ;;  %v5449_v57 = vsel %vm884_vm0, %v5444_v14, 0 }
0x11cd   : > { %9409 = vrcp.f32 %v5106_v5 }
0x11ce   : > { %v5131_v13 = vpack.c.bf16 %v5123_v28, %v5123_v28 }
0x11d0   : > { %8437 = vmatmul.msk.bf16.vlgmr.msrb.gmra.mxu3 %vm1045_vm1, %v5131_v13 }
0x11d1   : > { %5458 = vmatpush.bf16.xpose.msrb.mxu3 %v5449_v57 }
0x11d3   : > { %v9410_v6 = vpop.eup %9409  ;;  %v5282_v24 = vpop.permute.xlu1 %5281 }
0x11d4   : > { %v5124_v32 = vmul.f32 %v9410_v6, %v11867_v36  ;;  %v5287_v12 = vsel %vm1145_vm2, %v5282_v24, 0  ;;  %v5419_v3 = vpop.permute.xlu2 %5418 }
0x11d5   : > { %5296 = vmatpush.bf16.msrb.mxu0 %v5287_v12 }
0x11d6   : > { %v5132_v51 = vpack.c.bf16 %v5124_v32, %v5124_v32 }
0x11d8   : > { %8440 = vmatmul.msk.bf16.vlgmr.msra.gmra.mxu2 %vm884_vm0, %v5327_v46  ;;  %8438 = vmatmul.msk.bf16.vlgmr.msrb.gmra.mxu0 %vm1045_vm1, %v5132_v51 }
0x11db   : > { %v5306_v19 = vpop.permute.xlu1 %5305 }
0x11dc   : > { %v5311_v7 = vsel %vm1145_vm2, %v5306_v19, 0  ;;  %v5396_v30 = vpop.permute.xlu2 %5395 }
0x11dd   : > { %5320 = vmatpush.bf16.msrb.mxu1 %v5311_v7 }
0x11e0   : > { %8441 = vmatmul.msk.bf16.vlgmr.msra.gmra.mxu3 %vm884_vm0, %v5350_v22 }
0x11e3   : > { %v5442_v34 = vpop.permute.xlu1 %5441 }
0x11e4   : > { %v5490_v56 = vpop.permute.xlu2 %5489 }
0x11e5   : > { %v5495_v22 = vsel %vm884_vm0, %v5490_v56, 0 }
0x11e8   : > { %8444 = vmatmul.msk.bf16.vlgmr.msrb.gmra.mxu2 %vm884_vm0, %v5419_v3 }
0x11eb   : > { %v5398_v63 = vpop.permute.xlu1 %5397 }
0x11ec   : > { %v5403_v36 = vsel %vm884_vm0, %v5398_v63, 0 }
0x11ed   : > { %5412 = vmatpush.bf16.xpose.msra.mxu1 %v5403_v36 }
0x11f0   : > { %8445 = vmatmul.msk.bf16.vlgmr.msrb.gmra.mxu3 %vm884_vm0, %v5442_v34 }
0x11f1   : > { %v5109_v46 = vpop.xlane.xlu0 %5108 }
0x11f2   : > { %9411 = vrcp.f32 %v5109_v46 }
0x11f3   : > { %v5373_v11 = vpop.permute.xlu1 %5372 }
0x11f8   : > { %v9412_v31 = vpop.eup %9411 }
0x11f9   : > { %v5125_v33 = vmul.f32 %v9412_v31, %v11892_v44 }
0x11fb   : > { %v5133_v14 = vpack.c.bf16 %v5125_v33, %v5125_v33  ;;  %v5467_v28 = vpop.permute.xlu1 %5466 }
0x11fc   : > { %v5472_v57 = vsel %vm884_vm0, %v5467_v28, 0 }
0x11fd   : > { %8439 = vmatmul.msk.bf16.vlgmr.msrb.gmra.mxu1 %vm1045_vm1, %v5133_v14 }
0x11fe   : > { %5504 = vmatpush.bf16.xpose.msrb.mxu1 %v5495_v22 }
0x1203   : > { %v5488_v51 = vpop.permute.xlu1 %5487 }
0x1204   : > { %v5375_v5 = vpop.permute.xlu0 %5374 }
0x1205   : > { %v5380_v13 = vsel %vm884_vm0, %v5375_v5, 0 }
0x1206   : > { %5389 = vmatpush.bf16.xpose.msra.mxu0 %v5380_v13 }
0x120c   : > { %v5465_v6 = vpop.permute.xlu0 %5464 }
0x120d   : > { %v11942_v24 = vpop.f32.mrf.mxu2  ;;  %8442 = vmatmul.msk.bf16.vlgmr.msra.gmra.mxu0 %vm884_vm0, %v5373_v11  ;;  %8443 = vmatmul.msk.bf16.vlgmr.msra.gmra.mxu1 %vm884_vm0, %v5396_v30 }
0x120e   : > { %5481 = vmatpush.bf16.xpose.msrb.mxu0 %v5472_v57 }
0x1214   : > { %v5615_v44 = vpop.permute.xlu0 %5614 }
0x1215   : > { %v5620_v32 = vsel %vm1145_vm2, %v5615_v44, 0  ;;  %v5156_v12 = vpop.f32.mrf.mxu2 }
0x1216   : > { %5629 = vmatpush.bf16.msra.mxu2 %v5620_v32 }
0x121d   : > { %8446 = vmatmul.msk.bf16.vlgmr.msrb.gmra.mxu0 %vm884_vm0, %v5465_v6  ;;  %8447 = vmatmul.msk.bf16.vlgmr.msrb.gmra.mxu1 %vm884_vm0, %v5488_v51 }
0x1234   : > { %v11949_v19 = vpop.f32.mrf.mxu0 }
0x123c   : > { %v5204_v7 = vpop.f32.mrf.mxu0  ;;  %v11951_v34 = vpop.f32.mrf.mxu1 }
0x1243   : > { %v11955_v63 = vpop.f32.mrf.mxu3 }
0x1244   : > { %v5228_v30 = vpop.f32.mrf.mxu1 }
0x124b   : > { %v5180_v46 = vpop.f32.mrf.mxu3  ;;  %v11959_v31 = vpop.f32.mrf.mxu2 }
0x1253   : > { %v5252_v33 = vpop.f32.mrf.mxu2  ;;  %v11961_v11 = vpop.f32.mrf.mxu3 }
0x1255   : > { %v11965_v14 = vpop.f32.mrf.mxu0 }
0x125b   : > { %v5276_v22 = vpop.f32.mrf.mxu3  ;;  %v5345_v28 = vpop.f32.mrf.mxu2 }
0x125c   : > { %v5510_v5 = vmul.f32 0.17677669, %v5345_v28 }
0x125d   : > { %v5300_v13 = vpop.f32.mrf.mxu0 }
0x125e   : > { %v5518_v57 = vsel %vm1045_vm1, %v5510_v5, -inf }
0x125f   : > { %5519 = vmax.xlane.f32.xlu2 %v5518_v57 }
0x1263   : > { %v5347_v6 = vpop.f32.mrf.mxu2  ;;  %v5368_v44 = vpop.f32.mrf.mxu3 }
0x1264   : > { %v5511_v6 = vmul.f32 0.17677669, %v5368_v44 }
0x126b   : > { %v5370_v32 = vpop.f32.mrf.mxu3  ;;  %v5437_v12 = vpop.f32.mrf.mxu2 }
0x1273   : > { %v5439_v51 = vpop.f32.mrf.mxu2  ;;  %v5460_v7 = vpop.f32.mrf.mxu3 }
0x1274   : > { %v11974_v32 = vmul.f32 0.17677669, %v5460_v7 }
0x1276   : > { %v5533_v46 = vsel %vm1045_vm1, %v11974_v32, -inf }
0x127a   : > { %v11968_v30 = vpop.f32.mrf.mxu1 }
0x127b   : > { %v5462_v33 = vpop.f32.mrf.mxu3 }
0x1282   : > { %v5324_v3 = vpop.f32.mrf.mxu1 }
0x1283   : > { %v5521_v3 = vsel %vm1045_vm1, %v5511_v6, -inf }
0x128a   : > { %v5391_v22 = vpop.f32.mrf.mxu0  ;;  %v5414_v56 = vpop.f32.mrf.mxu1 }
0x128b   : > { %v5512_v28 = vmul.f32 0.17677669, %v5391_v22  ;;  %v5513_v13 = vmul.f32 0.17677669, %v5414_v56 }
0x128d   : > { %v5527_v36 = vsel %vm1045_vm1, %v5513_v13, -inf  ;;  %v5524_v57 = vsel %vm1045_vm1, %v5512_v28, -inf }
0x128e   : > { %5528 = vmax.xlane.f32.xlu2 %v5527_v36  ;;  %5525 = vmax.xlane.f32.xlu0 %v5524_v57 }
0x1292   : > { %v5393_v51 = vpop.f32.mrf.mxu0  ;;  %v5416_v62 = vpop.f32.mrf.mxu1 }
0x1293   : > { %v5514_v62 = vmul.f32 0.17677669, %v5437_v12 }
0x1295   : > { %v5530_v51 = vsel %vm1045_vm1, %v5514_v62, -inf }
0x1296   : > { %5534 = vmax.xlane.f32.xlu2 %v5533_v46  ;;  %5522 = vmax.xlane.f32.xlu0 %v5521_v3 }
0x129a   : > { %v5483_v33 = vpop.f32.mrf.mxu0  ;;  %v5506_v56 = vpop.f32.mrf.mxu1 }
0x129b   : > { %v11979_v22 = vmul.f32 0.17677669, %v5483_v33  ;;  %v5517_v23 = vmul.f32 0.17677669, %v5506_v56 }
0x129d   : > { %v5539_v36 = vsel %vm1045_vm1, %v5517_v23, -inf  ;;  %v5536_v44 = vsel %vm1045_vm1, %v11979_v22, -inf }
0x129e   : > { %5540 = vmax.xlane.f32.xlu0 %v5539_v36  ;;  %5537 = vmax.xlane.f32.xlu1 %v5536_v44 }
0x12a2   : > { %v5485_v7 = vpop.f32.mrf.mxu0  ;;  %v5508_v57 = vpop.f32.mrf.mxu1 }
0x12a6   : > { %5531 = vmax.xlane.f32.xlu1 %v5530_v51 }
0x12ae   : > { %5635 = vrot.lane.b32.xlu2 %v11744_v20, %s9526_s26 }
0x12b2   : > { %5698 = vrot.lane.b32.xlu0 %v11727_v1, %s9526_s26 }
0x12bf   : > { %5719 = vrot.lane.b32.xlu1 %v11815_v40, %s9526_s26 }
0x12c7   : > { %5656 = vrot.lane.b32.xlu1 %v11797_v53, %s9526_s26 }
0x12cf   : > { %5677 = vrot.lane.b32.xlu1 %v11822_v26, %s9526_s26 }
0x12d2   : > { %v5520_v12 = vpop.xlane.xlu2 %5519 }
0x12d3   : > { %v5542_v7 = vsub.f32 %v5510_v5, %v5520_v12 }
0x12d5   : > { %v5550_v57 = vmul.f32 1.442695, %v5542_v7 }
0x1301   : > { %v5529_v46 = vpop.xlane.xlu2 %5528  ;;  %v5526_v3 = vpop.xlane.xlu0 %5525 }
0x1302   : > { %v5545_v33 = vsub.f32 %v5513_v13, %v5529_v46  ;;  %v5544_v56 = vsub.f32 %v5512_v28, %v5526_v3 }
0x1304   : > { %v5556_v36 = vmul.f32 1.442695, %v5545_v33  ;;  %v5554_v44 = vmul.f32 1.442695, %v5544_v56 }
0x1306   : > { %9413 = vpow2.f32 %v5556_v36 }
0x1307   : > { %9415 = vpow2.f32 %v5554_v44 }
0x1308   : > { %9417 = vpow2.f32 %v5550_v57 }
0x1309   : > { %v5535_v51 = vpop.xlane.xlu2 %5534  ;;  %v5523_v27 = vpop.xlane.xlu0 %5522 }
0x130a   : > { %v5543_v38 = vsub.f32 %v5511_v6, %v5523_v27  ;;  %v5547_v36 = vsub.f32 %v11974_v32, %v5535_v51 }
0x130c   : > { %v11995_v35 = vpop.eup %9413  ;;  %v5552_v55 = vmul.f32 1.442695, %v5543_v38  ;;  %v5560_v57 = vmul.f32 1.442695, %v5547_v36 }
0x130d   : > { %v11997_v4 = vpop.eup %9415  ;;  %v5575_v17 = vsel %vm1045_vm1, %v11995_v35, 0.0 }
0x130e   : > { %5576 = vadd.xlane.f32.xlu0 %v5575_v17  ;;  %v5572_v28 = vsel %vm1045_vm1, %v11997_v4, 0.0  ;;  %9419 = vpow2.f32 %v5552_v55  ;;  %v12004_v6 = vpop.eup %9417 }
0x130f   : > { %5573 = vadd.xlane.f32.xlu2 %v5572_v28  ;;  %v5566_v17 = vsel %vm1045_vm1, %v12004_v6, 0.0 }
0x1311   : > { %v5636_v5 = vpop.permute.xlu2 %5635  ;;  %v5538_v13 = vpop.xlane.xlu1 %5537 }
0x1312   : > { %v5641_v12 = vsel %vm1145_vm2, %v5636_v5, 0  ;;  %v5541_v27 = vpop.xlane.xlu0 %5540 }
0x1313   : > { %v5549_v38 = vsub.f32 %v5517_v23, %v5541_v27  ;;  %5650 = vmatpush.bf16.msra.mxu3 %v5641_v12 }
0x1314   : > { %v12006_v46 = vpop.eup %9419 }
0x1315   : > { %v5564_v3 = vmul.f32 1.442695, %v5549_v38  ;;  %v5569_v33 = vsel %vm1045_vm1, %v12006_v46, 0.0 }
0x1316   : > { %5570 = vadd.xlane.f32.xlu1 %v5569_v33 }
0x1317   : > { %9421 = vpow2.f32 %v5564_v3  ;;  %5567 = vadd.xlane.f32.xlu2 %v5566_v17 }
0x1319   : > { %v5532_v55 = vpop.xlane.xlu1 %5531 }
0x131a   : > { %v5546_v56 = vsub.f32 %v5514_v62, %v5532_v55 }
0x131c   : > { %v5558_v44 = vmul.f32 1.442695, %v5546_v56 }
0x131d   : > { %v12013_v7 = vpop.eup %9421 }
0x131e   : > { %9423 = vpow2.f32 %v5558_v44  ;;  %v5587_v23 = vsel %vm1045_vm1, %v12013_v7, 0.0 }
0x131f   : > { %5588 = vadd.xlane.f32.xlu0 %v5587_v23  ;;  %9425 = vpow2.f32 %v5560_v57 }
0x1324   : > { %v12017_v28 = vpop.eup %9423  ;;  %v5699_v5 = vpop.permute.xlu0 %5698 }
0x1325   : > { %v5704_v12 = vsel %vm1145_vm2, %v5699_v5, 0  ;;  %v5578_v62 = vsel %vm1045_vm1, %v12017_v28, 0.0  ;;  %v12022_v32 = vpop.eup %9425 }
0x1326   : > { %5579 = vadd.xlane.f32.xlu1 %v5578_v62  ;;  %5713 = vmatpush.bf16.msrb.mxu2 %v5704_v12  ;;  %v5581_v51 = vsel %vm1045_vm1, %v12022_v32, 0.0 }
0x132e   : > { %5582 = vadd.xlane.f32.xlu1 %v5581_v51 }
0x132f   : > { %5807 = vrot.lane.b32.xlu2 %v11472_v16, %s9527_s27 }
0x1331   : > { %v5720_v27 = vpop.permute.xlu1 %5719 }
0x1332   : > { %v5725_v38 = vsel %vm1145_vm2, %v5720_v27, 0 }
0x1333   : > { %5782 = vrot.lane.b32.xlu0 %v11468_v52, %s9527_s27  ;;  %5734 = vmatpush.bf16.msrb.mxu3 %v5725_v38  ;;  %v5548_v52 = vsub.f32 %v11979_v22, %v5538_v13 }
0x1337   : > { %5805 = vrot.lane.b32.xlu2 %v11609_v47, %s9527_s27 }
0x1339   : > { %v5657_v3 = vpop.permute.xlu1 %5656 }
0x133a   : > { %v5662_v17 = vsel %vm1145_vm2, %v5657_v3, 0 }
0x133b   : > { %5740 = vrot.lane.b32.xlu0 %v11874_v61, %s9526_s26  ;;  %5671 = vmatpush.bf16.msra.mxu0 %v5662_v17 }
0x133f   : > { %5761 = vrot.lane.b32.xlu2 %v11879_v0, %s9526_s26 }
0x1341   : > { %v5678_v16 = vpop.permute.xlu1 %5677 }
0x1342   : > { %v5683_v33 = vsel %vm1145_vm2, %v5678_v16, 0 }
0x1343   : > { %5830 = vrot.lane.b32.xlu0 %v11676_v8, %s9527_s27  ;;  %5692 = vmatpush.bf16.msra.mxu1 %v5683_v33 }
0x1347   : > { %5853 = vrot.lane.b32.xlu2 %v11681_v41, %s9527_s27  ;;  %5784 = vrot.lane.b32.xlu1 %v11453_v43, %s9527_s27  ;;  %v5562_v43 = vmul.f32 1.442695, %v5548_v52 }
0x1349   : > { %9427 = vpow2.f32 %v5562_v43 }
0x134b   : > { %5899 = vrot.lane.b32.xlu0 %v11646_v59, %s9527_s27 }
0x134f   : > { %5828 = vrot.lane.b32.xlu2 %v11689_v54, %s9527_s27  ;;  %v12064_v47 = vpop.eup %9427 }
0x1353   : > { %5851 = vrot.lane.b32.xlu0 %v11652_v58, %s9527_s27 }
0x1357   : > { %5874 = vrot.lane.b32.xlu2 %v11637_v50, %s9527_s27  ;;  %v5584_v50 = vsel %vm1045_vm1, %v12064_v47, 0.0 }
0x135b   : > { %5897 = vrot.lane.b32.xlu0 %v11671_v25, %s9527_s27 }
0x135f   : > { %5922 = vrot.lane.b32.xlu2 %v11737_v49, %s9527_s27 }
0x1363   : > { %5920 = vrot.lane.b32.xlu0 %v11708_v60, %s9527_s27 }
0x1367   : > { %5943 = vrot.lane.b32.xlu2 %v11721_v21, %s9527_s27 }
0x136b   : > { %6070 = vrot.lane.b32.xlu0 %v11729_v42, %s9527_s27 }
0x1371   : > { %5585 = vadd.xlane.f32.xlu1 %v5584_v50 }
0x1381   : > { %v5577_v59 = vpop.xlane.xlu0 %5576 }
0x1382   : > { %v5574_v58 = vpop.xlane.xlu2 %5573  ;;  %9429 = vrcp.f32 %v5577_v59 }
0x1383   : > { %9431 = vrcp.f32 %v5574_v58 }
0x1388   : > { %v9430_v25 = vpop.eup %9429 }
0x1389   : > { %v9432_v8 = vpop.eup %9431  ;;  %v5601_v41 = vmul.f32 %v9430_v25, %v11995_v35  ;;  %v5571_v21 = vpop.xlane.xlu1 %5570 }
0x138a   : > { %v5600_v54 = vmul.f32 %v9432_v8, %v11997_v4  ;;  %v5568_v60 = vpop.xlane.xlu2 %5567  ;;  %5876 = vrot.lane.b32.xlu1 %v11604_v10, %s9527_s27 }
0x138b   : > { %v5609_v42 = vpack.c.bf16 %v5601_v41, %v5601_v41  ;;  %9433 = vrcp.f32 %v5568_v60 }
0x138c   : > { %v5608_v49 = vpack.c.bf16 %v5600_v54, %v5600_v54  ;;  %9435 = vrcp.f32 %v5571_v21 }
0x138d   : > { %8451 = vmatmul.msk.bf16.vlgmr.msra.gmra.mxu1 %vm1045_vm1, %v5609_v42 }
0x138e   : > { %8450 = vmatmul.msk.bf16.vlgmr.msra.gmra.mxu0 %vm1045_vm1, %v5608_v49 }
0x1391   : > { %v9434_v22 = vpop.eup %9433 }
0x1392   : > { %v9436_v13 = vpop.eup %9435  ;;  %v5598_v55 = vmul.f32 %v9434_v22, %v12004_v6  ;;  %v5808_v35 = vpop.permute.xlu2 %5807  ;;  %5945 = vrot.lane.b32.xlu1 %v11699_v9, %s9527_s27 }
0x1393   : > { %v5599_v4 = vmul.f32 %v9436_v13, %v12006_v46  ;;  %v5589_v36 = vpop.xlane.xlu0 %5588  ;;  %v5813_v44 = vsel %vm884_vm0, %v5808_v35, 0 }
0x1394   : > { %v5606_v56 = vpack.c.bf16 %v5598_v55, %v5598_v55  ;;  %9437 = vrcp.f32 %v5589_v36 }
0x1395   : > { %v5607_v10 = vpack.c.bf16 %v5599_v4, %v5599_v4 }
0x1396   : > { %8448 = vmatmul.msk.bf16.vlgmr.msra.gmra.mxu2 %vm1045_vm1, %v5606_v56 }
0x1397   : > { %8449 = vmatmul.msk.bf16.vlgmr.msra.gmra.mxu3 %vm1045_vm1, %v5607_v10 }
0x1398   : > { %5822 = vmatpush.bf16.xpose.msra.mxu3 %v5813_v44 }
0x1399   : > { %v5580_v23 = vpop.xlane.xlu1 %5579 }
0x139a   : > { %v5806_v57 = vpop.permute.xlu2 %5805  ;;  %9439 = vrcp.f32 %v5580_v23  ;;  %v9438_v6 = vpop.eup %9437 }
0x139b   : > { %v5605_v9 = vmul.f32 %v9438_v6, %v12013_v7 }
0x139d   : > { %v5613_v38 = vpack.c.bf16 %v5605_v9, %v5605_v9 }
0x13a0   : > { %v9440_v5 = vpop.eup %9439 }
0x13a1   : > { %v5602_v46 = vmul.f32 %v9440_v5, %v12017_v28  ;;  %v5583_v12 = vpop.xlane.xlu1 %5582 }
0x13a2   : > { %v5762_v62 = vpop.permute.xlu2 %5761  ;;  %9441 = vrcp.f32 %v5583_v12 }
0x13a3   : > { %v5610_v51 = vpack.c.bf16 %v5602_v46, %v5602_v46  ;;  %v5767_v27 = vsel %vm1145_vm2, %v5762_v62, 0 }
0x13a4   : > { %5776 = vmatpush.bf16.msrb.mxu1 %v5767_v27 }
0x13a5   : > { %v5783_v3 = vpop.permute.xlu0 %5782 }
0x13a6   : > { %8452 = vmatmul.msk.bf16.vlgmr.msrb.gmra.mxu2 %vm1045_vm1, %v5610_v51 }
0x13a7   : > { %8455 = vmatmul.msk.bf16.vlgmr.msrb.gmra.mxu1 %vm1045_vm1, %v5613_v38 }
0x13a8   : > { %v9442_v17 = vpop.eup %9441 }
0x13a9   : > { %v5603_v16 = vmul.f32 %v9442_v17, %v12022_v32 }
0x13aa   : > { %v5854_v33 = vpop.permute.xlu2 %5853 }
0x13ab   : > { %v5611_v7 = vpack.c.bf16 %v5603_v16, %v5603_v16  ;;  %v5859_v28 = vsel %vm884_vm0, %v5854_v33, 0 }
0x13ac   : > { %5868 = vmatpush.bf16.xpose.msra.mxu1 %v5859_v28 }
0x13ad   : > { %v5741_v52 = vpop.permute.xlu0 %5740  ;;  %8453 = vmatmul.msk.bf16.vlgmr.msrb.gmra.mxu3 %vm1045_vm1, %v5611_v7 }
0x13ae   : > { %v5746_v43 = vsel %vm1145_vm2, %v5741_v52, 0 }
0x13af   : > { %5755 = vmatpush.bf16.msrb.mxu0 %v5746_v43 }
0x13b2   : > { %v5829_v60 = vpop.permute.xlu2 %5828 }
0x13b5   : > { %v5831_v50 = vpop.permute.xlu0 %5830 }
0x13b6   : > { %v5836_v59 = vsel %vm884_vm0, %v5831_v50, 0 }
0x13b7   : > { %5845 = vmatpush.bf16.xpose.msra.mxu0 %v5836_v59 }
0x13b9   : > { %v5785_v58 = vpop.permute.xlu1 %5784 }
0x13ba   : > { %v5790_v25 = vsel %vm884_vm0, %v5785_v58, 0  ;;  %v5875_v21 = vpop.permute.xlu2 %5874 }
0x13bb   : > { %5799 = vmatpush.bf16.xpose.msra.mxu2 %v5790_v25 }
0x13bd   : > { %v5900_v32 = vpop.permute.xlu0 %5899  ;;  %8457 = vmatmul.msk.bf16.vlgmr.msra.gmra.mxu3 %vm884_vm0, %v5806_v57 }
0x13be   : > { %v5905_v8 = vsel %vm884_vm0, %v5900_v32, 0 }
0x13bf   : > { %5914 = vmatpush.bf16.xpose.msrb.mxu3 %v5905_v8 }
0x13c2   : > { %8456 = vmatmul.msk.bf16.vlgmr.msra.gmra.mxu2 %vm884_vm0, %v5783_v3  ;;  %v5923_v13 = vpop.permute.xlu2 %5922 }
0x13c3   : > { %v5928_v35 = vsel %vm884_vm0, %v5923_v13, 0 }
0x13c5   : > { %v5852_v41 = vpop.permute.xlu0 %5851 }
0x13c6   : > { %8459 = vmatmul.msk.bf16.vlgmr.msra.gmra.mxu1 %vm884_vm0, %v5852_v41 }
0x13ca   : > { %v5944_v5 = vpop.permute.xlu2 %5943 }
0x13cd   : > { %v5898_v54 = vpop.permute.xlu0 %5897 }
0x13ce   : > { %8461 = vmatmul.msk.bf16.vlgmr.msrb.gmra.mxu3 %vm884_vm0, %v5898_v54 }
0x13d5   : > { %v5921_v4 = vpop.permute.xlu0 %5920 }
0x13dd   : > { %v6071_v56 = vpop.permute.xlu0 %6070 }
0x13de   : > { %v6076_v44 = vsel %vm1145_vm2, %v6071_v56, 0 }
0x13e4   : > { %v5586_v42 = vpop.xlane.xlu1 %5585 }
0x13e5   : > { %9443 = vrcp.f32 %v5586_v42 }
0x13eb   : > { %v9444_v49 = vpop.eup %9443 }
0x13ec   : > { %v5604_v22 = vmul.f32 %v9444_v49, %v12064_v47 }
0x13ee   : > { %v5612_v55 = vpack.c.bf16 %v5604_v22, %v5604_v22 }
0x13f0   : > { %8454 = vmatmul.msk.bf16.vlgmr.msrb.gmra.mxu0 %vm1045_vm1, %v5612_v55 }
0x13f1   : > { %5937 = vmatpush.bf16.xpose.msrb.mxu0 %v5928_v35 }
0x13fc   : > { %v5877_v10 = vpop.permute.xlu1 %5876 }
0x13fd   : > { %v5882_v36 = vsel %vm884_vm0, %v5877_v10, 0 }
0x13fe   : > { %5891 = vmatpush.bf16.xpose.msrb.mxu2 %v5882_v36 }
0x1400   : > { %8458 = vmatmul.msk.bf16.vlgmr.msra.gmra.mxu0 %vm884_vm0, %v5829_v60 }
0x1404   : > { %v5946_v23 = vpop.permute.xlu1 %5945 }
0x1405   : > { %v5951_v47 = vsel %vm884_vm0, %v5946_v23, 0  ;;  %8460 = vmatmul.msk.bf16.vlgmr.msrb.gmra.mxu2 %vm884_vm0, %v5875_v21 }
0x1406   : > { %6085 = vmatpush.bf16.msra.mxu2 %v6076_v44  ;;  %5960 = vmatpush.bf16.xpose.msrb.mxu1 %v5951_v47 }
0x140a   : > { %v12105_v57 = vpop.f32.mrf.mxu1 }
0x140b   : > { %v12107_v6 = vpop.f32.mrf.mxu0 }
0x140c   : > { %v9135_v9 = vpack.i.bf16 %v12105_v57, %v12107_v6 }
0x140d   : > { %8463 = vmatmul.msk.bf16.vlgmr.msrb.gmra.mxu1 %vm884_vm0, %v5944_v5 }
0x1410   : > { %8462 = vmatmul.msk.bf16.vlgmr.msrb.gmra.mxu0 %vm884_vm0, %v5921_v4 }
0x1412   : > { %v5696_v46 = vpop.f32.mrf.mxu1 }
0x1413   : > { %v5675_v12 = vpop.f32.mrf.mxu0 }
0x1419   : > { %v12113_v62 = vpop.f32.mrf.mxu2 }
0x141a   : > { %v12115_v51 = vpop.f32.mrf.mxu3 }
0x141b   : > { %v9120_v27 = vpack.i.bf16 %v12115_v51, %v12113_v62 }
0x1421   : > { %v5633_v38 = vpop.f32.mrf.mxu2 }
0x1422   : > { %v5654_v3 = vpop.f32.mrf.mxu3 }
0x1424   : > { %v12119_v17 = vpop.f32.mrf.mxu1 }
0x1429   : > { %v12121_v16 = vpop.f32.mrf.mxu2 }
0x142c   : > { %v5780_v33 = vpop.f32.mrf.mxu1 }
0x1430   : > { %v12123_v7 = vpop.f32.mrf.mxu3 }
0x1431   : > { %v5717_v28 = vpop.f32.mrf.mxu2  ;;  %v9150_v52 = vpack.i.bf16 %v12123_v7, %v12121_v16 }
0x1438   : > { %v5738_v43 = vpop.f32.mrf.mxu3 }
0x1440   : > { %v5824_v50 = vpop.f32.mrf.mxu3 }
0x1441   : > { %v5967_v59 = vmul.f32 0.17677669, %v5824_v50 }
0x1443   : > { %v5870_v58 = vpop.f32.mrf.mxu1  ;;  %v5977_v25 = vsel %vm1045_vm1, %v5967_v59, -inf }
0x1444   : > { %5978 = vmax.xlane.f32.xlu0 %v5977_v25  ;;  %v5969_v21 = vmul.f32 0.17677669, %v5870_v58 }
0x1445   : > { %v5801_v32 = vpop.f32.mrf.mxu2 }
0x1446   : > { %v5966_v8 = vmul.f32 0.17677669, %v5801_v32  ;;  %v5983_v49 = vsel %vm1045_vm1, %v5969_v21, -inf }
0x1448   : > { %v5826_v41 = vpop.f32.mrf.mxu3  ;;  %v5974_v54 = vsel %vm1045_vm1, %v5966_v8, -inf }
0x1449   : > { %5975 = vmax.xlane.f32.xlu1 %v5974_v54 }
0x144b   : > { %v5872_v60 = vpop.f32.mrf.mxu1 }
0x144d   : > { %v5803_v42 = vpop.f32.mrf.mxu2 }
0x1451   : > { %v5916_v22 = vpop.f32.mrf.mxu3  ;;  %5984 = vmax.xlane.f32.xlu1 %v5983_v49 }
0x1452   : > { %v5971_v50 = vmul.f32 0.17677669, %v5916_v22 }
0x1454   : > { %v5989_v25 = vsel %vm1045_vm1, %v5971_v50, -inf }
0x1459   : > { %v5918_v13 = vpop.f32.mrf.mxu3 }
0x146d   : > { %v12130_v55 = vpop.f32.mrf.mxu0 }
0x1475   : > { %v5759_v35 = vpop.f32.mrf.mxu0 }
0x147d   : > { %v5847_v4 = vpop.f32.mrf.mxu0 }
0x147e   : > { %v5968_v56 = vmul.f32 0.17677669, %v5847_v4 }
0x1480   : > { %v5980_v10 = vsel %vm1045_vm1, %v5968_v56, -inf }
0x1481   : > { %5981 = vmax.xlane.f32.xlu2 %v5980_v10 }
0x1485   : > { %v5849_v36 = vpop.f32.mrf.mxu0 }
0x1488   : > { %v5893_v44 = vpop.f32.mrf.mxu2 }
0x1489   : > { %v5970_v23 = vmul.f32 0.17677669, %v5893_v44 }
0x148a   : > { %v5962_v47 = vpop.f32.mrf.mxu1 }
0x148b   : > { %v5973_v5 = vmul.f32 0.17677669, %v5962_v47  ;;  %v5986_v46 = vsel %vm1045_vm1, %v5970_v23, -inf }
0x148c   : > { %5987 = vmax.xlane.f32.xlu0 %v5986_v46 }
0x148d   : > { %v5939_v12 = vpop.f32.mrf.mxu0  ;;  %v5995_v38 = vsel %vm1045_vm1, %v5973_v5, -inf }
0x148e   : > { %v12135_v3 = vmul.f32 0.17677669, %v5939_v12  ;;  %5996 = vmax.xlane.f32.xlu1 %v5995_v38 }
0x1490   : > { %v5895_v33 = vpop.f32.mrf.mxu2  ;;  %v5992_v28 = vsel %vm1045_vm1, %v12135_v3, -inf }
0x1491   : > { %5993 = vmax.xlane.f32.xlu2 %v5992_v28 }
0x1492   : > { %v5964_v43 = vpop.f32.mrf.mxu1 }
0x1495   : > { %v5941_v58 = vpop.f32.mrf.mxu0 }
0x1499   : > { %5990 = vmax.xlane.f32.xlu2 %v5989_v25 }
0x14b1   : > { %6091 = vrot.lane.b32.xlu2 %v11744_v20, %s9527_s27 }
0x14b7   : > { %v5979_v32 = vpop.xlane.xlu0 %5978 }
0x14b8   : > { %v5999_v41 = vsub.f32 %v5967_v59, %v5979_v32 }
0x14ba   : > { %v6008_v54 = vmul.f32 1.442695, %v5999_v41 }
0x14bc   : > { %9445 = vpow2.f32 %v6008_v54  ;;  %v5976_v49 = vpop.xlane.xlu1 %5975 }
0x14bd   : > { %v5998_v35 = vsub.f32 %v5966_v8, %v5976_v49 }
0x14bf   : > { %v6006_v36 = vmul.f32 1.442695, %v5998_v35  ;;  %v13031_v35 = vpack.i.bf16 %v11955_v63, %v11942_v24 }
0x14c2   : > { %v9446_v60 = vpop.eup %9445 }
0x14c3   : > { %v6025_v42 = vsel %vm1045_vm1, %v9446_v60, 0.0 }
0x14c4   : > { %6026 = vadd.xlane.f32.xlu0 %v6025_v42  ;;  %v5985_v10 = vpop.xlane.xlu1 %5984 }
0x14c5   : > { %v6001_v59 = vsub.f32 %v5969_v21, %v5985_v10 }
0x14c7   : > { %v6012_v33 = vmul.f32 1.442695, %v6001_v59 }
0x14d8   : > { %6112 = vrot.lane.b32.xlu0 %v11797_v53, %s9527_s27 }
0x14f4   : > { %v5982_v22 = vpop.xlane.xlu2 %5981 }
0x14f5   : > { %v6000_v13 = vsub.f32 %v5968_v56, %v5982_v22 }
0x14f7   : > { %v6010_v4 = vmul.f32 1.442695, %v6000_v13 }
0x14f9   : > { %9447 = vpow2.f32 %v6010_v4 }
0x14fa   : > { %9449 = vpow2.f32 %v6006_v36 }
0x14ff   : > { %v12145_v20 = vpop.eup %9447  ;;  %v5988_v44 = vpop.xlane.xlu0 %5987 }
0x1500   : > { %v6002_v47 = vsub.f32 %v5970_v23, %v5988_v44  ;;  %v6028_v46 = vsel %vm1045_vm1, %v12145_v20, 0.0  ;;  %v9450_v56 = vpop.eup %9449 }
0x1501   : > { %6029 = vadd.xlane.f32.xlu1 %v6028_v46  ;;  %v5997_v12 = vpop.xlane.xlu1 %5996  ;;  %v6022_v43 = vsel %vm1045_vm1, %v9450_v56, 0.0 }
0x1502   : > { %v6014_v53 = vmul.f32 1.442695, %v6002_v47  ;;  %v6005_v38 = vsub.f32 %v5973_v5, %v5997_v12 }
0x1504   : > { %9451 = vpow2.f32 %v6014_v53  ;;  %v5994_v8 = vpop.xlane.xlu2 %5993  ;;  %v6020_v28 = vmul.f32 1.442695, %v6005_v38 }
0x1505   : > { %9453 = vpow2.f32 %v6012_v33  ;;  %v6004_v63 = vsub.f32 %v12135_v3, %v5994_v8 }
0x1506   : > { %9455 = vpow2.f32 %v6020_v28 }
0x1507   : > { %v6018_v62 = vmul.f32 1.442695, %v6004_v63 }
0x1509   : > { %6023 = vadd.xlane.f32.xlu1 %v6022_v43 }
0x150a   : > { %v12150_v58 = vpop.eup %9451 }
0x150b   : > { %v6034_v21 = vsel %vm1045_vm1, %v12150_v58, 0.0  ;;  %v9454_v25 = vpop.eup %9453 }
0x150c   : > { %v5991_v23 = vpop.xlane.xlu2 %5990  ;;  %6035 = vadd.xlane.f32.xlu2 %v6034_v21  ;;  %v12154_v41 = vpop.eup %9455  ;;  %v6031_v54 = vsel %vm1045_vm1, %v9454_v25, 0.0 }
0x150d   : > { %v6003_v32 = vsub.f32 %v5971_v50, %v5991_v23  ;;  %v6043_v42 = vsel %vm1045_vm1, %v12154_v41, 0.0 }
0x150f   : > { %v6016_v5 = vmul.f32 1.442695, %v6003_v32 }
0x1511   : > { %9457 = vpow2.f32 %v6016_v5  ;;  %6032 = vadd.xlane.f32.xlu1 %v6031_v54 }
0x1514   : > { %v6092_v49 = vpop.permute.xlu2 %6091  ;;  %6044 = vadd.xlane.f32.xlu2 %v6043_v42 }
0x1515   : > { %v6097_v22 = vsel %vm1145_vm2, %v6092_v49, 0 }
0x1516   : > { %6106 = vmatpush.bf16.msra.mxu3 %v6097_v22 }
0x1517   : > { %v12160_v13 = vpop.eup %9457 }
0x1518   : > { %v6037_v50 = vsel %vm1045_vm1, %v12160_v13, 0.0 }
0x1519   : > { %6038 = vadd.xlane.f32.xlu0 %v6037_v50 }
0x152a   : > { %6133 = vrot.lane.b32.xlu1 %v11822_v26, %s9527_s27 }
0x152c   : > { %6217 = vrot.lane.b32.xlu2 %v11879_v0, %s9527_s27 }
0x152d   : > { %6196 = vrot.lane.b32.xlu0 %v11874_v61, %s9527_s27 }
0x1532   : > { %6154 = vrot.lane.b32.xlu1 %v11727_v1, %s9527_s27 }
0x1535   : > { %9116 = vrot.lane.b32.xlu0 %v13031_v35, %s9527_s27 }
0x1537   : > { %v6027_v4 = vpop.xlane.xlu0 %6026 }
0x1538   : > { %9459 = vrcp.f32 %v6027_v4 }
0x1539   : > { %9461 = vpow2.f32 %v6018_v62 }
0x153a   : > { %6175 = vrot.lane.b32.xlu1 %v11815_v40, %s9527_s27  ;;  %v13032_v40 = vpack.i.bf16 %v11961_v11, %v11959_v31  ;;  %v13033_v31 = vpack.i.bf16 %v11951_v34, %v11949_v19 }
0x153d   : > { %9121 = vrot.lane.b32.xlu0 %v9120_v27, %s9526_s26 }
0x153e   : > { %v9460_v26 = vpop.eup %9459 }
0x153f   : > { %v6055_v61 = vmul.f32 %v9460_v26, %v9446_v60  ;;  %v9462_v51 = vpop.eup %9461 }
0x1540   : > { %v6040_v27 = vsel %vm1045_vm1, %v9462_v51, 0.0 }
0x1541   : > { %v6063_v0 = vpack.c.bf16 %v6055_v61, %v6055_v61 }
0x1543   : > { %8465 = vmatmul.msk.bf16.vlgmr.msra.gmra.mxu3 %vm1045_vm1, %v6063_v0 }
0x1545   : > { %9136 = vrot.lane.b32.xlu0 %v9135_v9, %s9526_s26 }
0x154a   : > { %v6113_v1 = vpop.permute.xlu0 %6112 }
0x154b   : > { %v6118_v24 = vsel %vm1145_vm2, %v6113_v1, 0 }
0x154c   : > { %6127 = vmatpush.bf16.msra.mxu0 %v6118_v24 }
0x154d   : > { %9146 = vrot.lane.b32.xlu0 %v13032_v40, %s9527_s27 }
0x1564   : > { %6041 = vadd.xlane.f32.xlu1 %v6040_v27 }
0x1574   : > { %v6030_v60 = vpop.xlane.xlu1 %6029 }
0x1575   : > { %9463 = vrcp.f32 %v6030_v60  ;;  %v8954_v60 = vld [vmem:[%s12996_s3 + $0x78] sm:$0xff] }
0x157b   : > { %v9464_v57 = vpop.eup %9463 }
0x157c   : > { %v6056_v6 = vmul.f32 %v9464_v57, %v12145_v20  ;;  %v6024_v9 = vpop.xlane.xlu1 %6023  ;;  %v8952_v57 = vld [vmem:[%s12996_s3 + $0x68] sm:$0xff] }
0x157d   : > { %9465 = vrcp.f32 %v6024_v9  ;;  %9131 = vrot.lane.b32.xlu1 %v13033_v31, %s9527_s27  ;;  %v8951_v9 = vld [vmem:[%s12996_s3 + $0x60] sm:$0xff] }
0x157e   : > { %v6064_v11 = vpack.c.bf16 %v6056_v6, %v6056_v6 }
0x157f   : > { %v6036_v59 = vpop.xlane.xlu2 %6035 }
0x1580   : > { %8466 = vmatmul.msk.bf16.vlgmr.msra.gmra.mxu0 %vm1045_vm1, %v6064_v11  ;;  %v8950_v11 = vld [vmem:[%s12996_s3 + $0x58] sm:$0xff] }
0x1583   : > { %v9466_v3 = vpop.eup %9465 }
0x1584   : > { %v6054_v10 = vmul.f32 %v9466_v3, %v9450_v56  ;;  %v6033_v44 = vpop.xlane.xlu1 %6032 }
0x1585   : > { %9467 = vrcp.f32 %v6033_v44  ;;  %v9165_v44 = vpack.i.bf16 %v12119_v17, %v12130_v55 }
0x1586   : > { %v6062_v36 = vpack.c.bf16 %v6054_v10, %v6054_v10  ;;  %9469 = vrcp.f32 %v6036_v59  ;;  %v13034_v10 = vpack.i.bf16 %v11968_v30, %v11965_v14  ;;  %v8948_v14 = vld [vmem:[%s12996_s3 + $0x48] sm:$0xff]  ;;  %v8947_v30 = vld [vmem:[%s12996_s3 + $0x40] sm:$0xff] }
0x1587   : > { %v6045_v47 = vpop.xlane.xlu2 %6044 }
0x1588   : > { %8464 = vmatmul.msk.bf16.vlgmr.msra.gmra.mxu2 %vm1045_vm1, %v6062_v36  ;;  %9471 = vrcp.f32 %v6045_v47  ;;  %v8949_v47 = vld [vmem:[%s12996_s3 + $0x50] sm:$0xff] }
0x158b   : > { %v9468_v46 = vpop.eup %9467 }
0x158c   : > { %v6039_v20 = vpop.xlane.xlu0 %6038  ;;  %v6057_v12 = vmul.f32 %v9468_v46, %v9454_v25  ;;  %v9470_v56 = vpop.eup %9469 }
0x158d   : > { %9473 = vrcp.f32 %v6039_v20  ;;  %v6058_v43 = vmul.f32 %v9470_v56, %v12150_v58 }
0x158e   : > { %v6065_v33 = vpack.c.bf16 %v6057_v12, %v6057_v12  ;;  %v9472_v25 = vpop.eup %9471 }
0x158f   : > { %v6218_v53 = vpop.permute.xlu2 %6217  ;;  %v6066_v32 = vpack.c.bf16 %v6058_v43, %v6058_v43  ;;  %v6061_v54 = vmul.f32 %v9472_v25, %v12154_v41 }
0x1590   : > { %v6223_v34 = vsel %vm1145_vm2, %v6218_v53, 0 }
0x1591   : > { %v6069_v50 = vpack.c.bf16 %v6061_v54, %v6061_v54 }
0x1593   : > { %v9474_v5 = vpop.eup %9473 }
0x1594   : > { %v6059_v42 = vmul.f32 %v9474_v5, %v12160_v13 }
0x1596   : > { %v6067_v35 = vpack.c.bf16 %v6059_v42, %v6059_v42 }
0x159c   : > { %v6134_v38 = vpop.permute.xlu1 %6133 }
0x159d   : > { %v6139_v19 = vsel %vm1145_vm2, %v6134_v38, 0 }
0x159e   : > { %6148 = vmatpush.bf16.msra.mxu1 %v6139_v19 }
0x159f   : > { %v6197_v8 = vpop.permute.xlu0 %6196 }
0x15a0   : > { %v6202_v28 = vsel %vm1145_vm2, %v6197_v8, 0 }
0x15a1   : > { %8467 = vmatmul.msk.bf16.vlgmr.msra.gmra.mxu1 %vm1045_vm1, %v6065_v33  ;;  %6211 = vmatpush.bf16.msrb.mxu0 %v6202_v28 }
0x15a2   : > { %6232 = vmatpush.bf16.msrb.mxu1 %v6223_v34 }
0x15a4   : > { %v6155_v21 = vpop.permute.xlu1 %6154 }
0x15a5   : > { %v6160_v23 = vsel %vm1145_vm2, %v6155_v21, 0 }
0x15a6   : > { %6169 = vmatpush.bf16.msrb.mxu2 %v6160_v23 }
0x15a7   : > { %v9117_v20 = vpop.permute.xlu0 %9116 }
0x15a8   : > { %v9119_v12 = vunpack.i.h.bf16 %v9117_v20  ;;  %v9118_v53 = vunpack.i.l.bf16 %v9117_v20 }
0x15a9   : > { %8468 = vmatmul.msk.bf16.vlgmr.msrb.gmra.mxu2 %vm1045_vm1, %v6066_v32 }
0x15aa   : > { %6413 = vmatpush.bf16.msra.mxu2 %v8954_v60  ;;  %v6335_v8 = vsel %vm884_vm0, %v11770_v45, %v9119_v12  ;;  %v6334_v56 = vsel %vm884_vm0, %v11773_v39, %v9118_v53  ;;  %v9181_v53 = vld [vmem:[%s12997_s4 + $0x1] ss:$0 sm:$0xff] }
0x15ac   : > { %v6176_v49 = vpop.permute.xlu1 %6175 }
0x15ad   : > { %v6181_v22 = vsel %vm1145_vm2, %v6176_v49, 0 }
0x15ae   : > { %6190 = vmatpush.bf16.msrb.mxu3 %v6181_v22 }
0x15af   : > { %v9122_v55 = vpop.permute.xlu0 %9121 }
0x15b0   : > { %v9124_v38 = vunpack.i.h.bf16 %v9122_v55  ;;  %v9123_v19 = vunpack.i.l.bf16 %v9122_v55 }
0x15b1   : > { %8469 = vmatmul.msk.bf16.vlgmr.msrb.gmra.mxu3 %vm1045_vm1, %v6067_v35  ;;  %8471 = vmatmul.msk.bf16.vlgmr.msrb.gmra.mxu1 %vm1045_vm1, %v6069_v50 }
0x15b2   : > { %v6342_v21 = vsel %vm2839_vm3, %v6334_v56, %v9123_v19  ;;  %v6343_v23 = vsel %vm2839_vm3, %v6335_v8, %v9124_v38  ;;  %v13035_v19 = vld [vmem:[#allocation3_spill] sm:$0xff]  ;;  %v13036_v8 = vld [vmem:[#allocation4_spill] sm:$0xff] }
0x15b7   : > { %v9137_v22 = vpop.permute.xlu0 %9136 }
0x15b8   : > { %v9139_v50 = vunpack.i.h.bf16 %v9137_v22  ;;  %v9138_v35 = vunpack.i.l.bf16 %v9137_v22  ;;  %v13039_v22 = vld [vmem:[#allocation7_spill] sm:$0xff] }
0x15c6   : > { %v6108_v58 = vpop.f32.mrf.mxu3 }
0x15ce   : > { %v6110_v4 = vpop.f32.mrf.mxu3 }
0x15d7   : > { %v6042_v26 = vpop.xlane.xlu1 %6041 }
0x15d8   : > { %9475 = vrcp.f32 %v6042_v26 }
0x15de   : > { %v9476_v61 = vpop.eup %9475 }
0x15df   : > { %v6060_v0 = vmul.f32 %v9476_v61, %v9462_v51  ;;  %v8953_v51 = vld [vmem:[%s12996_s3 + $0x70] sm:$0xff] }
0x15e0   : > { %6414 = vmatpush.bf16.msra.mxu2 %v8953_v51 }
0x15e1   : > { %v6068_v1 = vpack.c.bf16 %v6060_v0, %v6060_v0 }
0x15e3   : > { %8470 = vmatmul.msk.bf16.vlgmr.msrb.gmra.mxu0 %vm1045_vm1, %v6068_v1 }
0x15e4   : > { %6415 = vmatpush.bf16.msra.mxu2 %v8952_v57 }
0x15e8   : > { %6416 = vmatpush.bf16.msra.mxu2 %v8951_v9 }
0x15ec   : > { %6417 = vmatpush.bf16.msra.mxu2 %v8950_v11 }
0x15ef   : > { %v9132_v54 = vpop.permute.xlu1 %9131 }
0x15f0   : > { %6418 = vmatpush.bf16.msra.mxu2 %v8949_v47  ;;  %v9134_v42 = vunpack.i.h.bf16 %v9132_v54  ;;  %v9133_v49 = vunpack.i.l.bf16 %v9132_v54 }
0x15f2   : > { %v6337_v45 = vsel %vm884_vm0, %v11788_v48, %v9134_v42  ;;  %v6336_v39 = vsel %vm884_vm0, %v11786_v2, %v9133_v49 }
0x15f3   : > { %v6344_v61 = vsel %vm2839_vm3, %v6336_v39, %v9138_v35  ;;  %v6345_v0 = vsel %vm2839_vm3, %v6337_v45, %v9139_v50  ;;  %v13040_v35 = vld [vmem:[#allocation8_spill] sm:$0xff] }
0x15f4   : > { %6419 = vmatpush.bf16.msra.mxu2 %v8948_v14 }
0x15f8   : > { %6420 = vmatpush.bf16.msra.mxu2 %v8947_v30 }
0x15fd   : > { %v6129_v41 = vpop.f32.mrf.mxu0 }
0x1605   : > { %v6131_v13 = vpop.f32.mrf.mxu0 }
0x160b   : > { %v6087_v24 = vpop.f32.mrf.mxu2 }
0x160c   : > { %v9125_v40 = vpack.i.bf16 %v6108_v58, %v6087_v24  ;;  %v9147_v24 = vpop.permute.xlu0 %9146 }
0x160e   : > { %9126 = vrot.lane.b32.xlu2 %v9125_v40, %s9525_s30  ;;  %v9149_v40 = vunpack.i.h.bf16 %v9147_v24 }
0x1610   : > { %v6339_v60 = vsel %vm884_vm0, %v11792_v15, %v9149_v40 }
0x1613   : > { %v6089_v63 = vpop.f32.mrf.mxu2 }
0x1614   : > { %v9148_v63 = vunpack.i.l.bf16 %v9147_v24 }
0x1616   : > { %v6338_v51 = vsel %vm884_vm0, %v11779_v29, %v9148_v63 }
0x161e   : > { %v6150_v62 = vpop.f32.mrf.mxu1 }
0x161f   : > { %v9140_v27 = vpack.i.bf16 %v6150_v62, %v6129_v41 }
0x1621   : > { %9141 = vrot.lane.b32.xlu2 %v9140_v27, %s9525_s30 }
0x1626   : > { %v6152_v6 = vpop.f32.mrf.mxu1 }
0x1629   : > { %9151 = vrot.lane.b32.xlu2 %v9150_v52, %s9526_s26 }
0x162c   : > { %v6171_v31 = vpop.f32.mrf.mxu2 }
0x162e   : > { %v6234_v3 = vpop.f32.mrf.mxu1 }
0x1631   : > { %9161 = vrot.lane.b32.xlu2 %v13034_v10, %s9527_s27 }
0x1634   : > { %v6173_v16 = vpop.f32.mrf.mxu2  ;;  %v6192_v7 = vpop.f32.mrf.mxu3 }
0x1635   : > { %v9155_v52 = vpack.i.bf16 %v6192_v7, %v6171_v31 }
0x1636   : > { %v6236_v36 = vpop.f32.mrf.mxu1 }
0x1637   : > { %9156 = vrot.lane.b32.xlu0 %v9155_v52, %s9525_s30 }
0x163c   : > { %v6194_v59 = vpop.f32.mrf.mxu3 }
0x163f   : > { %9166 = vrot.lane.b32.xlu0 %v9165_v44, %s9526_s26 }
0x1660   : > { %v6213_v46 = vpop.f32.mrf.mxu0 }
0x1661   : > { %v9170_v17 = vpack.i.bf16 %v6234_v3, %v6213_v46 }
0x1663   : > { %9171 = vrot.lane.b32.xlu1 %v9170_v17, %s9525_s30 }
0x1668   : > { %v9127_v34 = vpop.permute.xlu2 %9126  ;;  %v6215_v33 = vpop.f32.mrf.mxu0 }
0x1669   : > { %v9129_v28 = vunpack.i.h.bf16 %v9127_v34  ;;  %v9128_v43 = vunpack.i.l.bf16 %v9127_v34 }
0x166b   : > { %v6350_v25 = vsel %vm2848_vm4, %v6342_v21, %v9128_v43  ;;  %v6351_v32 = vsel %vm2848_vm4, %v6343_v23, %v9129_v28  ;;  %v13037_v21 = vld [vmem:[#allocation5_spill] sm:$0xff] }
0x166c   : > { %v6358_v5 = vpack.c.bf16 %v6351_v32, %v6350_v25 }
0x166e   : > { %6421 = vmatmul.bf16.vlgmr.msra.gmra.mxu2 %v6358_v5  ;;  %v13038_v5 = vld [vmem:[#allocation6_spill] sm:$0xff] }
0x167b   : > { %v9142_v58 = vpop.permute.xlu2 %9141 }
0x167c   : > { %v9144_v4 = vunpack.i.h.bf16 %v9142_v58  ;;  %v9143_v26 = vunpack.i.l.bf16 %v9142_v58 }
0x167e   : > { %v6352_v1 = vsel %vm2848_vm4, %v6344_v61, %v9143_v26  ;;  %v6353_v41 = vsel %vm2848_vm4, %v6345_v0, %v9144_v4  ;;  %v13041_v61 = vld [vmem:[#allocation9_spill] sm:$0xff] }
0x167f   : > { %v6359_v13 = vpack.c.bf16 %v6353_v41, %v6352_v1  ;;  %v13042_v41 = vld [vmem:[#allocation2_spill] sm:$0xff] }
0x1681   : > { %6426 = vmatmul.bf16.gmra.mxu2 %v6359_v13 }
0x1683   : > { %v9152_v48 = vpop.permute.xlu2 %9151 }
0x1684   : > { %v9154_v2 = vunpack.i.h.bf16 %v9152_v48  ;;  %v9153_v62 = vunpack.i.l.bf16 %v9152_v48 }
0x1686   : > { %v6346_v9 = vsel %vm2839_vm3, %v6338_v51, %v9153_v62  ;;  %v6347_v31 = vsel %vm2839_vm3, %v6339_v60, %v9154_v2  ;;  %v13043_v60 = vld [vmem:[#allocation10_spill] sm:$0xff] }
0x168b   : > { %v9162_v16 = vpop.permute.xlu2 %9161 }
0x168c   : > { %v9164_v52 = vunpack.i.h.bf16 %v9162_v16  ;;  %v9163_v36 = vunpack.i.l.bf16 %v9162_v16 }
0x168e   : > { %v6341_v29 = vsel %vm884_vm0, %v11803_v18, %v9164_v52  ;;  %v6340_v47 = vsel %vm884_vm0, %v11801_v37, %v9163_v36 }
0x16a9   : > { %v9157_v27 = vpop.permute.xlu0 %9156 }
0x16aa   : > { %v9159_v57 = vunpack.i.h.bf16 %v9157_v27  ;;  %v9158_v6 = vunpack.i.l.bf16 %v9157_v27 }
0x16ac   : > { %v6354_v11 = vsel %vm2848_vm4, %v6346_v9, %v9158_v6  ;;  %v6355_v3 = vsel %vm2848_vm4, %v6347_v31, %v9159_v57 }
0x16ad   : > { %v6360_v10 = vpack.c.bf16 %v6355_v3, %v6354_v11 }
0x16af   : > { %6431 = vmatmul.bf16.gmra.mxu2 %v6360_v10 }
0x16b1   : > { %v9167_v7 = vpop.permute.xlu0 %9166 }
0x16b2   : > { %v9169_v15 = vunpack.i.h.bf16 %v9167_v7  ;;  %v9168_v59 = vunpack.i.l.bf16 %v9167_v7 }
0x16b4   : > { %v6349_v20 = vsel %vm2839_vm3, %v6341_v29, %v9169_v15  ;;  %v6348_v46 = vsel %vm2839_vm3, %v6340_v47, %v9168_v59 }
0x16d5   : > { %v9172_v44 = vpop.permute.xlu1 %9171 }
0x16d6   : > { %v9174_v14 = vunpack.i.h.bf16 %v9172_v44  ;;  %v9173_v30 = vunpack.i.l.bf16 %v9172_v44 }
0x16d8   : > { %v6356_v17 = vsel %vm2848_vm4, %v6348_v46, %v9173_v30  ;;  %v6357_v55 = vsel %vm2848_vm4, %v6349_v20, %v9174_v14  ;;  %v8984_v30 = vld [vmem:[%s13000_s7 + $0x1ec] sm:$0xf]  ;;  %v8628_v20 = vld [vmem:[%s13000_s7 + $0x1f8] sm:$0xf0] }
0x16d9   : > { %v6361_v12 = vpack.c.bf16 %v6357_v55, %v6356_v17  ;;  %v8631_v46 = vor.u32 %v8984_v30, %v8628_v20  ;;  %v8618_v17 = vld [vmem:[%s13000_s7 + $0x1e0] sm:$0xf]  ;;  %v8985_v55 = vld [vmem:[%s13000_s7 + $0x1ec] sm:$0xf0]  ;;  %v8556_v30 = vld [vmem:[%s13000_s7 + $0x170] sm:$0xf0] }
0x16da   : > { %v8562_v20 = vld [vmem:[%s13000_s7 + $0x168] sm:$0xf] }
0x16db   : > { %6436 = vmatmul.bf16.gmra.mxu2 %v6361_v12  ;;  %v8983_v12 = vld [vmem:[%s13000_s7 + $0x1e4] sm:$0xf] }
0x16dc   : > { %6892 = vmatpush.bf16.msrb.mxu2 %v8631_v46  ;;  %v8970_v46 = vld [vmem:[%s13000_s7 + $0x174] sm:$0xf0] }
0x16f1   : > { %v6422_v18 = vpop.f32.mrf.mxu2 }
0x16f2   : > { %v6423_v38 = vadd.f32 %v9181_v53, %v6422_v18  ;;  %v8620_v18 = vld [vmem:[%s13000_s7 + $0x1f0] sm:$0xf0] }
0x16f4   : > { %v6442_v37 = vadd.f32 %v6423_v38, %v13035_v19  ;;  %v8626_v38 = vld [vmem:[%s13000_s7 + $0x1e8] sm:$0xf]  ;;  %v8986_v19 = vld [vmem:[%s13000_s7 + $0x1f4] sm:$0xf0] }
0x16f6   : > { %6450 = vadd.xlane.f32.xlu2 %v6442_v37 }
0x16f9   : > { %v6424_v34 = vpop.f32.mrf.mxu2 }
0x16fa   : > { %v6425_v33 = vadd.f32 %v9181_v53, %v6424_v34  ;;  %v8627_v34 = vor.u32 %v8986_v19, %v8626_v38  ;;  %v8538_v38 = vld [vmem:[%s13000_s7 + $0x140] sm:$0xf]  ;;  %v8965_v19 = vld [vmem:[%s13000_s7 + $0x14c] sm:$0xf0] }
0x16fc   : > { %v6443_v56 = vadd.f32 %v6425_v33, %v13036_v8  ;;  %v8980_v33 = vld [vmem:[%s13000_s7 + $0x1cc] sm:$0xf]  ;;  %v8612_v8 = vld [vmem:[%s13000_s7 + $0x1d8] sm:$0xf0]  ;;  %6863 = vmatpush.bf16.msra.mxu1 %v8627_v34  ;;  %v8539_v34 = vor.u32 %v8965_v19, %v8538_v38 }
0x16fe   : > { %6452 = vadd.xlane.f32.xlu0 %v6443_v56 }
0x1704   : > { %v6427_v28 = vpop.f32.mrf.mxu2 }
0x1705   : > { %v6428_v43 = vadd.f32 %v9181_v53, %v6427_v28  ;;  %v8615_v28 = vor.u32 %v8980_v33, %v8612_v8  ;;  %v8540_v33 = vld [vmem:[%s13000_s7 + $0x150] sm:$0xf0]  ;;  %v8546_v8 = vld [vmem:[%s13000_s7 + $0x148] sm:$0xf] }
0x1707   : > { %v6444_v23 = vadd.f32 %v6428_v43, %v13037_v21  ;;  %v8981_v43 = vld [vmem:[%s13000_s7 + $0x1cc] sm:$0xf0]  ;;  %v8979_v21 = vld [vmem:[%s13000_s7 + $0x1c4] sm:$0xf]  ;;  %6893 = vmatpush.bf16.msrb.mxu2 %v8615_v28 }
0x1709   : > { %6454 = vadd.xlane.f32.xlu1 %v6444_v23 }
0x170c   : > { %v6429_v25 = vpop.f32.mrf.mxu2 }
0x170d   : > { %v6430_v32 = vadd.f32 %v9181_v53, %v6429_v25 }
0x170f   : > { %v6445_v54 = vadd.f32 %v6430_v32, %v13038_v5  ;;  %v8610_v5 = vld [vmem:[%s13000_s7 + $0x1c8] sm:$0xf] }
0x1711   : > { %6456 = vadd.xlane.f32.xlu2 %v6445_v54 }
0x1732   : > { %v6432_v42 = vpop.f32.mrf.mxu2 }
0x1733   : > { %v6433_v49 = vadd.f32 %v9181_v53, %v6432_v42 }
0x1735   : > { %v6446_v45 = vadd.f32 %v6433_v49, %v13039_v22  ;;  %v8976_v49 = vld [vmem:[%s13000_s7 + $0x1ac] sm:$0xf]  ;;  %v8596_v22 = vld [vmem:[%s13000_s7 + $0x1b8] sm:$0xf0] }
0x1737   : > { %6458 = vadd.xlane.f32.xlu2 %v6446_v45 }
0x173a   : > { %v6434_v39 = vpop.f32.mrf.mxu2 }
0x173b   : > { %v6435_v50 = vadd.f32 %v9181_v53, %v6434_v39  ;;  %v8599_v39 = vor.u32 %v8976_v49, %v8596_v22 }
0x173d   : > { %v6447_v58 = vadd.f32 %v6435_v50, %v13040_v35  ;;  %v8977_v50 = vld [vmem:[%s13000_s7 + $0x1ac] sm:$0xf0]  ;;  %v8975_v35 = vld [vmem:[%s13000_s7 + $0x1a4] sm:$0xf]  ;;  %6894 = vmatpush.bf16.msrb.mxu2 %v8599_v39  ;;  %v8530_v39 = vld [vmem:[%s13000_s7 + $0x128] sm:$0xf] }
0x173f   : > { %6460 = vadd.xlane.f32.xlu0 %v6447_v58 }
0x175e   : > { %v6437_v4 = vpop.f32.mrf.mxu2 }
0x175f   : > { %v6438_v26 = vadd.f32 %v9181_v53, %v6437_v4 }
0x1761   : > { %v12295_v0 = vadd.f32 %v6438_v26, %v13041_v61  ;;  %v8594_v61 = vld [vmem:[%s13000_s7 + $0x1a8] sm:$0xf] }
0x1763   : > { %6462 = vadd.xlane.f32.xlu0 %v12295_v0 }
0x1766   : > { %v6439_v40 = vpop.f32.mrf.mxu2 }
0x1767   : > { %v6440_v2 = vadd.f32 %v9181_v53, %v6439_v40  ;;  %v8619_v53 = vor.u32 %v8985_v55, %v8618_v17  ;;  %v8563_v55 = vor.u32 %v8970_v46, %v8562_v20 }
0x1769   : > { %v6451_v1 = vpop.xlane.xlu2 %6450  ;;  %v12307_v51 = vadd.f32 %v6440_v2, %v13043_v60  ;;  %6805 = vmatpush.bf16.msra.mxu3 %v8619_v53  ;;  %v8973_v2 = vld [vmem:[%s13000_s7 + $0x18c] sm:$0xf0]  ;;  %v8564_v53 = vld [vmem:[%s13000_s7 + $0x178] sm:$0xf0] }
0x176a   : > { %v6466_v13 = vmul.f32 %v6451_v1, %v13042_v41  ;;  %v8978_v1 = vld [vmem:[%s13000_s7 + $0x1b4] sm:$0xf0] }
0x176c   : > { %v12299_v24 = vsub.f32 %v6442_v37, %v6466_v13  ;;  %v8623_v37 = vor.u32 %v8983_v12, %v8620_v18  ;;  %v8968_v12 = vld [vmem:[%s13000_s7 + $0x16c] sm:$0xf] }
0x176d   : > { %v8567_v18 = vor.u32 %v8968_v12, %v8564_v53 }
0x176e   : > { %v6482_v48 = vmul.f32 %v12299_v24, %v12299_v24  ;;  %6834 = vmatpush.bf16.msra.mxu0 %v8623_v37  ;;  %v8963_v37 = vld [vmem:[%s13000_s7 + $0x144] sm:$0xf] }
0x176f   : > { %v8543_v28 = vor.u32 %v8963_v37, %v8540_v33 }
0x1770   : > { %6490 = vadd.xlane.f32.xlu1 %v6482_v48  ;;  %v8595_v48 = vor.u32 %v8978_v1, %v8594_v61 }
0x1771   : > { %v6453_v63 = vpop.xlane.xlu0 %6452 }
0x1772   : > { %v6467_v62 = vmul.f32 %v6453_v63, %v13042_v41  ;;  %v8570_v63 = vld [vmem:[%s13000_s7 + $0x180] sm:$0xf] }
0x1773   : > { %v8571_v60 = vor.u32 %v8973_v2, %v8570_v63  ;;  %v8508_v2 = vld [vmem:[%s13000_s7 + $0x110] sm:$0xf0] }
0x1774   : > { %v12304_v27 = vsub.f32 %v6443_v56, %v6467_v62  ;;  %v8602_v56 = vld [vmem:[%s13000_s7 + $0x1c0] sm:$0xf]  ;;  %v8971_v62 = vld [vmem:[%s13000_s7 + $0x184] sm:$0xf] }
0x1775   : > { %v8603_v25 = vor.u32 %v8981_v43, %v8602_v56  ;;  %v8966_v56 = vld [vmem:[%s13000_s7 + $0x154] sm:$0xf0] }
0x1776   : > { %v6483_v57 = vmul.f32 %v12304_v27, %v12304_v27  ;;  %v8547_v43 = vor.u32 %v8966_v56, %v8546_v8  ;;  %v12542_v8 = vld [vmem:[%s12998_s5 + $0x1] ss:$0 sm:$0xff] }
0x1777   : > { %6806 = vmatpush.bf16.msra.mxu3 %v8603_v25 }
0x1778   : > { %6492 = vadd.xlane.f32.xlu2 %v6483_v57  ;;  %6464 = vadd.xlane.f32.xlu1 %v12307_v51  ;;  %v8572_v57 = vld [vmem:[%s13000_s7 + $0x190] sm:$0xf0] }
0x177c   : > { %v6455_v6 = vpop.xlane.xlu1 %6454 }
0x177d   : > { %v6468_v9 = vmul.f32 %v6455_v6, %v13042_v41  ;;  %v8578_v6 = vld [vmem:[%s13000_s7 + $0x188] sm:$0xf] }
0x177f   : > { %v12313_v31 = vsub.f32 %v6444_v23, %v6468_v9  ;;  %v8604_v23 = vld [vmem:[%s13000_s7 + $0x1d0] sm:$0xf0]  ;;  %v8974_v9 = vld [vmem:[%s13000_s7 + $0x194] sm:$0xf0] }
0x1780   : > { %v8607_v32 = vor.u32 %v8979_v21, %v8604_v23  ;;  %v8964_v21 = vld [vmem:[%s13000_s7 + $0x14c] sm:$0xf]  ;;  %v8548_v23 = vld [vmem:[%s13000_s7 + $0x158] sm:$0xf0] }
0x1781   : > { %v6484_v11 = vmul.f32 %v12313_v31, %v12313_v31  ;;  %v8551_v25 = vor.u32 %v8964_v21, %v8548_v23 }
0x1782   : > { %6835 = vmatpush.bf16.msra.mxu0 %v8607_v32 }
0x1783   : > { %6494 = vadd.xlane.f32.xlu2 %v6484_v11 }
0x1784   : > { %v6457_v3 = vpop.xlane.xlu2 %6456 }
0x1785   : > { %v6469_v10 = vmul.f32 %v6457_v3, %v13042_v41  ;;  %v8575_v3 = vor.u32 %v8971_v62, %v8572_v57  ;;  %v8514_v62 = vld [vmem:[%s13000_s7 + $0x108] sm:$0xf] }
0x1787   : > { %v12318_v16 = vsub.f32 %v6445_v54, %v6469_v10  ;;  %v8982_v54 = vld [vmem:[%s13000_s7 + $0x1d4] sm:$0xf0]  ;;  %v8579_v10 = vor.u32 %v8974_v9, %v8578_v6  ;;  %v8956_v9 = vld [vmem:[%s13000_s7 + $0x10c] sm:$0xf] }
0x1788   : > { %v8611_v42 = vor.u32 %v8982_v54, %v8610_v5  ;;  %v8522_v5 = vld [vmem:[%s13000_s7 + $0x120] sm:$0xf]  ;;  %v8961_v54 = vld [vmem:[%s13000_s7 + $0x12c] sm:$0xf0] }
0x1789   : > { %v6485_v7 = vmul.f32 %v12318_v16, %v12318_v16  ;;  %v8523_v22 = vor.u32 %v8961_v54, %v8522_v5  ;;  %v12549_v5 = vld [vmem:[%s12999_s6 + $0x1] ss:$0 sm:$0xff] }
0x178a   : > { %6864 = vmatpush.bf16.msra.mxu1 %v8611_v42  ;;  %v8959_v42 = vld [vmem:[%s13000_s7 + $0x124] sm:$0xf] }
0x178b   : > { %6496 = vadd.xlane.f32.xlu0 %v6485_v7  ;;  %v8972_v7 = vld [vmem:[%s13000_s7 + $0x18c] sm:$0xf] }
0x178e   : > { %6865 = vmatpush.bf16.msra.mxu1 %v8595_v48  ;;  %v8957_v48 = vld [vmem:[%s13000_s7 + $0x10c] sm:$0xf0] }
0x1792   : > { %6866 = vmatpush.bf16.msra.mxu1 %v8579_v10 }
0x1796   : > { %6867 = vmatpush.bf16.msra.mxu1 %v8563_v55 }
0x179a   : > { %6868 = vmatpush.bf16.msra.mxu1 %v8547_v43 }
0x17aa   : > { %v6459_v52 = vpop.xlane.xlu2 %6458 }
0x17ab   : > { %v6470_v36 = vmul.f32 %v6459_v52, %v13042_v41  ;;  %v8580_v52 = vld [vmem:[%s13000_s7 + $0x198] sm:$0xf0] }
0x17ad   : > { %v12323_v15 = vsub.f32 %v6446_v45, %v6470_v36  ;;  %v8586_v45 = vld [vmem:[%s13000_s7 + $0x1a0] sm:$0xf]  ;;  %v8583_v36 = vor.u32 %v8972_v7, %v8580_v52 }
0x17ae   : > { %v8587_v4 = vor.u32 %v8977_v50, %v8586_v45  ;;  %v8524_v45 = vld [vmem:[%s13000_s7 + $0x130] sm:$0xf0]  ;;  %v8962_v50 = vld [vmem:[%s13000_s7 + $0x134] sm:$0xf0] }
0x17af   : > { %v6486_v59 = vmul.f32 %v12323_v15, %v12323_v15  ;;  %6895 = vmatpush.bf16.msrb.mxu2 %v8583_v36 }
0x17b0   : > { %6807 = vmatpush.bf16.msra.mxu3 %v8587_v4  ;;  %v8960_v4 = vld [vmem:[%s13000_s7 + $0x12c] sm:$0xf] }
0x17b1   : > { %6498 = vadd.xlane.f32.xlu1 %v6486_v59 }
0x17b2   : > { %v6461_v44 = vpop.xlane.xlu0 %6460 }
0x17b3   : > { %v6471_v29 = vmul.f32 %v6461_v44, %v13042_v41  ;;  %v8969_v44 = vld [vmem:[%s13000_s7 + $0x16c] sm:$0xf0]  ;;  %6896 = vmatpush.bf16.msrb.mxu2 %v8567_v18 }
0x17b4   : > { %6808 = vmatpush.bf16.msra.mxu3 %v8571_v60  ;;  %v8958_v60 = vld [vmem:[%s13000_s7 + $0x114] sm:$0xf0] }
0x17b5   : > { %v12328_v47 = vsub.f32 %v6447_v58, %v6471_v29  ;;  %v8588_v58 = vld [vmem:[%s13000_s7 + $0x1b0] sm:$0xf0]  ;;  %v8967_v29 = vld [vmem:[%s13000_s7 + $0x164] sm:$0xf]  ;;  %v8515_v6 = vor.u32 %v8958_v60, %v8514_v62 }
0x17b6   : > { %v8591_v26 = vor.u32 %v8975_v35, %v8588_v58  ;;  %v8559_v17 = vor.u32 %v8967_v29, %v8556_v30  ;;  %v8527_v35 = vor.u32 %v8959_v42, %v8524_v45  ;;  %v8531_v58 = vor.u32 %v8962_v50, %v8530_v39 }
0x17b7   : > { %v6487_v14 = vmul.f32 %v12328_v47, %v12328_v47  ;;  %6897 = vmatpush.bf16.msrb.mxu2 %v8551_v25 }
0x17b8   : > { %6836 = vmatpush.bf16.msra.mxu0 %v8591_v26  ;;  %v8532_v26 = vld [vmem:[%s13000_s7 + $0x138] sm:$0xf0]  ;;  %6869 = vmatpush.bf16.msra.mxu1 %v8531_v58 }
0x17b9   : > { %6500 = vadd.xlane.f32.xlu2 %v6487_v14  ;;  %v8535_v1 = vor.u32 %v8960_v4, %v8532_v26 }
0x17bb   : > { %6898 = vmatpush.bf16.msrb.mxu2 %v8535_v1 }
0x17bc   : > { %6837 = vmatpush.bf16.msra.mxu0 %v8575_v3  ;;  %v8516_v3 = vld [vmem:[%s13000_s7 + $0x118] sm:$0xf0]  ;;  %6870 = vmatpush.bf16.msra.mxu1 %v8515_v6 }
0x17bd   : > { %v8519_v10 = vor.u32 %v8956_v9, %v8516_v3 }
0x17bf   : > { %6899 = vmatpush.bf16.msrb.mxu2 %v8519_v10 }
0x17c0   : > { %6838 = vmatpush.bf16.msra.mxu0 %v8559_v17 }
0x17c4   : > { %6839 = vmatpush.bf16.msra.mxu0 %v8543_v28 }
0x17c8   : > { %6840 = vmatpush.bf16.msra.mxu0 %v8527_v35 }
0x17d6   : > { %v6463_v13 = vpop.xlane.xlu0 %6462 }
0x17d7   : > { %v6472_v40 = vmul.f32 %v6463_v13, %v13042_v41  ;;  %v8506_v13 = vld [vmem:[%s13000_s7 + $0x100] sm:$0xf] }
0x17d8   : > { %v8507_v63 = vor.u32 %v8957_v48, %v8506_v13 }
0x17d9   : > { %v12424_v11 = vsub.f32 %v12295_v0, %v6472_v40  ;;  %v8554_v0 = vld [vmem:[%s13000_s7 + $0x160] sm:$0xf]  ;;  %v8955_v40 = vld [vmem:[%s13000_s7 + $0x104] sm:$0xf] }
0x17da   : > { %v8555_v14 = vor.u32 %v8969_v44, %v8554_v0  ;;  %v8511_v57 = vor.u32 %v8955_v40, %v8508_v2 }
0x17db   : > { %v6488_v59 = vmul.f32 %v12424_v11, %v12424_v11 }
0x17dc   : > { %6809 = vmatpush.bf16.msra.mxu3 %v8555_v14  ;;  %6841 = vmatpush.bf16.msra.mxu0 %v8511_v57 }
0x17dd   : > { %6502 = vadd.xlane.f32.xlu0 %v6488_v59 }
0x17e0   : > { %6810 = vmatpush.bf16.msra.mxu3 %v8539_v34 }
0x17e3   : > { %v6491_v32 = vpop.xlane.xlu1 %6490 }
0x17e4   : > { %v6506_v49 = vmul.f32 %v6491_v32, %v13042_v41  ;;  %6811 = vmatpush.bf16.msra.mxu3 %v8523_v22 }
0x17e6   : > { %v6514_v61 = vadd.f32 1e-05, %v6506_v49 }
0x17e8   : > { %9477 = vrsqrt.f32 %v6514_v61  ;;  %6812 = vmatpush.bf16.msra.mxu3 %v8507_v63  ;;  %vm6528_vm1 = vweird.f32 %v6514_v61 }
0x17eb   : > { %v6465_v7 = vpop.xlane.xlu1 %6464  ;;  %v6493_v52 = vpop.xlane.xlu2 %6492 }
0x17ec   : > { %v6473_v36 = vmul.f32 %v6465_v7, %v13042_v41  ;;  %v6507_v59 = vmul.f32 %v6493_v52, %v13042_v41 }
0x17ee   : > { %v9478_v0 = vpop.eup %9477  ;;  %v12534_v44 = vsub.f32 %v12307_v51, %v6473_v36  ;;  %v6515_v29 = vadd.f32 1e-05, %v6507_v59 }
0x17ef   : > { %v6523_v14 = vmul.f32 %v9478_v0, %v6514_v61  ;;  %vm6529_vm0 = vweird.f32 %v9478_v0 }
0x17f0   : > { %9479 = vrsqrt.f32 %v6515_v29  ;;  %v6489_v30 = vmul.f32 %v12534_v44, %v12534_v44  ;;  %vm6530_vm2 = vmor %vm6528_vm1, %vm6529_vm0  ;;  %vm6538_vm4 = vweird.f32 %v6515_v29 }
0x17f1   : > { %v6524_v20 = vmul.f32 %v9478_v0, %v6523_v14 }
0x17f2   : > { %6504 = vadd.xlane.f32.xlu1 %v6489_v30 }
0x17f3   : > { %v6525_v46 = vmul.f32 0.5, %v6524_v20 }
0x17f5   : > { %v6526_v17 = vsub.f32 1.5, %v6525_v46 }
0x17f6   : > { %v9480_v55 = vpop.eup %9479  ;;  %v6495_v12 = vpop.xlane.xlu2 %6494 }
0x17f7   : > { %v6527_v53 = vmul.f32 %v9478_v0, %v6526_v17  ;;  %v6533_v18 = vmul.f32 %v9480_v55, %v6515_v29  ;;  %v6508_v38 = vmul.f32 %v6495_v12, %v13042_v41  ;;  %vm6539_vm3 = vweird.f32 %v9480_v55 }
0x17f8   : > { %vm6540_vm10 = vmor %vm6538_vm4, %vm6539_vm3 }
0x17f9   : > { %v6534_v51 = vmul.f32 %v9480_v55, %v6533_v18  ;;  %v6516_v19 = vadd.f32 1e-05, %v6508_v38  ;;  %v6531_v37 = vsel %vm6530_vm2, %v9478_v0, %v6527_v53 }
0x17fa   : > { %v6602_v56 = vmul.f32 %v6531_v37, %v12299_v24 }
0x17fb   : > { %v6535_v34 = vmul.f32 0.5, %v6534_v51  ;;  %9481 = vrsqrt.f32 %v6516_v19  ;;  %vm6548_vm12 = vweird.f32 %v6516_v19 }
0x17fc   : > { %v6613_v54 = vmul.f32 %v12542_v8, %v6602_v56 }
0x17fd   : > { %v6536_v33 = vsub.f32 1.5, %v6535_v34 }
0x17fe   : > { %v6497_v28 = vpop.xlane.xlu0 %6496  ;;  %v12555_v45 = vadd.f32 %v12549_v5, %v6613_v54  ;;  %v9018_v54 = vld [vmem:[%s13002_s9 + $0x1f8] sm:$0xff] }
0x17ff   : > { %v6537_v43 = vmul.f32 %v9480_v55, %v6536_v33  ;;  %v6509_v21 = vmul.f32 %v6497_v28, %v13042_v41  ;;  %7251 = vmatpush.bf16.msra.mxu2 %v9018_v54 }
0x1801   : > { %v9482_v23 = vpop.eup %9481  ;;  %v6541_v25 = vsel %vm6540_vm10, %v9480_v55, %v6537_v43  ;;  %v6517_v32 = vadd.f32 1e-05, %v6509_v21 }
0x1802   : > { %v6603_v42 = vmul.f32 %v6541_v25, %v12304_v27  ;;  %v6543_v49 = vmul.f32 %v9482_v23, %v6516_v19  ;;  %vm6549_vm11 = vweird.f32 %v9482_v23  ;;  %v9010_v25 = vld [vmem:[%s13002_s9 + $0x1b8] sm:$0xff] }
0x1803   : > { %9483 = vrsqrt.f32 %v6517_v32  ;;  %vm6550_vm13 = vmor %vm6548_vm12, %vm6549_vm11  ;;  %vm6558_vm15 = vweird.f32 %v6517_v32  ;;  %7222 = vmatpush.bf16.msrb.mxu1 %v9010_v25 }
0x1804   : > { %v6614_v24 = vmul.f32 %v12542_v8, %v6603_v42  ;;  %v6544_v22 = vmul.f32 %v9482_v23, %v6543_v49  ;;  %v9001_v42 = vld [vmem:[%s13002_s9 + $0x170] sm:$0xff] }
0x1806   : > { %v12558_v39 = vadd.f32 %v12549_v5, %v6614_v24  ;;  %v6545_v50 = vmul.f32 0.5, %v6544_v22  ;;  %v8993_v24 = vld [vmem:[%s13002_s9 + $0x130] sm:$0xff] }
0x1807   : > { %v9017_v22 = vld [vmem:[%s13002_s9 + $0x1f0] sm:$0xff] }
0x1808   : > { %v6546_v35 = vsub.f32 1.5, %v6545_v50  ;;  %v6632_v58 = vpack.c.bf16 %v12558_v39, %v12555_v45  ;;  %v9009_v50 = vld [vmem:[%s13002_s9 + $0x1b0] sm:$0xff]  ;;  %7252 = vmatpush.bf16.msra.mxu2 %v9017_v22 }
0x1809   : > { %v9484_v4 = vpop.eup %9483  ;;  %7223 = vmatpush.bf16.msrb.mxu1 %v9009_v50 }
0x180a   : > { %v6547_v26 = vmul.f32 %v9482_v23, %v6546_v35  ;;  %v6553_v27 = vmul.f32 %v9484_v4, %v6517_v32  ;;  %6813 = vmatmul.bf16.vlgmr.msra.gmra.mxu3 %v6632_v58  ;;  %6842 = vmatmul.bf16.vlgmr.msra.gmra.mxu0 %v6632_v58  ;;  %vm6559_vm14 = vweird.f32 %v9484_v4  ;;  %v8994_v32 = vld [vmem:[%s13002_s9 + $0x138] sm:$0xff]  ;;  %v9000_v35 = vld [vmem:[%s13002_s9 + $0x168] sm:$0xff] }
0x180b   : > { %6871 = vmatmul.bf16.vlgmr.msra.gmra.mxu1 %v6632_v58  ;;  %6900 = vmatmul.bf16.vlgmr.msrb.gmra.mxu2 %v6632_v58  ;;  %vm6560_vm5 = vmor %vm6558_vm15, %vm6559_vm14  ;;  %v9008_v58 = vld [vmem:[%s13002_s9 + $0x1a8] sm:$0xff] }
0x180c   : > { %v6554_v61 = vmul.f32 %v9484_v4, %v6553_v27  ;;  %v6551_v1 = vsel %vm6550_vm13, %v9482_v23, %v6547_v26  ;;  %v9002_v23 = vld [vmem:[%s13002_s9 + $0x178] sm:$0xff]  ;;  %7164 = vmatpush.bf16.msrb.mxu3 %v8994_v32  ;;  %v8992_v26 = vld [vmem:[%s13002_s9 + $0x128] sm:$0xff] }
0x180d   : > { %v6604_v40 = vmul.f32 %v6551_v1, %v12313_v31  ;;  %7193 = vmatpush.bf16.msrb.mxu0 %v9002_v23  ;;  %v9016_v27 = vld [vmem:[%s13002_s9 + $0x1e8] sm:$0xff]  ;;  %7224 = vmatpush.bf16.msrb.mxu1 %v9008_v58  ;;  %v9007_v1 = vld [vmem:[%s13002_s9 + $0x1a0] sm:$0xff] }
0x180e   : > { %v6555_v13 = vmul.f32 0.5, %v6554_v61  ;;  %v8999_v61 = vld [vmem:[%s13002_s9 + $0x160] sm:$0xff]  ;;  %7253 = vmatpush.bf16.msra.mxu2 %v9016_v27 }
0x180f   : > { %v6615_v60 = vmul.f32 %v12542_v8, %v6604_v40 }
0x1810   : > { %v6556_v48 = vsub.f32 1.5, %v6555_v13  ;;  %7165 = vmatpush.bf16.msrb.mxu3 %v8993_v24 }
0x1811   : > { %v12567_v6 = vadd.f32 %v12549_v5, %v6615_v60  ;;  %7194 = vmatpush.bf16.msrb.mxu0 %v9001_v42  ;;  %7225 = vmatpush.bf16.msrb.mxu1 %v9007_v1  ;;  %v9006_v60 = vld [vmem:[%s13002_s9 + $0x198] sm:$0xff] }
0x1812   : > { %v6557_v63 = vmul.f32 %v9484_v4, %v6556_v48 }
0x1814   : > { %v6561_v2 = vsel %vm6560_vm5, %v9484_v4, %v6557_v63  ;;  %7166 = vmatpush.bf16.msrb.mxu3 %v8992_v26  ;;  %v8991_v63 = vld [vmem:[%s13002_s9 + $0x120] sm:$0xff] }
0x1815   : > { %v6605_v62 = vmul.f32 %v6561_v2, %v12318_v16  ;;  %7195 = vmatpush.bf16.msrb.mxu0 %v9000_v35  ;;  %7226 = vmatpush.bf16.msrb.mxu1 %v9006_v60 }
0x1817   : > { %v6616_v57 = vmul.f32 %v12542_v8, %v6605_v62  ;;  %v8998_v62 = vld [vmem:[%s13002_s9 + $0x158] sm:$0xff] }
0x1818   : > { %7167 = vmatpush.bf16.msrb.mxu3 %v8991_v63 }
0x1819   : > { %v12570_v9 = vadd.f32 %v12549_v5, %v6616_v57  ;;  %7196 = vmatpush.bf16.msrb.mxu0 %v8999_v61 }
0x181b   : > { %v6633_v3 = vpack.c.bf16 %v12570_v9, %v12567_v6 }
0x181d   : > { %6818 = vmatmul.bf16.gmra.mxu3 %v6633_v3  ;;  %6847 = vmatmul.bf16.gmra.mxu0 %v6633_v3 }
0x181e   : > { %6876 = vmatmul.bf16.gmra.mxu1 %v6633_v3  ;;  %6905 = vmatmul.bf16.gmra.mxu2 %v6633_v3  ;;  %v9015_v3 = vld [vmem:[%s13002_s9 + $0x1e0] sm:$0xff] }
0x181f   : > { %7197 = vmatpush.bf16.msrb.mxu0 %v8998_v62  ;;  %7254 = vmatpush.bf16.msra.mxu2 %v9015_v3 }
0x1824   : > { %v6499_v31 = vpop.xlane.xlu1 %6498 }
0x1825   : > { %v6510_v16 = vmul.f32 %v6499_v31, %v13042_v41  ;;  %v8997_v31 = vld [vmem:[%s13002_s9 + $0x150] sm:$0xff] }
0x1826   : > { %7198 = vmatpush.bf16.msrb.mxu0 %v8997_v31 }
0x1827   : > { %v6518_v10 = vadd.f32 1e-05, %v6510_v16  ;;  %v8990_v16 = vld [vmem:[%s13002_s9 + $0x118] sm:$0xff] }
0x1828   : > { %7168 = vmatpush.bf16.msrb.mxu3 %v8990_v16 }
0x1829   : > { %9485 = vrsqrt.f32 %v6518_v10  ;;  %vm6568_vm7 = vweird.f32 %v6518_v10 }
0x182c   : > { %v6501_v7 = vpop.xlane.xlu2 %6500 }
0x182d   : > { %v6511_v52 = vmul.f32 %v6501_v7, %v13042_v41 }
0x182f   : > { %v9486_v36 = vpop.eup %9485  ;;  %v6519_v59 = vadd.f32 1e-05, %v6511_v52  ;;  %v9014_v52 = vld [vmem:[%s13002_s9 + $0x1d8] sm:$0xff] }
0x1830   : > { %v6563_v0 = vmul.f32 %v9486_v36, %v6518_v10  ;;  %vm6569_vm6 = vweird.f32 %v9486_v36  ;;  %v9005_v10 = vld [vmem:[%s13002_s9 + $0x190] sm:$0xff]  ;;  %7255 = vmatpush.bf16.msra.mxu2 %v9014_v52 }
0x1831   : > { %9487 = vrsqrt.f32 %v6519_v59  ;;  %vm6570_vm8 = vmor %vm6568_vm7, %vm6569_vm6  ;;  %vm6578_vm0 = vweird.f32 %v6519_v59  ;;  %7227 = vmatpush.bf16.msrb.mxu1 %v9005_v10 }
0x1832   : > { %v6564_v29 = vmul.f32 %v9486_v36, %v6563_v0  ;;  %v9004_v0 = vld [vmem:[%s13002_s9 + $0x188] sm:$0xff] }
0x1834   : > { %v6565_v14 = vmul.f32 0.5, %v6564_v29 }
0x1835   : > { %7228 = vmatpush.bf16.msrb.mxu1 %v9004_v0 }
0x1836   : > { %v6566_v30 = vsub.f32 1.5, %v6565_v14 }
0x1837   : > { %v9488_v20 = vpop.eup %9487 }
0x1838   : > { %v6567_v46 = vmul.f32 %v9486_v36, %v6566_v30  ;;  %v6573_v17 = vmul.f32 %v9488_v20, %v6519_v59  ;;  %vm6579_vm9 = vweird.f32 %v9488_v20  ;;  %v8996_v59 = vld [vmem:[%s13002_s9 + $0x148] sm:$0xff]  ;;  %v8989_v30 = vld [vmem:[%s13002_s9 + $0x110] sm:$0xff] }
0x1839   : > { %vm6580_vm1 = vmor %vm6578_vm0, %vm6579_vm9  ;;  %7199 = vmatpush.bf16.msrb.mxu0 %v8996_v59  ;;  %7169 = vmatpush.bf16.msrb.mxu3 %v8989_v30 }
0x183a   : > { %v6574_v55 = vmul.f32 %v9488_v20, %v6573_v17  ;;  %v6571_v12 = vsel %vm6570_vm8, %v9486_v36, %v6567_v46  ;;  %v8995_v17 = vld [vmem:[%s13002_s9 + $0x140] sm:$0xff] }
0x183b   : > { %v6606_v38 = vmul.f32 %v6571_v12, %v12323_v15 }
0x183c   : > { %v6575_v53 = vmul.f32 0.5, %v6574_v55  ;;  %v9003_v55 = vld [vmem:[%s13002_s9 + $0x180] sm:$0xff] }
0x183d   : > { %v6617_v34 = vmul.f32 %v12542_v8, %v6606_v38  ;;  %v9012_v38 = vld [vmem:[%s13002_s9 + $0x1c8] sm:$0xff]  ;;  %7200 = vmatpush.bf16.msrb.mxu0 %v8995_v17  ;;  %7229 = vmatpush.bf16.msrb.mxu1 %v9003_v55 }
0x183e   : > { %v6576_v18 = vsub.f32 1.5, %v6575_v53 }
0x183f   : > { %v12581_v56 = vadd.f32 %v12549_v5, %v6617_v34  ;;  %v8987_v34 = vld [vmem:[%s13002_s9 + $0x100] sm:$0xff] }
0x1840   : > { %v6577_v51 = vmul.f32 %v9488_v20, %v6576_v18  ;;  %v8988_v18 = vld [vmem:[%s13002_s9 + $0x108] sm:$0xff] }
0x1841   : > { %7170 = vmatpush.bf16.msrb.mxu3 %v8988_v18 }
0x1842   : > { %v6581_v19 = vsel %vm6580_vm1, %v9488_v20, %v6577_v51  ;;  %v9013_v20 = vld [vmem:[%s13002_s9 + $0x1d0] sm:$0xff] }
0x1843   : > { %v6607_v37 = vmul.f32 %v6581_v19, %v12328_v47  ;;  %7256 = vmatpush.bf16.msra.mxu2 %v9013_v20 }
0x1845   : > { %v6618_v33 = vmul.f32 %v12542_v8, %v6607_v37  ;;  %7171 = vmatpush.bf16.msrb.mxu3 %v8987_v34 }
0x1847   : > { %v12584_v28 = vadd.f32 %v12549_v5, %v6618_v33  ;;  %7257 = vmatpush.bf16.msra.mxu2 %v9012_v38  ;;  %v9011_v33 = vld [vmem:[%s13002_s9 + $0x1c0] sm:$0xff] }
0x1849   : > { %v6634_v43 = vpack.c.bf16 %v12584_v28, %v12581_v56 }
0x184b   : > { %6823 = vmatmul.bf16.gmra.mxu3 %v6634_v43  ;;  %6852 = vmatmul.bf16.gmra.mxu0 %v6634_v43 }
0x184c   : > { %6881 = vmatmul.bf16.gmra.mxu1 %v6634_v43  ;;  %6910 = vmatmul.bf16.gmra.mxu2 %v6634_v43 }
0x184d   : > { %7258 = vmatpush.bf16.msra.mxu2 %v9011_v33 }
0x1850   : > { %v6503_v15 = vpop.xlane.xlu0 %6502 }
0x1851   : > { %v6512_v47 = vmul.f32 %v6503_v15, %v13042_v41 }
0x1853   : > { %v12589_v21 = vadd.f32 1e-05, %v6512_v47 }
0x1855   : > { %9489 = vrsqrt.f32 %v12589_v21  ;;  %vm6588_vm3 = vweird.f32 %v12589_v21 }
0x185b   : > { %v12607_v49 = vpop.eup %9489 }
0x185c   : > { %v6583_v4 = vmul.f32 %v12607_v49, %v12589_v21  ;;  %vm6589_vm2 = vweird.f32 %v12607_v49 }
0x185d   : > { %vm6590_vm4 = vmor %vm6588_vm3, %vm6589_vm2 }
0x185e   : > { %v6584_v13 = vmul.f32 %v12607_v49, %v6583_v4 }
0x1860   : > { %v6585_v57 = vmul.f32 0.5, %v6584_v13 }
0x1862   : > { %v6586_v7 = vsub.f32 1.5, %v6585_v57 }
0x1864   : > { %v6587_v29 = vmul.f32 %v12607_v49, %v6586_v7 }
0x1865   : > { %v6505_v48 = vpop.xlane.xlu1 %6504 }
0x1866   : > { %v6513_v40 = vmul.f32 %v6505_v48, %v13042_v41  ;;  %v6591_v12 = vsel %vm6590_vm4, %v12607_v49, %v6587_v29 }
0x1867   : > { %v6608_v19 = vmul.f32 %v6591_v12, %v12424_v11 }
0x1868   : > { %v6521_v2 = vadd.f32 1e-05, %v6513_v40 }
0x1869   : > { %v6619_v47 = vmul.f32 %v12542_v8, %v6608_v19 }
0x186a   : > { %9491 = vrsqrt.f32 %v6521_v2  ;;  %vm6598_vm11 = vweird.f32 %v6521_v2 }
0x186b   : > { %v12703_v21 = vadd.f32 %v12549_v5, %v6619_v47 }
0x1870   : > { %v9492_v36 = vpop.eup %9491 }
0x1871   : > { %v6593_v14 = vmul.f32 %v9492_v36, %v6521_v2  ;;  %vm6599_vm10 = vweird.f32 %v9492_v36 }
0x1872   : > { %vm6600_vm12 = vmor %vm6598_vm11, %vm6599_vm10 }
0x1873   : > { %v6594_v46 = vmul.f32 %v9492_v36, %v6593_v14 }
0x1875   : > { %v6595_v53 = vmul.f32 0.5, %v6594_v46 }
0x1877   : > { %v6596_v51 = vsub.f32 1.5, %v6595_v53 }
0x1879   : > { %v6597_v37 = vmul.f32 %v9492_v36, %v6596_v51 }
0x187b   : > { %v6601_v43 = vsel %vm6600_vm12, %v9492_v36, %v6597_v37 }
0x187c   : > { %v6609_v15 = vmul.f32 %v6601_v43, %v12534_v44  ;;  %v8244_v44 = vld [vmem:[%s13001_s8 + $0x4] sm:$0xf] }
0x187d   : > { %v12715_v42 = vperm.slane %v8244_v44, 2  ;;  %v12719_v35 = vperm.slane %v8244_v44, 0  ;;  %v12722_v26 = vperm.slane %v8244_v44, 3 }
0x187e   : > { %v6620_v11 = vmul.f32 %v12542_v8, %v6609_v15  ;;  %v12713_v8 = vperm.slane %v8244_v44, 1 }
0x1880   : > { %v12706_v23 = vadd.f32 %v12549_v5, %v6620_v11 }
0x1882   : > { %v6635_v25 = vpack.c.bf16 %v12706_v23, %v12703_v21 }
0x1884   : > { %6828 = vmatmul.bf16.gmra.mxu3 %v6635_v25  ;;  %6857 = vmatmul.bf16.gmra.mxu0 %v6635_v25 }
0x1885   : > { %6886 = vmatmul.bf16.gmra.mxu1 %v6635_v25  ;;  %6915 = vmatmul.bf16.gmra.mxu2 %v6635_v25 }
0x1887   : > { %v6843_v32 = vpop.f32.mrf.mxu0 }
0x1888   : > { %v6872_v54 = vpop.f32.mrf.mxu1  ;;  %v6844_v5 = vadd.f32 %v6843_v32, %v12713_v8 }
0x1889   : > { %v6873_v22 = vadd.f32 %v6872_v54, %v12715_v42 }
0x188a   : > { %v6922_v61 = vmax.f32 %v6844_v5, 0.0 }
0x188b   : > { %v6923_v13 = vmax.f32 %v6873_v22, 0.0 }
0x188d   : > { %v6814_v49 = vpop.f32.mrf.mxu3 }
0x188e   : > { %v6901_v24 = vpop.f32.mrf.mxu2  ;;  %v6815_v40 = vadd.f32 %v6814_v49, %v12719_v35 }
0x188f   : > { %v6845_v50 = vpop.f32.mrf.mxu0  ;;  %v6902_v2 = vadd.f32 %v6901_v24, %v12722_v26 }
0x1890   : > { %v6846_v58 = vadd.f32 %v6845_v50, %v12713_v8  ;;  %v6874_v4 = vpop.f32.mrf.mxu1  ;;  %v6921_v16 = vmax.f32 %v6815_v40, 0.0 }
0x1891   : > { %v6875_v27 = vadd.f32 %v6874_v4, %v12715_v42  ;;  %v6924_v7 = vmax.f32 %v6902_v2, 0.0 }
0x1892   : > { %v6926_v1 = vmax.f32 %v6846_v58, 0.0 }
0x1893   : > { %v6927_v48 = vmax.f32 %v6875_v27, 0.0 }
0x1894   : > { %v6954_v63 = vpack.c.bf16 %v6926_v1, %v6922_v61 }
0x1895   : > { %v6955_v62 = vpack.c.bf16 %v6927_v48, %v6923_v13  ;;  %v6816_v60 = vpop.f32.mrf.mxu3 }
0x1896   : > { %v6817_v57 = vadd.f32 %v6816_v60, %v12719_v35  ;;  %v6903_v3 = vpop.f32.mrf.mxu2  ;;  %7201 = vmatmul.bf16.vlgmr.msrb.gmra.mxu0 %v6954_v63 }
0x1897   : > { %v6904_v31 = vadd.f32 %v6903_v3, %v12722_v26  ;;  %7230 = vmatmul.bf16.vlgmr.msrb.gmra.mxu1 %v6955_v62 }
0x1898   : > { %v6925_v10 = vmax.f32 %v6817_v57, 0.0 }
0x1899   : > { %v6928_v52 = vmax.f32 %v6904_v31, 0.0 }
0x189a   : > { %v6953_v36 = vpack.c.bf16 %v6925_v10, %v6921_v16  ;;  %v6848_v59 = vpop.f32.mrf.mxu0 }
0x189b   : > { %v6956_v0 = vpack.c.bf16 %v6928_v52, %v6924_v7  ;;  %v6877_v29 = vpop.f32.mrf.mxu1  ;;  %v6849_v30 = vadd.f32 %v6848_v59, %v12713_v8 }
0x189c   : > { %7172 = vmatmul.bf16.vlgmr.msrb.gmra.mxu3 %v6953_v36  ;;  %v6878_v46 = vadd.f32 %v6877_v29, %v12715_v42 }
0x189d   : > { %7259 = vmatmul.bf16.vlgmr.msra.gmra.mxu2 %v6956_v0  ;;  %v6930_v18 = vmax.f32 %v6849_v30, 0.0 }
0x189e   : > { %v6931_v51 = vmax.f32 %v6878_v46, 0.0 }
0x18a0   : > { %v6819_v14 = vpop.f32.mrf.mxu3 }
0x18a1   : > { %v6906_v20 = vpop.f32.mrf.mxu2  ;;  %v6820_v37 = vadd.f32 %v6819_v14, %v12719_v35 }
0x18a2   : > { %v6850_v17 = vpop.f32.mrf.mxu0  ;;  %v6907_v33 = vadd.f32 %v6906_v20, %v12722_v26 }
0x18a3   : > { %v6851_v55 = vadd.f32 %v6850_v17, %v12713_v8  ;;  %v6879_v12 = vpop.f32.mrf.mxu1  ;;  %v6929_v44 = vmax.f32 %v6820_v37, 0.0 }
0x18a4   : > { %v6880_v53 = vadd.f32 %v6879_v12, %v12715_v42  ;;  %v6932_v54 = vmax.f32 %v6907_v33, 0.0 }
0x18a5   : > { %v6934_v38 = vmax.f32 %v6851_v55, 0.0 }
0x18a6   : > { %v6935_v19 = vmax.f32 %v6880_v53, 0.0 }
0x18a7   : > { %v6958_v34 = vpack.c.bf16 %v6934_v38, %v6930_v18 }
0x18a8   : > { %v6959_v43 = vpack.c.bf16 %v6935_v19, %v6931_v51  ;;  %v6821_v15 = vpop.f32.mrf.mxu3 }
0x18a9   : > { %v6822_v47 = vadd.f32 %v6821_v15, %v12719_v35  ;;  %v6908_v11 = vpop.f32.mrf.mxu2  ;;  %7206 = vmatmul.bf16.gmra.mxu0 %v6958_v34 }
0x18aa   : > { %v6909_v25 = vadd.f32 %v6908_v11, %v12722_v26  ;;  %7235 = vmatmul.bf16.gmra.mxu1 %v6959_v43 }
0x18ab   : > { %v6933_v32 = vmax.f32 %v6822_v47, 0.0 }
0x18ac   : > { %v6936_v49 = vmax.f32 %v6909_v25, 0.0 }
0x18ad   : > { %v6957_v5 = vpack.c.bf16 %v6933_v32, %v6929_v44 }
0x18ae   : > { %v6960_v24 = vpack.c.bf16 %v6936_v49, %v6932_v54 }
0x18af   : > { %7177 = vmatmul.bf16.gmra.mxu3 %v6957_v5 }
0x18b0   : > { %7264 = vmatmul.bf16.gmra.mxu2 %v6960_v24 }
0x18c8   : > { %v6853_v22 = vpop.f32.mrf.mxu0 }
0x18c9   : > { %v6882_v50 = vpop.f32.mrf.mxu1  ;;  %v6854_v4 = vadd.f32 %v6853_v22, %v12713_v8 }
0x18ca   : > { %v6883_v61 = vadd.f32 %v6882_v50, %v12715_v42 }
0x18cb   : > { %v6938_v63 = vmax.f32 %v6854_v4, 0.0  ;;  %v12756_v4 = vld [vmem:[%s13003_s10 + $0x1] ss:$0 sm:$0xff] }
0x18cc   : > { %v6939_v62 = vmax.f32 %v6883_v61, 0.0 }
0x18ce   : > { %v6824_v58 = vpop.f32.mrf.mxu3 }
0x18cf   : > { %v6911_v27 = vpop.f32.mrf.mxu2  ;;  %v6825_v57 = vadd.f32 %v6824_v58, %v12719_v35 }
0x18d0   : > { %v6855_v1 = vpop.f32.mrf.mxu0  ;;  %v6912_v31 = vadd.f32 %v6911_v27, %v12722_v26 }
0x18d1   : > { %v6856_v13 = vadd.f32 %v6855_v1, %v12713_v8  ;;  %v6884_v48 = vpop.f32.mrf.mxu1  ;;  %v6937_v59 = vmax.f32 %v6825_v57, 0.0 }
0x18d2   : > { %v6885_v40 = vadd.f32 %v6884_v48, %v12715_v42  ;;  %v6940_v29 = vmax.f32 %v6912_v31, 0.0 }
0x18d3   : > { %v6942_v2 = vmax.f32 %v6856_v13, 0.0 }
0x18d4   : > { %v6943_v60 = vmax.f32 %v6885_v40, 0.0 }
0x18d5   : > { %v6962_v3 = vpack.c.bf16 %v6942_v2, %v6938_v63 }
0x18d6   : > { %v6963_v16 = vpack.c.bf16 %v6943_v60, %v6939_v62  ;;  %v6826_v10 = vpop.f32.mrf.mxu3 }
0x18d7   : > { %v6827_v7 = vadd.f32 %v6826_v10, %v12719_v35  ;;  %v6913_v52 = vpop.f32.mrf.mxu2  ;;  %7211 = vmatmul.bf16.gmra.mxu0 %v6962_v3 }
0x18d8   : > { %v6914_v36 = vadd.f32 %v6913_v52, %v12722_v26  ;;  %7240 = vmatmul.bf16.gmra.mxu1 %v6963_v16 }
0x18d9   : > { %v6941_v0 = vmax.f32 %v6827_v7, 0.0 }
0x18da   : > { %v6944_v14 = vmax.f32 %v6914_v36, 0.0 }
0x18db   : > { %v6961_v30 = vpack.c.bf16 %v6941_v0, %v6937_v59 }
0x18dc   : > { %v6964_v20 = vpack.c.bf16 %v6944_v14, %v6940_v29 }
0x18dd   : > { %7182 = vmatmul.bf16.gmra.mxu3 %v6961_v30 }
0x18de   : > { %7269 = vmatmul.bf16.gmra.mxu2 %v6964_v20 }
0x1901   : > { %v6858_v46 = vpop.f32.mrf.mxu0 }
0x1902   : > { %v6887_v17 = vpop.f32.mrf.mxu1  ;;  %v6859_v12 = vadd.f32 %v6858_v46, %v12713_v8 }
0x1903   : > { %v6888_v18 = vadd.f32 %v6887_v17, %v12715_v42 }
0x1904   : > { %v6946_v34 = vmax.f32 %v6859_v12, 0.0 }
0x1905   : > { %v6947_v43 = vmax.f32 %v6888_v18, 0.0 }
0x1907   : > { %v6829_v55 = vpop.f32.mrf.mxu3 }
0x1908   : > { %v6916_v53 = vpop.f32.mrf.mxu2  ;;  %v6830_v47 = vadd.f32 %v6829_v55, %v12719_v35 }
0x1909   : > { %v6860_v38 = vpop.f32.mrf.mxu0  ;;  %v6917_v25 = vadd.f32 %v6916_v53, %v12722_v26 }
0x190a   : > { %v6861_v51 = vadd.f32 %v6860_v38, %v12713_v8  ;;  %v6889_v19 = vpop.f32.mrf.mxu1  ;;  %v6945_v5 = vmax.f32 %v6830_v47, 0.0 }
0x190b   : > { %v6890_v37 = vadd.f32 %v6889_v19, %v12715_v42  ;;  %v6948_v24 = vmax.f32 %v6917_v25, 0.0 }
0x190c   : > { %v6950_v33 = vmax.f32 %v6861_v51, 0.0 }
0x190d   : > { %v6951_v15 = vmax.f32 %v6890_v37, 0.0 }
0x190e   : > { %v6966_v11 = vpack.c.bf16 %v6950_v33, %v6946_v34 }
0x190f   : > { %v6967_v44 = vpack.c.bf16 %v6951_v15, %v6947_v43  ;;  %v6831_v32 = vpop.f32.mrf.mxu3 }
0x1910   : > { %v6832_v54 = vadd.f32 %v6831_v32, %v12719_v35  ;;  %v6918_v49 = vpop.f32.mrf.mxu2  ;;  %7216 = vmatmul.bf16.gmra.mxu0 %v6966_v11 }
0x1911   : > { %v6919_v8 = vadd.f32 %v6918_v49, %v12722_v26  ;;  %7245 = vmatmul.bf16.gmra.mxu1 %v6967_v44 }
0x1912   : > { %v6949_v42 = vmax.f32 %v6832_v54, 0.0 }
0x1913   : > { %v6952_v22 = vmax.f32 %v6919_v8, 0.0  ;;  %v7202_v27 = vpop.f32.mrf.mxu0 }
0x1914   : > { %v6965_v50 = vpack.c.bf16 %v6949_v42, %v6945_v5  ;;  %v7231_v1 = vpop.f32.mrf.mxu1 }
0x1915   : > { %v6968_v58 = vpack.c.bf16 %v6952_v22, %v6948_v24 }
0x1916   : > { %7187 = vmatmul.bf16.gmra.mxu3 %v6965_v50 }
0x1917   : > { %7274 = vmatmul.bf16.gmra.mxu2 %v6968_v58 }
0x191b   : > { %v7204_v60 = vpop.f32.mrf.mxu0 }
0x191c   : > { %v7233_v3 = vpop.f32.mrf.mxu1 }
0x191f   : > { %v7173_v35 = vpop.f32.mrf.mxu3 }
0x1920   : > { %v7174_v61 = vadd.f32 %v12756_v4, %v7173_v35  ;;  %v7260_v13 = vpop.f32.mrf.mxu2 }
0x1922   : > { %v7203_v26 = vadd.f32 %v7202_v27, %v7174_v61 }
0x1924   : > { %v7232_v48 = vadd.f32 %v7231_v1, %v7203_v26 }
0x1926   : > { %v7261_v40 = vadd.f32 %v7260_v13, %v7232_v48  ;;  %v7207_v52 = vpop.f32.mrf.mxu0 }
0x1927   : > { %v7175_v63 = vpop.f32.mrf.mxu3  ;;  %v7236_v0 = vpop.f32.mrf.mxu1 }
0x1928   : > { %v7280_v2 = vadd.f32 %v7261_v40, %v12555_v45  ;;  %v7176_v62 = vadd.f32 %v12756_v4, %v7175_v63  ;;  %v7262_v16 = vpop.f32.mrf.mxu2 }
0x192a   : > { %v7205_v57 = vadd.f32 %v7204_v60, %v7176_v62  ;;  %7288 = vadd.xlane.f32.xlu2 %v7280_v2 }
0x192c   : > { %v7234_v31 = vadd.f32 %v7233_v3, %v7205_v57 }
0x192e   : > { %v7263_v10 = vadd.f32 %v7262_v16, %v7234_v31  ;;  %v7209_v55 = vpop.f32.mrf.mxu0 }
0x192f   : > { %v7238_v12 = vpop.f32.mrf.mxu1 }
0x1930   : > { %v12762_v7 = vadd.f32 %v7263_v10, %v12558_v39 }
0x1932   : > { %v7178_v36 = vpop.f32.mrf.mxu3  ;;  %7290 = vadd.xlane.f32.xlu0 %v12762_v7 }
0x1933   : > { %v7179_v59 = vadd.f32 %v12756_v4, %v7178_v36  ;;  %v7265_v29 = vpop.f32.mrf.mxu2 }
0x1935   : > { %v7208_v45 = vadd.f32 %v7207_v52, %v7179_v59 }
0x1937   : > { %v7237_v14 = vadd.f32 %v7236_v0, %v7208_v45 }
0x1939   : > { %v7266_v30 = vadd.f32 %v7265_v29, %v7237_v14 }
0x193a   : > { %v7180_v20 = vpop.f32.mrf.mxu3 }
0x193b   : > { %v12767_v46 = vadd.f32 %v7266_v30, %v12567_v6  ;;  %v7181_v17 = vadd.f32 %v12756_v4, %v7180_v20  ;;  %v7267_v18 = vpop.f32.mrf.mxu2 }
0x193d   : > { %v7210_v39 = vadd.f32 %v7209_v55, %v7181_v17  ;;  %7292 = vadd.xlane.f32.xlu1 %v12767_v46 }
0x193f   : > { %v7239_v53 = vadd.f32 %v7238_v12, %v7210_v39 }
0x1941   : > { %v7268_v38 = vadd.f32 %v7267_v18, %v7239_v53  ;;  %v8818_v18 = vld [vmem:[%s13006_s13 + $0x70] sm:$0xf] }
0x1943   : > { %v7283_v51 = vadd.f32 %v7268_v38, %v12570_v9  ;;  %v9034_v38 = vld [vmem:[%s13006_s13 + $0x74] sm:$0xf0] }
0x1945   : > { %7294 = vadd.xlane.f32.xlu2 %v7283_v51 }
0x1954   : > { %v7212_v19 = vpop.f32.mrf.mxu0 }
0x1955   : > { %v7241_v33 = vpop.f32.mrf.mxu1 }
0x195c   : > { %v7214_v32 = vpop.f32.mrf.mxu0 }
0x195d   : > { %v7243_v49 = vpop.f32.mrf.mxu1 }
0x1960   : > { %v7183_v37 = vpop.f32.mrf.mxu3 }
0x1961   : > { %v7184_v34 = vadd.f32 %v12756_v4, %v7183_v37  ;;  %v7270_v43 = vpop.f32.mrf.mxu2  ;;  %v8820_v37 = vld [vmem:[%s13006_s13 + $0x78] sm:$0xf0] }
0x1963   : > { %v7213_v6 = vadd.f32 %v7212_v19, %v7184_v34  ;;  %v8819_v19 = vor.u32 %v9034_v38, %v8818_v18 }
0x1965   : > { %v7242_v15 = vadd.f32 %v7241_v33, %v7213_v6  ;;  %7570 = vmatpush.bf16.msra.mxu3 %v8819_v19  ;;  %v8810_v33 = vld [vmem:[%s13006_s13 + $0x60] sm:$0xf]  ;;  %v9032_v6 = vld [vmem:[%s13006_s13 + $0x64] sm:$0xf0] }
0x1967   : > { %v7271_v47 = vadd.f32 %v7270_v43, %v7242_v15  ;;  %v9031_v43 = vld [vmem:[%s13006_s13 + $0x64] sm:$0xf]  ;;  %v8811_v15 = vor.u32 %v9032_v6, %v8810_v33 }
0x1968   : > { %v7185_v11 = vpop.f32.mrf.mxu3 }
0x1969   : > { %v7284_v25 = vadd.f32 %v7271_v47, %v12581_v56  ;;  %v7186_v44 = vadd.f32 %v12756_v4, %v7185_v11  ;;  %v7272_v8 = vpop.f32.mrf.mxu2  ;;  %v8812_v47 = vld [vmem:[%s13006_s13 + $0x68] sm:$0xf0]  ;;  %7571 = vmatpush.bf16.msra.mxu3 %v8811_v15 }
0x196a   : > { %v8815_v11 = vor.u32 %v9031_v43, %v8812_v47 }
0x196b   : > { %v7215_v54 = vadd.f32 %v7214_v32, %v7186_v44  ;;  %7296 = vadd.xlane.f32.xlu0 %v7284_v25  ;;  %v9030_v44 = vld [vmem:[%s13006_s13 + $0x54] sm:$0xf0]  ;;  %v9029_v32 = vld [vmem:[%s13006_s13 + $0x54] sm:$0xf] }
0x196d   : > { %v7244_v9 = vadd.f32 %v7243_v49, %v7215_v54  ;;  %v8804_v49 = vld [vmem:[%s13006_s13 + $0x58] sm:$0xf0] }
0x196f   : > { %v7273_v5 = vadd.f32 %v7272_v8, %v7244_v9  ;;  %v8807_v9 = vor.u32 %v9029_v32, %v8804_v49  ;;  %v8794_v8 = vld [vmem:[%s13006_s13 + $0x40] sm:$0xf] }
0x1971   : > { %v7285_v42 = vadd.f32 %v7273_v5, %v12584_v28  ;;  %v9028_v5 = vld [vmem:[%s13006_s13 + $0x44] sm:$0xf0] }
0x1973   : > { %7298 = vadd.xlane.f32.xlu1 %v7285_v42 }
0x198d   : > { %v7217_v24 = vpop.f32.mrf.mxu0 }
0x198e   : > { %v7246_v58 = vpop.f32.mrf.mxu1 }
0x1995   : > { %v7219_v62 = vpop.f32.mrf.mxu0 }
0x1996   : > { %v7248_v57 = vpop.f32.mrf.mxu1 }
0x1999   : > { %v7188_v22 = vpop.f32.mrf.mxu3 }
0x199a   : > { %v7189_v50 = vadd.f32 %v12756_v4, %v7188_v22  ;;  %v7275_v35 = vpop.f32.mrf.mxu2  ;;  %v8796_v22 = vld [vmem:[%s13006_s13 + $0x48] sm:$0xf0] }
0x199c   : > { %v7218_v27 = vadd.f32 %v7217_v24, %v7189_v50  ;;  %v8795_v24 = vor.u32 %v9028_v5, %v8794_v8 }
0x199d   : > { %v7289_v56 = vpop.xlane.xlu2 %7288 }
0x199e   : > { %v7247_v61 = vadd.f32 %v7246_v58, %v7218_v27  ;;  %v7304_v1 = vmul.f32 %v7289_v56, %v13042_v41  ;;  %v8786_v58 = vld [vmem:[%s13006_s13 + $0x30] sm:$0xf]  ;;  %v9026_v27 = vld [vmem:[%s13006_s13 + $0x34] sm:$0xf0] }
0x199f   : > { %v8787_v56 = vor.u32 %v9026_v27, %v8786_v58 }
0x19a0   : > { %v7276_v26 = vadd.f32 %v7275_v35, %v7247_v61  ;;  %v12778_v13 = vsub.f32 %v7280_v2, %v7304_v1  ;;  %v9025_v35 = vld [vmem:[%s13006_s13 + $0x34] sm:$0xf]  ;;  %v8788_v61 = vld [vmem:[%s13006_s13 + $0x38] sm:$0xf0] }
0x19a1   : > { %v7190_v48 = vpop.f32.mrf.mxu3  ;;  %v8791_v1 = vor.u32 %v9025_v35, %v8788_v61  ;;  %v12939_v61 = vld [vmem:[%s13005_s12 + $0x1] ss:$0 sm:$0xff] }
0x19a2   : > { %v12781_v40 = vadd.f32 %v7276_v26, %v12703_v21  ;;  %v7191_v28 = vadd.f32 %v12756_v4, %v7190_v48  ;;  %v7320_v63 = vmul.f32 %v12778_v13, %v12778_v13  ;;  %v7277_v16 = vpop.f32.mrf.mxu2  ;;  %v8778_v26 = vld [vmem:[%s13006_s13 + $0x20] sm:$0xf]  ;;  %v9024_v48 = vld [vmem:[%s13006_s13 + $0x24] sm:$0xf0] }
0x19a4   : > { %v7220_v60 = vadd.f32 %v7219_v62, %v7191_v28  ;;  %7328 = vadd.xlane.f32.xlu2 %v7320_v63  ;;  %7300 = vadd.xlane.f32.xlu1 %v12781_v40  ;;  %v9023_v28 = vld [vmem:[%s13006_s13 + $0x24] sm:$0xf]  ;;  %v8779_v63 = vor.u32 %v9024_v48, %v8778_v26  ;;  %v8780_v62 = vld [vmem:[%s13006_s13 + $0x28] sm:$0xf0] }
0x19a5   : > { %v7291_v3 = vpop.xlane.xlu0 %7290 }
0x19a6   : > { %v7249_v31 = vadd.f32 %v7248_v57, %v7220_v60  ;;  %v7305_v2 = vmul.f32 %v7291_v3, %v13042_v41  ;;  %v8783_v60 = vor.u32 %v9023_v28, %v8780_v62 }
0x19a8   : > { %v7278_v10 = vadd.f32 %v7277_v16, %v7249_v31  ;;  %v12789_v21 = vsub.f32 %v12762_v7, %v7305_v2  ;;  %v8770_v31 = vld [vmem:[%s13006_s13 + $0x10] sm:$0xf]  ;;  %v9022_v2 = vld [vmem:[%s13006_s13 + $0x14] sm:$0xf0]  ;;  %v9021_v16 = vld [vmem:[%s13006_s13 + $0x14] sm:$0xf] }
0x19aa   : > { %v12792_v4 = vadd.f32 %v7278_v10, %v12706_v23  ;;  %v7321_v52 = vmul.f32 %v12789_v21, %v12789_v21 }
0x19ac   : > { %7302 = vadd.xlane.f32.xlu2 %v12792_v4  ;;  %7330 = vadd.xlane.f32.xlu0 %v7321_v52 }
0x19b0   : > { %v7293_v36 = vpop.xlane.xlu1 %7292 }
0x19b1   : > { %v7306_v59 = vmul.f32 %v7293_v36, %v13042_v41  ;;  %v8771_v36 = vor.u32 %v9022_v2, %v8770_v31 }
0x19b3   : > { %v12799_v0 = vsub.f32 %v12767_v46, %v7306_v59  ;;  %v8772_v59 = vld [vmem:[%s13006_s13 + $0x18] sm:$0xf0] }
0x19b5   : > { %v7322_v45 = vmul.f32 %v12799_v0, %v12799_v0 }
0x19b7   : > { %7332 = vadd.xlane.f32.xlu0 %v7322_v45  ;;  %v8775_v45 = vor.u32 %v9021_v16, %v8772_v59 }
0x19b8   : > { %v7295_v7 = vpop.xlane.xlu2 %7294 }
0x19b9   : > { %v7307_v23 = vmul.f32 %v7295_v7, %v13042_v41 }
0x19bb   : > { %v12804_v29 = vsub.f32 %v7283_v51, %v7307_v23  ;;  %v9033_v51 = vld [vmem:[%s13006_s13 + $0x74] sm:$0xf] }
0x19bc   : > { %v8823_v34 = vor.u32 %v9033_v51, %v8820_v37 }
0x19bd   : > { %v7323_v14 = vmul.f32 %v12804_v29, %v12804_v29 }
0x19be   : > { %7599 = vmatpush.bf16.msra.mxu0 %v8823_v34 }
0x19bf   : > { %7334 = vadd.xlane.f32.xlu1 %v7323_v14  ;;  %v8762_v14 = vld [vmem:[%s13006_s13] sm:$0xf] }
0x19c2   : > { %7600 = vmatpush.bf16.msra.mxu0 %v8815_v11 }
0x19c6   : > { %7601 = vmatpush.bf16.msra.mxu0 %v8807_v9 }
0x19de   : > { %v7297_v30 = vpop.xlane.xlu0 %7296 }
0x19df   : > { %v7308_v20 = vmul.f32 %v7297_v30, %v13042_v41  ;;  %v9020_v30 = vld [vmem:[%s13006_s13 + $0x4] sm:$0xf0] }
0x19e1   : > { %v12809_v17 = vsub.f32 %v7284_v25, %v7308_v20  ;;  %v8802_v25 = vld [vmem:[%s13006_s13 + $0x50] sm:$0xf]  ;;  %v9019_v20 = vld [vmem:[%s13006_s13 + $0x4] sm:$0xf] }
0x19e2   : > { %v8803_v54 = vor.u32 %v9030_v44, %v8802_v25 }
0x19e3   : > { %v7324_v46 = vmul.f32 %v12809_v17, %v12809_v17 }
0x19e4   : > { %7572 = vmatpush.bf16.msra.mxu3 %v8803_v54 }
0x19e5   : > { %7336 = vadd.xlane.f32.xlu2 %v7324_v46 }
0x19e6   : > { %v7299_v55 = vpop.xlane.xlu1 %7298 }
0x19e7   : > { %v7309_v39 = vmul.f32 %v7299_v55, %v13042_v41  ;;  %v8764_v55 = vld [vmem:[%s13006_s13 + $0x8] sm:$0xf0] }
0x19e8   : > { %7573 = vmatpush.bf16.msra.mxu3 %v8795_v24 }
0x19e9   : > { %v12814_v12 = vsub.f32 %v7285_v42, %v7309_v39  ;;  %v9027_v42 = vld [vmem:[%s13006_s13 + $0x44] sm:$0xf]  ;;  %v8767_v39 = vor.u32 %v9019_v20, %v8764_v55 }
0x19ea   : > { %v8799_v50 = vor.u32 %v9027_v42, %v8796_v22  ;;  %v12932_v42 = vld [vmem:[%s13004_s11 + $0x1] ss:$0 sm:$0xff] }
0x19eb   : > { %v7325_v53 = vmul.f32 %v12814_v12, %v12814_v12 }
0x19ec   : > { %7602 = vmatpush.bf16.msra.mxu0 %v8799_v50  ;;  %7574 = vmatpush.bf16.msra.mxu3 %v8787_v56 }
0x19ed   : > { %7338 = vadd.xlane.f32.xlu0 %v7325_v53 }
0x19f0   : > { %7603 = vmatpush.bf16.msra.mxu0 %v8791_v1  ;;  %7575 = vmatpush.bf16.msra.mxu3 %v8779_v63 }
0x19f4   : > { %7604 = vmatpush.bf16.msra.mxu0 %v8783_v60  ;;  %7576 = vmatpush.bf16.msra.mxu3 %v8771_v36 }
0x19f8   : > { %7605 = vmatpush.bf16.msra.mxu0 %v8775_v45 }
0x19fc   : > { %7606 = vmatpush.bf16.msra.mxu0 %v8767_v39 }
0x1a17   : > { %v7329_v57 = vpop.xlane.xlu2 %7328  ;;  %v7301_v3 = vpop.xlane.xlu1 %7300 }
0x1a18   : > { %v7344_v10 = vmul.f32 %v7329_v57, %v13042_v41  ;;  %v7310_v52 = vmul.f32 %v7301_v3, %v13042_v41 }
0x1a1a   : > { %v7352_v7 = vadd.f32 1e-05, %v7344_v10  ;;  %v12905_v23 = vsub.f32 %v12781_v40, %v7310_v52  ;;  %v8763_v40 = vor.u32 %v9020_v30, %v8762_v14 }
0x1a1c   : > { %9493 = vrsqrt.f32 %v7352_v7  ;;  %v7326_v46 = vmul.f32 %v12905_v23, %v12905_v23  ;;  %7577 = vmatpush.bf16.msra.mxu3 %v8763_v40  ;;  %vm7366_vm14 = vweird.f32 %v7352_v7 }
0x1a1e   : > { %7340 = vadd.xlane.f32.xlu1 %v7326_v46 }
0x1a1f   : > { %v7303_v53 = vpop.xlane.xlu2 %7302  ;;  %v7331_v18 = vpop.xlane.xlu0 %7330 }
0x1a20   : > { %v7311_v38 = vmul.f32 %v7303_v53, %v13042_v41  ;;  %v7345_v51 = vmul.f32 %v7331_v18, %v13042_v41 }
0x1a22   : > { %v9494_v19 = vpop.eup %9493  ;;  %v12924_v37 = vsub.f32 %v12792_v4, %v7311_v38  ;;  %v7353_v34 = vadd.f32 1e-05, %v7345_v51 }
0x1a23   : > { %v7361_v33 = vmul.f32 %v9494_v19, %v7352_v7  ;;  %vm7367_vm13 = vweird.f32 %v9494_v19 }
0x1a24   : > { %9495 = vrsqrt.f32 %v7353_v34  ;;  %v7327_v6 = vmul.f32 %v12924_v37, %v12924_v37  ;;  %vm7368_vm15 = vmor %vm7366_vm14, %vm7367_vm13  ;;  %vm7376_vm6 = vweird.f32 %v7353_v34 }
0x1a25   : > { %v7362_v43 = vmul.f32 %v9494_v19, %v7361_v33 }
0x1a26   : > { %7342 = vadd.xlane.f32.xlu2 %v7327_v6 }
0x1a27   : > { %v7363_v15 = vmul.f32 0.5, %v7362_v43 }
0x1a29   : > { %v7364_v47 = vsub.f32 1.5, %v7363_v15 }
0x1a2a   : > { %v9496_v11 = vpop.eup %9495  ;;  %v7333_v25 = vpop.xlane.xlu0 %7332 }
0x1a2b   : > { %v7365_v44 = vmul.f32 %v9494_v19, %v7364_v47  ;;  %v7371_v32 = vmul.f32 %v9496_v11, %v7353_v34  ;;  %v7346_v54 = vmul.f32 %v7333_v25, %v13042_v41  ;;  %vm7377_vm5 = vweird.f32 %v9496_v11 }
0x1a2c   : > { %vm7378_vm7 = vmor %vm7376_vm6, %vm7377_vm5 }
0x1a2d   : > { %v7372_v4 = vmul.f32 %v9496_v11, %v7371_v32  ;;  %v7354_v49 = vadd.f32 1e-05, %v7346_v54  ;;  %v7369_v9 = vsel %vm7368_vm15, %v9494_v19, %v7365_v44 }
0x1a2e   : > { %v7440_v24 = vmul.f32 %v7369_v9, %v12778_v13 }
0x1a2f   : > { %v7373_v8 = vmul.f32 0.5, %v7372_v4  ;;  %9497 = vrsqrt.f32 %v7354_v49  ;;  %vm7386_vm9 = vweird.f32 %v7354_v49 }
0x1a30   : > { %v7451_v1 = vmul.f32 %v12932_v42, %v7440_v24 }
0x1a31   : > { %v7374_v5 = vsub.f32 1.5, %v7373_v8 }
0x1a32   : > { %v7335_v22 = vpop.xlane.xlu1 %7334  ;;  %v7462_v63 = vadd.f32 %v12939_v61, %v7451_v1 }
0x1a33   : > { %v7375_v50 = vmul.f32 %v9496_v11, %v7374_v5  ;;  %v7347_v58 = vmul.f32 %v7335_v22, %v13042_v41 }
0x1a35   : > { %v9498_v27 = vpop.eup %9497  ;;  %v7379_v35 = vsel %vm7378_vm7, %v9496_v11, %v7375_v50  ;;  %v7355_v56 = vadd.f32 1e-05, %v7347_v58 }
0x1a36   : > { %v7441_v26 = vmul.f32 %v7379_v35, %v12789_v21  ;;  %v7381_v48 = vmul.f32 %v9498_v27, %v7354_v49  ;;  %vm7387_vm8 = vweird.f32 %v9498_v27 }
0x1a37   : > { %9499 = vrsqrt.f32 %v7355_v56  ;;  %vm7388_vm0 = vmor %vm7386_vm9, %vm7387_vm8  ;;  %vm7396_vm2 = vweird.f32 %v7355_v56 }
0x1a38   : > { %v7452_v13 = vmul.f32 %v12932_v42, %v7441_v26  ;;  %v7382_v28 = vmul.f32 %v9498_v27, %v7381_v48 }
0x1a3a   : > { %v7463_v62 = vadd.f32 %v12939_v61, %v7452_v13  ;;  %v7383_v60 = vmul.f32 0.5, %v7382_v28 }
0x1a3c   : > { %v7384_v57 = vsub.f32 1.5, %v7383_v60  ;;  %v7470_v3 = vpack.c.bf16 %v7463_v62, %v7462_v63 }
0x1a3d   : > { %v9500_v31 = vpop.eup %9499 }
0x1a3e   : > { %v7385_v2 = vmul.f32 %v9498_v27, %v7384_v57  ;;  %v7391_v16 = vmul.f32 %v9500_v31, %v7355_v56  ;;  %7578 = vmatmul.bf16.vlgmr.msra.gmra.mxu3 %v7470_v3  ;;  %7607 = vmatmul.bf16.vlgmr.msra.gmra.mxu0 %v7470_v3  ;;  %vm7397_vm1 = vweird.f32 %v9500_v31 }
0x1a3f   : > { %vm7398_vm3 = vmor %vm7396_vm2, %vm7397_vm1 }
0x1a40   : > { %v7392_v21 = vmul.f32 %v9500_v31, %v7391_v16  ;;  %v7389_v10 = vsel %vm7388_vm0, %v9498_v27, %v7385_v2 }
0x1a41   : > { %v7442_v59 = vmul.f32 %v7389_v10, %v12799_v0 }
0x1a42   : > { %v7393_v52 = vmul.f32 0.5, %v7392_v21 }
0x1a43   : > { %v7453_v30 = vmul.f32 %v12932_v42, %v7442_v59 }
0x1a44   : > { %v7394_v36 = vsub.f32 1.5, %v7393_v52 }
0x1a45   : > { %v7464_v46 = vadd.f32 %v12939_v61, %v7453_v30 }
0x1a46   : > { %v7395_v45 = vmul.f32 %v9500_v31, %v7394_v36 }
0x1a48   : > { %v7399_v7 = vsel %vm7398_vm3, %v9500_v31, %v7395_v45 }
0x1a49   : > { %v7443_v14 = vmul.f32 %v7399_v7, %v12804_v29 }
0x1a4b   : > { %v7454_v20 = vmul.f32 %v12932_v42, %v7443_v14 }
0x1a4d   : > { %v7465_v40 = vadd.f32 %v12939_v61, %v7454_v20 }
0x1a4f   : > { %v7471_v55 = vpack.c.bf16 %v7465_v40, %v7464_v46 }
0x1a51   : > { %7583 = vmatmul.bf16.gmra.mxu3 %v7471_v55  ;;  %7612 = vmatmul.bf16.gmra.mxu0 %v7471_v55 }
0x1a58   : > { %v7337_v39 = vpop.xlane.xlu2 %7336 }
0x1a59   : > { %v7348_v0 = vmul.f32 %v7337_v39, %v13042_v41 }
0x1a5b   : > { %v7356_v53 = vadd.f32 1e-05, %v7348_v0 }
0x1a5d   : > { %9501 = vrsqrt.f32 %v7356_v53  ;;  %vm7406_vm10 = vweird.f32 %v7356_v53 }
0x1a60   : > { %v7339_v18 = vpop.xlane.xlu0 %7338 }
0x1a61   : > { %v7349_v38 = vmul.f32 %v7339_v18, %v13042_v41 }
0x1a63   : > { %v9502_v29 = vpop.eup %9501  ;;  %v7357_v51 = vadd.f32 1e-05, %v7349_v38 }
0x1a64   : > { %v7401_v19 = vmul.f32 %v9502_v29, %v7356_v53  ;;  %vm7407_vm4 = vweird.f32 %v9502_v29 }
0x1a65   : > { %9503 = vrsqrt.f32 %v7357_v51  ;;  %vm7408_vm11 = vmor %vm7406_vm10, %vm7407_vm4  ;;  %vm7416_vm13 = vweird.f32 %v7357_v51 }
0x1a66   : > { %v7402_v34 = vmul.f32 %v9502_v29, %v7401_v19 }
0x1a68   : > { %v7403_v33 = vmul.f32 0.5, %v7402_v34 }
0x1a6a   : > { %v7404_v6 = vsub.f32 1.5, %v7403_v33 }
0x1a6b   : > { %v9504_v43 = vpop.eup %9503 }
0x1a6c   : > { %v7405_v15 = vmul.f32 %v9502_v29, %v7404_v6  ;;  %v7411_v47 = vmul.f32 %v9504_v43, %v7357_v51  ;;  %vm7417_vm12 = vweird.f32 %v9504_v43 }
0x1a6d   : > { %vm7418_vm14 = vmor %vm7416_vm13, %vm7417_vm12 }
0x1a6e   : > { %v7412_v11 = vmul.f32 %v9504_v43, %v7411_v47  ;;  %v7409_v25 = vsel %vm7408_vm11, %v9502_v29, %v7405_v15 }
0x1a6f   : > { %v7444_v54 = vmul.f32 %v7409_v25, %v12809_v17 }
0x1a70   : > { %v7413_v44 = vmul.f32 0.5, %v7412_v11 }
0x1a71   : > { %v7455_v8 = vmul.f32 %v12932_v42, %v7444_v54 }
0x1a72   : > { %v7414_v32 = vsub.f32 1.5, %v7413_v44 }
0x1a73   : > { %v7466_v24 = vadd.f32 %v12939_v61, %v7455_v8 }
0x1a74   : > { %v7415_v4 = vmul.f32 %v9504_v43, %v7414_v32 }
0x1a76   : > { %v7419_v49 = vsel %vm7418_vm14, %v9504_v43, %v7415_v4 }
0x1a77   : > { %v7445_v9 = vmul.f32 %v7419_v49, %v12814_v12 }
0x1a79   : > { %v7456_v5 = vmul.f32 %v12932_v42, %v7445_v9 }
0x1a7b   : > { %v7467_v22 = vadd.f32 %v12939_v61, %v7456_v5 }
0x1a7d   : > { %v7472_v50 = vpack.c.bf16 %v7467_v22, %v7466_v24 }
0x1a7f   : > { %7588 = vmatmul.bf16.gmra.mxu3 %v7472_v50  ;;  %7617 = vmatmul.bf16.gmra.mxu0 %v7472_v50 }
0x1a91   : > { %v7341_v58 = vpop.xlane.xlu1 %7340 }
0x1a92   : > { %v7350_v17 = vmul.f32 %v7341_v58, %v13042_v41 }
0x1a94   : > { %v7358_v27 = vadd.f32 1e-05, %v7350_v17 }
0x1a96   : > { %9505 = vrsqrt.f32 %v7358_v27  ;;  %vm7426_vm5 = vweird.f32 %v7358_v27 }
0x1a99   : > { %v7343_v35 = vpop.xlane.xlu2 %7342 }
0x1a9a   : > { %v7351_v56 = vmul.f32 %v7343_v35, %v13042_v41 }
0x1a9c   : > { %v9506_v12 = vpop.eup %9505  ;;  %v7359_v1 = vadd.f32 1e-05, %v7351_v56 }
0x1a9d   : > { %v7421_v26 = vmul.f32 %v9506_v12, %v7358_v27  ;;  %vm7427_vm15 = vweird.f32 %v9506_v12 }
0x1a9e   : > { %9507 = vrsqrt.f32 %v7359_v1  ;;  %vm7428_vm6 = vmor %vm7426_vm5, %vm7427_vm15  ;;  %vm7436_vm8 = vweird.f32 %v7359_v1 }
0x1a9f   : > { %v7422_v48 = vmul.f32 %v9506_v12, %v7421_v26 }
0x1aa1   : > { %v7423_v13 = vmul.f32 0.5, %v7422_v48 }
0x1aa3   : > { %v7424_v28 = vsub.f32 1.5, %v7423_v13 }
0x1aa4   : > { %v9508_v63 = vpop.eup %9507 }
0x1aa5   : > { %v7425_v62 = vmul.f32 %v9506_v12, %v7424_v28  ;;  %v7431_v60 = vmul.f32 %v9508_v63, %v7359_v1  ;;  %vm7437_vm7 = vweird.f32 %v9508_v63 }
0x1aa6   : > { %vm7438_vm9 = vmor %vm7436_vm8, %vm7437_vm7 }
0x1aa7   : > { %v7432_v57 = vmul.f32 %v9508_v63, %v7431_v60  ;;  %v7429_v3 = vsel %vm7428_vm6, %v9506_v12, %v7425_v62 }
0x1aa8   : > { %v7446_v41 = vmul.f32 %v7429_v3, %v12905_v23 }
0x1aa9   : > { %v7433_v31 = vmul.f32 0.5, %v7432_v57 }
0x1aaa   : > { %v7457_v52 = vmul.f32 %v12932_v42, %v7446_v41 }
0x1aab   : > { %v7434_v2 = vsub.f32 1.5, %v7433_v31 }
0x1aac   : > { %v7468_v59 = vadd.f32 %v12939_v61, %v7457_v52 }
0x1aad   : > { %v7435_v16 = vmul.f32 %v9508_v63, %v7434_v2 }
0x1aaf   : > { %v7439_v21 = vsel %vm7438_vm9, %v9508_v63, %v7435_v16 }
0x1ab0   : > { %v7447_v10 = vmul.f32 %v7439_v21, %v12924_v37 }
0x1ab2   : > { %v7458_v36 = vmul.f32 %v12932_v42, %v7447_v10 }
0x1ab4   : > { %v7469_v45 = vadd.f32 %v12939_v61, %v7458_v36 }
0x1ab6   : > { %v7473_v7 = vpack.c.bf16 %v7469_v45, %v7468_v59 }
0x1ab8   : > { %7593 = vmatmul.bf16.gmra.mxu3 %v7473_v7  ;;  %7622 = vmatmul.bf16.gmra.mxu0 %v7473_v7 }
0x1abb   : > { %v7608_v23 = vpop.f32.mrf.mxu0 }
0x1abc   : > { %7629 = vst [vmem:[%s12972_s28 + $0x8] sm:$0xff] %v7608_v23 }
0x1ac1   : > { %v7579_v37 = vpop.f32.mrf.mxu3 }
0x1ac2   : > { %7628 = vst [vmem:[%s12972_s28] sm:$0xff] %v7579_v37 }
0x1ac3   : > { %v7610_v42 = vpop.f32.mrf.mxu0 }
0x1ac4   : > { %7631 = vst [vmem:[%s12972_s28 + $0x18] sm:$0xff] %v7610_v42 }
0x1ac9   : > { %v7581_v61 = vpop.f32.mrf.mxu3 }
0x1aca   : > { %7630 = vst [vmem:[%s12972_s28 + $0x10] sm:$0xff] %v7581_v61 }
0x1ace   : > { %v7613_v14 = vpop.f32.mrf.mxu0 }
0x1acf   : > { %7633 = vst [vmem:[%s12972_s28 + $0x28] sm:$0xff] %v7613_v14 }
0x1ad4   : > { %v7584_v30 = vpop.f32.mrf.mxu3 }
0x1ad5   : > { %7632 = vst [vmem:[%s12972_s28 + $0x20] sm:$0xff] %v7584_v30 }
0x1ad6   : > { %v7615_v20 = vpop.f32.mrf.mxu0 }
0x1ad7   : > { %7635 = vst [vmem:[%s12972_s28 + $0x38] sm:$0xff] %v7615_v20 }
0x1adc   : > { %v7586_v46 = vpop.f32.mrf.mxu3 }
0x1add   : > { %7634 = vst [vmem:[%s12972_s28 + $0x30] sm:$0xff] %v7586_v46 }
0x1afc   : > { %v7618_v40 = vpop.f32.mrf.mxu0 }
0x1afd   : > { %7637 = vst [vmem:[%s12972_s28 + $0x48] sm:$0xff] %v7618_v40 }
0x1b02   : > { %v7589_v55 = vpop.f32.mrf.mxu3 }
0x1b03   : > { %7636 = vst [vmem:[%s12972_s28 + $0x40] sm:$0xff] %v7589_v55 }
0x1b04   : > { %v7620_v39 = vpop.f32.mrf.mxu0 }
0x1b05   : > { %7639 = vst [vmem:[%s12972_s28 + $0x58] sm:$0xff] %v7620_v39 }
0x1b0a   : > { %v7591_v0 = vpop.f32.mrf.mxu3 }
0x1b0b   : > { %7638 = vst [vmem:[%s12972_s28 + $0x50] sm:$0xff] %v7591_v0 }
0x1b35   : > { %v7623_v53 = vpop.f32.mrf.mxu0 }
0x1b36   : > { %7641 = vst [vmem:[%s12972_s28 + $0x68] sm:$0xff] %v7623_v53 }
0x1b3b   : > { %v7594_v18 = vpop.f32.mrf.mxu3 }
0x1b3c   : > { %7640 = vst [vmem:[%s12972_s28 + $0x60] sm:$0xff] %v7594_v18 }
0x1b3d   : > { %v7625_v38 = vpop.f32.mrf.mxu0 }
0x1b3e   : > { %7643 = vst [vmem:[%s12972_s28 + $0x78] sm:$0xff] %v7625_v38 }
0x1b43   : > { %v7596_v29 = vpop.f32.mrf.mxu3 }
0x1b44   : > { %7642 = vst [vmem:[%s12972_s28 + $0x70] sm:$0xff] %v7596_v29 }
0x1b45 PF: > { %s24_s29 = sadd.s32 1, %s9523_s29  }
0x1b46   : > { %p21_p4 = scmp.ge.s32.totalorder %s24_s29, 4  }
0x1b48   :  { %23 = sbr.rel (!%p21_p4) target bundleno = 1 (0x1), region = 118 }

</bundles_post_ra>
